<compile_context>
chip_gen: v5e
topology: v5e:2x2
jax: 0.10.0
libtpu: 0.0.40
codegen_flags: <defaults>
</compile_context>

<pallas_src>
import functools

import numpy as np
import jax
import jax.numpy as jnp
from jax import lax
from jax.experimental import pallas as pl
from jax.experimental.pallas import tpu as pltpu

N_SITES = 8          # numberSamplingIndex in the reference
PHYS = 2
BOND = 8
NB = 16              # samples per kernel program; NB*BOND = 128 lanes (one vreg wide)
LANES = NB * BOND    # 128

# Full-f32 MXU matmuls (multi-pass).  Default precision lowers to bf16 passes
# whose ~1e-3 error can flip bits near decision thresholds.
_DOT = functools.partial(jnp.dot,
                         precision=lax.Precision.HIGHEST,
                         preferred_element_type=jnp.float32)


# ----------------------------------------------------------------------------
# Pallas kernel: batched sequential perfect sampling for one MPS.
# ----------------------------------------------------------------------------
def _perfect_sampling_kernel(pack_ref, seg_ref, r_ref, x_ref, gv_ref):
    # pack_ref : VMEM (N_SITES, 32, 8)     rows 0:16 = [a0; a1], rows 16:32 = [a0^T; a1^T]
    # seg_ref  : VMEM (LANES, LANES)       block-diag ones(8x8) lane-group segment-sum matrix
    # r_ref    : VMEM (1, N_SITES, LANES)  uniforms, replicated across each sample's 8 lanes
    # x_ref    : VMEM (1, N_SITES, LANES)  sampled bits (replicated within each 8-lane group)
    # gv_ref   : VMEM scratch (N_SITES, 16, 8)   [G0_i; G1_i] per site
    B = BOND
    f32 = jnp.float32

    # ---- right-environment sweep (shared across the whole batch) -------------
    # G0_i = a0 R_{i+1} a0^T, G1_i = a1 R_{i+1} a1^T, R_i = G0_i + G1_i.
    # Formulated so every block slice is a sublane slice at a multiple of 8.
    r_env = None
    for i in range(N_SITES - 1, -1, -1):
        site = pack_ref[i]                      # (32, 8)
        a_v = site[0:2 * B, :]                  # [a0; a1]          (16, 8)
        a0t = site[2 * B:3 * B, :]              # a0^T              (8, 8)
        a1t = site[3 * B:4 * B, :]              # a1^T              (8, 8)
        if i == N_SITES - 1:
            x = a_v                             # R_N == I: skip the matmul
        else:
            x = _DOT(a_v, r_env)                # [a0 R; a1 R]      (16, 8)
        g0 = _DOT(x[:B, :], a0t)                # a0 R a0^T
        g1 = _DOT(x[B:, :], a1t)                # a1 R a1^T
        gv_ref[i] = jnp.concatenate([g0, g1], axis=0)   # stage in VMEM scratch
        if i > 0:
            r_env = g0 + g1

    seg = seg_ref[...]                          # (128, 128)

    # ---- batched sequential conditional sampling ------------------------------
    # Per sample b: L_b = P_b^T P_b (unnormalized), P_b = prod of chosen site
    # matrices, carried column-stacked as Q = [P_1^T | ... | P_NB^T]  (8, 128).
    # Deferred renormalization: the chosen raw probability at step i equals the
    # cumulative product of the true probabilities, so r < ps0 <=> r*pcum < ps0_raw.
    lane = lax.broadcasted_iota(jnp.int32, (B, LANES), 1)
    sub = lax.broadcasted_iota(jnp.int32, (B, LANES), 0)
    q = ((lane & (B - 1)) == sub).astype(f32)   # NB stacked identity blocks
    pcum = jnp.ones((1, LANES), dtype=f32)

    bits = []
    for i in range(N_SITES):
        gv = gv_ref[i]                          # (16, 8)  = [G0; G1]
        avt = pack_ref[i][2 * B:4 * B, :]       # (16, 8)  = [a0^T; a1^T]

        # probabilities: ps1_raw_b = tr(P G0 P^T), ps0_raw_b = tr(P G1 P^T)
        w = _DOT(gv, q)                         # (16, 128): [G0 P_b^T ; G1 P_b^T]
        s_g0 = jnp.sum(w[:B, :] * q, axis=0, keepdims=True)    # (1, 128)
        s_g1 = jnp.sum(w[B:, :] * q, axis=0, keepdims=True)
        # 8-lane segment sums, result replicated within each sample's lane group
        ps1_raw = _DOT(s_g0, seg)               # rho[0,0] * pcum
        ps0_raw = _DOT(s_g1, seg)               # rho[1,1] * pcum

        r_i = jnp.reshape(r_ref[0, i, :], (1, LANES))
        take0 = (r_i * pcum) < ps0_raw          # v0=[0,1] -> phys idx 1 -> bit 0

        if i < N_SITES - 1:
            # speculative update for both branches, selected after the compare
            y = _DOT(avt, q)                    # (16, 128): [a0^T P^T ; a1^T P^T]
            q = jnp.where(take0, y[B:, :], y[:B, :])
            pcum = jnp.where(take0, ps0_raw, ps1_raw)

        bits.append(jnp.where(take0, f32(0.0), f32(1.0)))

    # one lane-dense (8, 128) store
    x_ref[...] = jnp.reshape(jnp.concatenate(bits, axis=0), (1, N_SITES, LANES))


# ----------------------------------------------------------------------------
# Host wrapper
# ----------------------------------------------------------------------------
def perfect_sampling_pallas(packed, seg, r_batch):
    """packed (N_SITES,32,8), seg (128,128), r_batch (ns, N_SITES) -> (ns, N_SITES) bits."""
    r_batch = r_batch.astype(jnp.float32)
    ns = r_batch.shape[0]
    g = -(-ns // NB)                            # number of sample groups (grid size)
    pad = g * NB - ns
    if pad:
        r_full = jnp.concatenate(
            [r_batch, jnp.full((pad, N_SITES), 0.5, jnp.float32)], axis=0)
    else:
        r_full = r_batch
    # (g, NB, N) -> (g, N, NB) -> replicate each sample's r over its 8 lanes
    r_grp = r_full.reshape(g, NB, N_SITES).transpose(0, 2, 1)
    r_rep = jnp.repeat(r_grp, BOND, axis=2)     # (g, N_SITES, 128)

    out = pl.pallas_call(
        _perfect_sampling_kernel,
        out_shape=jax.ShapeDtypeStruct((g, N_SITES, LANES), jnp.float32),
        grid=(g,),
        in_specs=[
            pl.BlockSpec((N_SITES, 2 * PHYS * BOND, BOND), lambda gi: (0, 0, 0)),
            pl.BlockSpec((LANES, LANES), lambda gi: (0, 0)),
            pl.BlockSpec((1, N_SITES, LANES), lambda gi: (gi, 0, 0)),
        ],
        out_specs=pl.BlockSpec((1, N_SITES, LANES), lambda gi: (gi, 0, 0)),
        scratch_shapes=[pltpu.VMEM((N_SITES, 2 * BOND, BOND), jnp.float32)],
        compiler_params=pltpu.CompilerParams(
            dimension_semantics=("parallel",)),     # v7x: groups split across both TCs
    )(packed, seg, r_rep)

    # lane 8*b of group gi holds sample (gi*NB + b)
    bits = out[:, :, ::BOND].transpose(0, 2, 1).reshape(g * NB, N_SITES)
    return bits[:ns]


# ----------------------------------------------------------------------------
# Parameter construction (plays the role of qtn.pack / ParameterDict in torch).
# ----------------------------------------------------------------------------
def build_normalized_mps(key, n=N_SITES, d=PHYS, D=BOND):
    a = jax.random.normal(key, (n, d, D, D), dtype=jnp.float32) * 0.5
    # boundary sites use only index 0 on their dangling bond (padded bond dim 1)
    left_mask = (jnp.arange(D) == 0).astype(jnp.float32)[None, :, None]
    right_mask = (jnp.arange(D) == 0).astype(jnp.float32)[None, None, :]
    a = a.at[0].multiply(left_mask)
    a = a.at[n - 1].multiply(right_mask)
    # normalize the state so that trace(rho) == 1 at every sampling step
    r_env = jnp.eye(D, dtype=jnp.float32)
    for i in range(n - 1, -1, -1):
        r_env = sum(a[i, s] @ r_env @ a[i, s].T for s in range(d))
    norm2 = r_env[0, 0]
    a = a / (norm2 ** (1.0 / (2.0 * n)))
    return a


class Generator:
    """JAX/Pallas analogue of the torch Generator module (tn = 8-site MPS)."""

    def __init__(self, key):
        # analogous to torch.nn.ParameterDict built from qtn.pack(tn)
        self.mps_params = build_normalized_mps(key)
        # hoisted per-call preprocessing: one merged lane/sublane-packed site
        # tensor ([a0;a1] rows 0:16, [a0^T;a1^T] rows 16:32) + the constant
        # lane-group segment-sum matrix.
        a = self.mps_params.astype(jnp.float32)
        a_v = a.reshape(N_SITES, PHYS * BOND, BOND)
        a_vt = a.transpose(0, 1, 3, 2).reshape(N_SITES, PHYS * BOND, BOND)
        self.packed = jnp.concatenate([a_v, a_vt], axis=1)          # (N, 32, 8)
        self.seg = jnp.asarray(np.kron(np.eye(NB, dtype=np.float32),
                                       np.ones((BOND, BOND), dtype=np.float32)))

    def sample(self, r_batch):
        """Draw one bit-string per row of r_batch (num_samples, N_SITES)."""
        return perfect_sampling_pallas(self.packed, self.seg, r_batch)

    def forward(self, r):
        # the reference draws r via np.random inside forward(); randomness is
        # made explicit/deterministic here via the `r` argument.
        return self.sample(jnp.asarray(r, jnp.float32)[None, :])[0]


# ----------------------------------------------------------------------------
# Plain-numpy reference (same math as the quimb contractions) for validation.
# ----------------------------------------------------------------------------
def reference_perfect_sampling(a, r):
    a = np.asarray(a, dtype=np.float64)
    r = np.asarray(r, dtype=np.float64)
    n, d, D, _ = a.shape
    r_env = [None] * (n + 1)
    r_env[n] = np.eye(D)
    for i in range(n - 1, 0, -1):
        r_env[i] = sum(a[i, s] @ r_env[i + 1] @ a[i, s].T for s in range(d))
    left = np.eye(D)
    x = np.zeros(n, dtype=np.float32)
    margins = np.zeros(n)
    for i in range(n):
        ps1 = float(np.sum((left @ a[i, 0] @ r_env[i + 1]) * a[i, 0]))  # rho[0,0]
        ps0 = float(np.sum((left @ a[i, 1] @ r_env[i + 1]) * a[i, 1]))  # rho[1,1]
        assert 0.999 < ps0 + ps1 < 1.001, (i, ps0, ps1)
        margins[i] = abs(r[i] - ps0)
        if r[i] < ps0:
            x[i], m, p = 0.0, a[i, 1], ps0
        else:
            x[i], m, p = 1.0, a[i, 0], ps1
        left = (m.T @ left @ m) / p
    return x, margins


if __name__ == "__main__":
    key = jax.random.PRNGKey(0)
    key_params, key_r = jax.random.split(key)

    gen = Generator(key_params)

    n_samp = 2 * NB                              # 32 samples -> exercises the parallel grid
    r_batch = jax.random.uniform(key_r, (n_samp, N_SITES), dtype=jnp.float32)

    x = jax.block_until_ready(gen.sample(r_batch))
    assert x.shape == (n_samp, N_SITES) and x.dtype == jnp.float32
    x_np = np.asarray(x)

    a_np = np.asarray(gen.mps_params)
    r_np = np.asarray(r_batch)
    for b in range(n_samp):
        x_ref, margins = reference_perfect_sampling(a_np, r_np[b])
        # compare bit-exactly up to the first site whose draw is within f32
        # rounding of the decision threshold (after such a site the reference
        # and kernel may legitimately follow different branches).
        unsafe = margins <= 1e-3
        limit = int(np.argmax(unsafe)) if unsafe.any() else N_SITES
        assert np.array_equal(x_np[b, :limit], x_ref[:limit]), \
            (b, x_np[b], x_ref, margins)

    # single-sample forward() path (original module semantics)
    x1 = jax.block_until_ready(gen.forward(r_batch[0]))
    assert x1.shape == (N_SITES,) and x1.dtype == jnp.float32
    assert np.array_equal(np.asarray(x1), x_np[0])

    print("KERNEL_OK")
</pallas_src>

<mosaic_0001>
module attributes {stable_mosaic.version = 11 : i64} {
  func.func @_perfect_sampling_kernel(%arg0: i32, %arg1: memref<8x32x8xf32, #tpu.memory_space<vmem>>, %arg2: memref<128x128xf32, #tpu.memory_space<vmem>>, %arg3: memref<1x8x128xf32, #tpu.memory_space<vmem>>, %arg4: memref<1x8x128xf32, #tpu.memory_space<vmem>>, %arg5: memref<8x16x8xf32, #tpu.memory_space<vmem>>) attributes {dimension_semantics = [#tpu.dimension_semantics<parallel>], iteration_bounds = array<i64: 2>, scalar_prefetch = 0 : i64, scratch_operands = 1 : i64, tpu.core_type = #tpu.core_type<tc>, window_params = [{pipeline_mode = #tpu.pipeline_mode<synchronous>, transform_indices = @transform_0, window_bounds = array<i64: 8, 32, 8>}, {pipeline_mode = #tpu.pipeline_mode<synchronous>, transform_indices = @transform_1, window_bounds = array<i64: 128, 128>}, {transform_indices = @transform_2, window_bounds = array<i64: 1, 8, 128>}, {transform_indices = @transform_3, window_bounds = array<i64: 1, 8, 128>}]} {
    %c7 = arith.constant 7 : index
    %c0 = arith.constant 0 : index
    %c0_0 = arith.constant 0 : index
    %0 = vector.load %arg1[%c7, %c0, %c0_0] : memref<8x32x8xf32, #tpu.memory_space<vmem>>, vector<1x32x8xf32>
    %1 = vector.shape_cast %0 : vector<1x32x8xf32> to vector<32x8xf32>
    %2 = vector.extract_strided_slice %1 {offsets = [0, 0], sizes = [16, 8], strides = [1, 1]} : vector<32x8xf32> to vector<16x8xf32>
    %3 = vector.extract_strided_slice %1 {offsets = [16, 0], sizes = [8, 8], strides = [1, 1]} : vector<32x8xf32> to vector<8x8xf32>
    %4 = vector.extract_strided_slice %1 {offsets = [24, 0], sizes = [8, 8], strides = [1, 1]} : vector<32x8xf32> to vector<8x8xf32>
    %5 = vector.extract_strided_slice %2 {offsets = [0, 0], sizes = [8, 8], strides = [1, 1]} : vector<16x8xf32> to vector<8x8xf32>
    %cst = arith.constant dense<0.000000e+00> : vector<8x8xf32>
    %6 = tpu.matmul %5, %3, %cst {dimension_numbers = #tpu.dot_dimension_numbers<[1], [0], [0], [1], [0, 0, 1, 1], [], []>, precision = #tpu.contract_precision<fp32>} : vector<8x8xf32>, vector<8x8xf32>, vector<8x8xf32> -> vector<8x8xf32>
    %7 = vector.extract_strided_slice %2 {offsets = [8, 0], sizes = [8, 8], strides = [1, 1]} : vector<16x8xf32> to vector<8x8xf32>
    %cst_1 = arith.constant dense<0.000000e+00> : vector<8x8xf32>
    %8 = tpu.matmul %7, %4, %cst_1 {dimension_numbers = #tpu.dot_dimension_numbers<[1], [0], [0], [1], [0, 0, 1, 1], [], []>, precision = #tpu.contract_precision<fp32>} : vector<8x8xf32>, vector<8x8xf32>, vector<8x8xf32> -> vector<8x8xf32>
    %9 = tpu.concatenate %6, %8 in 0 : vector<8x8xf32>, vector<8x8xf32> -> vector<16x8xf32>
    %c7_2 = arith.constant 7 : index
    %c0_3 = arith.constant 0 : index
    %c0_4 = arith.constant 0 : index
    %10 = vector.load %arg5[%c7_2, %c0_3, %c0_4] : memref<8x16x8xf32, #tpu.memory_space<vmem>>, vector<1x16x8xf32>
    %11 = vector.shape_cast %10 : vector<1x16x8xf32> to vector<16x8xf32>
    %12 = vector.shape_cast %9 : vector<16x8xf32> to vector<1x16x8xf32>
    tpu.vector_store %arg5[%c7_2, %c0_3, %c0_4], %12 {strides = array<i32>} : memref<8x16x8xf32, #tpu.memory_space<vmem>>, vector<1x16x8xf32>,
    %13 = arith.addf %6, %8 : vector<8x8xf32>
    %c6 = arith.constant 6 : index
    %c0_5 = arith.constant 0 : index
    %c0_6 = arith.constant 0 : index
    %14 = vector.load %arg1[%c6, %c0_5, %c0_6] : memref<8x32x8xf32, #tpu.memory_space<vmem>>, vector<1x32x8xf32>
    %15 = vector.shape_cast %14 : vector<1x32x8xf32> to vector<32x8xf32>
    %16 = vector.extract_strided_slice %15 {offsets = [0, 0], sizes = [16, 8], strides = [1, 1]} : vector<32x8xf32> to vector<16x8xf32>
    %17 = vector.extract_strided_slice %15 {offsets = [16, 0], sizes = [8, 8], strides = [1, 1]} : vector<32x8xf32> to vector<8x8xf32>
    %18 = vector.extract_strided_slice %15 {offsets = [24, 0], sizes = [8, 8], strides = [1, 1]} : vector<32x8xf32> to vector<8x8xf32>
    %cst_7 = arith.constant dense<0.000000e+00> : vector<16x8xf32>
    %19 = tpu.matmul %16, %13, %cst_7 {dimension_numbers = #tpu.dot_dimension_numbers<[1], [0], [0], [1], [0, 0, 1, 1], [], []>, precision = #tpu.contract_precision<fp32>} : vector<16x8xf32>, vector<8x8xf32>, vector<16x8xf32> -> vector<16x8xf32>
    %20 = vector.extract_strided_slice %19 {offsets = [0, 0], sizes = [8, 8], strides = [1, 1]} : vector<16x8xf32> to vector<8x8xf32>
    %cst_8 = arith.constant dense<0.000000e+00> : vector<8x8xf32>
    %21 = tpu.matmul %20, %17, %cst_8 {dimension_numbers = #tpu.dot_dimension_numbers<[1], [0], [0], [1], [0, 0, 1, 1], [], []>, precision = #tpu.contract_precision<fp32>} : vector<8x8xf32>, vector<8x8xf32>, vector<8x8xf32> -> vector<8x8xf32>
    %22 = vector.extract_strided_slice %19 {offsets = [8, 0], sizes = [8, 8], strides = [1, 1]} : vector<16x8xf32> to vector<8x8xf32>
    %cst_9 = arith.constant dense<0.000000e+00> : vector<8x8xf32>
    %23 = tpu.matmul %22, %18, %cst_9 {dimension_numbers = #tpu.dot_dimension_numbers<[1], [0], [0], [1], [0, 0, 1, 1], [], []>, precision = #tpu.contract_precision<fp32>} : vector<8x8xf32>, vector<8x8xf32>, vector<8x8xf32> -> vector<8x8xf32>
    %24 = tpu.concatenate %21, %23 in 0 : vector<8x8xf32>, vector<8x8xf32> -> vector<16x8xf32>
    %c6_10 = arith.constant 6 : index
    %c0_11 = arith.constant 0 : index
    %c0_12 = arith.constant 0 : index
    %25 = vector.load %arg5[%c6_10, %c0_11, %c0_12] : memref<8x16x8xf32, #tpu.memory_space<vmem>>, vector<1x16x8xf32>
    %26 = vector.shape_cast %25 : vector<1x16x8xf32> to vector<16x8xf32>
    %27 = vector.shape_cast %24 : vector<16x8xf32> to vector<1x16x8xf32>
    tpu.vector_store %arg5[%c6_10, %c0_11, %c0_12], %27 {strides = array<i32>} : memref<8x16x8xf32, #tpu.memory_space<vmem>>, vector<1x16x8xf32>,
    %28 = arith.addf %21, %23 : vector<8x8xf32>
    %c5 = arith.constant 5 : index
    %c0_13 = arith.constant 0 : index
    %c0_14 = arith.constant 0 : index
    %29 = vector.load %arg1[%c5, %c0_13, %c0_14] : memref<8x32x8xf32, #tpu.memory_space<vmem>>, vector<1x32x8xf32>
    %30 = vector.shape_cast %29 : vector<1x32x8xf32> to vector<32x8xf32>
    %31 = vector.extract_strided_slice %30 {offsets = [0, 0], sizes = [16, 8], strides = [1, 1]} : vector<32x8xf32> to vector<16x8xf32>
    %32 = vector.extract_strided_slice %30 {offsets = [16, 0], sizes = [8, 8], strides = [1, 1]} : vector<32x8xf32> to vector<8x8xf32>
    %33 = vector.extract_strided_slice %30 {offsets = [24, 0], sizes = [8, 8], strides = [1, 1]} : vector<32x8xf32> to vector<8x8xf32>
    %cst_15 = arith.constant dense<0.000000e+00> : vector<16x8xf32>
    %34 = tpu.matmul %31, %28, %cst_15 {dimension_numbers = #tpu.dot_dimension_numbers<[1], [0], [0], [1], [0, 0, 1, 1], [], []>, precision = #tpu.contract_precision<fp32>} : vector<16x8xf32>, vector<8x8xf32>, vector<16x8xf32> -> vector<16x8xf32>
    %35 = vector.extract_strided_slice %34 {offsets = [0, 0], sizes = [8, 8], strides = [1, 1]} : vector<16x8xf32> to vector<8x8xf32>
    %cst_16 = arith.constant dense<0.000000e+00> : vector<8x8xf32>
    %36 = tpu.matmul %35, %32, %cst_16 {dimension_numbers = #tpu.dot_dimension_numbers<[1], [0], [0], [1], [0, 0, 1, 1], [], []>, precision = #tpu.contract_precision<fp32>} : vector<8x8xf32>, vector<8x8xf32>, vector<8x8xf32> -> vector<8x8xf32>
    %37 = vector.extract_strided_slice %34 {offsets = [8, 0], sizes = [8, 8], strides = [1, 1]} : vector<16x8xf32> to vector<8x8xf32>
    %cst_17 = arith.constant dense<0.000000e+00> : vector<8x8xf32>
    %38 = tpu.matmul %37, %33, %cst_17 {dimension_numbers = #tpu.dot_dimension_numbers<[1], [0], [0], [1], [0, 0, 1, 1], [], []>, precision = #tpu.contract_precision<fp32>} : vector<8x8xf32>, vector<8x8xf32>, vector<8x8xf32> -> vector<8x8xf32>
    %39 = tpu.concatenate %36, %38 in 0 : vector<8x8xf32>, vector<8x8xf32> -> vector<16x8xf32>
    %c5_18 = arith.constant 5 : index
    %c0_19 = arith.constant 0 : index
    %c0_20 = arith.constant 0 : index
    %40 = vector.load %arg5[%c5_18, %c0_19, %c0_20] : memref<8x16x8xf32, #tpu.memory_space<vmem>>, vector<1x16x8xf32>
    %41 = vector.shape_cast %40 : vector<1x16x8xf32> to vector<16x8xf32>
    %42 = vector.shape_cast %39 : vector<16x8xf32> to vector<1x16x8xf32>
    tpu.vector_store %arg5[%c5_18, %c0_19, %c0_20], %42 {strides = array<i32>} : memref<8x16x8xf32, #tpu.memory_space<vmem>>, vector<1x16x8xf32>,
    %43 = arith.addf %36, %38 : vector<8x8xf32>
    %c4 = arith.constant 4 : index
    %c0_21 = arith.constant 0 : index
    %c0_22 = arith.constant 0 : index
    %44 = vector.load %arg1[%c4, %c0_21, %c0_22] : memref<8x32x8xf32, #tpu.memory_space<vmem>>, vector<1x32x8xf32>
    %45 = vector.shape_cast %44 : vector<1x32x8xf32> to vector<32x8xf32>
    %46 = vector.extract_strided_slice %45 {offsets = [0, 0], sizes = [16, 8], strides = [1, 1]} : vector<32x8xf32> to vector<16x8xf32>
    %47 = vector.extract_strided_slice %45 {offsets = [16, 0], sizes = [8, 8], strides = [1, 1]} : vector<32x8xf32> to vector<8x8xf32>
    %48 = vector.extract_strided_slice %45 {offsets = [24, 0], sizes = [8, 8], strides = [1, 1]} : vector<32x8xf32> to vector<8x8xf32>
    %cst_23 = arith.constant dense<0.000000e+00> : vector<16x8xf32>
    %49 = tpu.matmul %46, %43, %cst_23 {dimension_numbers = #tpu.dot_dimension_numbers<[1], [0], [0], [1], [0, 0, 1, 1], [], []>, precision = #tpu.contract_precision<fp32>} : vector<16x8xf32>, vector<8x8xf32>, vector<16x8xf32> -> vector<16x8xf32>
    %50 = vector.extract_strided_slice %49 {offsets = [0, 0], sizes = [8, 8], strides = [1, 1]} : vector<16x8xf32> to vector<8x8xf32>
    %cst_24 = arith.constant dense<0.000000e+00> : vector<8x8xf32>
    %51 = tpu.matmul %50, %47, %cst_24 {dimension_numbers = #tpu.dot_dimension_numbers<[1], [0], [0], [1], [0, 0, 1, 1], [], []>, precision = #tpu.contract_precision<fp32>} : vector<8x8xf32>, vector<8x8xf32>, vector<8x8xf32> -> vector<8x8xf32>
    %52 = vector.extract_strided_slice %49 {offsets = [8, 0], sizes = [8, 8], strides = [1, 1]} : vector<16x8xf32> to vector<8x8xf32>
    %cst_25 = arith.constant dense<0.000000e+00> : vector<8x8xf32>
    %53 = tpu.matmul %52, %48, %cst_25 {dimension_numbers = #tpu.dot_dimension_numbers<[1], [0], [0], [1], [0, 0, 1, 1], [], []>, precision = #tpu.contract_precision<fp32>} : vector<8x8xf32>, vector<8x8xf32>, vector<8x8xf32> -> vector<8x8xf32>
    %54 = tpu.concatenate %51, %53 in 0 : vector<8x8xf32>, vector<8x8xf32> -> vector<16x8xf32>
    %c4_26 = arith.constant 4 : index
    %c0_27 = arith.constant 0 : index
    %c0_28 = arith.constant 0 : index
    %55 = vector.load %arg5[%c4_26, %c0_27, %c0_28] : memref<8x16x8xf32, #tpu.memory_space<vmem>>, vector<1x16x8xf32>
    %56 = vector.shape_cast %55 : vector<1x16x8xf32> to vector<16x8xf32>
    %57 = vector.shape_cast %54 : vector<16x8xf32> to vector<1x16x8xf32>
    tpu.vector_store %arg5[%c4_26, %c0_27, %c0_28], %57 {strides = array<i32>} : memref<8x16x8xf32, #tpu.memory_space<vmem>>, vector<1x16x8xf32>,
    %58 = arith.addf %51, %53 : vector<8x8xf32>
    %c3 = arith.constant 3 : index
    %c0_29 = arith.constant 0 : index
    %c0_30 = arith.constant 0 : index
    %59 = vector.load %arg1[%c3, %c0_29, %c0_30] : memref<8x32x8xf32, #tpu.memory_space<vmem>>, vector<1x32x8xf32>
    %60 = vector.shape_cast %59 : vector<1x32x8xf32> to vector<32x8xf32>
    %61 = vector.extract_strided_slice %60 {offsets = [0, 0], sizes = [16, 8], strides = [1, 1]} : vector<32x8xf32> to vector<16x8xf32>
    %62 = vector.extract_strided_slice %60 {offsets = [16, 0], sizes = [8, 8], strides = [1, 1]} : vector<32x8xf32> to vector<8x8xf32>
    %63 = vector.extract_strided_slice %60 {offsets = [24, 0], sizes = [8, 8], strides = [1, 1]} : vector<32x8xf32> to vector<8x8xf32>
    %cst_31 = arith.constant dense<0.000000e+00> : vector<16x8xf32>
    %64 = tpu.matmul %61, %58, %cst_31 {dimension_numbers = #tpu.dot_dimension_numbers<[1], [0], [0], [1], [0, 0, 1, 1], [], []>, precision = #tpu.contract_precision<fp32>} : vector<16x8xf32>, vector<8x8xf32>, vector<16x8xf32> -> vector<16x8xf32>
    %65 = vector.extract_strided_slice %64 {offsets = [0, 0], sizes = [8, 8], strides = [1, 1]} : vector<16x8xf32> to vector<8x8xf32>
    %cst_32 = arith.constant dense<0.000000e+00> : vector<8x8xf32>
    %66 = tpu.matmul %65, %62, %cst_32 {dimension_numbers = #tpu.dot_dimension_numbers<[1], [0], [0], [1], [0, 0, 1, 1], [], []>, precision = #tpu.contract_precision<fp32>} : vector<8x8xf32>, vector<8x8xf32>, vector<8x8xf32> -> vector<8x8xf32>
    %67 = vector.extract_strided_slice %64 {offsets = [8, 0], sizes = [8, 8], strides = [1, 1]} : vector<16x8xf32> to vector<8x8xf32>
    %cst_33 = arith.constant dense<0.000000e+00> : vector<8x8xf32>
    %68 = tpu.matmul %67, %63, %cst_33 {dimension_numbers = #tpu.dot_dimension_numbers<[1], [0], [0], [1], [0, 0, 1, 1], [], []>, precision = #tpu.contract_precision<fp32>} : vector<8x8xf32>, vector<8x8xf32>, vector<8x8xf32> -> vector<8x8xf32>
    %69 = tpu.concatenate %66, %68 in 0 : vector<8x8xf32>, vector<8x8xf32> -> vector<16x8xf32>
    %c3_34 = arith.constant 3 : index
    %c0_35 = arith.constant 0 : index
    %c0_36 = arith.constant 0 : index
    %70 = vector.load %arg5[%c3_34, %c0_35, %c0_36] : memref<8x16x8xf32, #tpu.memory_space<vmem>>, vector<1x16x8xf32>
    %71 = vector.shape_cast %70 : vector<1x16x8xf32> to vector<16x8xf32>
    %72 = vector.shape_cast %69 : vector<16x8xf32> to vector<1x16x8xf32>
    tpu.vector_store %arg5[%c3_34, %c0_35, %c0_36], %72 {strides = array<i32>} : memref<8x16x8xf32, #tpu.memory_space<vmem>>, vector<1x16x8xf32>,
    %73 = arith.addf %66, %68 : vector<8x8xf32>
    %c2 = arith.constant 2 : index
    %c0_37 = arith.constant 0 : index
    %c0_38 = arith.constant 0 : index
    %74 = vector.load %arg1[%c2, %c0_37, %c0_38] : memref<8x32x8xf32, #tpu.memory_space<vmem>>, vector<1x32x8xf32>
    %75 = vector.shape_cast %74 : vector<1x32x8xf32> to vector<32x8xf32>
    %76 = vector.extract_strided_slice %75 {offsets = [0, 0], sizes = [16, 8], strides = [1, 1]} : vector<32x8xf32> to vector<16x8xf32>
    %77 = vector.extract_strided_slice %75 {offsets = [16, 0], sizes = [8, 8], strides = [1, 1]} : vector<32x8xf32> to vector<8x8xf32>
    %78 = vector.extract_strided_slice %75 {offsets = [24, 0], sizes = [8, 8], strides = [1, 1]} : vector<32x8xf32> to vector<8x8xf32>
    %cst_39 = arith.constant dense<0.000000e+00> : vector<16x8xf32>
    %79 = tpu.matmul %76, %73, %cst_39 {dimension_numbers = #tpu.dot_dimension_numbers<[1], [0], [0], [1], [0, 0, 1, 1], [], []>, precision = #tpu.contract_precision<fp32>} : vector<16x8xf32>, vector<8x8xf32>, vector<16x8xf32> -> vector<16x8xf32>
    %80 = vector.extract_strided_slice %79 {offsets = [0, 0], sizes = [8, 8], strides = [1, 1]} : vector<16x8xf32> to vector<8x8xf32>
    %cst_40 = arith.constant dense<0.000000e+00> : vector<8x8xf32>
    %81 = tpu.matmul %80, %77, %cst_40 {dimension_numbers = #tpu.dot_dimension_numbers<[1], [0], [0], [1], [0, 0, 1, 1], [], []>, precision = #tpu.contract_precision<fp32>} : vector<8x8xf32>, vector<8x8xf32>, vector<8x8xf32> -> vector<8x8xf32>
    %82 = vector.extract_strided_slice %79 {offsets = [8, 0], sizes = [8, 8], strides = [1, 1]} : vector<16x8xf32> to vector<8x8xf32>
    %cst_41 = arith.constant dense<0.000000e+00> : vector<8x8xf32>
    %83 = tpu.matmul %82, %78, %cst_41 {dimension_numbers = #tpu.dot_dimension_numbers<[1], [0], [0], [1], [0, 0, 1, 1], [], []>, precision = #tpu.contract_precision<fp32>} : vector<8x8xf32>, vector<8x8xf32>, vector<8x8xf32> -> vector<8x8xf32>
    %84 = tpu.concatenate %81, %83 in 0 : vector<8x8xf32>, vector<8x8xf32> -> vector<16x8xf32>
    %c2_42 = arith.constant 2 : index
    %c0_43 = arith.constant 0 : index
    %c0_44 = arith.constant 0 : index
    %85 = vector.load %arg5[%c2_42, %c0_43, %c0_44] : memref<8x16x8xf32, #tpu.memory_space<vmem>>, vector<1x16x8xf32>
    %86 = vector.shape_cast %85 : vector<1x16x8xf32> to vector<16x8xf32>
    %87 = vector.shape_cast %84 : vector<16x8xf32> to vector<1x16x8xf32>
    tpu.vector_store %arg5[%c2_42, %c0_43, %c0_44], %87 {strides = array<i32>} : memref<8x16x8xf32, #tpu.memory_space<vmem>>, vector<1x16x8xf32>,
    %88 = arith.addf %81, %83 : vector<8x8xf32>
    %c1 = arith.constant 1 : index
    %c0_45 = arith.constant 0 : index
    %c0_46 = arith.constant 0 : index
    %89 = vector.load %arg1[%c1, %c0_45, %c0_46] : memref<8x32x8xf32, #tpu.memory_space<vmem>>, vector<1x32x8xf32>
    %90 = vector.shape_cast %89 : vector<1x32x8xf32> to vector<32x8xf32>
    %91 = vector.extract_strided_slice %90 {offsets = [0, 0], sizes = [16, 8], strides = [1, 1]} : vector<32x8xf32> to vector<16x8xf32>
    %92 = vector.extract_strided_slice %90 {offsets = [16, 0], sizes = [8, 8], strides = [1, 1]} : vector<32x8xf32> to vector<8x8xf32>
    %93 = vector.extract_strided_slice %90 {offsets = [24, 0], sizes = [8, 8], strides = [1, 1]} : vector<32x8xf32> to vector<8x8xf32>
    %cst_47 = arith.constant dense<0.000000e+00> : vector<16x8xf32>
    %94 = tpu.matmul %91, %88, %cst_47 {dimension_numbers = #tpu.dot_dimension_numbers<[1], [0], [0], [1], [0, 0, 1, 1], [], []>, precision = #tpu.contract_precision<fp32>} : vector<16x8xf32>, vector<8x8xf32>, vector<16x8xf32> -> vector<16x8xf32>
    %95 = vector.extract_strided_slice %94 {offsets = [0, 0], sizes = [8, 8], strides = [1, 1]} : vector<16x8xf32> to vector<8x8xf32>
    %cst_48 = arith.constant dense<0.000000e+00> : vector<8x8xf32>
    %96 = tpu.matmul %95, %92, %cst_48 {dimension_numbers = #tpu.dot_dimension_numbers<[1], [0], [0], [1], [0, 0, 1, 1], [], []>, precision = #tpu.contract_precision<fp32>} : vector<8x8xf32>, vector<8x8xf32>, vector<8x8xf32> -> vector<8x8xf32>
    %97 = vector.extract_strided_slice %94 {offsets = [8, 0], sizes = [8, 8], strides = [1, 1]} : vector<16x8xf32> to vector<8x8xf32>
    %cst_49 = arith.constant dense<0.000000e+00> : vector<8x8xf32>
    %98 = tpu.matmul %97, %93, %cst_49 {dimension_numbers = #tpu.dot_dimension_numbers<[1], [0], [0], [1], [0, 0, 1, 1], [], []>, precision = #tpu.contract_precision<fp32>} : vector<8x8xf32>, vector<8x8xf32>, vector<8x8xf32> -> vector<8x8xf32>
    %99 = tpu.concatenate %96, %98 in 0 : vector<8x8xf32>, vector<8x8xf32> -> vector<16x8xf32>
    %c1_50 = arith.constant 1 : index
    %c0_51 = arith.constant 0 : index
    %c0_52 = arith.constant 0 : index
    %100 = vector.load %arg5[%c1_50, %c0_51, %c0_52] : memref<8x16x8xf32, #tpu.memory_space<vmem>>, vector<1x16x8xf32>
    %101 = vector.shape_cast %100 : vector<1x16x8xf32> to vector<16x8xf32>
    %102 = vector.shape_cast %99 : vector<16x8xf32> to vector<1x16x8xf32>
    tpu.vector_store %arg5[%c1_50, %c0_51, %c0_52], %102 {strides = array<i32>} : memref<8x16x8xf32, #tpu.memory_space<vmem>>, vector<1x16x8xf32>,
    %103 = arith.addf %96, %98 : vector<8x8xf32>
    %c0_53 = arith.constant 0 : index
    %c0_54 = arith.constant 0 : index
    %c0_55 = arith.constant 0 : index
    %104 = vector.load %arg1[%c0_53, %c0_54, %c0_55] : memref<8x32x8xf32, #tpu.memory_space<vmem>>, vector<1x32x8xf32>
    %105 = vector.shape_cast %104 : vector<1x32x8xf32> to vector<32x8xf32>
    %106 = vector.extract_strided_slice %105 {offsets = [0, 0], sizes = [16, 8], strides = [1, 1]} : vector<32x8xf32> to vector<16x8xf32>
    %107 = vector.extract_strided_slice %105 {offsets = [16, 0], sizes = [8, 8], strides = [1, 1]} : vector<32x8xf32> to vector<8x8xf32>
    %108 = vector.extract_strided_slice %105 {offsets = [24, 0], sizes = [8, 8], strides = [1, 1]} : vector<32x8xf32> to vector<8x8xf32>
    %cst_56 = arith.constant dense<0.000000e+00> : vector<16x8xf32>
    %109 = tpu.matmul %106, %103, %cst_56 {dimension_numbers = #tpu.dot_dimension_numbers<[1], [0], [0], [1], [0, 0, 1, 1], [], []>, precision = #tpu.contract_precision<fp32>} : vector<16x8xf32>, vector<8x8xf32>, vector<16x8xf32> -> vector<16x8xf32>
    %110 = vector.extract_strided_slice %109 {offsets = [0, 0], sizes = [8, 8], strides = [1, 1]} : vector<16x8xf32> to vector<8x8xf32>
    %cst_57 = arith.constant dense<0.000000e+00> : vector<8x8xf32>
    %111 = tpu.matmul %110, %107, %cst_57 {dimension_numbers = #tpu.dot_dimension_numbers<[1], [0], [0], [1], [0, 0, 1, 1], [], []>, precision = #tpu.contract_precision<fp32>} : vector<8x8xf32>, vector<8x8xf32>, vector<8x8xf32> -> vector<8x8xf32>
    %112 = vector.extract_strided_slice %109 {offsets = [8, 0], sizes = [8, 8], strides = [1, 1]} : vector<16x8xf32> to vector<8x8xf32>
    %cst_58 = arith.constant dense<0.000000e+00> : vector<8x8xf32>
    %113 = tpu.matmul %112, %108, %cst_58 {dimension_numbers = #tpu.dot_dimension_numbers<[1], [0], [0], [1], [0, 0, 1, 1], [], []>, precision = #tpu.contract_precision<fp32>} : vector<8x8xf32>, vector<8x8xf32>, vector<8x8xf32> -> vector<8x8xf32>
    %114 = tpu.concatenate %111, %113 in 0 : vector<8x8xf32>, vector<8x8xf32> -> vector<16x8xf32>
    %c0_59 = arith.constant 0 : index
    %c0_60 = arith.constant 0 : index
    %c0_61 = arith.constant 0 : index
    %115 = vector.load %arg5[%c0_59, %c0_60, %c0_61] : memref<8x16x8xf32, #tpu.memory_space<vmem>>, vector<1x16x8xf32>
    %116 = vector.shape_cast %115 : vector<1x16x8xf32> to vector<16x8xf32>
    %117 = vector.shape_cast %114 : vector<16x8xf32> to vector<1x16x8xf32>
    tpu.vector_store %arg5[%c0_59, %c0_60, %c0_61], %117 {strides = array<i32>} : memref<8x16x8xf32, #tpu.memory_space<vmem>>, vector<1x16x8xf32>,
    %c0_62 = arith.constant 0 : index
    %c0_63 = arith.constant 0 : index
    %118 = vector.load %arg2[%c0_62, %c0_63] : memref<128x128xf32, #tpu.memory_space<vmem>>, vector<128x128xf32>
    %119 = tpu.iota {dimensions = array<i32: 1>} : vector<8x128xi32>
    %120 = tpu.iota {dimensions = array<i32: 0>} : vector<8x128xi32>
    %c7_i32 = arith.constant 7 : i32
    %121 = vector.broadcast %c7_i32 : i32 to vector<8x128xi32>
    %122 = arith.andi %119, %121 : vector<8x128xi32>
    %123 = arith.cmpi eq, %122, %120 : vector<8x128xi32>
    %124 = arith.extui %123 : vector<8x128xi1> to vector<8x128xi32>
    %125 = arith.sitofp %124 : vector<8x128xi32> to vector<8x128xf32>
    %cst_64 = arith.constant 1.000000e+00 : f32
    %126 = vector.broadcast %cst_64 : f32 to vector<1x128xf32>
    %c0_65 = arith.constant 0 : index
    %c0_66 = arith.constant 0 : index
    %c0_67 = arith.constant 0 : index
    %127 = vector.load %arg5[%c0_65, %c0_66, %c0_67] : memref<8x16x8xf32, #tpu.memory_space<vmem>>, vector<1x16x8xf32>
    %128 = vector.shape_cast %127 : vector<1x16x8xf32> to vector<16x8xf32>
    %c0_68 = arith.constant 0 : index
    %c0_69 = arith.constant 0 : index
    %c0_70 = arith.constant 0 : index
    %129 = vector.load %arg1[%c0_68, %c0_69, %c0_70] : memref<8x32x8xf32, #tpu.memory_space<vmem>>, vector<1x32x8xf32>
    %130 = vector.shape_cast %129 : vector<1x32x8xf32> to vector<32x8xf32>
    %131 = vector.extract_strided_slice %130 {offsets = [16, 0], sizes = [16, 8], strides = [1, 1]} : vector<32x8xf32> to vector<16x8xf32>
    %cst_71 = arith.constant dense<0.000000e+00> : vector<16x128xf32>
    %132 = tpu.matmul %128, %125, %cst_71 {dimension_numbers = #tpu.dot_dimension_numbers<[1], [0], [0], [1], [0, 0, 1, 1], [], []>, precision = #tpu.contract_precision<fp32>} : vector<16x8xf32>, vector<8x128xf32>, vector<16x128xf32> -> vector<16x128xf32>
    %133 = vector.extract_strided_slice %132 {offsets = [0, 0], sizes = [8, 128], strides = [1, 1]} : vector<16x128xf32> to vector<8x128xf32>
    %134 = arith.mulf %133, %125 : vector<8x128xf32>
    %cst_72 = arith.constant dense<0.000000e+00> : vector<128xf32>
    %135 = vector.multi_reduction <add>, %134, %cst_72 [0] : vector<8x128xf32> to vector<128xf32>
    %136 = vector.shape_cast %135 : vector<128xf32> to vector<1x128xf32>
    %137 = vector.extract_strided_slice %132 {offsets = [8, 0], sizes = [8, 128], strides = [1, 1]} : vector<16x128xf32> to vector<8x128xf32>
    %138 = arith.mulf %137, %125 : vector<8x128xf32>
    %cst_73 = arith.constant dense<0.000000e+00> : vector<128xf32>
    %139 = vector.multi_reduction <add>, %138, %cst_73 [0] : vector<8x128xf32> to vector<128xf32>
    %140 = vector.shape_cast %139 : vector<128xf32> to vector<1x128xf32>
    %cst_74 = arith.constant dense<0.000000e+00> : vector<1x128xf32>
    %141 = tpu.matmul %136, %118, %cst_74 {dimension_numbers = #tpu.dot_dimension_numbers<[1], [0], [0], [1], [0, 0, 1, 1], [], []>, precision = #tpu.contract_precision<fp32>} : vector<1x128xf32>, vector<128x128xf32>, vector<1x128xf32> -> vector<1x128xf32>
    %cst_75 = arith.constant dense<0.000000e+00> : vector<1x128xf32>
    %142 = tpu.matmul %140, %118, %cst_75 {dimension_numbers = #tpu.dot_dimension_numbers<[1], [0], [0], [1], [0, 0, 1, 1], [], []>, precision = #tpu.contract_precision<fp32>} : vector<1x128xf32>, vector<128x128xf32>, vector<1x128xf32> -> vector<1x128xf32>
    %c0_76 = arith.constant 0 : index
    %c0_77 = arith.constant 0 : index
    %c0_78 = arith.constant 0 : index
    %143 = vector.load %arg3[%c0_76, %c0_77, %c0_78] : memref<1x8x128xf32, #tpu.memory_space<vmem>>, vector<1x1x128xf32>
    %144 = vector.shape_cast %143 : vector<1x1x128xf32> to vector<128xf32>
    %145 = vector.shape_cast %144 : vector<128xf32> to vector<1x128xf32>
    %146 = arith.mulf %145, %126 : vector<1x128xf32>
    %147 = arith.cmpf olt, %146, %142 : vector<1x128xf32>
    %cst_79 = arith.constant dense<0.000000e+00> : vector<16x128xf32>
    %148 = tpu.matmul %131, %125, %cst_79 {dimension_numbers = #tpu.dot_dimension_numbers<[1], [0], [0], [1], [0, 0, 1, 1], [], []>, precision = #tpu.contract_precision<fp32>} : vector<16x8xf32>, vector<8x128xf32>, vector<16x128xf32> -> vector<16x128xf32>
    %149 = vector.extract_strided_slice %148 {offsets = [8, 0], sizes = [8, 128], strides = [1, 1]} : vector<16x128xf32> to vector<8x128xf32>
    %150 = vector.extract_strided_slice %148 {offsets = [0, 0], sizes = [8, 128], strides = [1, 1]} : vector<16x128xf32> to vector<8x128xf32>
    %151 = vector.shape_cast %147 : vector<1x128xi1> to vector<1x128xi1>
    %152 = vector.broadcast %151 : vector<1x128xi1> to vector<8x128xi1>
    %153 = arith.select %152, %149, %150 : vector<8x128xi1>, vector<8x128xf32>
    %154 = arith.select %147, %142, %141 : vector<1x128xi1>, vector<1x128xf32>
    %cst_80 = arith.constant 0.000000e+00 : f32
    %cst_81 = arith.constant 1.000000e+00 : f32
    %155 = vector.broadcast %cst_80 : f32 to vector<1x128xf32>
    %156 = vector.broadcast %cst_81 : f32 to vector<1x128xf32>
    %157 = arith.select %147, %155, %156 : vector<1x128xi1>, vector<1x128xf32>
    %c1_82 = arith.constant 1 : index
    %c0_83 = arith.constant 0 : index
    %c0_84 = arith.constant 0 : index
    %158 = vector.load %arg5[%c1_82, %c0_83, %c0_84] : memref<8x16x8xf32, #tpu.memory_space<vmem>>, vector<1x16x8xf32>
    %159 = vector.shape_cast %158 : vector<1x16x8xf32> to vector<16x8xf32>
    %c1_85 = arith.constant 1 : index
    %c0_86 = arith.constant 0 : index
    %c0_87 = arith.constant 0 : index
    %160 = vector.load %arg1[%c1_85, %c0_86, %c0_87] : memref<8x32x8xf32, #tpu.memory_space<vmem>>, vector<1x32x8xf32>
    %161 = vector.shape_cast %160 : vector<1x32x8xf32> to vector<32x8xf32>
    %162 = vector.extract_strided_slice %161 {offsets = [16, 0], sizes = [16, 8], strides = [1, 1]} : vector<32x8xf32> to vector<16x8xf32>
    %cst_88 = arith.constant dense<0.000000e+00> : vector<16x128xf32>
    %163 = tpu.matmul %159, %153, %cst_88 {dimension_numbers = #tpu.dot_dimension_numbers<[1], [0], [0], [1], [0, 0, 1, 1], [], []>, precision = #tpu.contract_precision<fp32>} : vector<16x8xf32>, vector<8x128xf32>, vector<16x128xf32> -> vector<16x128xf32>
    %164 = vector.extract_strided_slice %163 {offsets = [0, 0], sizes = [8, 128], strides = [1, 1]} : vector<16x128xf32> to vector<8x128xf32>
    %165 = arith.mulf %164, %153 : vector<8x128xf32>
    %cst_89 = arith.constant dense<0.000000e+00> : vector<128xf32>
    %166 = vector.multi_reduction <add>, %165, %cst_89 [0] : vector<8x128xf32> to vector<128xf32>
    %167 = vector.shape_cast %166 : vector<128xf32> to vector<1x128xf32>
    %168 = vector.extract_strided_slice %163 {offsets = [8, 0], sizes = [8, 128], strides = [1, 1]} : vector<16x128xf32> to vector<8x128xf32>
    %169 = arith.mulf %168, %153 : vector<8x128xf32>
    %cst_90 = arith.constant dense<0.000000e+00> : vector<128xf32>
    %170 = vector.multi_reduction <add>, %169, %cst_90 [0] : vector<8x128xf32> to vector<128xf32>
    %171 = vector.shape_cast %170 : vector<128xf32> to vector<1x128xf32>
    %cst_91 = arith.constant dense<0.000000e+00> : vector<1x128xf32>
    %172 = tpu.matmul %167, %118, %cst_91 {dimension_numbers = #tpu.dot_dimension_numbers<[1], [0], [0], [1], [0, 0, 1, 1], [], []>, precision = #tpu.contract_precision<fp32>} : vector<1x128xf32>, vector<128x128xf32>, vector<1x128xf32> -> vector<1x128xf32>
    %cst_92 = arith.constant dense<0.000000e+00> : vector<1x128xf32>
    %173 = tpu.matmul %171, %118, %cst_92 {dimension_numbers = #tpu.dot_dimension_numbers<[1], [0], [0], [1], [0, 0, 1, 1], [], []>, precision = #tpu.contract_precision<fp32>} : vector<1x128xf32>, vector<128x128xf32>, vector<1x128xf32> -> vector<1x128xf32>
    %c0_93 = arith.constant 0 : index
    %c1_94 = arith.constant 1 : index
    %c0_95 = arith.constant 0 : index
    %174 = vector.load %arg3[%c0_93, %c1_94, %c0_95] : memref<1x8x128xf32, #tpu.memory_space<vmem>>, vector<1x1x128xf32>
    %175 = vector.shape_cast %174 : vector<1x1x128xf32> to vector<128xf32>
    %176 = vector.shape_cast %175 : vector<128xf32> to vector<1x128xf32>
    %177 = arith.mulf %176, %154 : vector<1x128xf32>
    %178 = arith.cmpf olt, %177, %173 : vector<1x128xf32>
    %cst_96 = arith.constant dense<0.000000e+00> : vector<16x128xf32>
    %179 = tpu.matmul %162, %153, %cst_96 {dimension_numbers = #tpu.dot_dimension_numbers<[1], [0], [0], [1], [0, 0, 1, 1], [], []>, precision = #tpu.contract_precision<fp32>} : vector<16x8xf32>, vector<8x128xf32>, vector<16x128xf32> -> vector<16x128xf32>
    %180 = vector.extract_strided_slice %179 {offsets = [8, 0], sizes = [8, 128], strides = [1, 1]} : vector<16x128xf32> to vector<8x128xf32>
    %181 = vector.extract_strided_slice %179 {offsets = [0, 0], sizes = [8, 128], strides = [1, 1]} : vector<16x128xf32> to vector<8x128xf32>
    %182 = vector.shape_cast %178 : vector<1x128xi1> to vector<1x128xi1>
    %183 = vector.broadcast %182 : vector<1x128xi1> to vector<8x128xi1>
    %184 = arith.select %183, %180, %181 : vector<8x128xi1>, vector<8x128xf32>
    %185 = arith.select %178, %173, %172 : vector<1x128xi1>, vector<1x128xf32>
    %cst_97 = arith.constant 0.000000e+00 : f32
    %cst_98 = arith.constant 1.000000e+00 : f32
    %186 = vector.broadcast %cst_97 : f32 to vector<1x128xf32>
    %187 = vector.broadcast %cst_98 : f32 to vector<1x128xf32>
    %188 = arith.select %178, %186, %187 : vector<1x128xi1>, vector<1x128xf32>
    %c2_99 = arith.constant 2 : index
    %c0_100 = arith.constant 0 : index
    %c0_101 = arith.constant 0 : index
    %189 = vector.load %arg5[%c2_99, %c0_100, %c0_101] : memref<8x16x8xf32, #tpu.memory_space<vmem>>, vector<1x16x8xf32>
    %190 = vector.shape_cast %189 : vector<1x16x8xf32> to vector<16x8xf32>
    %c2_102 = arith.constant 2 : index
    %c0_103 = arith.constant 0 : index
    %c0_104 = arith.constant 0 : index
    %191 = vector.load %arg1[%c2_102, %c0_103, %c0_104] : memref<8x32x8xf32, #tpu.memory_space<vmem>>, vector<1x32x8xf32>
    %192 = vector.shape_cast %191 : vector<1x32x8xf32> to vector<32x8xf32>
    %193 = vector.extract_strided_slice %192 {offsets = [16, 0], sizes = [16, 8], strides = [1, 1]} : vector<32x8xf32> to vector<16x8xf32>
    %cst_105 = arith.constant dense<0.000000e+00> : vector<16x128xf32>
    %194 = tpu.matmul %190, %184, %cst_105 {dimension_numbers = #tpu.dot_dimension_numbers<[1], [0], [0], [1], [0, 0, 1, 1], [], []>, precision = #tpu.contract_precision<fp32>} : vector<16x8xf32>, vector<8x128xf32>, vector<16x128xf32> -> vector<16x128xf32>
    %195 = vector.extract_strided_slice %194 {offsets = [0, 0], sizes = [8, 128], strides = [1, 1]} : vector<16x128xf32> to vector<8x128xf32>
    %196 = arith.mulf %195, %184 : vector<8x128xf32>
    %cst_106 = arith.constant dense<0.000000e+00> : vector<128xf32>
    %197 = vector.multi_reduction <add>, %196, %cst_106 [0] : vector<8x128xf32> to vector<128xf32>
    %198 = vector.shape_cast %197 : vector<128xf32> to vector<1x128xf32>
    %199 = vector.extract_strided_slice %194 {offsets = [8, 0], sizes = [8, 128], strides = [1, 1]} : vector<16x128xf32> to vector<8x128xf32>
    %200 = arith.mulf %199, %184 : vector<8x128xf32>
    %cst_107 = arith.constant dense<0.000000e+00> : vector<128xf32>
    %201 = vector.multi_reduction <add>, %200, %cst_107 [0] : vector<8x128xf32> to vector<128xf32>
    %202 = vector.shape_cast %201 : vector<128xf32> to vector<1x128xf32>
    %cst_108 = arith.constant dense<0.000000e+00> : vector<1x128xf32>
    %203 = tpu.matmul %198, %118, %cst_108 {dimension_numbers = #tpu.dot_dimension_numbers<[1], [0], [0], [1], [0, 0, 1, 1], [], []>, precision = #tpu.contract_precision<fp32>} : vector<1x128xf32>, vector<128x128xf32>, vector<1x128xf32> -> vector<1x128xf32>
    %cst_109 = arith.constant dense<0.000000e+00> : vector<1x128xf32>
    %204 = tpu.matmul %202, %118, %cst_109 {dimension_numbers = #tpu.dot_dimension_numbers<[1], [0], [0], [1], [0, 0, 1, 1], [], []>, precision = #tpu.contract_precision<fp32>} : vector<1x128xf32>, vector<128x128xf32>, vector<1x128xf32> -> vector<1x128xf32>
    %c0_110 = arith.constant 0 : index
    %c2_111 = arith.constant 2 : index
    %c0_112 = arith.constant 0 : index
    %205 = vector.load %arg3[%c0_110, %c2_111, %c0_112] : memref<1x8x128xf32, #tpu.memory_space<vmem>>, vector<1x1x128xf32>
    %206 = vector.shape_cast %205 : vector<1x1x128xf32> to vector<128xf32>
    %207 = vector.shape_cast %206 : vector<128xf32> to vector<1x128xf32>
    %208 = arith.mulf %207, %185 : vector<1x128xf32>
    %209 = arith.cmpf olt, %208, %204 : vector<1x128xf32>
    %cst_113 = arith.constant dense<0.000000e+00> : vector<16x128xf32>
    %210 = tpu.matmul %193, %184, %cst_113 {dimension_numbers = #tpu.dot_dimension_numbers<[1], [0], [0], [1], [0, 0, 1, 1], [], []>, precision = #tpu.contract_precision<fp32>} : vector<16x8xf32>, vector<8x128xf32>, vector<16x128xf32> -> vector<16x128xf32>
    %211 = vector.extract_strided_slice %210 {offsets = [8, 0], sizes = [8, 128], strides = [1, 1]} : vector<16x128xf32> to vector<8x128xf32>
    %212 = vector.extract_strided_slice %210 {offsets = [0, 0], sizes = [8, 128], strides = [1, 1]} : vector<16x128xf32> to vector<8x128xf32>
    %213 = vector.shape_cast %209 : vector<1x128xi1> to vector<1x128xi1>
    %214 = vector.broadcast %213 : vector<1x128xi1> to vector<8x128xi1>
    %215 = arith.select %214, %211, %212 : vector<8x128xi1>, vector<8x128xf32>
    %216 = arith.select %209, %204, %203 : vector<1x128xi1>, vector<1x128xf32>
    %cst_114 = arith.constant 0.000000e+00 : f32
    %cst_115 = arith.constant 1.000000e+00 : f32
    %217 = vector.broadcast %cst_114 : f32 to vector<1x128xf32>
    %218 = vector.broadcast %cst_115 : f32 to vector<1x128xf32>
    %219 = arith.select %209, %217, %218 : vector<1x128xi1>, vector<1x128xf32>
    %c3_116 = arith.constant 3 : index
    %c0_117 = arith.constant 0 : index
    %c0_118 = arith.constant 0 : index
    %220 = vector.load %arg5[%c3_116, %c0_117, %c0_118] : memref<8x16x8xf32, #tpu.memory_space<vmem>>, vector<1x16x8xf32>
    %221 = vector.shape_cast %220 : vector<1x16x8xf32> to vector<16x8xf32>
    %c3_119 = arith.constant 3 : index
    %c0_120 = arith.constant 0 : index
    %c0_121 = arith.constant 0 : index
    %222 = vector.load %arg1[%c3_119, %c0_120, %c0_121] : memref<8x32x8xf32, #tpu.memory_space<vmem>>, vector<1x32x8xf32>
    %223 = vector.shape_cast %222 : vector<1x32x8xf32> to vector<32x8xf32>
    %224 = vector.extract_strided_slice %223 {offsets = [16, 0], sizes = [16, 8], strides = [1, 1]} : vector<32x8xf32> to vector<16x8xf32>
    %cst_122 = arith.constant dense<0.000000e+00> : vector<16x128xf32>
    %225 = tpu.matmul %221, %215, %cst_122 {dimension_numbers = #tpu.dot_dimension_numbers<[1], [0], [0], [1], [0, 0, 1, 1], [], []>, precision = #tpu.contract_precision<fp32>} : vector<16x8xf32>, vector<8x128xf32>, vector<16x128xf32> -> vector<16x128xf32>
    %226 = vector.extract_strided_slice %225 {offsets = [0, 0], sizes = [8, 128], strides = [1, 1]} : vector<16x128xf32> to vector<8x128xf32>
    %227 = arith.mulf %226, %215 : vector<8x128xf32>
    %cst_123 = arith.constant dense<0.000000e+00> : vector<128xf32>
    %228 = vector.multi_reduction <add>, %227, %cst_123 [0] : vector<8x128xf32> to vector<128xf32>
    %229 = vector.shape_cast %228 : vector<128xf32> to vector<1x128xf32>
    %230 = vector.extract_strided_slice %225 {offsets = [8, 0], sizes = [8, 128], strides = [1, 1]} : vector<16x128xf32> to vector<8x128xf32>
    %231 = arith.mulf %230, %215 : vector<8x128xf32>
    %cst_124 = arith.constant dense<0.000000e+00> : vector<128xf32>
    %232 = vector.multi_reduction <add>, %231, %cst_124 [0] : vector<8x128xf32> to vector<128xf32>
    %233 = vector.shape_cast %232 : vector<128xf32> to vector<1x128xf32>
    %cst_125 = arith.constant dense<0.000000e+00> : vector<1x128xf32>
    %234 = tpu.matmul %229, %118, %cst_125 {dimension_numbers = #tpu.dot_dimension_numbers<[1], [0], [0], [1], [0, 0, 1, 1], [], []>, precision = #tpu.contract_precision<fp32>} : vector<1x128xf32>, vector<128x128xf32>, vector<1x128xf32> -> vector<1x128xf32>
    %cst_126 = arith.constant dense<0.000000e+00> : vector<1x128xf32>
    %235 = tpu.matmul %233, %118, %cst_126 {dimension_numbers = #tpu.dot_dimension_numbers<[1], [0], [0], [1], [0, 0, 1, 1], [], []>, precision = #tpu.contract_precision<fp32>} : vector<1x128xf32>, vector<128x128xf32>, vector<1x128xf32> -> vector<1x128xf32>
    %c0_127 = arith.constant 0 : index
    %c3_128 = arith.constant 3 : index
    %c0_129 = arith.constant 0 : index
    %236 = vector.load %arg3[%c0_127, %c3_128, %c0_129] : memref<1x8x128xf32, #tpu.memory_space<vmem>>, vector<1x1x128xf32>
    %237 = vector.shape_cast %236 : vector<1x1x128xf32> to vector<128xf32>
    %238 = vector.shape_cast %237 : vector<128xf32> to vector<1x128xf32>
    %239 = arith.mulf %238, %216 : vector<1x128xf32>
    %240 = arith.cmpf olt, %239, %235 : vector<1x128xf32>
    %cst_130 = arith.constant dense<0.000000e+00> : vector<16x128xf32>
    %241 = tpu.matmul %224, %215, %cst_130 {dimension_numbers = #tpu.dot_dimension_numbers<[1], [0], [0], [1], [0, 0, 1, 1], [], []>, precision = #tpu.contract_precision<fp32>} : vector<16x8xf32>, vector<8x128xf32>, vector<16x128xf32> -> vector<16x128xf32>
    %242 = vector.extract_strided_slice %241 {offsets = [8, 0], sizes = [8, 128], strides = [1, 1]} : vector<16x128xf32> to vector<8x128xf32>
    %243 = vector.extract_strided_slice %241 {offsets = [0, 0], sizes = [8, 128], strides = [1, 1]} : vector<16x128xf32> to vector<8x128xf32>
    %244 = vector.shape_cast %240 : vector<1x128xi1> to vector<1x128xi1>
    %245 = vector.broadcast %244 : vector<1x128xi1> to vector<8x128xi1>
    %246 = arith.select %245, %242, %243 : vector<8x128xi1>, vector<8x128xf32>
    %247 = arith.select %240, %235, %234 : vector<1x128xi1>, vector<1x128xf32>
    %cst_131 = arith.constant 0.000000e+00 : f32
    %cst_132 = arith.constant 1.000000e+00 : f32
    %248 = vector.broadcast %cst_131 : f32 to vector<1x128xf32>
    %249 = vector.broadcast %cst_132 : f32 to vector<1x128xf32>
    %250 = arith.select %240, %248, %249 : vector<1x128xi1>, vector<1x128xf32>
    %c4_133 = arith.constant 4 : index
    %c0_134 = arith.constant 0 : index
    %c0_135 = arith.constant 0 : index
    %251 = vector.load %arg5[%c4_133, %c0_134, %c0_135] : memref<8x16x8xf32, #tpu.memory_space<vmem>>, vector<1x16x8xf32>
    %252 = vector.shape_cast %251 : vector<1x16x8xf32> to vector<16x8xf32>
    %c4_136 = arith.constant 4 : index
    %c0_137 = arith.constant 0 : index
    %c0_138 = arith.constant 0 : index
    %253 = vector.load %arg1[%c4_136, %c0_137, %c0_138] : memref<8x32x8xf32, #tpu.memory_space<vmem>>, vector<1x32x8xf32>
    %254 = vector.shape_cast %253 : vector<1x32x8xf32> to vector<32x8xf32>
    %255 = vector.extract_strided_slice %254 {offsets = [16, 0], sizes = [16, 8], strides = [1, 1]} : vector<32x8xf32> to vector<16x8xf32>
    %cst_139 = arith.constant dense<0.000000e+00> : vector<16x128xf32>
    %256 = tpu.matmul %252, %246, %cst_139 {dimension_numbers = #tpu.dot_dimension_numbers<[1], [0], [0], [1], [0, 0, 1, 1], [], []>, precision = #tpu.contract_precision<fp32>} : vector<16x8xf32>, vector<8x128xf32>, vector<16x128xf32> -> vector<16x128xf32>
    %257 = vector.extract_strided_slice %256 {offsets = [0, 0], sizes = [8, 128], strides = [1, 1]} : vector<16x128xf32> to vector<8x128xf32>
    %258 = arith.mulf %257, %246 : vector<8x128xf32>
    %cst_140 = arith.constant dense<0.000000e+00> : vector<128xf32>
    %259 = vector.multi_reduction <add>, %258, %cst_140 [0] : vector<8x128xf32> to vector<128xf32>
    %260 = vector.shape_cast %259 : vector<128xf32> to vector<1x128xf32>
    %261 = vector.extract_strided_slice %256 {offsets = [8, 0], sizes = [8, 128], strides = [1, 1]} : vector<16x128xf32> to vector<8x128xf32>
    %262 = arith.mulf %261, %246 : vector<8x128xf32>
    %cst_141 = arith.constant dense<0.000000e+00> : vector<128xf32>
    %263 = vector.multi_reduction <add>, %262, %cst_141 [0] : vector<8x128xf32> to vector<128xf32>
    %264 = vector.shape_cast %263 : vector<128xf32> to vector<1x128xf32>
    %cst_142 = arith.constant dense<0.000000e+00> : vector<1x128xf32>
    %265 = tpu.matmul %260, %118, %cst_142 {dimension_numbers = #tpu.dot_dimension_numbers<[1], [0], [0], [1], [0, 0, 1, 1], [], []>, precision = #tpu.contract_precision<fp32>} : vector<1x128xf32>, vector<128x128xf32>, vector<1x128xf32> -> vector<1x128xf32>
    %cst_143 = arith.constant dense<0.000000e+00> : vector<1x128xf32>
    %266 = tpu.matmul %264, %118, %cst_143 {dimension_numbers = #tpu.dot_dimension_numbers<[1], [0], [0], [1], [0, 0, 1, 1], [], []>, precision = #tpu.contract_precision<fp32>} : vector<1x128xf32>, vector<128x128xf32>, vector<1x128xf32> -> vector<1x128xf32>
    %c0_144 = arith.constant 0 : index
    %c4_145 = arith.constant 4 : index
    %c0_146 = arith.constant 0 : index
    %267 = vector.load %arg3[%c0_144, %c4_145, %c0_146] : memref<1x8x128xf32, #tpu.memory_space<vmem>>, vector<1x1x128xf32>
    %268 = vector.shape_cast %267 : vector<1x1x128xf32> to vector<128xf32>
    %269 = vector.shape_cast %268 : vector<128xf32> to vector<1x128xf32>
    %270 = arith.mulf %269, %247 : vector<1x128xf32>
    %271 = arith.cmpf olt, %270, %266 : vector<1x128xf32>
    %cst_147 = arith.constant dense<0.000000e+00> : vector<16x128xf32>
    %272 = tpu.matmul %255, %246, %cst_147 {dimension_numbers = #tpu.dot_dimension_numbers<[1], [0], [0], [1], [0, 0, 1, 1], [], []>, precision = #tpu.contract_precision<fp32>} : vector<16x8xf32>, vector<8x128xf32>, vector<16x128xf32> -> vector<16x128xf32>
    %273 = vector.extract_strided_slice %272 {offsets = [8, 0], sizes = [8, 128], strides = [1, 1]} : vector<16x128xf32> to vector<8x128xf32>
    %274 = vector.extract_strided_slice %272 {offsets = [0, 0], sizes = [8, 128], strides = [1, 1]} : vector<16x128xf32> to vector<8x128xf32>
    %275 = vector.shape_cast %271 : vector<1x128xi1> to vector<1x128xi1>
    %276 = vector.broadcast %275 : vector<1x128xi1> to vector<8x128xi1>
    %277 = arith.select %276, %273, %274 : vector<8x128xi1>, vector<8x128xf32>
    %278 = arith.select %271, %266, %265 : vector<1x128xi1>, vector<1x128xf32>
    %cst_148 = arith.constant 0.000000e+00 : f32
    %cst_149 = arith.constant 1.000000e+00 : f32
    %279 = vector.broadcast %cst_148 : f32 to vector<1x128xf32>
    %280 = vector.broadcast %cst_149 : f32 to vector<1x128xf32>
    %281 = arith.select %271, %279, %280 : vector<1x128xi1>, vector<1x128xf32>
    %c5_150 = arith.constant 5 : index
    %c0_151 = arith.constant 0 : index
    %c0_152 = arith.constant 0 : index
    %282 = vector.load %arg5[%c5_150, %c0_151, %c0_152] : memref<8x16x8xf32, #tpu.memory_space<vmem>>, vector<1x16x8xf32>
    %283 = vector.shape_cast %282 : vector<1x16x8xf32> to vector<16x8xf32>
    %c5_153 = arith.constant 5 : index
    %c0_154 = arith.constant 0 : index
    %c0_155 = arith.constant 0 : index
    %284 = vector.load %arg1[%c5_153, %c0_154, %c0_155] : memref<8x32x8xf32, #tpu.memory_space<vmem>>, vector<1x32x8xf32>
    %285 = vector.shape_cast %284 : vector<1x32x8xf32> to vector<32x8xf32>
    %286 = vector.extract_strided_slice %285 {offsets = [16, 0], sizes = [16, 8], strides = [1, 1]} : vector<32x8xf32> to vector<16x8xf32>
    %cst_156 = arith.constant dense<0.000000e+00> : vector<16x128xf32>
    %287 = tpu.matmul %283, %277, %cst_156 {dimension_numbers = #tpu.dot_dimension_numbers<[1], [0], [0], [1], [0, 0, 1, 1], [], []>, precision = #tpu.contract_precision<fp32>} : vector<16x8xf32>, vector<8x128xf32>, vector<16x128xf32> -> vector<16x128xf32>
    %288 = vector.extract_strided_slice %287 {offsets = [0, 0], sizes = [8, 128], strides = [1, 1]} : vector<16x128xf32> to vector<8x128xf32>
    %289 = arith.mulf %288, %277 : vector<8x128xf32>
    %cst_157 = arith.constant dense<0.000000e+00> : vector<128xf32>
    %290 = vector.multi_reduction <add>, %289, %cst_157 [0] : vector<8x128xf32> to vector<128xf32>
    %291 = vector.shape_cast %290 : vector<128xf32> to vector<1x128xf32>
    %292 = vector.extract_strided_slice %287 {offsets = [8, 0], sizes = [8, 128], strides = [1, 1]} : vector<16x128xf32> to vector<8x128xf32>
    %293 = arith.mulf %292, %277 : vector<8x128xf32>
    %cst_158 = arith.constant dense<0.000000e+00> : vector<128xf32>
    %294 = vector.multi_reduction <add>, %293, %cst_158 [0] : vector<8x128xf32> to vector<128xf32>
    %295 = vector.shape_cast %294 : vector<128xf32> to vector<1x128xf32>
    %cst_159 = arith.constant dense<0.000000e+00> : vector<1x128xf32>
    %296 = tpu.matmul %291, %118, %cst_159 {dimension_numbers = #tpu.dot_dimension_numbers<[1], [0], [0], [1], [0, 0, 1, 1], [], []>, precision = #tpu.contract_precision<fp32>} : vector<1x128xf32>, vector<128x128xf32>, vector<1x128xf32> -> vector<1x128xf32>
    %cst_160 = arith.constant dense<0.000000e+00> : vector<1x128xf32>
    %297 = tpu.matmul %295, %118, %cst_160 {dimension_numbers = #tpu.dot_dimension_numbers<[1], [0], [0], [1], [0, 0, 1, 1], [], []>, precision = #tpu.contract_precision<fp32>} : vector<1x128xf32>, vector<128x128xf32>, vector<1x128xf32> -> vector<1x128xf32>
    %c0_161 = arith.constant 0 : index
    %c5_162 = arith.constant 5 : index
    %c0_163 = arith.constant 0 : index
    %298 = vector.load %arg3[%c0_161, %c5_162, %c0_163] : memref<1x8x128xf32, #tpu.memory_space<vmem>>, vector<1x1x128xf32>
    %299 = vector.shape_cast %298 : vector<1x1x128xf32> to vector<128xf32>
    %300 = vector.shape_cast %299 : vector<128xf32> to vector<1x128xf32>
    %301 = arith.mulf %300, %278 : vector<1x128xf32>
    %302 = arith.cmpf olt, %301, %297 : vector<1x128xf32>
    %cst_164 = arith.constant dense<0.000000e+00> : vector<16x128xf32>
    %303 = tpu.matmul %286, %277, %cst_164 {dimension_numbers = #tpu.dot_dimension_numbers<[1], [0], [0], [1], [0, 0, 1, 1], [], []>, precision = #tpu.contract_precision<fp32>} : vector<16x8xf32>, vector<8x128xf32>, vector<16x128xf32> -> vector<16x128xf32>
    %304 = vector.extract_strided_slice %303 {offsets = [8, 0], sizes = [8, 128], strides = [1, 1]} : vector<16x128xf32> to vector<8x128xf32>
    %305 = vector.extract_strided_slice %303 {offsets = [0, 0], sizes = [8, 128], strides = [1, 1]} : vector<16x128xf32> to vector<8x128xf32>
    %306 = vector.shape_cast %302 : vector<1x128xi1> to vector<1x128xi1>
    %307 = vector.broadcast %306 : vector<1x128xi1> to vector<8x128xi1>
    %308 = arith.select %307, %304, %305 : vector<8x128xi1>, vector<8x128xf32>
    %309 = arith.select %302, %297, %296 : vector<1x128xi1>, vector<1x128xf32>
    %cst_165 = arith.constant 0.000000e+00 : f32
    %cst_166 = arith.constant 1.000000e+00 : f32
    %310 = vector.broadcast %cst_165 : f32 to vector<1x128xf32>
    %311 = vector.broadcast %cst_166 : f32 to vector<1x128xf32>
    %312 = arith.select %302, %310, %311 : vector<1x128xi1>, vector<1x128xf32>
    %c6_167 = arith.constant 6 : index
    %c0_168 = arith.constant 0 : index
    %c0_169 = arith.constant 0 : index
    %313 = vector.load %arg5[%c6_167, %c0_168, %c0_169] : memref<8x16x8xf32, #tpu.memory_space<vmem>>, vector<1x16x8xf32>
    %314 = vector.shape_cast %313 : vector<1x16x8xf32> to vector<16x8xf32>
    %c6_170 = arith.constant 6 : index
    %c0_171 = arith.constant 0 : index
    %c0_172 = arith.constant 0 : index
    %315 = vector.load %arg1[%c6_170, %c0_171, %c0_172] : memref<8x32x8xf32, #tpu.memory_space<vmem>>, vector<1x32x8xf32>
    %316 = vector.shape_cast %315 : vector<1x32x8xf32> to vector<32x8xf32>
    %317 = vector.extract_strided_slice %316 {offsets = [16, 0], sizes = [16, 8], strides = [1, 1]} : vector<32x8xf32> to vector<16x8xf32>
    %cst_173 = arith.constant dense<0.000000e+00> : vector<16x128xf32>
    %318 = tpu.matmul %314, %308, %cst_173 {dimension_numbers = #tpu.dot_dimension_numbers<[1], [0], [0], [1], [0, 0, 1, 1], [], []>, precision = #tpu.contract_precision<fp32>} : vector<16x8xf32>, vector<8x128xf32>, vector<16x128xf32> -> vector<16x128xf32>
    %319 = vector.extract_strided_slice %318 {offsets = [0, 0], sizes = [8, 128], strides = [1, 1]} : vector<16x128xf32> to vector<8x128xf32>
    %320 = arith.mulf %319, %308 : vector<8x128xf32>
    %cst_174 = arith.constant dense<0.000000e+00> : vector<128xf32>
    %321 = vector.multi_reduction <add>, %320, %cst_174 [0] : vector<8x128xf32> to vector<128xf32>
    %322 = vector.shape_cast %321 : vector<128xf32> to vector<1x128xf32>
    %323 = vector.extract_strided_slice %318 {offsets = [8, 0], sizes = [8, 128], strides = [1, 1]} : vector<16x128xf32> to vector<8x128xf32>
    %324 = arith.mulf %323, %308 : vector<8x128xf32>
    %cst_175 = arith.constant dense<0.000000e+00> : vector<128xf32>
    %325 = vector.multi_reduction <add>, %324, %cst_175 [0] : vector<8x128xf32> to vector<128xf32>
    %326 = vector.shape_cast %325 : vector<128xf32> to vector<1x128xf32>
    %cst_176 = arith.constant dense<0.000000e+00> : vector<1x128xf32>
    %327 = tpu.matmul %322, %118, %cst_176 {dimension_numbers = #tpu.dot_dimension_numbers<[1], [0], [0], [1], [0, 0, 1, 1], [], []>, precision = #tpu.contract_precision<fp32>} : vector<1x128xf32>, vector<128x128xf32>, vector<1x128xf32> -> vector<1x128xf32>
    %cst_177 = arith.constant dense<0.000000e+00> : vector<1x128xf32>
    %328 = tpu.matmul %326, %118, %cst_177 {dimension_numbers = #tpu.dot_dimension_numbers<[1], [0], [0], [1], [0, 0, 1, 1], [], []>, precision = #tpu.contract_precision<fp32>} : vector<1x128xf32>, vector<128x128xf32>, vector<1x128xf32> -> vector<1x128xf32>
    %c0_178 = arith.constant 0 : index
    %c6_179 = arith.constant 6 : index
    %c0_180 = arith.constant 0 : index
    %329 = vector.load %arg3[%c0_178, %c6_179, %c0_180] : memref<1x8x128xf32, #tpu.memory_space<vmem>>, vector<1x1x128xf32>
    %330 = vector.shape_cast %329 : vector<1x1x128xf32> to vector<128xf32>
    %331 = vector.shape_cast %330 : vector<128xf32> to vector<1x128xf32>
    %332 = arith.mulf %331, %309 : vector<1x128xf32>
    %333 = arith.cmpf olt, %332, %328 : vector<1x128xf32>
    %cst_181 = arith.constant dense<0.000000e+00> : vector<16x128xf32>
    %334 = tpu.matmul %317, %308, %cst_181 {dimension_numbers = #tpu.dot_dimension_numbers<[1], [0], [0], [1], [0, 0, 1, 1], [], []>, precision = #tpu.contract_precision<fp32>} : vector<16x8xf32>, vector<8x128xf32>, vector<16x128xf32> -> vector<16x128xf32>
    %335 = vector.extract_strided_slice %334 {offsets = [8, 0], sizes = [8, 128], strides = [1, 1]} : vector<16x128xf32> to vector<8x128xf32>
    %336 = vector.extract_strided_slice %334 {offsets = [0, 0], sizes = [8, 128], strides = [1, 1]} : vector<16x128xf32> to vector<8x128xf32>
    %337 = vector.shape_cast %333 : vector<1x128xi1> to vector<1x128xi1>
    %338 = vector.broadcast %337 : vector<1x128xi1> to vector<8x128xi1>
    %339 = arith.select %338, %335, %336 : vector<8x128xi1>, vector<8x128xf32>
    %340 = arith.select %333, %328, %327 : vector<1x128xi1>, vector<1x128xf32>
    %cst_182 = arith.constant 0.000000e+00 : f32
    %cst_183 = arith.constant 1.000000e+00 : f32
    %341 = vector.broadcast %cst_182 : f32 to vector<1x128xf32>
    %342 = vector.broadcast %cst_183 : f32 to vector<1x128xf32>
    %343 = arith.select %333, %341, %342 : vector<1x128xi1>, vector<1x128xf32>
    %c7_184 = arith.constant 7 : index
    %c0_185 = arith.constant 0 : index
    %c0_186 = arith.constant 0 : index
    %344 = vector.load %arg5[%c7_184, %c0_185, %c0_186] : memref<8x16x8xf32, #tpu.memory_space<vmem>>, vector<1x16x8xf32>
    %345 = vector.shape_cast %344 : vector<1x16x8xf32> to vector<16x8xf32>
    %cst_187 = arith.constant dense<0.000000e+00> : vector<16x128xf32>
    %346 = tpu.matmul %345, %339, %cst_187 {dimension_numbers = #tpu.dot_dimension_numbers<[1], [0], [0], [1], [0, 0, 1, 1], [], []>, precision = #tpu.contract_precision<fp32>} : vector<16x8xf32>, vector<8x128xf32>, vector<16x128xf32> -> vector<16x128xf32>
    %347 = vector.extract_strided_slice %346 {offsets = [8, 0], sizes = [8, 128], strides = [1, 1]} : vector<16x128xf32> to vector<8x128xf32>
    %348 = arith.mulf %347, %339 : vector<8x128xf32>
    %cst_188 = arith.constant dense<0.000000e+00> : vector<128xf32>
    %349 = vector.multi_reduction <add>, %348, %cst_188 [0] : vector<8x128xf32> to vector<128xf32>
    %350 = vector.shape_cast %349 : vector<128xf32> to vector<1x128xf32>
    %cst_189 = arith.constant dense<0.000000e+00> : vector<1x128xf32>
    %351 = tpu.matmul %350, %118, %cst_189 {dimension_numbers = #tpu.dot_dimension_numbers<[1], [0], [0], [1], [0, 0, 1, 1], [], []>, precision = #tpu.contract_precision<fp32>} : vector<1x128xf32>, vector<128x128xf32>, vector<1x128xf32> -> vector<1x128xf32>
    %c0_190 = arith.constant 0 : index
    %c7_191 = arith.constant 7 : index
    %c0_192 = arith.constant 0 : index
    %352 = vector.load %arg3[%c0_190, %c7_191, %c0_192] : memref<1x8x128xf32, #tpu.memory_space<vmem>>, vector<1x1x128xf32>
    %353 = vector.shape_cast %352 : vector<1x1x128xf32> to vector<128xf32>
    %354 = vector.shape_cast %353 : vector<128xf32> to vector<1x128xf32>
    %355 = arith.mulf %354, %340 : vector<1x128xf32>
    %356 = arith.cmpf olt, %355, %351 : vector<1x128xf32>
    %cst_193 = arith.constant 0.000000e+00 : f32
    %cst_194 = arith.constant 1.000000e+00 : f32
    %357 = vector.broadcast %cst_193 : f32 to vector<1x128xf32>
    %358 = vector.broadcast %cst_194 : f32 to vector<1x128xf32>
    %359 = arith.select %356, %357, %358 : vector<1x128xi1>, vector<1x128xf32>
    %360 = tpu.concatenate %157, %188, %219, %250, %281, %312, %343, %359 in 0 : vector<1x128xf32>, vector<1x128xf32>, vector<1x128xf32>, vector<1x128xf32>, vector<1x128xf32>, vector<1x128xf32>, vector<1x128xf32>, vector<1x128xf32> -> vector<8x128xf32>
    %361 = vector.shape_cast %360 : vector<8x128xf32> to vector<1x8x128xf32>
    %c0_195 = arith.constant 0 : index
    %c0_196 = arith.constant 0 : index
    %c0_197 = arith.constant 0 : index
    %362 = vector.load %arg4[%c0_195, %c0_196, %c0_197] : memref<1x8x128xf32, #tpu.memory_space<vmem>>, vector<1x8x128xf32>
    tpu.vector_store %arg4[%c0_195, %c0_196, %c0_197], %361 {strides = array<i32>} : memref<1x8x128xf32, #tpu.memory_space<vmem>>, vector<1x8x128xf32>,
    return
  }
  func.func @transform_0(%arg0: i32) -> (i32, i32, i32) {
    %c0_i32 = arith.constant 0 : i32
    %c0_i32_0 = arith.constant 0 : i32
    %c0_i32_1 = arith.constant 0 : i32
    %c0_i32_2 = arith.constant 0 : i32
    return %c0_i32, %c0_i32_0, %c0_i32_1 : i32, i32, i32
  }
  func.func @transform_1(%arg0: i32) -> (i32, i32) {
    %c0_i32 = arith.constant 0 : i32
    %c0_i32_0 = arith.constant 0 : i32
    %c0_i32_1 = arith.constant 0 : i32
    return %c0_i32, %c0_i32_0 : i32, i32
  }
  func.func @transform_2(%arg0: i32) -> (i32, i32, i32) {
    %c0_i32 = arith.constant 0 : i32
    %c0_i32_0 = arith.constant 0 : i32
    %c0_i32_1 = arith.constant 0 : i32
    return %arg0, %c0_i32, %c0_i32_0 : i32, i32, i32
  }
  func.func @transform_3(%arg0: i32) -> (i32, i32, i32) {
    %c0_i32 = arith.constant 0 : i32
    %c0_i32_0 = arith.constant 0 : i32
    %c0_i32_1 = arith.constant 0 : i32
    return %arg0, %c0_i32, %c0_i32_0 : i32, i32, i32
  }
}

</mosaic_0001>

<bundles_post_ra>
// kernel: tpu_custom_call.1
= control target key start
LH: loop header
LB: loop body
LE: loop exit
PB: predicated region body
PF: predicated region fallthrough
CT: control target
= control target key end

     0   :  { %8 = vsyncpa [#allocation4], 0  ;;  %s14755_s0 = inlined_call_operand.vmem [shape: f32[8,32,8], index: 0, kind: input, shape index: {}]   ;;  %s14756_s1 = inlined_call_operand.vmem [shape: f32[128,128], index: 1, kind: input, shape index: {}]   ;;  %s14757_s2 = inlined_call_operand.vmem [shape: f32[2,8,128], index: 2, kind: input, shape index: {}]   ;;  %s14758_s3 = inlined_call_operand.hbm [shape: f32[2,8,128], index: 3, kind: output, shape index: {}]  }
   0x1   :  { %10 = vsyncpa [#allocation4 + $0x1], 0  ;;  %s12277_s12 = smov 0   ;;  %s12279_s13 = smov 0  }
   0x2   :  { %s12281_s14 = smov 0   ;;  %s12283_s15 = smov 0  }
   0x3 LB: > { %s12298_s16 = sadd.s32 4294967295, %s12252_s15   ;;  %s12091_s17 = sadd.s32 4294967294, %s12252_s15   ;;  %s12252_s15 = sphi %s12283_s15, %s15444_s15   ;;  %s12248_s14 = sphi %s12281_s14, %s15443_s14   ;;  %s12244_s13 = sphi %s12279_s13, %s15442_s13   ;;  %s12240_s12 = sphi %s12277_s12, %s15441_s12  }
   0x4   : > { %s12302_s18 = sadd.s32 1, %s12252_s15   ;;  %s91_s19 = sadd.s32 1, %s12248_s14 }
   0x5   : > { %s88_s20 = ssub.s32 %s12252_s15, %s12302_s18  ;;  %p101_p0 = scmp.ne.s32.totalorder %s12248_s14, %s12244_s13 }
   0x6   : > { %p89_p1 = scmp.eq.s32.totalorder %s88_s20, 0  ;;  %p102_p2 = scmp.eq.s32.totalorder %s12298_s16, 1 }
   0x7   : > { %p107_p3 = scmp.ne.s32.totalorder %s12244_s13, %s12240_s12  ;;  %p108_p4 = scmp.eq.s32.totalorder %s12091_s17, 1 }
   0x8   : > { %s12313_s21 = scalar_select %p89_p1, %s12248_s14, %s91_s19  }
   0x9   : > { %p12315_p5 = por %p102_p2, %p101_p0  ;;  %p12319_p6 = por %p108_p4, %p107_p3 }
   0xa   : > { %p12094_p7 = scmp.ge.s32.totalorder %s12252_s15, 1  ;;  %p139_p8 = scmp.lt.s32.totalorder %s12252_s15, 3 }
   0xc   : > { %p140_p9 = pnand %p12094_p7, %p139_p8 }
   0xe   : > { %143 = sbr.rel (%p140_p9) target bundleno = 5513 (0x1589), region = 32 }
  0x13   : > { %v12099_v0 = vld [vmem:[%s14755_s0 + $0xf0] sm:$0xff]  ;;  %v12097_v1 = vld [vmem:[%s14755_s0 + $0xe0] sm:$0xff]  ;;  %vm171_vm0 = vcmask 64512   ;;  %v12100_v2 = vld [vmem:[%s14755_s0 + $0xf8] sm:$0xff]  ;;  %p162_p10 = scmp.lt.s32.totalorder %s12298_s16, 1  ;;  %vm12001_vm5 = vcmask 1040384  }
  0x14   : > { %v190_v3 = vand.u32 4294901760, %v12099_v0  ;;  %v173_v4 = vsel %vm171_vm0, %v12097_v1, 0  ;;  %v339_v5 = vand.u32 4294901760, %v12100_v2  ;;  %v12098_v6 = vld [vmem:[%s14755_s0 + $0xe8] sm:$0xff]  ;;  %v12101_v32 = vld [vmem:[%s14755_s0 + $0xc0] sm:$0xff]  ;;  %vm12003_vm8 = vcmask 1041408  }
  0x15   : > { %v192_v7 = vand.u32 4294901760, %v173_v4  ;;  %v322_v8 = vsel %vm171_vm0, %v12098_v6, 0  ;;  %v480_v35 = vsel %vm171_vm0, %v12101_v32, 0  ;;  %v12102_v42 = vld [vmem:[%s14755_s0 + $0xc8] sm:$0xff]  ;;  %s163_s30 = scalar_select %p162_p10, %s12298_s16, 1  ;;  %vm12005_vm11 = vcmask 1042432  }
  0x16   : > { %191 = vmatpush.msra.mxu0 %v190_v3  ;;  %v217_v9 = vsub.f32 %v12099_v0, %v190_v3  ;;  %340 = vmatpush.msra.mxu2 %v339_v5  ;;  %v366_v10 = vsub.f32 %v12100_v2, %v339_v5  ;;  %v341_v11 = vand.u32 4294901760, %v322_v8  ;;  %v502_v39 = vand.u32 4294901760, %v480_v35  ;;  %s159_s24 = sand.u32 1, %s12244_s13   ;;  %s12145_s26 = sshll.u32 %s12298_s16, 3 }
  0x17   : > { %v193_v12 = vsub.f32 %v173_v4, %v192_v7  ;;  %v483_v45 = vsel %vm171_vm0, %v12102_v42, 0  ;;  %v12103_v4 = vld [vmem:[%s14755_s0 + $0xd0] sm:$0xff]  ;;  %s12096_s4 = sshll.u32 %s163_s30, 3  ;;  %vm12007_vm14 = vcmask 1043456   ;;  %s12095_s25 = sshll.u32 %s159_s24, 3 }
  0x18   : > { %v218_v13 = vand.u32 4294901760, %v217_v9  ;;  %244 = vmatpush.msrb.mxu0 %v217_v9  ;;  %v367_v14 = vand.u32 4294901760, %v366_v10  ;;  %v342_v15 = vsub.f32 %v322_v8, %v341_v11  ;;  %v503_v43 = vsub.f32 %v480_v35, %v502_v39  ;;  %s12980_s7 = scalar_lea.vmem %s14757_s2, %s12096_s4  ;;  %s12027_s29 = scalar_lea.hbm %s14758_s3, %s12145_s26 }
  0x19   : > { %v194_v16 = vand.u32 4294901760, %v193_v12  ;;  %v510_v51 = vand.u32 4294901760, %v483_v45  ;;  %s161_s30 = scalar_lea.vmem [#allocation3], %s12095_s25  ;;  %s12031_s5 = sshll.u32 %s12027_s29, 4  ;;  %s12032_s5 = int_to_ptr.hbm [resolvable:$true] %s12031_s5 }
  0x1a   : > { %v219_v17 = vsub.f32 %v217_v9, %v218_v13  ;;  %v368_v18 = vsub.f32 %v366_v10, %v367_v14  ;;  %v343_v19 = vand.u32 4294901760, %v342_v15  ;;  %442 = vmatpush.msrb.mxu2 %v367_v14  ;;  %v504_v50 = vand.u32 4294901760, %v503_v43  ;;  %s12029_s4 = sshll.u32 %s161_s30, 4  ;;  %s12017_s16 = scalar_lea.sflag [#allocation4], %s159_s24  ;;  %s12030_s4 = int_to_ptr.vmem [resolvable:$true] %s12029_s4 }
  0x1b   : > { %v195_v20 = vsub.f32 %v193_v12, %v194_v16  ;;  %v511_v56 = vsub.f32 %v483_v45, %v510_v51  ;;  %s12210_s10 = scalar_lea.hbm %s14758_s3, 16 }
  0x1c   : > { %v220_v21 = vand.u32 4294901760, %v219_v17  ;;  %v369_v22 = vand.u32 4294901760, %v368_v18  ;;  %v344_v23 = vsub.f32 %v342_v15, %v343_v19  ;;  %v505_v55 = vsub.f32 %v503_v43, %v504_v50 }
  0x1d   : > { %v196_v24 = vand.u32 4294901760, %v195_v20  ;;  %v512_v60 = vand.u32 4294901760, %v511_v56 }
  0x1e   : > { %221 = vmatpush.msra.mxu1 %v220_v21  ;;  %370 = vmatpush.msra.mxu3 %v369_v22  ;;  %v345_v25 = vand.u32 4294901760, %v344_v23  ;;  %v506_v59 = vand.u32 4294901760, %v505_v55  ;;  %v12105_v55 = vld [vmem:[%s14755_s0 + $0xa0] sm:$0xff] }
  0x1f   : > { %197 = vmatmul.f32.vlgmr.msra.gmra.mxu0 %v196_v24  ;;  %223 = vmatmul.f32.vlgmr.msra.gmra.mxu1 %v192_v7  ;;  %v513_v63 = vsub.f32 %v511_v56, %v512_v60 }
  0x20   : > { %267 = vmatpush.msrb.mxu1 %v190_v3  ;;  %346 = vmatmul.f32.vlgmr.msra.gmra.mxu2 %v345_v25 }
  0x21   : > { %372 = vmatmul.f32.vlgmr.msra.gmra.mxu3 %v341_v11  ;;  %293 = vmatpush.msra.mxu0 %v218_v13  ;;  %v514_v2 = vand.u32 4294901760, %v513_v63 }
  0x22   : > { %315 = vmatpush.msra.mxu1 %v190_v3  ;;  %464 = vmatpush.msrb.mxu3 %v339_v5 }
  0x27   : > { %247 = vmatmul.f32.vlgmr.msrb.gmra.mxu0 %v193_v12  ;;  %271 = vmatmul.f32.vlgmr.msrb.gmra.mxu1 %v194_v16 }
  0x28   : > { %444 = vmatmul.f32.vlgmr.msrb.gmra.mxu2 %v341_v11  ;;  %393 = vmatpush.msrb.mxu0 %v366_v10 }
  0x29   : > { %466 = vmatmul.f32.vlgmr.msrb.gmra.mxu3 %v341_v11  ;;  %416 = vmatpush.msrb.mxu1 %v339_v5  ;;  %v680_v5 = vand.u32 4294901760, %v12103_v4  ;;  %v12104_v11 = vld [vmem:[%s14755_s0 + $0xd8] sm:$0xff] }
  0x2a   : > { %v829_v12 = vand.u32 4294901760, %v12104_v11 }
  0x2b   : > { %v707_v6 = vsub.f32 %v12103_v4, %v680_v5 }
  0x2c   : > { %v856_v13 = vsub.f32 %v12104_v11, %v829_v12 }
  0x2e   : > { %v857_v22 = vand.u32 4294901760, %v856_v13 }
  0x2f   : > { %295 = vmatmul.f32.vlgmr.msra.gmra.mxu0 %v192_v7  ;;  %317 = vmatmul.f32.vlgmr.msra.gmra.mxu1 %v192_v7  ;;  %v708_v7 = vand.u32 4294901760, %v707_v6 }
  0x31   : > { %v709_v8 = vsub.f32 %v707_v6, %v708_v7 }
  0x33   : > { %v710_v9 = vand.u32 4294901760, %v709_v8 }
  0x37   : > { %396 = vmatmul.f32.vlgmr.msrb.gmra.mxu0 %v342_v15  ;;  %420 = vmatmul.f32.vlgmr.msrb.gmra.mxu1 %v343_v19 }
  0x9c   : > { %v198_v26 = vpop.f32.mrf.mxu0  ;;  %v224_v27 = vpop.f32.mrf.mxu1 }
  0x9d   : > { %v225_v30 = vadd.f32 %v224_v27, %v198_v26  ;;  %v858_v27 = vsub.f32 %v856_v13, %v857_v22 }
  0xa3   : > { %v347_v34 = vpop.f32.mrf.mxu2 }
  0xa4   : > { %v248_v28 = vpop.f32.mrf.mxu0  ;;  %v272_v29 = vpop.f32.mrf.mxu1 }
  0xa5   : > { %v249_v31 = vadd.f32 %v248_v28, %v225_v30  ;;  %v373_v41 = vpop.f32.mrf.mxu3 }
  0xa6   : > { %v374_v44 = vadd.f32 %v373_v41, %v347_v34 }
  0xa7   : > { %v273_v33 = vadd.f32 %v272_v29, %v249_v31 }
  0xab   : > { %v445_v49 = vpop.f32.mrf.mxu2 }
  0xac   : > { %v296_v36 = vpop.f32.mrf.mxu0  ;;  %v318_v37 = vpop.f32.mrf.mxu1 }
  0xad   : > { %v297_v38 = vadd.f32 %v296_v36, %v273_v33  ;;  %v467_v53 = vpop.f32.mrf.mxu3  ;;  %v859_v33 = vand.u32 4294901760, %v858_v27 }
  0xaf   : > { %v319_v40 = vadd.f32 %v318_v37, %v297_v38 }
  0xb1   : > { %471 = vst.msk [vmem:[#allocation2 + $0x70] sm:$0xff] %vm171_vm0, %v319_v40 }
  0xb4   : > { %v397_v46 = vpop.f32.mrf.mxu0  ;;  %v421_v47 = vpop.f32.mrf.mxu1 }
  0xb5   : > { %v398_v48 = vadd.f32 %v397_v46, %v374_v44 }
  0xb7   : > { %v422_v52 = vadd.f32 %v421_v47, %v398_v48 }
  0xb9   : > { %v446_v54 = vadd.f32 %v445_v49, %v422_v52 }
  0xbb   : > { %v468_v57 = vadd.f32 %v467_v53, %v446_v54 }
  0xbd   : > { %472 = vst.msk [vmem:[#allocation2 + $0x78] sm:$0xff] %vm171_vm0, %v468_v57  ;;  %v473_v58 = vadd.f32 %v468_v57, %v319_v40 }
  0xbf   : > { %v500_v61 = vand.u32 4294901760, %v473_v58 }
  0xc1   : > { %v535_v62 = vsub.f32 %v473_v58, %v500_v61  ;;  %501 = vmatpush.msra.mxu0 %v500_v61  ;;  %594 = vmatpush.msra.mxu3 %v500_v61 }
  0xc2   : > { %507 = vmatmul.f32.vlgmr.msra.gmra.mxu0 %v506_v59  ;;  %598 = vmatmul.f32.vlgmr.msra.gmra.mxu3 %v504_v50  ;;  %v970_v59 = vsel %vm171_vm0, %v12105_v55, 0 }
  0xc3   : > { %566 = vmatpush.msra.mxu2 %v535_v62  ;;  %v536_v0 = vand.u32 4294901760, %v535_v62  ;;  %711 = vmatpush.msrb.mxu3 %v710_v9 }
  0xc4   : > { %569 = vmatmul.f32.vlgmr.msra.gmra.mxu2 %v503_v43 }
  0xc5   : > { %626 = vmatpush.msrb.mxu0 %v536_v0  ;;  %v537_v1 = vsub.f32 %v535_v62, %v536_v0  ;;  %681 = vmatpush.msrb.mxu2 %v680_v5  ;;  %v992_v62 = vand.u32 4294901760, %v970_v59 }
  0xc6   : > { %757 = vmatpush.msra.mxu3 %v680_v5 }
  0xc7   : > { %v538_v3 = vand.u32 4294901760, %v537_v1  ;;  %734 = vmatpush.msra.mxu2 %v707_v6  ;;  %783 = vmatpush.msra.mxu0 %v708_v7 }
  0xc9   : > { %539 = vmatpush.msra.mxu1 %v538_v3 }
  0xca   : > { %515 = vmatmul.f32.gmra.mxu0 %v514_v2  ;;  %541 = vmatmul.f32.vlgmr.msra.gmra.mxu1 %v502_v39  ;;  %v12106_v2 = vld [vmem:[%s14755_s0 + $0xa8] sm:$0xff] }
  0xcb   : > { %652 = vmatpush.msrb.mxu1 %v500_v61  ;;  %604 = vmatmul.f32.gmra.mxu3 %v512_v60  ;;  %v973_v7 = vsel %vm171_vm0, %v12106_v2, 0 }
  0xcc   : > { %574 = vmatmul.f32.gmra.mxu2 %v511_v56 }
  0xcd   : > { %805 = vmatpush.msra.mxu1 %v680_v5  ;;  %v993_v5 = vsub.f32 %v970_v59, %v992_v62 }
  0xcf   : > { %v994_v9 = vand.u32 4294901760, %v993_v5 }
  0xd2   : > { %545 = vmatmul.f32.gmra.mxu1 %v510_v51  ;;  %628 = vmatmul.f32.vlgmr.msrb.gmra.mxu0 %v502_v39 }
  0xd3   : > { %883 = vmatpush.msrb.mxu0 %v856_v13 }
  0xda   : > { %632 = vmatmul.f32.gmra.mxu0 %v510_v51  ;;  %654 = vmatmul.f32.vlgmr.msrb.gmra.mxu1 %v502_v39 }
  0xdb   : > { %906 = vmatpush.msrb.mxu1 %v829_v12 }
  0xe2   : > { %658 = vmatmul.f32.gmra.mxu1 %v510_v51 }
 0x13f   : > { %v508_v10 = vpop.f32.mrf.mxu0 }
 0x145   : > { %v599_v18 = vpop.f32.mrf.mxu3 }
 0x147   : > { %v516_v14 = vpop.f32.mrf.mxu0  ;;  %v542_v15 = vpop.f32.mrf.mxu1 }
 0x148   : > { %v570_v16 = vpop.f32.mrf.mxu2  ;;  %v543_v17 = vadd.f32 %v542_v15, %v508_v10  ;;  %v1000_v10 = vand.u32 4294901760, %v973_v7  ;;  %v995_v15 = vsub.f32 %v993_v5, %v994_v9 }
 0x14a   : > { %v571_v20 = vadd.f32 %v570_v16, %v543_v17  ;;  %v1001_v16 = vsub.f32 %v973_v7, %v1000_v10 }
 0x14c   : > { %v600_v23 = vadd.f32 %v599_v18, %v571_v20  ;;  %v1002_v20 = vand.u32 4294901760, %v1001_v16 }
 0x14e   : > { %v605_v31 = vpop.f32.mrf.mxu3 }
 0x14f   : > { %v546_v19 = vpop.f32.mrf.mxu1  ;;  %v629_v21 = vpop.f32.mrf.mxu0 }
 0x150   : > { %v547_v24 = vadd.f32 %v546_v19, %v516_v14  ;;  %v575_v25 = vpop.f32.mrf.mxu2  ;;  %v630_v26 = vadd.f32 %v629_v21, %v600_v23  ;;  %v996_v19 = vand.u32 4294901760, %v995_v15  ;;  %v1003_v23 = vsub.f32 %v1001_v16, %v1002_v20  ;;  %v12109_v15 = vld [vmem:[%s14755_s0 + $0x80] sm:$0xff] }
 0x152   : > { %v576_v29 = vadd.f32 %v575_v25, %v547_v24 }
 0x154   : > { %v606_v36 = vadd.f32 %v605_v31, %v576_v29 }
 0x157   : > { %v655_v28 = vpop.f32.mrf.mxu1  ;;  %v633_v34 = vpop.f32.mrf.mxu0 }
 0x158   : > { %v656_v30 = vadd.f32 %v655_v28, %v630_v26  ;;  %v634_v38 = vadd.f32 %v633_v34, %v606_v36  ;;  %v1004_v26 = vand.u32 4294901760, %v1003_v23  ;;  %v12107_v28 = vld [vmem:[%s14755_s0 + $0xb0] sm:$0xff] }
 0x159   : > { %v1170_v29 = vand.u32 4294901760, %v12107_v28 }
 0x15a   : > { %v663_v32 = vsel %vm171_vm0, %v656_v30, 0 }
 0x15b   : > { %v682_v35 = vand.u32 4294901760, %v663_v32  ;;  %v1197_v30 = vsub.f32 %v12107_v28, %v1170_v29 }
 0x15d   : > { %v683_v37 = vsub.f32 %v663_v32, %v682_v35  ;;  %713 = vmatmul.f32.vlgmr.msrb.gmra.mxu3 %v682_v35  ;;  %785 = vmatmul.f32.vlgmr.msra.gmra.mxu0 %v682_v35  ;;  %v1198_v31 = vand.u32 4294901760, %v1197_v30 }
 0x15e   : > { %807 = vmatmul.f32.vlgmr.msra.gmra.mxu1 %v682_v35  ;;  %860 = vmatpush.msrb.mxu3 %v859_v33  ;;  %v12108_v35 = vld [vmem:[%s14755_s0 + $0xb8] sm:$0xff] }
 0x15f   : > { %v684_v39 = vand.u32 4294901760, %v683_v37  ;;  %v659_v40 = vpop.f32.mrf.mxu1  ;;  %v1199_v32 = vsub.f32 %v1197_v30, %v1198_v31  ;;  %v1319_v36 = vand.u32 4294901760, %v12108_v35 }
 0x160   : > { %v660_v41 = vadd.f32 %v659_v40, %v634_v38 }
 0x161   : > { %v685_v42 = vsub.f32 %v683_v37, %v684_v39  ;;  %v1200_v33 = vand.u32 4294901760, %v1199_v32 }
 0x162   : > { %v812_v43 = vsel %vm171_vm0, %v660_v41, 0 }
 0x163   : > { %v831_v44 = vand.u32 4294901760, %v812_v43  ;;  %v686_v45 = vand.u32 4294901760, %v685_v42 }
 0x165   : > { %v832_v46 = vsub.f32 %v812_v43, %v831_v44  ;;  %687 = vmatmul.f32.vlgmr.msrb.gmra.mxu2 %v686_v45  ;;  %761 = vmatmul.f32.vlgmr.msra.gmra.mxu3 %v684_v39 }
 0x166   : > { %830 = vmatpush.msrb.mxu2 %v829_v12  ;;  %954 = vmatpush.msra.mxu3 %v829_v12 }
 0x167   : > { %886 = vmatmul.f32.vlgmr.msrb.gmra.mxu0 %v832_v46  ;;  %v833_v47 = vand.u32 4294901760, %v832_v46 }
 0x169   : > { %910 = vmatmul.f32.vlgmr.msrb.gmra.mxu1 %v833_v47  ;;  %v834_v48 = vsub.f32 %v832_v46, %v833_v47 }
 0x16b   : > { %v835_v49 = vand.u32 4294901760, %v834_v48 }
 0x16d   : > { %737 = vmatmul.f32.vlgmr.msra.gmra.mxu2 %v683_v37  ;;  %862 = vmatmul.f32.vlgmr.msrb.gmra.mxu3 %v831_v44  ;;  %v1346_v37 = vsub.f32 %v12108_v35, %v1319_v36 }
 0x16e   : > { %932 = vmatpush.msra.mxu2 %v857_v22 }
 0x16f   : > { %v1347_v46 = vand.u32 4294901760, %v1346_v37 }
 0x175   : > { %836 = vmatmul.f32.vlgmr.msrb.gmra.mxu2 %v835_v49  ;;  %956 = vmatmul.f32.vlgmr.msra.gmra.mxu3 %v831_v44 }
 0x17d   : > { %934 = vmatmul.f32.vlgmr.msra.gmra.mxu2 %v831_v44 }
 0x1da   : > { %v786_v57 = vpop.f32.mrf.mxu0 }
 0x1db   : > { %v808_v61 = vpop.f32.mrf.mxu1 }
 0x1e0   : > { %v714_v50 = vpop.f32.mrf.mxu3 }
 0x1e4   : > { %v887_v4 = vpop.f32.mrf.mxu0 }
 0x1e6   : > { %v911_v8 = vpop.f32.mrf.mxu1 }
 0x1e8   : > { %v688_v51 = vpop.f32.mrf.mxu2  ;;  %v762_v52 = vpop.f32.mrf.mxu3 }
 0x1e9   : > { %v715_v53 = vadd.f32 %v714_v50, %v688_v51  ;;  %v1348_v51 = vsub.f32 %v1346_v37, %v1347_v46 }
 0x1f0   : > { %v738_v54 = vpop.f32.mrf.mxu2  ;;  %v863_v0 = vpop.f32.mrf.mxu3 }
 0x1f1   : > { %v739_v56 = vadd.f32 %v738_v54, %v715_v53 }
 0x1f3   : > { %v763_v58 = vadd.f32 %v762_v52, %v739_v56 }
 0x1f5   : > { %v787_v60 = vadd.f32 %v786_v57, %v763_v58  ;;  %v1349_v57 = vand.u32 4294901760, %v1348_v51 }
 0x1f7   : > { %v809_v63 = vadd.f32 %v808_v61, %v787_v60 }
 0x1f8   : > { %v837_v1 = vpop.f32.mrf.mxu2  ;;  %v957_v14 = vpop.f32.mrf.mxu3 }
 0x1f9   : > { %v864_v3 = vadd.f32 %v863_v0, %v837_v1  ;;  %961 = vst.msk [vmem:[#allocation2 + $0x60] sm:$0xff] %vm171_vm0, %v809_v63 }
 0x1fb   : > { %v888_v6 = vadd.f32 %v887_v4, %v864_v3 }
 0x1fd   : > { %v912_v11 = vadd.f32 %v911_v8, %v888_v6 }
 0x200   : > { %v935_v12 = vpop.f32.mrf.mxu2 }
 0x201   : > { %v936_v13 = vadd.f32 %v935_v12, %v912_v11 }
 0x203   : > { %v958_v17 = vadd.f32 %v957_v14, %v936_v13 }
 0x205   : > { %962 = vst.msk [vmem:[#allocation2 + $0x68] sm:$0xff] %vm171_vm0, %v958_v17  ;;  %v963_v18 = vadd.f32 %v958_v17, %v809_v63 }
 0x207   : > { %v990_v21 = vand.u32 4294901760, %v963_v18 }
 0x209   : > { %991 = vmatpush.msra.mxu0 %v990_v21  ;;  %1084 = vmatpush.msrb.mxu3 %v990_v21  ;;  %v1025_v22 = vsub.f32 %v963_v18, %v990_v21 }
 0x20a   : > { %997 = vmatmul.f32.vlgmr.msra.gmra.mxu0 %v996_v19  ;;  %1088 = vmatmul.f32.vlgmr.msrb.gmra.mxu3 %v994_v9  ;;  %v1460_v19 = vsel %vm171_vm0, %v12109_v15, 0 }
 0x20b   : > { %1056 = vmatpush.msrb.mxu2 %v1025_v22  ;;  %v1026_v24 = vand.u32 4294901760, %v1025_v22  ;;  %1201 = vmatpush.msra.mxu3 %v1200_v33 }
 0x20c   : > { %1059 = vmatmul.f32.vlgmr.msrb.gmra.mxu2 %v993_v5 }
 0x20d   : > { %1116 = vmatpush.msrb.mxu0 %v1026_v24  ;;  %v1027_v25 = vsub.f32 %v1025_v22, %v1026_v24  ;;  %1171 = vmatpush.msra.mxu2 %v1170_v29  ;;  %v1482_v22 = vand.u32 4294901760, %v1460_v19 }
 0x20e   : > { %1247 = vmatpush.msrb.mxu3 %v1170_v29 }
 0x20f   : > { %v1028_v27 = vand.u32 4294901760, %v1027_v25  ;;  %1224 = vmatpush.msrb.mxu2 %v1197_v30  ;;  %1273 = vmatpush.msra.mxu0 %v1198_v31 }
 0x211   : > { %1029 = vmatpush.msra.mxu1 %v1028_v27 }
 0x212   : > { %1005 = vmatmul.f32.gmra.mxu0 %v1004_v26  ;;  %1031 = vmatmul.f32.vlgmr.msra.gmra.mxu1 %v992_v62  ;;  %v12110_v26 = vld [vmem:[%s14755_s0 + $0x88] sm:$0xff] }
 0x213   : > { %1142 = vmatpush.msrb.mxu1 %v990_v21  ;;  %1094 = vmatmul.f32.gmra.mxu3 %v1002_v20  ;;  %v1463_v31 = vsel %vm171_vm0, %v12110_v26, 0 }
 0x214   : > { %1064 = vmatmul.f32.gmra.mxu2 %v1001_v16 }
 0x215   : > { %1295 = vmatpush.msra.mxu1 %v1170_v29  ;;  %v1483_v29 = vsub.f32 %v1460_v19, %v1482_v22 }
 0x217   : > { %v1484_v33 = vand.u32 4294901760, %v1483_v29 }
 0x21a   : > { %1035 = vmatmul.f32.gmra.mxu1 %v1000_v10  ;;  %1118 = vmatmul.f32.vlgmr.msrb.gmra.mxu0 %v992_v62 }
 0x21b   : > { %1373 = vmatpush.msrb.mxu0 %v1346_v37 }
 0x222   : > { %1122 = vmatmul.f32.gmra.mxu0 %v1000_v10  ;;  %1144 = vmatmul.f32.vlgmr.msrb.gmra.mxu1 %v992_v62 }
 0x223   : > { %1396 = vmatpush.msrb.mxu1 %v1319_v36 }
 0x22a   : > { %1148 = vmatmul.f32.gmra.mxu1 %v1000_v10 }
 0x287   : > { %v998_v34 = vpop.f32.mrf.mxu0 }
 0x28d   : > { %v1089_v42 = vpop.f32.mrf.mxu3 }
 0x28f   : > { %v1006_v38 = vpop.f32.mrf.mxu0  ;;  %v1032_v39 = vpop.f32.mrf.mxu1 }
 0x290   : > { %v1060_v40 = vpop.f32.mrf.mxu2  ;;  %v1033_v41 = vadd.f32 %v1032_v39, %v998_v34  ;;  %v1490_v34 = vand.u32 4294901760, %v1463_v31  ;;  %v1485_v39 = vsub.f32 %v1483_v29, %v1484_v33 }
 0x292   : > { %v1061_v44 = vadd.f32 %v1060_v40, %v1033_v41  ;;  %v1491_v40 = vsub.f32 %v1463_v31, %v1490_v34 }
 0x294   : > { %v1090_v47 = vadd.f32 %v1089_v42, %v1061_v44  ;;  %v1492_v44 = vand.u32 4294901760, %v1491_v40 }
 0x296   : > { %v1095_v55 = vpop.f32.mrf.mxu3 }
 0x297   : > { %v1036_v43 = vpop.f32.mrf.mxu1  ;;  %v1119_v45 = vpop.f32.mrf.mxu0 }
 0x298   : > { %v1037_v48 = vadd.f32 %v1036_v43, %v1006_v38  ;;  %v1065_v49 = vpop.f32.mrf.mxu2  ;;  %v1120_v50 = vadd.f32 %v1119_v45, %v1090_v47  ;;  %v1486_v43 = vand.u32 4294901760, %v1485_v39  ;;  %v1493_v47 = vsub.f32 %v1491_v40, %v1492_v44  ;;  %v12113_v39 = vld [vmem:[%s14755_s0 + $0x60] sm:$0xff] }
 0x29a   : > { %v1066_v53 = vadd.f32 %v1065_v49, %v1037_v48 }
 0x29c   : > { %v1096_v60 = vadd.f32 %v1095_v55, %v1066_v53 }
 0x29f   : > { %v1145_v52 = vpop.f32.mrf.mxu1  ;;  %v1123_v58 = vpop.f32.mrf.mxu0 }
 0x2a0   : > { %v1146_v54 = vadd.f32 %v1145_v52, %v1120_v50  ;;  %v1124_v62 = vadd.f32 %v1123_v58, %v1096_v60  ;;  %v1494_v50 = vand.u32 4294901760, %v1493_v47  ;;  %v12111_v52 = vld [vmem:[%s14755_s0 + $0x90] sm:$0xff] }
 0x2a1   : > { %v1660_v53 = vand.u32 4294901760, %v12111_v52 }
 0x2a2   : > { %v1153_v56 = vsel %vm171_vm0, %v1146_v54, 0 }
 0x2a3   : > { %v1172_v59 = vand.u32 4294901760, %v1153_v56  ;;  %v1687_v54 = vsub.f32 %v12111_v52, %v1660_v53 }
 0x2a5   : > { %v1173_v61 = vsub.f32 %v1153_v56, %v1172_v59  ;;  %1203 = vmatmul.f32.vlgmr.msra.gmra.mxu3 %v1172_v59  ;;  %1275 = vmatmul.f32.vlgmr.msra.gmra.mxu0 %v1172_v59  ;;  %v1688_v55 = vand.u32 4294901760, %v1687_v54 }
 0x2a6   : > { %1297 = vmatmul.f32.vlgmr.msra.gmra.mxu1 %v1172_v59  ;;  %1350 = vmatpush.msra.mxu3 %v1349_v57  ;;  %v12112_v59 = vld [vmem:[%s14755_s0 + $0x98] sm:$0xff] }
 0x2a7   : > { %v1174_v63 = vand.u32 4294901760, %v1173_v61  ;;  %v1149_v0 = vpop.f32.mrf.mxu1  ;;  %v1689_v56 = vsub.f32 %v1687_v54, %v1688_v55  ;;  %v1809_v60 = vand.u32 4294901760, %v12112_v59 }
 0x2a8   : > { %v1150_v1 = vadd.f32 %v1149_v0, %v1124_v62 }
 0x2a9   : > { %v1175_v2 = vsub.f32 %v1173_v61, %v1174_v63  ;;  %v1690_v57 = vand.u32 4294901760, %v1689_v56 }
 0x2aa   : > { %v1302_v3 = vsel %vm171_vm0, %v1150_v1, 0 }
 0x2ab   : > { %v1321_v4 = vand.u32 4294901760, %v1302_v3  ;;  %v1176_v5 = vand.u32 4294901760, %v1175_v2 }
 0x2ad   : > { %v1322_v6 = vsub.f32 %v1302_v3, %v1321_v4  ;;  %1177 = vmatmul.f32.vlgmr.msra.gmra.mxu2 %v1176_v5  ;;  %1251 = vmatmul.f32.vlgmr.msrb.gmra.mxu3 %v1174_v63 }
 0x2ae   : > { %1320 = vmatpush.msra.mxu2 %v1319_v36  ;;  %1444 = vmatpush.msrb.mxu3 %v1319_v36 }
 0x2af   : > { %1376 = vmatmul.f32.vlgmr.msrb.gmra.mxu0 %v1322_v6  ;;  %v1323_v7 = vand.u32 4294901760, %v1322_v6 }
 0x2b1   : > { %1400 = vmatmul.f32.vlgmr.msrb.gmra.mxu1 %v1323_v7  ;;  %v1324_v8 = vsub.f32 %v1322_v6, %v1323_v7 }
 0x2b3   : > { %v1325_v9 = vand.u32 4294901760, %v1324_v8 }
 0x2b5   : > { %1227 = vmatmul.f32.vlgmr.msrb.gmra.mxu2 %v1173_v61  ;;  %1352 = vmatmul.f32.vlgmr.msra.gmra.mxu3 %v1321_v4  ;;  %v1836_v61 = vsub.f32 %v12112_v59, %v1809_v60 }
 0x2b6   : > { %1422 = vmatpush.msrb.mxu2 %v1347_v46 }
 0x2b7   : > { %v1837_v6 = vand.u32 4294901760, %v1836_v61 }
 0x2bd   : > { %1326 = vmatmul.f32.vlgmr.msra.gmra.mxu2 %v1325_v9  ;;  %1446 = vmatmul.f32.vlgmr.msrb.gmra.mxu3 %v1321_v4 }
 0x2c5   : > { %1424 = vmatmul.f32.vlgmr.msrb.gmra.mxu2 %v1321_v4 }
 0x322   : > { %v1276_v17 = vpop.f32.mrf.mxu0 }
 0x323   : > { %v1298_v21 = vpop.f32.mrf.mxu1 }
 0x328   : > { %v1204_v10 = vpop.f32.mrf.mxu3 }
 0x32c   : > { %v1377_v28 = vpop.f32.mrf.mxu0 }
 0x32e   : > { %v1401_v32 = vpop.f32.mrf.mxu1 }
 0x330   : > { %v1178_v11 = vpop.f32.mrf.mxu2  ;;  %v1252_v12 = vpop.f32.mrf.mxu3 }
 0x331   : > { %v1205_v13 = vadd.f32 %v1204_v10, %v1178_v11  ;;  %v1838_v11 = vsub.f32 %v1836_v61, %v1837_v6 }
 0x338   : > { %v1228_v14 = vpop.f32.mrf.mxu2  ;;  %v1353_v24 = vpop.f32.mrf.mxu3 }
 0x339   : > { %v1229_v16 = vadd.f32 %v1228_v14, %v1205_v13 }
 0x33b   : > { %v1253_v18 = vadd.f32 %v1252_v12, %v1229_v16 }
 0x33d   : > { %v1277_v20 = vadd.f32 %v1276_v17, %v1253_v18  ;;  %v1839_v17 = vand.u32 4294901760, %v1838_v11 }
 0x33f   : > { %v1299_v23 = vadd.f32 %v1298_v21, %v1277_v20 }
 0x340   : > { %v1327_v25 = vpop.f32.mrf.mxu2  ;;  %v1447_v38 = vpop.f32.mrf.mxu3 }
 0x341   : > { %v1354_v27 = vadd.f32 %v1353_v24, %v1327_v25  ;;  %1451 = vst.msk [vmem:[#allocation2 + $0x50] sm:$0xff] %vm171_vm0, %v1299_v23 }
 0x343   : > { %v1378_v30 = vadd.f32 %v1377_v28, %v1354_v27 }
 0x345   : > { %v1402_v35 = vadd.f32 %v1401_v32, %v1378_v30 }
 0x348   : > { %v1425_v36 = vpop.f32.mrf.mxu2 }
 0x349   : > { %v1426_v37 = vadd.f32 %v1425_v36, %v1402_v35 }
 0x34b   : > { %v1448_v41 = vadd.f32 %v1447_v38, %v1426_v37 }
 0x34d   : > { %1452 = vst.msk [vmem:[#allocation2 + $0x58] sm:$0xff] %vm171_vm0, %v1448_v41  ;;  %v1453_v42 = vadd.f32 %v1448_v41, %v1299_v23 }
 0x34f   : > { %v1480_v45 = vand.u32 4294901760, %v1453_v42 }
 0x351   : > { %1481 = vmatpush.msra.mxu0 %v1480_v45  ;;  %1574 = vmatpush.msra.mxu3 %v1480_v45  ;;  %v1515_v46 = vsub.f32 %v1453_v42, %v1480_v45 }
 0x352   : > { %1487 = vmatmul.f32.vlgmr.msra.gmra.mxu0 %v1486_v43  ;;  %1578 = vmatmul.f32.vlgmr.msra.gmra.mxu3 %v1484_v33  ;;  %v1950_v43 = vsel %vm171_vm0, %v12113_v39, 0 }
 0x353   : > { %1546 = vmatpush.msra.mxu2 %v1515_v46  ;;  %v1516_v48 = vand.u32 4294901760, %v1515_v46  ;;  %1691 = vmatpush.msrb.mxu3 %v1690_v57 }
 0x354   : > { %1549 = vmatmul.f32.vlgmr.msra.gmra.mxu2 %v1483_v29 }
 0x355   : > { %1606 = vmatpush.msrb.mxu0 %v1516_v48  ;;  %v1517_v49 = vsub.f32 %v1515_v46, %v1516_v48  ;;  %1661 = vmatpush.msrb.mxu2 %v1660_v53  ;;  %v1972_v46 = vand.u32 4294901760, %v1950_v43 }
 0x356   : > { %1737 = vmatpush.msra.mxu3 %v1660_v53 }
 0x357   : > { %v1518_v51 = vand.u32 4294901760, %v1517_v49  ;;  %1714 = vmatpush.msra.mxu2 %v1687_v54  ;;  %1763 = vmatpush.msra.mxu0 %v1688_v55 }
 0x359   : > { %1519 = vmatpush.msra.mxu1 %v1518_v51 }
 0x35a   : > { %1495 = vmatmul.f32.gmra.mxu0 %v1494_v50  ;;  %1521 = vmatmul.f32.vlgmr.msra.gmra.mxu1 %v1482_v22  ;;  %v12114_v50 = vld [vmem:[%s14755_s0 + $0x68] sm:$0xff] }
 0x35b   : > { %1632 = vmatpush.msrb.mxu1 %v1480_v45  ;;  %1584 = vmatmul.f32.gmra.mxu3 %v1492_v44  ;;  %v1953_v55 = vsel %vm171_vm0, %v12114_v50, 0 }
 0x35c   : > { %1554 = vmatmul.f32.gmra.mxu2 %v1491_v40 }
 0x35d   : > { %1785 = vmatpush.msra.mxu1 %v1660_v53  ;;  %v1973_v53 = vsub.f32 %v1950_v43, %v1972_v46 }
 0x35f   : > { %v1974_v57 = vand.u32 4294901760, %v1973_v53 }
 0x362   : > { %1525 = vmatmul.f32.gmra.mxu1 %v1490_v34  ;;  %1608 = vmatmul.f32.vlgmr.msrb.gmra.mxu0 %v1482_v22 }
 0x363   : > { %1863 = vmatpush.msrb.mxu0 %v1836_v61 }
 0x36a   : > { %1612 = vmatmul.f32.gmra.mxu0 %v1490_v34  ;;  %1634 = vmatmul.f32.vlgmr.msrb.gmra.mxu1 %v1482_v22 }
 0x36b   : > { %1886 = vmatpush.msrb.mxu1 %v1809_v60 }
 0x372   : > { %1638 = vmatmul.f32.gmra.mxu1 %v1490_v34 }
 0x3cf   : > { %v1488_v58 = vpop.f32.mrf.mxu0 }
 0x3d5   : > { %v1579_v2 = vpop.f32.mrf.mxu3 }
 0x3d7   : > { %v1496_v62 = vpop.f32.mrf.mxu0  ;;  %v1522_v63 = vpop.f32.mrf.mxu1 }
 0x3d8   : > { %v1550_v0 = vpop.f32.mrf.mxu2  ;;  %v1523_v1 = vadd.f32 %v1522_v63, %v1488_v58  ;;  %v1980_v58 = vand.u32 4294901760, %v1953_v55  ;;  %v1975_v63 = vsub.f32 %v1973_v53, %v1974_v57 }
 0x3da   : > { %v1551_v4 = vadd.f32 %v1550_v0, %v1523_v1  ;;  %v1981_v0 = vsub.f32 %v1953_v55, %v1980_v58 }
 0x3dc   : > { %v1580_v7 = vadd.f32 %v1579_v2, %v1551_v4  ;;  %v1982_v4 = vand.u32 4294901760, %v1981_v0 }
 0x3de   : > { %v1585_v15 = vpop.f32.mrf.mxu3 }
 0x3df   : > { %v1526_v3 = vpop.f32.mrf.mxu1  ;;  %v1609_v5 = vpop.f32.mrf.mxu0 }
 0x3e0   : > { %v1527_v8 = vadd.f32 %v1526_v3, %v1496_v62  ;;  %v1555_v9 = vpop.f32.mrf.mxu2  ;;  %v1610_v10 = vadd.f32 %v1609_v5, %v1580_v7  ;;  %v1976_v3 = vand.u32 4294901760, %v1975_v63  ;;  %v1983_v7 = vsub.f32 %v1981_v0, %v1982_v4  ;;  %v12117_v63 = vld [vmem:[%s14755_s0 + $0x40] sm:$0xff] }
 0x3e2   : > { %v1556_v13 = vadd.f32 %v1555_v9, %v1527_v8 }
 0x3e4   : > { %v1586_v20 = vadd.f32 %v1585_v15, %v1556_v13 }
 0x3e7   : > { %v1635_v12 = vpop.f32.mrf.mxu1  ;;  %v1613_v18 = vpop.f32.mrf.mxu0 }
 0x3e8   : > { %v1636_v14 = vadd.f32 %v1635_v12, %v1610_v10  ;;  %v1614_v22 = vadd.f32 %v1613_v18, %v1586_v20  ;;  %v1984_v10 = vand.u32 4294901760, %v1983_v7  ;;  %v12115_v12 = vld [vmem:[%s14755_s0 + $0x70] sm:$0xff] }
 0x3e9   : > { %v2150_v13 = vand.u32 4294901760, %v12115_v12 }
 0x3ea   : > { %v1643_v16 = vsel %vm171_vm0, %v1636_v14, 0 }
 0x3eb   : > { %v1662_v19 = vand.u32 4294901760, %v1643_v16  ;;  %v2177_v14 = vsub.f32 %v12115_v12, %v2150_v13 }
 0x3ed   : > { %v1663_v21 = vsub.f32 %v1643_v16, %v1662_v19  ;;  %1693 = vmatmul.f32.vlgmr.msrb.gmra.mxu3 %v1662_v19  ;;  %1765 = vmatmul.f32.vlgmr.msra.gmra.mxu0 %v1662_v19  ;;  %v2178_v15 = vand.u32 4294901760, %v2177_v14 }
 0x3ee   : > { %1787 = vmatmul.f32.vlgmr.msra.gmra.mxu1 %v1662_v19  ;;  %1840 = vmatpush.msrb.mxu3 %v1839_v17  ;;  %v12116_v19 = vld [vmem:[%s14755_s0 + $0x78] sm:$0xff] }
 0x3ef   : > { %v1664_v23 = vand.u32 4294901760, %v1663_v21  ;;  %v1639_v24 = vpop.f32.mrf.mxu1  ;;  %v2179_v16 = vsub.f32 %v2177_v14, %v2178_v15  ;;  %v2299_v20 = vand.u32 4294901760, %v12116_v19 }
 0x3f0   : > { %v1640_v25 = vadd.f32 %v1639_v24, %v1614_v22 }
 0x3f1   : > { %v1665_v26 = vsub.f32 %v1663_v21, %v1664_v23  ;;  %v2180_v17 = vand.u32 4294901760, %v2179_v16 }
 0x3f2   : > { %v1792_v27 = vsel %vm171_vm0, %v1640_v25, 0 }
 0x3f3   : > { %v1811_v28 = vand.u32 4294901760, %v1792_v27  ;;  %v1666_v29 = vand.u32 4294901760, %v1665_v26 }
 0x3f5   : > { %v1812_v30 = vsub.f32 %v1792_v27, %v1811_v28  ;;  %1667 = vmatmul.f32.vlgmr.msrb.gmra.mxu2 %v1666_v29  ;;  %1741 = vmatmul.f32.vlgmr.msra.gmra.mxu3 %v1664_v23 }
 0x3f6   : > { %1810 = vmatpush.msrb.mxu2 %v1809_v60  ;;  %1934 = vmatpush.msra.mxu3 %v1809_v60 }
 0x3f7   : > { %1866 = vmatmul.f32.vlgmr.msrb.gmra.mxu0 %v1812_v30  ;;  %v1813_v31 = vand.u32 4294901760, %v1812_v30 }
 0x3f9   : > { %1890 = vmatmul.f32.vlgmr.msrb.gmra.mxu1 %v1813_v31  ;;  %v1814_v32 = vsub.f32 %v1812_v30, %v1813_v31 }
 0x3fb   : > { %v1815_v33 = vand.u32 4294901760, %v1814_v32 }
 0x3fd   : > { %1717 = vmatmul.f32.vlgmr.msra.gmra.mxu2 %v1663_v21  ;;  %1842 = vmatmul.f32.vlgmr.msrb.gmra.mxu3 %v1811_v28  ;;  %v2326_v21 = vsub.f32 %v12116_v19, %v2299_v20 }
 0x3fe   : > { %1912 = vmatpush.msra.mxu2 %v1837_v6 }
 0x3ff   : > { %v2327_v30 = vand.u32 4294901760, %v2326_v21 }
 0x405   : > { %1816 = vmatmul.f32.vlgmr.msrb.gmra.mxu2 %v1815_v33  ;;  %1936 = vmatmul.f32.vlgmr.msra.gmra.mxu3 %v1811_v28 }
 0x40d   : > { %1914 = vmatmul.f32.vlgmr.msra.gmra.mxu2 %v1811_v28 }
 0x46a   : > { %v1766_v41 = vpop.f32.mrf.mxu0 }
 0x46b   : > { %v1788_v45 = vpop.f32.mrf.mxu1 }
 0x470   : > { %v1694_v34 = vpop.f32.mrf.mxu3 }
 0x474   : > { %v1867_v52 = vpop.f32.mrf.mxu0 }
 0x476   : > { %v1891_v56 = vpop.f32.mrf.mxu1 }
 0x478   : > { %v1668_v35 = vpop.f32.mrf.mxu2  ;;  %v1742_v36 = vpop.f32.mrf.mxu3 }
 0x479   : > { %v1695_v37 = vadd.f32 %v1694_v34, %v1668_v35  ;;  %v2328_v35 = vsub.f32 %v2326_v21, %v2327_v30 }
 0x480   : > { %v1718_v38 = vpop.f32.mrf.mxu2  ;;  %v1843_v48 = vpop.f32.mrf.mxu3 }
 0x481   : > { %v1719_v40 = vadd.f32 %v1718_v38, %v1695_v37 }
 0x483   : > { %v1743_v42 = vadd.f32 %v1742_v36, %v1719_v40 }
 0x485   : > { %v1767_v44 = vadd.f32 %v1766_v41, %v1743_v42  ;;  %v2329_v41 = vand.u32 4294901760, %v2328_v35 }
 0x487   : > { %v1789_v47 = vadd.f32 %v1788_v45, %v1767_v44 }
 0x488   : > { %v1817_v49 = vpop.f32.mrf.mxu2  ;;  %v1937_v62 = vpop.f32.mrf.mxu3 }
 0x489   : > { %v1844_v51 = vadd.f32 %v1843_v48, %v1817_v49  ;;  %1941 = vst.msk [vmem:[#allocation2 + $0x40] sm:$0xff] %vm171_vm0, %v1789_v47 }
 0x48b   : > { %v1868_v54 = vadd.f32 %v1867_v52, %v1844_v51 }
 0x48d   : > { %v1892_v59 = vadd.f32 %v1891_v56, %v1868_v54 }
 0x490   : > { %v1915_v60 = vpop.f32.mrf.mxu2 }
 0x491   : > { %v1916_v61 = vadd.f32 %v1915_v60, %v1892_v59 }
 0x493   : > { %v1938_v1 = vadd.f32 %v1937_v62, %v1916_v61 }
 0x495   : > { %1942 = vst.msk [vmem:[#allocation2 + $0x48] sm:$0xff] %vm171_vm0, %v1938_v1  ;;  %v1943_v2 = vadd.f32 %v1938_v1, %v1789_v47 }
 0x497   : > { %v1970_v5 = vand.u32 4294901760, %v1943_v2 }
 0x499   : > { %1971 = vmatpush.msra.mxu0 %v1970_v5  ;;  %2064 = vmatpush.msrb.mxu3 %v1970_v5  ;;  %v2005_v6 = vsub.f32 %v1943_v2, %v1970_v5 }
 0x49a   : > { %1977 = vmatmul.f32.vlgmr.msra.gmra.mxu0 %v1976_v3  ;;  %2068 = vmatmul.f32.vlgmr.msrb.gmra.mxu3 %v1974_v57  ;;  %v2440_v3 = vsel %vm171_vm0, %v12117_v63, 0 }
 0x49b   : > { %2036 = vmatpush.msrb.mxu2 %v2005_v6  ;;  %v2006_v8 = vand.u32 4294901760, %v2005_v6  ;;  %2181 = vmatpush.msra.mxu3 %v2180_v17 }
 0x49c   : > { %2039 = vmatmul.f32.vlgmr.msrb.gmra.mxu2 %v1973_v53 }
 0x49d   : > { %2096 = vmatpush.msrb.mxu0 %v2006_v8  ;;  %v2007_v9 = vsub.f32 %v2005_v6, %v2006_v8  ;;  %2151 = vmatpush.msra.mxu2 %v2150_v13  ;;  %v2462_v6 = vand.u32 4294901760, %v2440_v3 }
 0x49e   : > { %2227 = vmatpush.msrb.mxu3 %v2150_v13 }
 0x49f   : > { %v2008_v11 = vand.u32 4294901760, %v2007_v9  ;;  %2204 = vmatpush.msrb.mxu2 %v2177_v14  ;;  %2253 = vmatpush.msra.mxu0 %v2178_v15 }
 0x4a1   : > { %2009 = vmatpush.msra.mxu1 %v2008_v11 }
 0x4a2   : > { %1985 = vmatmul.f32.gmra.mxu0 %v1984_v10  ;;  %2011 = vmatmul.f32.vlgmr.msra.gmra.mxu1 %v1972_v46  ;;  %v12118_v10 = vld [vmem:[%s14755_s0 + $0x48] sm:$0xff] }
 0x4a3   : > { %2122 = vmatpush.msrb.mxu1 %v1970_v5  ;;  %2074 = vmatmul.f32.gmra.mxu3 %v1982_v4  ;;  %v2443_v15 = vsel %vm171_vm0, %v12118_v10, 0 }
 0x4a4   : > { %2044 = vmatmul.f32.gmra.mxu2 %v1981_v0 }
 0x4a5   : > { %2275 = vmatpush.msra.mxu1 %v2150_v13  ;;  %v2463_v13 = vsub.f32 %v2440_v3, %v2462_v6 }
 0x4a7   : > { %v2464_v17 = vand.u32 4294901760, %v2463_v13 }
 0x4aa   : > { %2015 = vmatmul.f32.gmra.mxu1 %v1980_v58  ;;  %2098 = vmatmul.f32.vlgmr.msrb.gmra.mxu0 %v1972_v46 }
 0x4ab   : > { %2353 = vmatpush.msrb.mxu0 %v2326_v21 }
 0x4b2   : > { %2102 = vmatmul.f32.gmra.mxu0 %v1980_v58  ;;  %2124 = vmatmul.f32.vlgmr.msrb.gmra.mxu1 %v1972_v46 }
 0x4b3   : > { %2376 = vmatpush.msrb.mxu1 %v2299_v20 }
 0x4ba   : > { %2128 = vmatmul.f32.gmra.mxu1 %v1980_v58 }
 0x517   : > { %v1978_v18 = vpop.f32.mrf.mxu0 }
 0x51d   : > { %v2069_v26 = vpop.f32.mrf.mxu3 }
 0x51f   : > { %v1986_v22 = vpop.f32.mrf.mxu0  ;;  %v2012_v23 = vpop.f32.mrf.mxu1 }
 0x520   : > { %v2040_v24 = vpop.f32.mrf.mxu2  ;;  %v2013_v25 = vadd.f32 %v2012_v23, %v1978_v18  ;;  %v2470_v18 = vand.u32 4294901760, %v2443_v15  ;;  %v2465_v23 = vsub.f32 %v2463_v13, %v2464_v17 }
 0x522   : > { %v2041_v28 = vadd.f32 %v2040_v24, %v2013_v25  ;;  %v2471_v24 = vsub.f32 %v2443_v15, %v2470_v18 }
 0x524   : > { %v2070_v31 = vadd.f32 %v2069_v26, %v2041_v28  ;;  %v2472_v28 = vand.u32 4294901760, %v2471_v24 }
 0x526   : > { %v2075_v39 = vpop.f32.mrf.mxu3 }
 0x527   : > { %v2016_v27 = vpop.f32.mrf.mxu1  ;;  %v2099_v29 = vpop.f32.mrf.mxu0 }
 0x528   : > { %v2017_v32 = vadd.f32 %v2016_v27, %v1986_v22  ;;  %v2045_v33 = vpop.f32.mrf.mxu2  ;;  %v2100_v34 = vadd.f32 %v2099_v29, %v2070_v31  ;;  %v2466_v27 = vand.u32 4294901760, %v2465_v23  ;;  %v2473_v31 = vsub.f32 %v2471_v24, %v2472_v28  ;;  %v12121_v23 = vld [vmem:[%s14755_s0 + $0x20] sm:$0xff] }
 0x52a   : > { %v2046_v37 = vadd.f32 %v2045_v33, %v2017_v32 }
 0x52c   : > { %v2076_v44 = vadd.f32 %v2075_v39, %v2046_v37 }
 0x52f   : > { %v2125_v36 = vpop.f32.mrf.mxu1  ;;  %v2103_v42 = vpop.f32.mrf.mxu0 }
 0x530   : > { %v2126_v38 = vadd.f32 %v2125_v36, %v2100_v34  ;;  %v2104_v46 = vadd.f32 %v2103_v42, %v2076_v44  ;;  %v2474_v34 = vand.u32 4294901760, %v2473_v31  ;;  %v12119_v36 = vld [vmem:[%s14755_s0 + $0x50] sm:$0xff] }
 0x531   : > { %v2640_v37 = vand.u32 4294901760, %v12119_v36 }
 0x532   : > { %v2133_v40 = vsel %vm171_vm0, %v2126_v38, 0 }
 0x533   : > { %v2152_v43 = vand.u32 4294901760, %v2133_v40  ;;  %v2667_v38 = vsub.f32 %v12119_v36, %v2640_v37 }
 0x535   : > { %v2153_v45 = vsub.f32 %v2133_v40, %v2152_v43  ;;  %2183 = vmatmul.f32.vlgmr.msra.gmra.mxu3 %v2152_v43  ;;  %2255 = vmatmul.f32.vlgmr.msra.gmra.mxu0 %v2152_v43  ;;  %v2668_v39 = vand.u32 4294901760, %v2667_v38 }
 0x536   : > { %2277 = vmatmul.f32.vlgmr.msra.gmra.mxu1 %v2152_v43  ;;  %2330 = vmatpush.msra.mxu3 %v2329_v41  ;;  %v12120_v43 = vld [vmem:[%s14755_s0 + $0x58] sm:$0xff] }
 0x537   : > { %v2154_v47 = vand.u32 4294901760, %v2153_v45  ;;  %v2129_v48 = vpop.f32.mrf.mxu1  ;;  %v2669_v40 = vsub.f32 %v2667_v38, %v2668_v39  ;;  %v2789_v44 = vand.u32 4294901760, %v12120_v43 }
 0x538   : > { %v2130_v49 = vadd.f32 %v2129_v48, %v2104_v46 }
 0x539   : > { %v2155_v50 = vsub.f32 %v2153_v45, %v2154_v47  ;;  %v2670_v41 = vand.u32 4294901760, %v2669_v40 }
 0x53a   : > { %v2282_v51 = vsel %vm171_vm0, %v2130_v49, 0 }
 0x53b   : > { %v2301_v52 = vand.u32 4294901760, %v2282_v51  ;;  %v2156_v53 = vand.u32 4294901760, %v2155_v50 }
 0x53d   : > { %v2302_v54 = vsub.f32 %v2282_v51, %v2301_v52  ;;  %2157 = vmatmul.f32.vlgmr.msra.gmra.mxu2 %v2156_v53  ;;  %2231 = vmatmul.f32.vlgmr.msrb.gmra.mxu3 %v2154_v47 }
 0x53e   : > { %2300 = vmatpush.msra.mxu2 %v2299_v20  ;;  %2424 = vmatpush.msrb.mxu3 %v2299_v20 }
 0x53f   : > { %v2303_v55 = vand.u32 4294901760, %v2302_v54  ;;  %2356 = vmatmul.f32.vlgmr.msrb.gmra.mxu0 %v2302_v54 }
 0x541   : > { %2380 = vmatmul.f32.vlgmr.msrb.gmra.mxu1 %v2303_v55  ;;  %v2304_v56 = vsub.f32 %v2302_v54, %v2303_v55 }
 0x543   : > { %v2305_v57 = vand.u32 4294901760, %v2304_v56 }
 0x545   : > { %2207 = vmatmul.f32.vlgmr.msrb.gmra.mxu2 %v2153_v45  ;;  %2332 = vmatmul.f32.vlgmr.msra.gmra.mxu3 %v2301_v52  ;;  %v2816_v45 = vsub.f32 %v12120_v43, %v2789_v44 }
 0x546   : > { %2402 = vmatpush.msrb.mxu2 %v2327_v30 }
 0x547   : > { %v2817_v54 = vand.u32 4294901760, %v2816_v45 }
 0x54d   : > { %2306 = vmatmul.f32.vlgmr.msra.gmra.mxu2 %v2305_v57  ;;  %2426 = vmatmul.f32.vlgmr.msrb.gmra.mxu3 %v2301_v52 }
 0x555   : > { %2404 = vmatmul.f32.vlgmr.msrb.gmra.mxu2 %v2301_v52 }
 0x5b2   : > { %v2256_v1 = vpop.f32.mrf.mxu0 }
 0x5b3   : > { %v2278_v5 = vpop.f32.mrf.mxu1 }
 0x5b8   : > { %v2184_v58 = vpop.f32.mrf.mxu3 }
 0x5bc   : > { %v2357_v12 = vpop.f32.mrf.mxu0 }
 0x5be   : > { %v2381_v16 = vpop.f32.mrf.mxu1 }
 0x5c0   : > { %v2158_v59 = vpop.f32.mrf.mxu2  ;;  %v2232_v60 = vpop.f32.mrf.mxu3 }
 0x5c1   : > { %v2185_v61 = vadd.f32 %v2184_v58, %v2158_v59  ;;  %v2818_v59 = vsub.f32 %v2816_v45, %v2817_v54 }
 0x5c8   : > { %v2208_v62 = vpop.f32.mrf.mxu2  ;;  %v2333_v8 = vpop.f32.mrf.mxu3 }
 0x5c9   : > { %v2209_v0 = vadd.f32 %v2208_v62, %v2185_v61 }
 0x5cb   : > { %v2233_v2 = vadd.f32 %v2232_v60, %v2209_v0 }
 0x5cd   : > { %v2257_v4 = vadd.f32 %v2256_v1, %v2233_v2  ;;  %v2819_v1 = vand.u32 4294901760, %v2818_v59 }
 0x5cf   : > { %v2279_v7 = vadd.f32 %v2278_v5, %v2257_v4 }
 0x5d0   : > { %v2307_v9 = vpop.f32.mrf.mxu2  ;;  %v2427_v22 = vpop.f32.mrf.mxu3 }
 0x5d1   : > { %v2334_v11 = vadd.f32 %v2333_v8, %v2307_v9  ;;  %2431 = vst.msk [vmem:[#allocation2 + $0x30] sm:$0xff] %vm171_vm0, %v2279_v7 }
 0x5d3   : > { %v2358_v14 = vadd.f32 %v2357_v12, %v2334_v11 }
 0x5d5   : > { %v2382_v19 = vadd.f32 %v2381_v16, %v2358_v14 }
 0x5d8   : > { %v2405_v20 = vpop.f32.mrf.mxu2 }
 0x5d9   : > { %v2406_v21 = vadd.f32 %v2405_v20, %v2382_v19 }
 0x5db   : > { %v2428_v25 = vadd.f32 %v2427_v22, %v2406_v21 }
 0x5dd   : > { %2432 = vst.msk [vmem:[#allocation2 + $0x38] sm:$0xff] %vm171_vm0, %v2428_v25  ;;  %v2433_v26 = vadd.f32 %v2428_v25, %v2279_v7 }
 0x5df   : > { %v2460_v29 = vand.u32 4294901760, %v2433_v26 }
 0x5e1   : > { %2461 = vmatpush.msra.mxu0 %v2460_v29  ;;  %2554 = vmatpush.msra.mxu3 %v2460_v29  ;;  %v2495_v30 = vsub.f32 %v2433_v26, %v2460_v29 }
 0x5e2   : > { %2467 = vmatmul.f32.vlgmr.msra.gmra.mxu0 %v2466_v27  ;;  %2558 = vmatmul.f32.vlgmr.msra.gmra.mxu3 %v2464_v17  ;;  %v2930_v27 = vsel %vm171_vm0, %v12121_v23, 0 }
 0x5e3   : > { %2526 = vmatpush.msra.mxu2 %v2495_v30  ;;  %v2496_v32 = vand.u32 4294901760, %v2495_v30  ;;  %2671 = vmatpush.msrb.mxu3 %v2670_v41 }
 0x5e4   : > { %2529 = vmatmul.f32.vlgmr.msra.gmra.mxu2 %v2463_v13 }
 0x5e5   : > { %2586 = vmatpush.msrb.mxu0 %v2496_v32  ;;  %v2497_v33 = vsub.f32 %v2495_v30, %v2496_v32  ;;  %2641 = vmatpush.msrb.mxu2 %v2640_v37  ;;  %v2952_v30 = vand.u32 4294901760, %v2930_v27 }
 0x5e6   : > { %2717 = vmatpush.msra.mxu3 %v2640_v37 }
 0x5e7   : > { %v2498_v35 = vand.u32 4294901760, %v2497_v33  ;;  %2694 = vmatpush.msra.mxu2 %v2667_v38  ;;  %2743 = vmatpush.msra.mxu0 %v2668_v39 }
 0x5e9   : > { %2499 = vmatpush.msra.mxu1 %v2498_v35 }
 0x5ea   : > { %2475 = vmatmul.f32.gmra.mxu0 %v2474_v34  ;;  %2501 = vmatmul.f32.vlgmr.msra.gmra.mxu1 %v2462_v6  ;;  %v12122_v34 = vld [vmem:[%s14755_s0 + $0x28] sm:$0xff] }
 0x5eb   : > { %2612 = vmatpush.msrb.mxu1 %v2460_v29  ;;  %2564 = vmatmul.f32.gmra.mxu3 %v2472_v28  ;;  %v2933_v39 = vsel %vm171_vm0, %v12122_v34, 0 }
 0x5ec   : > { %2534 = vmatmul.f32.gmra.mxu2 %v2471_v24 }
 0x5ed   : > { %2765 = vmatpush.msra.mxu1 %v2640_v37  ;;  %v2953_v37 = vsub.f32 %v2930_v27, %v2952_v30 }
 0x5ef   : > { %v2954_v41 = vand.u32 4294901760, %v2953_v37 }
 0x5f2   : > { %2505 = vmatmul.f32.gmra.mxu1 %v2470_v18  ;;  %2588 = vmatmul.f32.vlgmr.msrb.gmra.mxu0 %v2462_v6 }
 0x5f3   : > { %2843 = vmatpush.msrb.mxu0 %v2816_v45 }
 0x5fa   : > { %2592 = vmatmul.f32.gmra.mxu0 %v2470_v18  ;;  %2614 = vmatmul.f32.vlgmr.msrb.gmra.mxu1 %v2462_v6 }
 0x5fb   : > { %2866 = vmatpush.msrb.mxu1 %v2789_v44 }
 0x602   : > { %2618 = vmatmul.f32.gmra.mxu1 %v2470_v18 }
 0x65f   : > { %v2468_v42 = vpop.f32.mrf.mxu0 }
 0x665   : > { %v2559_v50 = vpop.f32.mrf.mxu3 }
 0x667   : > { %v2476_v46 = vpop.f32.mrf.mxu0  ;;  %v2502_v47 = vpop.f32.mrf.mxu1 }
 0x668   : > { %v2530_v48 = vpop.f32.mrf.mxu2  ;;  %v2503_v49 = vadd.f32 %v2502_v47, %v2468_v42  ;;  %v2960_v42 = vand.u32 4294901760, %v2933_v39  ;;  %v2955_v47 = vsub.f32 %v2953_v37, %v2954_v41 }
 0x66a   : > { %v2531_v52 = vadd.f32 %v2530_v48, %v2503_v49  ;;  %v2961_v48 = vsub.f32 %v2933_v39, %v2960_v42 }
 0x66c   : > { %v2560_v55 = vadd.f32 %v2559_v50, %v2531_v52  ;;  %v2962_v52 = vand.u32 4294901760, %v2961_v48 }
 0x66e   : > { %v2565_v63 = vpop.f32.mrf.mxu3 }
 0x66f   : > { %v2506_v51 = vpop.f32.mrf.mxu1  ;;  %v2589_v53 = vpop.f32.mrf.mxu0 }
 0x670   : > { %v2507_v56 = vadd.f32 %v2506_v51, %v2476_v46  ;;  %v2535_v57 = vpop.f32.mrf.mxu2  ;;  %v2590_v58 = vadd.f32 %v2589_v53, %v2560_v55  ;;  %v2956_v51 = vand.u32 4294901760, %v2955_v47  ;;  %v2963_v55 = vsub.f32 %v2961_v48, %v2962_v52  ;;  %v3414_v47 = vld [vmem:[%s14755_s0] sm:$0xff] }
 0x672   : > { %v2536_v61 = vadd.f32 %v2535_v57, %v2507_v56 }
 0x674   : > { %v2566_v4 = vadd.f32 %v2565_v63, %v2536_v61 }
 0x677   : > { %v2615_v60 = vpop.f32.mrf.mxu1  ;;  %v2593_v2 = vpop.f32.mrf.mxu0 }
 0x678   : > { %v2616_v62 = vadd.f32 %v2615_v60, %v2590_v58  ;;  %v2594_v6 = vadd.f32 %v2593_v2, %v2566_v4  ;;  %v2964_v58 = vand.u32 4294901760, %v2963_v55  ;;  %v12123_v60 = vld [vmem:[%s14755_s0 + $0x30] sm:$0xff] }
 0x679   : > { %v3130_v61 = vand.u32 4294901760, %v12123_v60 }
 0x67a   : > { %v2623_v0 = vsel %vm171_vm0, %v2616_v62, 0 }
 0x67b   : > { %v2642_v3 = vand.u32 4294901760, %v2623_v0  ;;  %v3157_v62 = vsub.f32 %v12123_v60, %v3130_v61 }
 0x67d   : > { %v2643_v5 = vsub.f32 %v2623_v0, %v2642_v3  ;;  %2673 = vmatmul.f32.vlgmr.msrb.gmra.mxu3 %v2642_v3  ;;  %2745 = vmatmul.f32.vlgmr.msra.gmra.mxu0 %v2642_v3  ;;  %v3158_v63 = vand.u32 4294901760, %v3157_v62 }
 0x67e   : > { %2767 = vmatmul.f32.vlgmr.msra.gmra.mxu1 %v2642_v3  ;;  %2820 = vmatpush.msrb.mxu3 %v2819_v1  ;;  %v12124_v3 = vld [vmem:[%s14755_s0 + $0x38] sm:$0xff] }
 0x67f   : > { %v2644_v7 = vand.u32 4294901760, %v2643_v5  ;;  %v2619_v8 = vpop.f32.mrf.mxu1  ;;  %v3159_v0 = vsub.f32 %v3157_v62, %v3158_v63  ;;  %v3279_v4 = vand.u32 4294901760, %v12124_v3 }
 0x680   : > { %v2620_v9 = vadd.f32 %v2619_v8, %v2594_v6 }
 0x681   : > { %v2645_v10 = vsub.f32 %v2643_v5, %v2644_v7  ;;  %v3160_v1 = vand.u32 4294901760, %v3159_v0 }
 0x682   : > { %v2772_v11 = vsel %vm171_vm0, %v2620_v9, 0 }
 0x683   : > { %v2646_v12 = vand.u32 4294901760, %v2645_v10  ;;  %v2791_v13 = vand.u32 4294901760, %v2772_v11 }
 0x685   : > { %v2792_v14 = vsub.f32 %v2772_v11, %v2791_v13  ;;  %2647 = vmatmul.f32.vlgmr.msrb.gmra.mxu2 %v2646_v12  ;;  %2721 = vmatmul.f32.vlgmr.msra.gmra.mxu3 %v2644_v7 }
 0x686   : > { %2790 = vmatpush.msrb.mxu2 %v2789_v44  ;;  %2914 = vmatpush.msra.mxu3 %v2789_v44 }
 0x687   : > { %v2793_v15 = vand.u32 4294901760, %v2792_v14  ;;  %2846 = vmatmul.f32.vlgmr.msrb.gmra.mxu0 %v2792_v14 }
 0x689   : > { %2870 = vmatmul.f32.vlgmr.msrb.gmra.mxu1 %v2793_v15  ;;  %v2794_v16 = vsub.f32 %v2792_v14, %v2793_v15 }
 0x68b   : > { %v2795_v17 = vand.u32 4294901760, %v2794_v16 }
 0x68d   : > { %2697 = vmatmul.f32.vlgmr.msra.gmra.mxu2 %v2643_v5  ;;  %2822 = vmatmul.f32.vlgmr.msrb.gmra.mxu3 %v2791_v13  ;;  %v3306_v5 = vsub.f32 %v12124_v3, %v3279_v4 }
 0x68e   : > { %2892 = vmatpush.msra.mxu2 %v2817_v54 }
 0x68f   : > { %v3307_v14 = vand.u32 4294901760, %v3306_v5 }
 0x695   : > { %2796 = vmatmul.f32.vlgmr.msrb.gmra.mxu2 %v2795_v17  ;;  %2916 = vmatmul.f32.vlgmr.msra.gmra.mxu3 %v2791_v13 }
 0x69d   : > { %2894 = vmatmul.f32.vlgmr.msra.gmra.mxu2 %v2791_v13 }
 0x6fa   : > { %v2746_v25 = vpop.f32.mrf.mxu0 }
 0x6fb   : > { %v2768_v29 = vpop.f32.mrf.mxu1 }
 0x700   : > { %v2674_v18 = vpop.f32.mrf.mxu3 }
 0x704   : > { %v2847_v36 = vpop.f32.mrf.mxu0 }
 0x706   : > { %v2871_v40 = vpop.f32.mrf.mxu1 }
 0x708   : > { %v2648_v19 = vpop.f32.mrf.mxu2  ;;  %v2722_v20 = vpop.f32.mrf.mxu3 }
 0x709   : > { %v2675_v21 = vadd.f32 %v2674_v18, %v2648_v19  ;;  %v3308_v19 = vsub.f32 %v3306_v5, %v3307_v14 }
 0x710   : > { %v2698_v22 = vpop.f32.mrf.mxu2  ;;  %v2823_v32 = vpop.f32.mrf.mxu3 }
 0x711   : > { %v2699_v24 = vadd.f32 %v2698_v22, %v2675_v21 }
 0x713   : > { %v2723_v26 = vadd.f32 %v2722_v20, %v2699_v24 }
 0x715   : > { %v2747_v28 = vadd.f32 %v2746_v25, %v2723_v26  ;;  %v3309_v25 = vand.u32 4294901760, %v3308_v19 }
 0x717   : > { %v2769_v31 = vadd.f32 %v2768_v29, %v2747_v28 }
 0x718   : > { %v2797_v33 = vpop.f32.mrf.mxu2  ;;  %v2917_v46 = vpop.f32.mrf.mxu3 }
 0x719   : > { %v2824_v35 = vadd.f32 %v2823_v32, %v2797_v33  ;;  %2921 = vst.msk [vmem:[#allocation2 + $0x20] sm:$0xff] %vm171_vm0, %v2769_v31 }
 0x71b   : > { %v2848_v38 = vadd.f32 %v2847_v36, %v2824_v35 }
 0x71d   : > { %v2872_v43 = vadd.f32 %v2871_v40, %v2848_v38 }
 0x720   : > { %v2895_v44 = vpop.f32.mrf.mxu2 }
 0x721   : > { %v2896_v45 = vadd.f32 %v2895_v44, %v2872_v43 }
 0x723   : > { %v2918_v49 = vadd.f32 %v2917_v46, %v2896_v45 }
 0x725   : > { %2922 = vst.msk [vmem:[#allocation2 + $0x28] sm:$0xff] %vm171_vm0, %v2918_v49  ;;  %v2923_v50 = vadd.f32 %v2918_v49, %v2769_v31 }
 0x727   : > { %v2950_v53 = vand.u32 4294901760, %v2923_v50 }
 0x729   : > { %2951 = vmatpush.msra.mxu0 %v2950_v53  ;;  %3044 = vmatpush.msrb.mxu3 %v2950_v53  ;;  %v2985_v54 = vsub.f32 %v2923_v50, %v2950_v53 }
 0x72a   : > { %2957 = vmatmul.f32.vlgmr.msra.gmra.mxu0 %v2956_v51  ;;  %3048 = vmatmul.f32.vlgmr.msrb.gmra.mxu3 %v2954_v41  ;;  %v3419_v51 = vsel %vm171_vm0, %v3414_v47, 0 }
 0x72b   : > { %3016 = vmatpush.msrb.mxu2 %v2985_v54  ;;  %v2986_v56 = vand.u32 4294901760, %v2985_v54  ;;  %3161 = vmatpush.msra.mxu3 %v3160_v1 }
 0x72c   : > { %3019 = vmatmul.f32.vlgmr.msrb.gmra.mxu2 %v2953_v37 }
 0x72d   : > { %3076 = vmatpush.msrb.mxu0 %v2986_v56  ;;  %v2987_v57 = vsub.f32 %v2985_v54, %v2986_v56  ;;  %3131 = vmatpush.msra.mxu2 %v3130_v61  ;;  %v3441_v54 = vand.u32 4294901760, %v3419_v51 }
 0x72e   : > { %3207 = vmatpush.msrb.mxu3 %v3130_v61 }
 0x72f   : > { %v2988_v59 = vand.u32 4294901760, %v2987_v57  ;;  %3184 = vmatpush.msrb.mxu2 %v3157_v62  ;;  %3233 = vmatpush.msra.mxu0 %v3158_v63 }
 0x731   : > { %2989 = vmatpush.msra.mxu1 %v2988_v59 }
 0x732   : > { %2965 = vmatmul.f32.gmra.mxu0 %v2964_v58  ;;  %2991 = vmatmul.f32.vlgmr.msra.gmra.mxu1 %v2952_v30  ;;  %v3415_v58 = vld [vmem:[%s14755_s0 + $0x8] sm:$0xff] }
 0x733   : > { %3102 = vmatpush.msrb.mxu1 %v2950_v53  ;;  %3054 = vmatmul.f32.gmra.mxu3 %v2962_v52  ;;  %v3422_v63 = vsel %vm171_vm0, %v3415_v58, 0 }
 0x734   : > { %3024 = vmatmul.f32.gmra.mxu2 %v2961_v48 }
 0x735   : > { %3255 = vmatpush.msra.mxu1 %v3130_v61  ;;  %v3442_v61 = vsub.f32 %v3419_v51, %v3441_v54 }
 0x737   : > { %v3443_v1 = vand.u32 4294901760, %v3442_v61 }
 0x73a   : > { %2995 = vmatmul.f32.gmra.mxu1 %v2960_v42  ;;  %3078 = vmatmul.f32.vlgmr.msrb.gmra.mxu0 %v2952_v30 }
 0x73b   : > { %3333 = vmatpush.msrb.mxu0 %v3306_v5 }
 0x742   : > { %3082 = vmatmul.f32.gmra.mxu0 %v2960_v42  ;;  %3104 = vmatmul.f32.vlgmr.msrb.gmra.mxu1 %v2952_v30 }
 0x743   : > { %3356 = vmatpush.msrb.mxu1 %v3279_v4 }
 0x74a   : > { %3108 = vmatmul.f32.gmra.mxu1 %v2960_v42 }
 0x7a7   : > { %v2958_v2 = vpop.f32.mrf.mxu0 }
 0x7ad   : > { %v3049_v10 = vpop.f32.mrf.mxu3 }
 0x7af   : > { %v2966_v6 = vpop.f32.mrf.mxu0  ;;  %v2992_v7 = vpop.f32.mrf.mxu1 }
 0x7b0   : > { %v3020_v8 = vpop.f32.mrf.mxu2  ;;  %v2993_v9 = vadd.f32 %v2992_v7, %v2958_v2  ;;  %v3449_v2 = vand.u32 4294901760, %v3422_v63  ;;  %v3444_v7 = vsub.f32 %v3442_v61, %v3443_v1 }
 0x7b2   : > { %v3021_v12 = vadd.f32 %v3020_v8, %v2993_v9  ;;  %v3450_v8 = vsub.f32 %v3422_v63, %v3449_v2 }
 0x7b4   : > { %v3050_v15 = vadd.f32 %v3049_v10, %v3021_v12  ;;  %v3451_v12 = vand.u32 4294901760, %v3450_v8 }
 0x7b6   : > { %v3055_v23 = vpop.f32.mrf.mxu3 }
 0x7b7   : > { %v2996_v11 = vpop.f32.mrf.mxu1  ;;  %v3079_v13 = vpop.f32.mrf.mxu0 }
 0x7b8   : > { %v2997_v16 = vadd.f32 %v2996_v11, %v2966_v6  ;;  %v3025_v17 = vpop.f32.mrf.mxu2  ;;  %v3080_v18 = vadd.f32 %v3079_v13, %v3050_v15  ;;  %v3445_v11 = vand.u32 4294901760, %v3444_v7  ;;  %v3452_v15 = vsub.f32 %v3450_v8, %v3451_v12 }
 0x7b9   : > { %v12254_v7 = vmov 0.0  }
 0x7ba   : > { %v3026_v21 = vadd.f32 %v3025_v17, %v2997_v16 }
 0x7bc   : > { %v3056_v28 = vadd.f32 %v3055_v23, %v3026_v21 }
 0x7bf   : > { %v3105_v20 = vpop.f32.mrf.mxu1  ;;  %v3083_v26 = vpop.f32.mrf.mxu0 }
 0x7c0   : > { %v3106_v22 = vadd.f32 %v3105_v20, %v3080_v18  ;;  %v3084_v30 = vadd.f32 %v3083_v26, %v3056_v28  ;;  %v3453_v18 = vand.u32 4294901760, %v3452_v15  ;;  %v12460_v20 = vld [vmem:[%s14755_s0 + $0x10] sm:$0xff] }
 0x7c1   : > { %v3619_v21 = vand.u32 4294901760, %v12460_v20 }
 0x7c2   : > { %v3113_v24 = vsel %vm171_vm0, %v3106_v22, 0 }
 0x7c3   : > { %v3132_v27 = vand.u32 4294901760, %v3113_v24  ;;  %v3646_v22 = vsub.f32 %v12460_v20, %v3619_v21 }
 0x7c5   : > { %v3133_v29 = vsub.f32 %v3113_v24, %v3132_v27  ;;  %3163 = vmatmul.f32.vlgmr.msra.gmra.mxu3 %v3132_v27  ;;  %3235 = vmatmul.f32.vlgmr.msra.gmra.mxu0 %v3132_v27  ;;  %v3647_v23 = vand.u32 4294901760, %v3646_v22 }
 0x7c6   : > { %3257 = vmatmul.f32.vlgmr.msra.gmra.mxu1 %v3132_v27  ;;  %3310 = vmatpush.msra.mxu3 %v3309_v25  ;;  %v12467_v27 = vld [vmem:[%s14755_s0 + $0x18] sm:$0xff] }
 0x7c7   : > { %v3134_v31 = vand.u32 4294901760, %v3133_v29  ;;  %v3109_v32 = vpop.f32.mrf.mxu1  ;;  %v3648_v24 = vsub.f32 %v3646_v22, %v3647_v23  ;;  %15058 = vst [vmem:[#allocation6_spill] sm:$0xff] %v12467_v27  ;;  %v3768_v28 = vand.u32 4294901760, %v12467_v27 }
 0x7c8   : > { %v3110_v33 = vadd.f32 %v3109_v32, %v3084_v30 }
 0x7c9   : > { %v3135_v34 = vsub.f32 %v3133_v29, %v3134_v31  ;;  %v3649_v25 = vand.u32 4294901760, %v3648_v24 }
 0x7ca   : > { %v3262_v35 = vsel %vm171_vm0, %v3110_v33, 0 }
 0x7cb   : > { %v3136_v36 = vand.u32 4294901760, %v3135_v34  ;;  %v3281_v37 = vand.u32 4294901760, %v3262_v35 }
 0x7cd   : > { %v3282_v38 = vsub.f32 %v3262_v35, %v3281_v37  ;;  %3137 = vmatmul.f32.vlgmr.msra.gmra.mxu2 %v3136_v36  ;;  %3211 = vmatmul.f32.vlgmr.msrb.gmra.mxu3 %v3134_v31 }
 0x7ce   : > { %3280 = vmatpush.msra.mxu2 %v3279_v4  ;;  %3404 = vmatpush.msrb.mxu3 %v3279_v4 }
 0x7cf   : > { %v3283_v39 = vand.u32 4294901760, %v3282_v38  ;;  %3336 = vmatmul.f32.vlgmr.msrb.gmra.mxu0 %v3282_v38 }
 0x7d1   : > { %3360 = vmatmul.f32.vlgmr.msrb.gmra.mxu1 %v3283_v39  ;;  %v3284_v40 = vsub.f32 %v3282_v38, %v3283_v39 }
 0x7d3   : > { %v3285_v41 = vand.u32 4294901760, %v3284_v40 }
 0x7d5   : > { %3187 = vmatmul.f32.vlgmr.msrb.gmra.mxu2 %v3133_v29  ;;  %3312 = vmatmul.f32.vlgmr.msra.gmra.mxu3 %v3281_v37  ;;  %v3795_v29 = vsub.f32 %v12467_v27, %v3768_v28 }
 0x7d6   : > { %3382 = vmatpush.msrb.mxu2 %v3307_v14 }
 0x7d7   : > { %v3796_v38 = vand.u32 4294901760, %v3795_v29 }
 0x7dd   : > { %3286 = vmatmul.f32.vlgmr.msra.gmra.mxu2 %v3285_v41  ;;  %3406 = vmatmul.f32.vlgmr.msrb.gmra.mxu3 %v3281_v37 }
 0x7e5   : > { %3384 = vmatmul.f32.vlgmr.msrb.gmra.mxu2 %v3281_v37 }
 0x842   : > { %v3236_v49 = vpop.f32.mrf.mxu0 }
 0x843   : > { %v3258_v53 = vpop.f32.mrf.mxu1 }
 0x848   : > { %v3164_v42 = vpop.f32.mrf.mxu3 }
 0x84c   : > { %v3337_v60 = vpop.f32.mrf.mxu0 }
 0x84e   : > { %v3361_v0 = vpop.f32.mrf.mxu1 }
 0x850   : > { %v3138_v43 = vpop.f32.mrf.mxu2  ;;  %v3212_v44 = vpop.f32.mrf.mxu3 }
 0x851   : > { %v3165_v45 = vadd.f32 %v3164_v42, %v3138_v43  ;;  %v3797_v43 = vsub.f32 %v3795_v29, %v3796_v38 }
 0x858   : > { %v3188_v46 = vpop.f32.mrf.mxu2  ;;  %v3313_v56 = vpop.f32.mrf.mxu3 }
 0x859   : > { %v3189_v48 = vadd.f32 %v3188_v46, %v3165_v45 }
 0x85b   : > { %v3213_v50 = vadd.f32 %v3212_v44, %v3189_v48 }
 0x85d   : > { %v3237_v52 = vadd.f32 %v3236_v49, %v3213_v50  ;;  %v3798_v49 = vand.u32 4294901760, %v3797_v43 }
 0x85f   : > { %v3259_v55 = vadd.f32 %v3258_v53, %v3237_v52 }
 0x860   : > { %v3287_v57 = vpop.f32.mrf.mxu2  ;;  %v3407_v6 = vpop.f32.mrf.mxu3 }
 0x861   : > { %v3314_v59 = vadd.f32 %v3313_v56, %v3287_v57  ;;  %3411 = vst.msk [vmem:[#allocation2 + $0x10] sm:$0xff] %vm171_vm0, %v3259_v55 }
 0x863   : > { %v3338_v62 = vadd.f32 %v3337_v60, %v3314_v59 }
 0x865   : > { %v3362_v3 = vadd.f32 %v3361_v0, %v3338_v62 }
 0x868   : > { %v3385_v4 = vpop.f32.mrf.mxu2 }
 0x869   : > { %v3386_v5 = vadd.f32 %v3385_v4, %v3362_v3 }
 0x86b   : > { %v3408_v9 = vadd.f32 %v3407_v6, %v3386_v5  ;;  %v15059_v6 = vmov 0 }
 0x86d   : > { %3412 = vst.msk [vmem:[#allocation2 + $0x18] sm:$0xff] %vm171_vm0, %v3408_v9  ;;  %v3413_v10 = vadd.f32 %v3408_v9, %v3259_v55 }
 0x86f   : > { %v3439_v13 = vand.u32 4294901760, %v3413_v10 }
 0x871   : > { %3440 = vmatpush.msra.mxu0 %v3439_v13  ;;  %3533 = vmatpush.msra.mxu3 %v3439_v13  ;;  %v3474_v14 = vsub.f32 %v3413_v10, %v3439_v13 }
 0x872   : > { %3446 = vmatmul.f32.vlgmr.msra.gmra.mxu0 %v3445_v11  ;;  %3537 = vmatmul.f32.vlgmr.msra.gmra.mxu3 %v3443_v1 }
 0x873   : > { %3505 = vmatpush.msra.mxu2 %v3474_v14  ;;  %v3475_v16 = vand.u32 4294901760, %v3474_v14  ;;  %3650 = vmatpush.msrb.mxu3 %v3649_v25 }
 0x874   : > { %3508 = vmatmul.f32.vlgmr.msra.gmra.mxu2 %v3442_v61 }
 0x875   : > { %3565 = vmatpush.msrb.mxu0 %v3475_v16  ;;  %v3476_v17 = vsub.f32 %v3474_v14, %v3475_v16  ;;  %3620 = vmatpush.msrb.mxu2 %v3619_v21  ;;  %v14759_v14 = vmov 1.0  }
 0x876   : > { %3696 = vmatpush.msra.mxu3 %v3619_v21 }
 0x877   : > { %v3477_v19 = vand.u32 4294901760, %v3476_v17  ;;  %3673 = vmatpush.msra.mxu2 %v3646_v22  ;;  %3722 = vmatpush.msra.mxu0 %v3647_v23 }
 0x879   : > { %3478 = vmatpush.msra.mxu1 %v3477_v19 }
 0x87a   : > { %3454 = vmatmul.f32.gmra.mxu0 %v3453_v18  ;;  %3480 = vmatmul.f32.vlgmr.msra.gmra.mxu1 %v3441_v54 }
 0x87b   : > { %3591 = vmatpush.msrb.mxu1 %v3439_v13  ;;  %3543 = vmatmul.f32.gmra.mxu3 %v3451_v12 }
 0x87c   : > { %3513 = vmatmul.f32.gmra.mxu2 %v3450_v8 }
 0x87d   : > { %3744 = vmatpush.msra.mxu1 %v3619_v21 }
 0x882   : > { %3484 = vmatmul.f32.gmra.mxu1 %v3449_v2  ;;  %3567 = vmatmul.f32.vlgmr.msrb.gmra.mxu0 %v3441_v54 }
 0x883   : > { %3822 = vmatpush.msrb.mxu0 %v3795_v29 }
 0x88a   : > { %3571 = vmatmul.f32.gmra.mxu0 %v3449_v2  ;;  %3593 = vmatmul.f32.vlgmr.msrb.gmra.mxu1 %v3441_v54 }
 0x88b   : > { %3845 = vmatpush.msrb.mxu1 %v3768_v28 }
 0x892   : > { %3597 = vmatmul.f32.gmra.mxu1 %v3449_v2  ;;  %v3917_v2 = vlaneseq }
 0x894   : > { %v3918_v3 = vand.u32 127, %v3917_v2  ;;  %v3920_v4 = vshrl.u32 %v3917_v2, 7 }
 0x896   : > { %v3921_v5 = vand.u32 7, %v3918_v3 }
 0x898   : > { %vm12473_vm1 = vcmp.eq.s32.totalorder %v3921_v5, %v3920_v4 }
 0x899   : > { %v15060_v6 = vsel %vm12473_vm1, 4294967295, %v15059_v6  ;;  %v12479_v8 = vsel %vm12473_vm1, 1.0, %v12254_v7 }
 0x89a   : > { %15061 = vst [vmem:[#allocation7_spill] sm:$0xff] %v15060_v6  ;;  %v12483_v9 = vsub.f32 %v12479_v8, %v12479_v8 }
 0x89c   : > { %15062 = vst [vmem:[#allocation8_spill] sm:$0xff] %v12483_v9  ;;  %v12486_v10 = vand.u32 4294901760, %v12483_v9 }
 0x89e   : > { %15063 = vst [vmem:[#allocation9_spill] sm:$0xff] %v12486_v10  ;;  %v3987_v11 = vsub.f32 %v12483_v9, %v12486_v10 }
 0x8a0   : > { %v12491_v12 = vand.u32 4294901760, %v3987_v11 }
 0x8a2   : > { %15064 = vst [vmem:[#allocation10_spill] sm:$0xff] %v12491_v12 }
 0x8ef   : > { %v3447_v26 = vpop.f32.mrf.mxu0 }
 0x8f5   : > { %v3538_v34 = vpop.f32.mrf.mxu3 }
 0x8f7   : > { %v3455_v30 = vpop.f32.mrf.mxu0  ;;  %v3481_v31 = vpop.f32.mrf.mxu1 }
 0x8f8   : > { %v3509_v32 = vpop.f32.mrf.mxu2  ;;  %v3482_v33 = vadd.f32 %v3481_v31, %v3447_v26 }
 0x8fa   : > { %v3510_v36 = vadd.f32 %v3509_v32, %v3482_v33 }
 0x8fc   : > { %v3539_v39 = vadd.f32 %v3538_v34, %v3510_v36 }
 0x8fe   : > { %v3544_v47 = vpop.f32.mrf.mxu3 }
 0x8ff   : > { %v3485_v35 = vpop.f32.mrf.mxu1  ;;  %v3568_v37 = vpop.f32.mrf.mxu0 }
 0x900   : > { %v3486_v40 = vadd.f32 %v3485_v35, %v3455_v30  ;;  %v3514_v41 = vpop.f32.mrf.mxu2  ;;  %v3569_v42 = vadd.f32 %v3568_v37, %v3539_v39 }
 0x902   : > { %v3515_v45 = vadd.f32 %v3514_v41, %v3486_v40 }
 0x904   : > { %v3545_v52 = vadd.f32 %v3544_v47, %v3515_v45  ;;  %v3915_v45 = vld [vmem:[%s14756_s1 + $0x70] sm:$0xff] }
 0x907   : > { %v3594_v44 = vpop.f32.mrf.mxu1  ;;  %v3572_v50 = vpop.f32.mrf.mxu0 }
 0x908   : > { %v3595_v46 = vadd.f32 %v3594_v44, %v3569_v42  ;;  %v3573_v54 = vadd.f32 %v3572_v50, %v3545_v52  ;;  %v3916_v44 = vld [vmem:[%s14756_s1 + $0x78] sm:$0xff]  ;;  %v3913_v50 = vld [vmem:[%s14756_s1 + $0x60] sm:$0xff]  ;;  %v3911_v52 = vld [vmem:[%s14756_s1 + $0x50] sm:$0xff] }
 0x909   : > { %v12520_v47 = vand.u32 4294901760, %v3916_v44 }
 0x90a   : > { %v3602_v48 = vsel %vm171_vm0, %v3595_v46, 0  ;;  %v3914_v46 = vld [vmem:[%s14756_s1 + $0x68] sm:$0xff] }
 0x90b   : > { %v3621_v51 = vand.u32 4294901760, %v3602_v48 }
 0x90d   : > { %v3622_v53 = vsub.f32 %v3602_v48, %v3621_v51  ;;  %3652 = vmatmul.f32.vlgmr.msrb.gmra.mxu3 %v3621_v51  ;;  %3724 = vmatmul.f32.vlgmr.msra.gmra.mxu0 %v3621_v51  ;;  %v12522_v48 = vand.u32 4294901760, %v3915_v45 }
 0x90e   : > { %3746 = vmatmul.f32.vlgmr.msra.gmra.mxu1 %v3621_v51  ;;  %3799 = vmatpush.msrb.mxu3 %v3798_v49  ;;  %v12524_v49 = vand.u32 4294901760, %v3914_v46  ;;  %v3912_v51 = vld [vmem:[%s14756_s1 + $0x58] sm:$0xff] }
 0x90f   : > { %v3623_v55 = vand.u32 4294901760, %v3622_v53  ;;  %v3598_v56 = vpop.f32.mrf.mxu1  ;;  %3989 = vmatpush.msra.mxu1 %v12491_v12  ;;  %12126 = vmatpush.msk.msra.mxu0 %vm12473_vm1, %v14759_v14 }
 0x910   : > { %v3599_v57 = vadd.f32 %v3598_v56, %v3573_v54  ;;  %v12535_v54 = vand.u32 4294901760, %v3913_v50  ;;  %v12539_v56 = vand.u32 4294901760, %v3911_v52 }
 0x911   : > { %v3624_v58 = vsub.f32 %v3622_v53, %v3623_v55 }
 0x912   : > { %v3751_v59 = vsel %vm171_vm0, %v3599_v57, 0  ;;  %v3910_v57 = vld [vmem:[%s14756_s1 + $0x48] sm:$0xff] }
 0x913   : > { %v3625_v60 = vand.u32 4294901760, %v3624_v58  ;;  %v3770_v61 = vand.u32 4294901760, %v3751_v59  ;;  %v12545_v58 = vsub.f32 %v3916_v44, %v12520_v47 }
 0x915   : > { %v3771_v62 = vsub.f32 %v3751_v59, %v3770_v61  ;;  %3626 = vmatmul.f32.vlgmr.msrb.gmra.mxu2 %v3625_v60  ;;  %3700 = vmatmul.f32.vlgmr.msra.gmra.mxu3 %v3623_v55  ;;  %v12537_v55 = vand.u32 4294901760, %v3912_v51  ;;  %v12548_v59 = vsub.f32 %v3915_v45, %v12522_v48  ;;  %v12551_v60 = vsub.f32 %v3914_v46, %v12524_v49 }
 0x916   : > { %3769 = vmatpush.msrb.mxu2 %v3768_v28  ;;  %3893 = vmatpush.msra.mxu3 %v3768_v28  ;;  %v12568_v3 = vand.u32 4294901760, %v12545_v58 }
 0x917   : > { %v3772_v63 = vand.u32 4294901760, %v3771_v62  ;;  %3825 = vmatmul.f32.vlgmr.msrb.gmra.mxu0 %v3771_v62  ;;  %v12571_v4 = vand.u32 4294901760, %v12548_v59  ;;  %v12575_v5 = vand.u32 4294901760, %v12551_v60 }
 0x918   : > { %4076 = vmatpush.msrb.mxu0 %v12486_v10 }
 0x919   : > { %3849 = vmatmul.f32.vlgmr.msrb.gmra.mxu1 %v3772_v63  ;;  %v3773_v0 = vsub.f32 %v3771_v62, %v3772_v63  ;;  %v12556_v62 = vsub.f32 %v3913_v50, %v12535_v54  ;;  %v12559_v63 = vsub.f32 %v3912_v51, %v12537_v55  ;;  %v3906_v50 = vld [vmem:[%s14756_s1 + $0x28] sm:$0xff] }
 0x91a   : > { %12128 = vmatpush.msk.msrb.mxu1 %vm12473_vm1, %v14759_v14 }
 0x91b   : > { %v3774_v1 = vand.u32 4294901760, %v3773_v0  ;;  %v12562_v0 = vsub.f32 %v3911_v52, %v12539_v56  ;;  %v12579_v11 = vand.u32 4294901760, %v12556_v62 }
 0x91d   : > { %3676 = vmatmul.f32.vlgmr.msra.gmra.mxu2 %v3622_v53  ;;  %3801 = vmatmul.f32.vlgmr.msrb.gmra.mxu3 %v3770_v61 }
 0x91e   : > { %3871 = vmatpush.msra.mxu2 %v3796_v38  ;;  %12127 = vmatpush.msk.msrb.mxu3 %vm12473_vm1, %v14759_v14 }
 0x925   : > { %3775 = vmatmul.f32.vlgmr.msrb.gmra.mxu2 %v3774_v1  ;;  %3895 = vmatmul.f32.vlgmr.msra.gmra.mxu3 %v3770_v61  ;;  %v12564_v1 = vand.u32 4294901760, %v3910_v57 }
 0x926   : > { %4016 = vmatpush.msrb.mxu2 %v12483_v9 }
 0x92d   : > { %3873 = vmatmul.f32.vlgmr.msra.gmra.mxu2 %v3770_v61 }
 0x92e   : > { %4127 = vmatpush.msra.mxu2 %v12520_v47 }
 0x930   : > { %4129 = vmatpush.msra.mxu2 %v12522_v48 }
 0x932   : > { %4131 = vmatpush.msra.mxu2 %v12524_v49 }
 0x934   : > { %4133 = vmatpush.msra.mxu2 %v12535_v54 }
 0x936   : > { %4135 = vmatpush.msra.mxu2 %v12537_v55 }
 0x938   : > { %4137 = vmatpush.msra.mxu2 %v12539_v56 }
 0x93a   : > { %4139 = vmatpush.msra.mxu2 %v12564_v1 }
 0x98a   : > { %v3725_v21 = vpop.f32.mrf.mxu0 }
 0x98b   : > { %v3747_v24 = vpop.f32.mrf.mxu1 }
 0x990   : > { %v3653_v13 = vpop.f32.mrf.mxu3 }
 0x994   : > { %v3826_v30 = vpop.f32.mrf.mxu0 }
 0x996   : > { %v3850_v32 = vpop.f32.mrf.mxu1 }
 0x998   : > { %v3627_v15 = vpop.f32.mrf.mxu2  ;;  %v3701_v16 = vpop.f32.mrf.mxu3 }
 0x999   : > { %v3654_v17 = vadd.f32 %v3653_v13, %v3627_v15  ;;  %v4170_v13 = vsub.f32 %v12545_v58, %v12568_v3  ;;  %v4176_v15 = vsub.f32 %v12548_v59, %v12571_v4 }
 0x9a0   : > { %v3677_v18 = vpop.f32.mrf.mxu2  ;;  %v3802_v26 = vpop.f32.mrf.mxu3 }
 0x9a1   : > { %v3678_v19 = vadd.f32 %v3677_v18, %v3654_v17  ;;  %v12590_v17 = vand.u32 4294901760, %v12559_v63 }
 0x9a3   : > { %v3702_v22 = vadd.f32 %v3701_v16, %v3678_v19  ;;  %v4182_v16 = vsub.f32 %v12551_v60, %v12575_v5  ;;  %v12594_v19 = vand.u32 4294901760, %v12562_v0 }
 0x9a5   : > { %v3726_v23 = vadd.f32 %v3725_v21, %v3702_v22  ;;  %15065 = vst [vmem:[#allocation11_spill] sm:$0xff] %v12594_v19  ;;  %v12596_v21 = vand.u32 4294901760, %v4170_v13  ;;  %v12598_v22 = vand.u32 4294901760, %v4176_v15 }
 0x9a7   : > { %v3748_v25 = vadd.f32 %v3747_v24, %v3726_v23  ;;  %15066 = vst [vmem:[#allocation12_spill] sm:$0xff] %v12596_v21  ;;  %v4188_v23 = vsub.f32 %v12556_v62, %v12579_v11  ;;  %v12605_v24 = vsub.f32 %v3910_v57, %v12564_v1  ;;  %4172 = vmatpush.msra.mxu3 %v12596_v21  ;;  %v12688_v57 = vand.u32 4294901760, %v3906_v50 }
 0x9a8   : > { %v3776_v28 = vpop.f32.mrf.mxu2  ;;  %v3896_v38 = vpop.f32.mrf.mxu3  ;;  %15067 = vst [vmem:[#allocation13_spill] sm:$0xff] %v12598_v22 }
 0x9a9   : > { %3899 = vst.msk [vmem:[#allocation2] sm:$0xff] %vm171_vm0, %v3748_v25  ;;  %v3803_v29 = vadd.f32 %v3802_v26, %v3776_v28  ;;  %v12608_v26 = vand.u32 4294901760, %v4182_v16  ;;  %v4194_v28 = vsub.f32 %v12559_v63, %v12590_v17  ;;  %4178 = vmatpush.msra.mxu3 %v12598_v22  ;;  %v12703_v15 = vsub.f32 %v3906_v50, %v12688_v57 }
 0x9ab   : > { %v3827_v31 = vadd.f32 %v3826_v30, %v3803_v29  ;;  %15068 = vst [vmem:[#allocation14_spill] sm:$0xff] %v12608_v26  ;;  %v12614_v29 = vand.u32 4294901760, %v12605_v24  ;;  %4184 = vmatpush.msra.mxu3 %v12608_v26 }
 0x9ac   : > { %15078 = vst [vmem:[#allocation24_spill] sm:$0xff] %v12703_v15 }
 0x9ad   : > { %v3851_v33 = vadd.f32 %v3850_v32, %v3827_v31  ;;  %15069 = vst [vmem:[#allocation15_spill] sm:$0xff] %v12614_v29  ;;  %v12618_v31 = vand.u32 4294901760, %v4188_v23  ;;  %v4200_v32 = vsub.f32 %v12562_v0, %v12594_v19 }
 0x9af   : > { %15070 = vst [vmem:[#allocation16_spill] sm:$0xff] %v12618_v31  ;;  %4190 = vmatpush.msra.mxu3 %v12618_v31 }
 0x9b0   : > { %v3874_v34 = vpop.f32.mrf.mxu2  ;;  %v3925_v35 = vld [vmem:[#allocation2] sm:$0xff] }
 0x9b1   : > { %v3875_v36 = vadd.f32 %v3874_v34, %v3851_v33  ;;  %v3930_v37 = vsel %vm171_vm0, %v3925_v35, 0  ;;  %v12626_v34 = vand.u32 4294901760, %v4194_v28  ;;  %v4206_v35 = vsub.f32 %v12605_v24, %v12614_v29 }
 0x9b2   : > { %v12506_v39 = vand.u32 4294901760, %v3930_v37  ;;  %v12719_v28 = vand.u32 4294901760, %v12703_v15 }
 0x9b3   : > { %v3897_v40 = vadd.f32 %v3896_v38, %v3875_v36  ;;  %15071 = vst [vmem:[#allocation17_spill] sm:$0xff] %v12626_v34  ;;  %v12633_v36 = vand.u32 4294901760, %v4200_v32  ;;  %4196 = vmatpush.msra.mxu3 %v12626_v34  ;;  %v3909_v38 = vld [vmem:[%s14756_s1 + $0x40] sm:$0xff] }
 0x9b4   : > { %3991 = vmatmul.f32.vlgmr.msra.gmra.mxu1 %v12506_v39  ;;  %v3953_v41 = vsub.f32 %v3930_v37, %v12506_v39  ;;  %v12639_v37 = vand.u32 4294901760, %v4206_v35  ;;  %15080 = vst [vmem:[#allocation26_spill] sm:$0xff] %v12719_v28 }
 0x9b5   : > { %3900 = vst.msk [vmem:[#allocation2 + $0x8] sm:$0xff] %vm171_vm0, %v3897_v40  ;;  %4323 = vmatpush.msra.mxu1 %v12520_v47  ;;  %4202 = vmatpush.msra.mxu3 %v12633_v36  ;;  %v12650_v40 = vand.u32 4294901760, %v3909_v38 }
 0x9b6   : > { %4019 = vmatmul.f32.vlgmr.msrb.gmra.mxu2 %v3953_v41  ;;  %v3954_v42 = vand.u32 4294901760, %v3953_v41  ;;  %15072 = vst [vmem:[#allocation18_spill] sm:$0xff] %v12633_v36 }
 0x9b7   : > { %4325 = vmatpush.msra.mxu1 %v12522_v48  ;;  %15073 = vst [vmem:[#allocation19_spill] sm:$0xff] %v12639_v37  ;;  %4208 = vmatpush.msra.mxu3 %v12639_v37 }
 0x9b8   : > { %4048 = vmatmul.f32.vlgmr.msrb.gmra.mxu3 %v3954_v42  ;;  %v3955_v43 = vsub.f32 %v3953_v41, %v3954_v42  ;;  %v3908_v41 = vld [vmem:[%s14756_s1 + $0x38] sm:$0xff]  ;;  %v12656_v42 = vsub.f32 %v3909_v38, %v12650_v40  ;;  %4141 = vmatpush.msra.mxu2 %v12650_v40  ;;  %v4230_v38 = vsub.f32 %v12703_v15, %v12719_v28 }
 0x9b9   : > { %4327 = vmatpush.msra.mxu1 %v12524_v49 }
 0x9ba   : > { %v3956_v53 = vand.u32 4294901760, %v3955_v43  ;;  %v12658_v43 = vand.u32 4294901760, %v3908_v41  ;;  %v12666_v44 = vand.u32 4294901760, %v12656_v42 }
 0x9bb   : > { %4329 = vmatpush.msra.mxu1 %v12535_v54 }
 0x9bc   : > { %3957 = vmatmul.f32.vlgmr.msra.gmra.mxu0 %v3956_v53  ;;  %v3926_v61 = vld [vmem:[#allocation2 + $0x8] sm:$0xff]  ;;  %15074 = vst [vmem:[#allocation20_spill] sm:$0xff] %v12666_v44  ;;  %v12669_v45 = vsub.f32 %v3908_v41, %v12658_v43  ;;  %4143 = vmatpush.msra.mxu2 %v12658_v43  ;;  %v4212_v51 = vsub.f32 %v12656_v42, %v12666_v44 }
 0x9bd   : > { %v3933_v2 = vsel %vm171_vm0, %v3926_v61, 0  ;;  %4270 = vmatpush.msra.mxu0 %v12545_v58  ;;  %4331 = vmatpush.msra.mxu1 %v12537_v55  ;;  %v3905_v61 = vld [vmem:[%s14756_s1 + $0x20] sm:$0xff] }
 0x9be   : > { %v3960_v7 = vand.u32 4294901760, %v3933_v2  ;;  %v12682_v52 = vand.u32 4294901760, %v12669_v45  ;;  %v12707_v16 = vand.u32 4294901760, %v3905_v61 }
 0x9bf   : > { %4273 = vmatpush.msra.mxu0 %v12548_v59  ;;  %4333 = vmatpush.msra.mxu1 %v12539_v56 }
 0x9c0   : > { %3995 = vmatmul.f32.gmra.mxu1 %v3960_v7  ;;  %v3961_v18 = vsub.f32 %v3933_v2, %v3960_v7  ;;  %15075 = vst [vmem:[#allocation21_spill] sm:$0xff] %v12682_v52  ;;  %v12695_v2 = vand.u32 4294901760, %v4212_v51  ;;  %v12725_v32 = vsub.f32 %v3905_v61, %v12707_v16  ;;  %v3902_v51 = vld [vmem:[%s14756_s1 + $0x8] sm:$0xff]  ;;  %v12751_v61 = vand.u32 4294901760, %v4230_v38  ;;  %v3901_v38 = vld [vmem:[%s14756_s1] sm:$0xff] }
 0x9c1   : > { %4276 = vmatpush.msra.mxu0 %v12551_v60  ;;  %4335 = vmatpush.msra.mxu1 %v12564_v1  ;;  %v12778_v9 = vand.u32 4294901760, %v3901_v38 }
 0x9c2   : > { %4024 = vmatmul.f32.gmra.mxu2 %v3961_v18  ;;  %v3962_v25 = vand.u32 4294901760, %v3961_v18  ;;  %15076 = vst [vmem:[#allocation22_spill] sm:$0xff] %v12695_v2  ;;  %4214 = vmatpush.msra.mxu3 %v12695_v2  ;;  %v12743_v50 = vand.u32 4294901760, %v12725_v32 }
 0x9c3   : > { %4279 = vmatpush.msra.mxu0 %v12556_v62  ;;  %4337 = vmatpush.msra.mxu1 %v12650_v40  ;;  %15081 = vst [vmem:[#allocation27_spill] sm:$0xff] %v12725_v32 }
 0x9c4   : > { %4054 = vmatmul.f32.gmra.mxu3 %v3962_v25  ;;  %v3963_v30 = vsub.f32 %v3961_v18, %v3962_v25  ;;  %v3904_v18 = vld [vmem:[%s14756_s1 + $0x18] sm:$0xff]  ;;  %15084 = vst [vmem:[#allocation30_spill] sm:$0xff] %v12743_v50  ;;  %v4236_v14 = vsub.f32 %v12725_v32, %v12743_v50 }
 0x9c5   : > { %4282 = vmatpush.msra.mxu0 %v12559_v63  ;;  %4339 = vmatpush.msra.mxu1 %v12658_v43  ;;  %15085 = vst [vmem:[#allocation31_spill] sm:$0xff] %v12751_v61 }
 0x9c6   : > { %v3964_v33 = vand.u32 4294901760, %v3963_v30  ;;  %v12722_v30 = vand.u32 4294901760, %v3904_v18  ;;  %15090 = vst [vmem:[#allocation36_spill] sm:$0xff] %v12778_v9  ;;  %v12781_v12 = vand.u32 4294901760, %v4236_v14 }
 0x9c7   : > { %4285 = vmatpush.msra.mxu0 %v12562_v0 }
 0x9c8   : > { %3965 = vmatmul.f32.gmra.mxu0 %v3964_v33  ;;  %4104 = vmatmul.f32.vlgmr.msrb.gmra.mxu1 %v12506_v39  ;;  %v3903_v33 = vld [vmem:[%s14756_s1 + $0x10] sm:$0xff]  ;;  %v12738_v41 = vsub.f32 %v3904_v18, %v12722_v30  ;;  %15091 = vst [vmem:[#allocation37_spill] sm:$0xff] %v12781_v12 }
 0x9c9   : > { %4288 = vmatpush.msra.mxu0 %v12605_v24 }
 0x9ca   : > { %15083 = vst [vmem:[#allocation29_spill] sm:$0xff] %v12738_v41 }
 0x9cb   : > { %4291 = vmatpush.msra.mxu0 %v12656_v42 }
 0x9cd   : > { %4294 = vmatpush.msra.mxu0 %v12669_v45 }
 0x9d0   : > { %4078 = vmatmul.f32.vlgmr.msrb.gmra.mxu0 %v12506_v39  ;;  %4108 = vmatmul.f32.gmra.mxu1 %v3960_v7  ;;  %v3907_v39 = vld [vmem:[%s14756_s1 + $0x30] sm:$0xff] }
 0x9d1   : > { %v12672_v46 = vand.u32 4294901760, %v3907_v39 }
 0x9d3   : > { %v12685_v53 = vsub.f32 %v3907_v39, %v12672_v46  ;;  %4341 = vmatpush.msra.mxu1 %v12672_v46  ;;  %4145 = vmatpush.msra.mxu2 %v12672_v46  ;;  %v12740_v39 = vand.u32 4294901760, %v3903_v33 }
 0x9d5   : > { %v12700_v13 = vand.u32 4294901760, %v12685_v53  ;;  %4297 = vmatpush.msra.mxu0 %v12685_v53  ;;  %4343 = vmatpush.msra.mxu1 %v12688_v57  ;;  %v12757_v18 = vsub.f32 %v3903_v33, %v12740_v39 }
 0x9d6   : > { %4147 = vmatpush.msra.mxu2 %v12688_v57 }
 0x9d7   : > { %15077 = vst [vmem:[#allocation23_spill] sm:$0xff] %v12700_v13  ;;  %v4224_v25 = vsub.f32 %v12685_v53, %v12700_v13  ;;  %4300 = vmatpush.msra.mxu0 %v12703_v15  ;;  %4345 = vmatpush.msra.mxu1 %v12707_v16  ;;  %v12773_v10 = vand.u32 4294901760, %v12757_v18 }
 0x9d8   : > { %4082 = vmatmul.f32.gmra.mxu0 %v3960_v7  ;;  %v4218_v7 = vsub.f32 %v12669_v45, %v12682_v52  ;;  %4149 = vmatpush.msra.mxu2 %v12707_v16  ;;  %15087 = vst [vmem:[#allocation33_spill] sm:$0xff] %v12757_v18 }
 0x9d9   : > { %v12733_v35 = vand.u32 4294901760, %v4224_v25  ;;  %4303 = vmatpush.msra.mxu0 %v12725_v32  ;;  %4347 = vmatpush.msra.mxu1 %v12722_v30  ;;  %v12759_v25 = vand.u32 4294901760, %v3902_v51  ;;  %15088 = vst [vmem:[#allocation34_spill] sm:$0xff] %v12773_v10 }
 0x9da   : > { %v12714_v23 = vand.u32 4294901760, %v4218_v7  ;;  %v12754_v7 = vand.u32 4294901760, %v12738_v41  ;;  %4151 = vmatpush.msra.mxu2 %v12722_v30 }
 0x9db   : > { %15082 = vst [vmem:[#allocation28_spill] sm:$0xff] %v12733_v35  ;;  %4306 = vmatpush.msra.mxu0 %v12738_v41  ;;  %4349 = vmatpush.msra.mxu1 %v12740_v39  ;;  %v12776_v6 = vsub.f32 %v3902_v51, %v12759_v25  ;;  %v12793_v51 = vsub.f32 %v3901_v38, %v12778_v9 }
 0x9dc   : > { %15079 = vst [vmem:[#allocation25_spill] sm:$0xff] %v12714_v23  ;;  %4220 = vmatpush.msra.mxu3 %v12714_v23  ;;  %v4242_v33 = vsub.f32 %v12738_v41, %v12754_v7  ;;  %4153 = vmatpush.msra.mxu2 %v12740_v39  ;;  %v4248_v41 = vsub.f32 %v12757_v18, %v12773_v10 }
 0x9dd   : > { %15086 = vst [vmem:[#allocation32_spill] sm:$0xff] %v12754_v7  ;;  %4309 = vmatpush.msra.mxu0 %v12757_v18  ;;  %4351 = vmatpush.msra.mxu1 %v12759_v25  ;;  %v12790_v32 = vand.u32 4294901760, %v12776_v6  ;;  %v12803_v15 = vand.u32 4294901760, %v12793_v51 }
 0x9de   : > { %4226 = vmatpush.msra.mxu3 %v12733_v35  ;;  %15089 = vst [vmem:[#allocation35_spill] sm:$0xff] %v12776_v6  ;;  %v12785_v27 = vand.u32 4294901760, %v4242_v33  ;;  %4155 = vmatpush.msra.mxu2 %v12759_v25  ;;  %v12798_v14 = vand.u32 4294901760, %v4248_v41 }
 0x9df   : > { %15093 = vst [vmem:[#allocation39_spill] sm:$0xff] %v12790_v32  ;;  %4312 = vmatpush.msra.mxu0 %v12776_v6  ;;  %v4254_v33 = vsub.f32 %v12776_v6, %v12790_v32  ;;  %4353 = vmatpush.msra.mxu1 %v12778_v9  ;;  %v4260_v41 = vsub.f32 %v12793_v51, %v12803_v15 }
 0x9e0   : > { %4232 = vmatpush.msra.mxu3 %v12751_v61  ;;  %15092 = vst [vmem:[#allocation38_spill] sm:$0xff] %v12785_v27  ;;  %4157 = vmatpush.msra.mxu2 %v12778_v9 }
 0x9e1   : > { %15094 = vst [vmem:[#allocation40_spill] sm:$0xff] %v12793_v51  ;;  %4315 = vmatpush.msra.mxu0 %v12793_v51  ;;  %v12809_v38 = vand.u32 4294901760, %v4254_v33  ;;  %4513 = vmatpush.msrb.mxu1 %v12596_v21  ;;  %v12817_v6 = vand.u32 4294901760, %v4260_v41 }
 0x9e2   : > { %4238 = vmatpush.msra.mxu3 %v12781_v12  ;;  %15095 = vst [vmem:[#allocation41_spill] sm:$0xff] %v12798_v14  ;;  %4364 = vmatpush.msrb.mxu2 %v12568_v3 }
 0x9e3   : > { %15096 = vst [vmem:[#allocation42_spill] sm:$0xff] %v12803_v15  ;;  %4468 = vmatpush.msrb.mxu0 %v12520_v47  ;;  %4519 = vmatpush.msrb.mxu1 %v12598_v22 }
 0x9e4   : > { %4244 = vmatpush.msra.mxu3 %v12785_v27  ;;  %15097 = vst [vmem:[#allocation43_spill] sm:$0xff] %v12809_v38  ;;  %4368 = vmatpush.msrb.mxu2 %v12571_v4 }
 0x9e5   : > { %15098 = vst [vmem:[#allocation44_spill] sm:$0xff] %v12817_v6  ;;  %4470 = vmatpush.msrb.mxu0 %v12522_v48  ;;  %4525 = vmatpush.msrb.mxu1 %v12608_v26 }
 0x9e6   : > { %4250 = vmatpush.msra.mxu3 %v12798_v14  ;;  %4372 = vmatpush.msrb.mxu2 %v12575_v5 }
 0x9e7   : > { %4472 = vmatpush.msrb.mxu0 %v12524_v49  ;;  %4531 = vmatpush.msrb.mxu1 %v12618_v31 }
 0x9e8   : > { %4256 = vmatpush.msra.mxu3 %v12809_v38  ;;  %4376 = vmatpush.msrb.mxu2 %v12579_v11 }
 0x9e9   : > { %4474 = vmatpush.msrb.mxu0 %v12535_v54  ;;  %4537 = vmatpush.msrb.mxu1 %v12626_v34 }
 0x9ea   : > { %4262 = vmatpush.msra.mxu3 %v12817_v6  ;;  %4380 = vmatpush.msrb.mxu2 %v12590_v17 }
 0x9eb   : > { %4476 = vmatpush.msrb.mxu0 %v12537_v55  ;;  %4543 = vmatpush.msrb.mxu1 %v12633_v36 }
 0x9ec   : > { %4431 = vmatpush.msrb.mxu3 %v12520_v47  ;;  %4384 = vmatpush.msrb.mxu2 %v12594_v19 }
 0x9ed   : > { %4478 = vmatpush.msrb.mxu0 %v12539_v56  ;;  %4549 = vmatpush.msrb.mxu1 %v12639_v37 }
 0x9ee   : > { %4433 = vmatpush.msrb.mxu3 %v12522_v48  ;;  %4388 = vmatpush.msrb.mxu2 %v12614_v29 }
 0x9ef   : > { %4480 = vmatpush.msrb.mxu0 %v12564_v1  ;;  %4555 = vmatpush.msrb.mxu1 %v12695_v2 }
 0x9f0   : > { %4435 = vmatpush.msrb.mxu3 %v12524_v49  ;;  %4392 = vmatpush.msrb.mxu2 %v12666_v44 }
 0x9f1   : > { %4482 = vmatpush.msrb.mxu0 %v12650_v40  ;;  %4561 = vmatpush.msrb.mxu1 %v12714_v23 }
 0x9f2   : > { %4437 = vmatpush.msrb.mxu3 %v12535_v54  ;;  %4396 = vmatpush.msrb.mxu2 %v12682_v52 }
 0x9f3   : > { %4484 = vmatpush.msrb.mxu0 %v12658_v43  ;;  %4567 = vmatpush.msrb.mxu1 %v12733_v35 }
 0x9f4   : > { %4439 = vmatpush.msrb.mxu3 %v12537_v55  ;;  %4400 = vmatpush.msrb.mxu2 %v12700_v13 }
 0x9f5   : > { %4486 = vmatpush.msrb.mxu0 %v12672_v46  ;;  %4573 = vmatpush.msrb.mxu1 %v12751_v61 }
 0x9f6   : > { %4441 = vmatpush.msrb.mxu3 %v12539_v56  ;;  %4404 = vmatpush.msrb.mxu2 %v12719_v28 }
 0x9f7   : > { %4488 = vmatpush.msrb.mxu0 %v12688_v57  ;;  %4579 = vmatpush.msrb.mxu1 %v12781_v12 }
 0x9f8   : > { %4443 = vmatpush.msrb.mxu3 %v12564_v1  ;;  %4408 = vmatpush.msrb.mxu2 %v12743_v50 }
 0x9f9   : > { %4490 = vmatpush.msrb.mxu0 %v12707_v16  ;;  %4585 = vmatpush.msrb.mxu1 %v12785_v27 }
 0x9fa   : > { %4445 = vmatpush.msrb.mxu3 %v12650_v40  ;;  %4412 = vmatpush.msrb.mxu2 %v12754_v7 }
 0x9fb   : > { %4492 = vmatpush.msrb.mxu0 %v12722_v30  ;;  %4591 = vmatpush.msrb.mxu1 %v12798_v14 }
 0x9fc   : > { %4447 = vmatpush.msrb.mxu3 %v12658_v43  ;;  %4416 = vmatpush.msrb.mxu2 %v12773_v10 }
 0x9fd   : > { %4494 = vmatpush.msrb.mxu0 %v12740_v39  ;;  %4597 = vmatpush.msrb.mxu1 %v12809_v38 }
 0x9fe   : > { %4449 = vmatpush.msrb.mxu3 %v12672_v46  ;;  %4420 = vmatpush.msrb.mxu2 %v12790_v32 }
 0x9ff   : > { %4496 = vmatpush.msrb.mxu0 %v12759_v25  ;;  %4603 = vmatpush.msrb.mxu1 %v12817_v6 }
 0xa00   : > { %4451 = vmatpush.msrb.mxu3 %v12688_v57  ;;  %4424 = vmatpush.msrb.mxu2 %v12803_v15 }
 0xa01   : > { %4498 = vmatpush.msrb.mxu0 %v12778_v9 }
 0xa02   : > { %4453 = vmatpush.msrb.mxu3 %v12707_v16 }
 0xa04   : > { %4455 = vmatpush.msrb.mxu3 %v12722_v30 }
 0xa06   : > { %4457 = vmatpush.msrb.mxu3 %v12740_v39 }
 0xa08   : > { %4459 = vmatpush.msrb.mxu3 %v12759_v25 }
 0xa0a   : > { %4461 = vmatpush.msrb.mxu3 %v12778_v9 }
 0xa31   : > { %v3992_v33 = vpop.f32.mrf.mxu1 }
 0xa39   : > { %v3958_v41 = vpop.f32.mrf.mxu0  ;;  %v4020_v12 = vpop.f32.mrf.mxu2 }
 0xa3a   : > { %v3993_v27 = vadd.f32 %v3992_v33, %v3958_v41 }
 0xa3b   : > { %v4049_v35 = vpop.f32.mrf.mxu3 }
 0xa3c   : > { %v4021_v61 = vadd.f32 %v4020_v12, %v3993_v27 }
 0xa3d   : > { %v3996_v14 = vpop.f32.mrf.mxu1 }
 0xa3e   : > { %v4050_v23 = vadd.f32 %v4049_v35, %v4021_v61 }
 0xa45   : > { %v3966_v38 = vpop.f32.mrf.mxu0  ;;  %v4105_v37 = vpop.f32.mrf.mxu1 }
 0xa46   : > { %v3997_v2 = vadd.f32 %v3996_v14, %v3966_v38  ;;  %v4025_v6 = vpop.f32.mrf.mxu2  ;;  %v4811_v38 = vsel %vm171_vm0, %v12460_v20, 0  ;;  %v15100_v20 = vld [vmem:[#allocation27_spill] sm:$0xff] }
 0xa47   : > { %v4055_v21 = vpop.f32.mrf.mxu3 }
 0xa48   : > { %v4026_v31 = vadd.f32 %v4025_v6, %v3997_v2 }
 0xa4a   : > { %v4056_v51 = vadd.f32 %v4055_v21, %v4026_v31 }
 0xa4d   : > { %v4079_v36 = vpop.f32.mrf.mxu0  ;;  %v4109_v41 = vpop.f32.mrf.mxu1 }
 0xa4e   : > { %v4080_v34 = vadd.f32 %v4079_v36, %v4050_v23 }
 0xa50   : > { %v4106_v26 = vadd.f32 %v4105_v37, %v4080_v34 }
 0xa52   : > { %v4112_v22 = vmul.f32 %v12479_v8, %v4106_v26 }
 0xa54   : > { %v4113_v18 = vrot.slane %v4112_v22, 4 }
 0xa55   : > { %v4083_v15 = vpop.f32.mrf.mxu0 }
 0xa56   : > { %v4114_v32 = vadd.f32 %v4113_v18, %v4112_v22  ;;  %v4084_v33 = vadd.f32 %v4083_v15, %v4056_v51 }
 0xa58   : > { %v4115_v9 = vrot.slane %v4114_v32, 2  ;;  %v4110_v27 = vadd.f32 %v4109_v41, %v4084_v33  ;;  %v4833_v33 = vand.u32 4294901760, %v4811_v38  ;;  %v15099_v41 = vld [vmem:[#allocation24_spill] sm:$0xff] }
 0xa5a   : > { %v4116_v12 = vadd.f32 %v4115_v9, %v4114_v32  ;;  %v4119_v35 = vmul.f32 %v12479_v8, %v4110_v27  ;;  %v15101_v27 = vld [vmem:[#allocation36_spill] sm:$0xff] }
 0xa5c   : > { %v4117_v61 = vrot.slane %v4116_v12, 1  ;;  %v4120_v14 = vrot.slane %v4119_v35, 4 }
 0xa5e   : > { %v4118_v36 = vadd.f32 %v4117_v61, %v4116_v12  ;;  %v4121_v23 = vadd.f32 %v4120_v14, %v4119_v35  ;;  %v15102_v12 = vld [vmem:[#allocation39_spill] sm:$0xff]  ;;  %v4834_v35 = vsub.f32 %v4811_v38, %v4833_v33  ;;  %v15103_v61 = vld [vmem:[#allocation29_spill] sm:$0xff]  ;;  %v15104_v14 = vld [vmem:[#allocation6_spill] sm:$0xff] }
 0xa60   : > { %v4122_v6 = vrot.slane %v4121_v23, 2  ;;  %v4158_v34 = vand.u32 4294901760, %v4118_v36 }
 0xa62   : > { %v4123_v37 = vadd.f32 %v4122_v6, %v4121_v23  ;;  %4264 = vmatmul.f32.vlgmr.msra.gmra.mxu3 %v4158_v34  ;;  %v4159_v26 = vsub.f32 %v4118_v36, %v4158_v34  ;;  %v4814_v36 = vsel %vm171_vm0, %v15104_v14, 0  ;;  %v15105_v23 = vld [vmem:[#allocation42_spill] sm:$0xff]  ;;  %v15106_v6 = vld [vmem:[#allocation33_spill] sm:$0xff] }
 0xa63   : > { %4664 = vmatpush.msra.mxu3 %v12520_v47 }
 0xa64   : > { %v4124_v21 = vrot.slane %v4123_v37, 1  ;;  %4318 = vmatmul.f32.vlgmr.msra.gmra.mxu0 %v4159_v26  ;;  %v4160_v22 = vand.u32 4294901760, %v4159_v26 }
 0xa65   : > { %4666 = vmatpush.msra.mxu3 %v12522_v48  ;;  %4705 = vmatpush.msra.mxu0 %v12568_v3 }
 0xa66   : > { %v4125_v9 = vadd.f32 %v4124_v21, %v4123_v37  ;;  %4357 = vmatmul.f32.vlgmr.msra.gmra.mxu1 %v4160_v22  ;;  %v4161_v8 = vsub.f32 %v4159_v26, %v4160_v22  ;;  %v4835_v37 = vand.u32 4294901760, %v4834_v35  ;;  %v4841_v26 = vand.u32 4294901760, %v4814_v36  ;;  %v15108_v21 = vld [vmem:[#allocation35_spill] sm:$0xff]  ;;  %v15109_v22 = vld [vmem:[#allocation8_spill] sm:$0xff] }
 0xa67   : > { %4668 = vmatpush.msra.mxu3 %v12524_v49  ;;  %4709 = vmatpush.msra.mxu0 %v12571_v4 }
 0xa68   : > { %4772 = vmatpush.msra.mxu1 %v12520_v47  ;;  %v4162_v31 = vand.u32 4294901760, %v4161_v8  ;;  %v12890_v2 = vand.u32 4294901760, %v4125_v9 }
 0xa69   : > { %4670 = vmatpush.msra.mxu3 %v12535_v54  ;;  %4713 = vmatpush.msra.mxu0 %v12575_v5 }
 0xa6a   : > { %4774 = vmatpush.msra.mxu1 %v12522_v48  ;;  %4163 = vmatmul.f32.vlgmr.msra.gmra.mxu2 %v4162_v31  ;;  %v12896_v15 = vsub.f32 %v4125_v9, %v12890_v2  ;;  %v15110_v9 = vmov 1.0   ;;  %v15112_v31 = vld [vmem:[#allocation40_spill] sm:$0xff] }
 0xa6b   : > { %4463 = vmatmul.f32.vlgmr.msrb.gmra.mxu3 %v4158_v34  ;;  %4611 = vmatpush.msra.mxu2 %v12545_v58 }
 0xa6c   : > { %4672 = vmatpush.msra.mxu3 %v12537_v55  ;;  %4717 = vmatpush.msra.mxu0 %v12579_v11  ;;  %v4501_v32 = vand.u32 4294901760, %v12896_v15 }
 0xa6d   : > { %4776 = vmatpush.msra.mxu1 %v12524_v49  ;;  %4614 = vmatpush.msra.mxu2 %v12548_v59 }
 0xa6e   : > { %4674 = vmatpush.msra.mxu3 %v12539_v56  ;;  %4721 = vmatpush.msra.mxu0 %v12590_v17  ;;  %v4502_v18 = vsub.f32 %v12896_v15, %v4501_v32 }
 0xa6f   : > { %4778 = vmatpush.msra.mxu1 %v12535_v54  ;;  %4617 = vmatpush.msra.mxu2 %v12551_v60 }
 0xa70   : > { %4605 = vmatmul.f32.vlgmr.msrb.gmra.mxu1 %v12890_v2  ;;  %4676 = vmatpush.msra.mxu3 %v12564_v1  ;;  %v4503_v51 = vand.u32 4294901760, %v4502_v18  ;;  %v4842_v18 = vsub.f32 %v4814_v36, %v4841_v26 }
 0xa71   : > { %4725 = vmatpush.msra.mxu0 %v12594_v19  ;;  %4780 = vmatpush.msra.mxu1 %v12537_v55 }
 0xa72   : > { %4620 = vmatpush.msra.mxu2 %v12556_v62  ;;  %4678 = vmatpush.msra.mxu3 %v12650_v40  ;;  %v4843_v38 = vand.u32 4294901760, %v4842_v18 }
 0xa73   : > { %4729 = vmatpush.msra.mxu0 %v12614_v29  ;;  %4782 = vmatpush.msra.mxu1 %v12539_v56 }
 0xa74   : > { %4426 = vmatmul.f32.vlgmr.msrb.gmra.mxu2 %v4158_v34  ;;  %4504 = vmatmul.f32.vlgmr.msrb.gmra.mxu0 %v4503_v51  ;;  %v15107_v34 = vld [vmem:[#allocation10_spill] sm:$0xff]  ;;  %v4844_v14 = vsub.f32 %v4842_v18, %v4843_v38 }
 0xa75   : > { %4623 = vmatpush.msra.mxu2 %v12559_v63  ;;  %4680 = vmatpush.msra.mxu3 %v12658_v43 }
 0xa76   : > { %4733 = vmatpush.msra.mxu0 %v12666_v44  ;;  %4784 = vmatpush.msra.mxu1 %v12564_v1 }
 0xa77   : > { %4626 = vmatpush.msra.mxu2 %v12562_v0  ;;  %4682 = vmatpush.msra.mxu3 %v12672_v46 }
 0xa78   : > { %4737 = vmatpush.msra.mxu0 %v12682_v52  ;;  %4786 = vmatpush.msra.mxu1 %v12650_v40  ;;  %v14834_v52 = vmov 0  }
 0xa79   : > { %4629 = vmatpush.msra.mxu2 %v12605_v24  ;;  %4684 = vmatpush.msra.mxu3 %v12688_v57 }
 0xa7a   : > { %4741 = vmatpush.msra.mxu0 %v12700_v13  ;;  %4788 = vmatpush.msra.mxu1 %v12658_v43 }
 0xa7b   : > { %4632 = vmatpush.msra.mxu2 %v12656_v42  ;;  %4686 = vmatpush.msra.mxu3 %v12707_v16 }
 0xa7c   : > { %4745 = vmatpush.msra.mxu0 %v12719_v28  ;;  %4790 = vmatpush.msra.mxu1 %v12672_v46 }
 0xa7d   : > { %4635 = vmatpush.msra.mxu2 %v12669_v45  ;;  %4688 = vmatpush.msra.mxu3 %v12722_v30 }
 0xa7e   : > { %4749 = vmatpush.msra.mxu0 %v12743_v50  ;;  %4792 = vmatpush.msra.mxu1 %v12688_v57 }
 0xa7f   : > { %4638 = vmatpush.msra.mxu2 %v12685_v53  ;;  %4690 = vmatpush.msra.mxu3 %v12740_v39 }
 0xa80   : > { %4753 = vmatpush.msra.mxu0 %v12754_v7  ;;  %4794 = vmatpush.msra.mxu1 %v12707_v16  ;;  %v12983_v7 = vld [vmem:[%s12980_s7] sm:$0x1] }
 0xa81   : > { %4641 = vmatpush.msra.mxu2 %v15099_v41  ;;  %4692 = vmatpush.msra.mxu3 %v12759_v25  ;;  %15114 = vst [vmem:[#allocation24_spill] sm:$0xff] %v12983_v7 }
 0xa82   : > { %4757 = vmatpush.msra.mxu0 %v12773_v10  ;;  %4796 = vmatpush.msra.mxu1 %v12722_v30 }
 0xa83   : > { %4644 = vmatpush.msra.mxu2 %v15100_v20  ;;  %4694 = vmatpush.msra.mxu3 %v15101_v27 }
 0xa84   : > { %4761 = vmatpush.msra.mxu0 %v15102_v12  ;;  %4798 = vmatpush.msra.mxu1 %v12740_v39 }
 0xa85   : > { %4698 = vmatmul.f32.vlgmr.msra.gmra.mxu3 %v4501_v32  ;;  %4647 = vmatpush.msra.mxu2 %v15103_v61  ;;  %v4836_v32 = vsub.f32 %v4834_v35, %v4835_v37 }
 0xa86   : > { %4765 = vmatpush.msra.mxu0 %v15105_v23  ;;  %4800 = vmatpush.msra.mxu1 %v12759_v25 }
 0xa87   : > { %4767 = vmatmul.f32.vlgmr.msra.gmra.mxu0 %v12890_v2  ;;  %4650 = vmatpush.msra.mxu2 %v15106_v6  ;;  %v4837_v51 = vand.u32 4294901760, %v4836_v32 }
 0xa88   : > { %4802 = vmatpush.msra.mxu1 %v15101_v27  ;;  %4870 = vmatpush.msrb.mxu3 %v15107_v34  ;;  %v4845_v34 = vand.u32 4294901760, %v4844_v14 }
 0xa89   : > { %4804 = vmatmul.f32.vlgmr.msra.gmra.mxu1 %v12890_v2  ;;  %4653 = vmatpush.msra.mxu2 %v15108_v21  ;;  %v15113_v2 = vld [vmem:[#allocation9_spill] sm:$0xff] }
 0xa8a   : > { %4897 = vmatpush.msrb.mxu0 %v15109_v22  ;;  %12130 = vmatpush.msk.msrb.mxu1 %vm12473_vm1, %v15110_v9 }
 0xa8b   : > { %4656 = vmatpush.msra.mxu2 %v15112_v31  ;;  %12131 = vmatpush.msk.msra.mxu3 %vm12473_vm1, %v15110_v9 }
 0xa8c   : > { %4659 = vmatmul.f32.vlgmr.msra.gmra.mxu2 %v12896_v15 }
 0xa8d   : > { %12129 = vmatpush.msk.msrb.mxu2 %vm12473_vm1, %v15110_v9  ;;  %4872 = vmatmul.f32.vlgmr.msrb.gmra.mxu3 %v4833_v33 }
 0xa8f   : > { %4957 = vmatpush.msra.mxu2 %v15113_v2  ;;  %4900 = vmatmul.f32.vlgmr.msrb.gmra.mxu0 %v4834_v35 }
 0xa91   : > { %4929 = vmatmul.f32.vlgmr.msrb.gmra.mxu1 %v4835_v37 }
 0xa94   : > { %4838 = vmatmul.f32.vlgmr.msrb.gmra.mxu2 %v4837_v51 }
 0xa95   : > { %4876 = vmatmul.f32.gmra.mxu3 %v4841_v26 }
 0xa97   : > { %4905 = vmatmul.f32.gmra.mxu0 %v4842_v18 }
 0xa99   : > { %4935 = vmatmul.f32.gmra.mxu1 %v4843_v38 }
 0xa9c   : > { %4846 = vmatmul.f32.gmra.mxu2 %v4845_v34 }
 0xa9d   : > { %4985 = vmatmul.f32.vlgmr.msra.gmra.mxu3 %v4833_v33 }
 0xaa4   : > { %4959 = vmatmul.f32.vlgmr.msra.gmra.mxu2 %v4833_v33 }
 0xaa5   : > { %4989 = vmatmul.f32.gmra.mxu3 %v4841_v26 }
 0xaac   : > { %4963 = vmatmul.f32.gmra.mxu2 %v4841_v26 }
 0xae1   : > { %v4319_v22 = vpop.f32.mrf.mxu0 }
 0xae3   : > { %v4358_v35 = vpop.f32.mrf.mxu1 }
 0xae5   : > { %v4265_v15 = vpop.f32.mrf.mxu3 }
 0xaed   : > { %v4164_v36 = vpop.f32.mrf.mxu2  ;;  %v4606_v18 = vpop.f32.mrf.mxu1 }
 0xaee   : > { %v4464_v8 = vpop.f32.mrf.mxu3  ;;  %v4266_v37 = vadd.f32 %v4265_v15, %v4164_v36 }
 0xaf0   : > { %v4320_v14 = vadd.f32 %v4319_v22, %v4266_v37 }
 0xaf1   : > { %v4505_v2 = vpop.f32.mrf.mxu0 }
 0xaf2   : > { %v4607_v38 = vadd.f32 %v4606_v18, %v4505_v2  ;;  %v4359_v33 = vadd.f32 %v4358_v35, %v4320_v14 }
 0xaf7   : > { %v4427_v32 = vpop.f32.mrf.mxu2 }
 0xaf8   : > { %v4428_v23 = vadd.f32 %v4427_v32, %v4359_v33 }
 0xafa   : > { %v4465_v37 = vadd.f32 %v4464_v8, %v4428_v23 }
 0xb04   : > { %v4768_v12 = vpop.f32.mrf.mxu0 }
 0xb06   : > { %v4805_v10 = vpop.f32.mrf.mxu1 }
 0xb08   : > { %v4699_v51 = vpop.f32.mrf.mxu3 }
 0xb0e   : > { %v4930_v18 = vpop.f32.mrf.mxu1 }
 0xb0f   : > { %v4660_v34 = vpop.f32.mrf.mxu2 }
 0xb10   : > { %v4661_v9 = vadd.f32 %v4660_v34, %v4607_v38  ;;  %v4873_v15 = vpop.f32.mrf.mxu3 }
 0xb12   : > { %v4700_v26 = vadd.f32 %v4699_v51, %v4661_v9  ;;  %v4901_v9 = vpop.f32.mrf.mxu0 }
 0xb14   : > { %v4769_v36 = vadd.f32 %v4768_v12, %v4700_v26  ;;  %v4999_v12 = vld [vmem:[#allocation2 + $0x10] sm:$0xff] }
 0xb15   : > { %v5004_v14 = vsel %vm171_vm0, %v4999_v12, 0 }
 0xb16   : > { %v12985_v22 = vadd.f32 %v4805_v10, %v4769_v36  ;;  %v12996_v8 = vand.u32 4294901760, %v5004_v14  ;;  %v5000_v36 = vld [vmem:[#allocation2 + $0x18] sm:$0xff] }
 0xb17   : > { %v4839_v2 = vpop.f32.mrf.mxu2  ;;  %v5007_v28 = vsel %vm171_vm0, %v5000_v36, 0 }
 0xb18   : > { %15115 = vst [vmem:[#allocation6_spill] sm:$0xff] %v12985_v22  ;;  %vm4809_vm2 = vcmp.lt.f32.partialorder %v12983_v7, %v12985_v22  ;;  %v4877_v32 = vpop.f32.mrf.mxu3  ;;  %v4874_v10 = vadd.f32 %v4873_v15, %v4839_v2  ;;  %v13004_v12 = vand.u32 4294901760, %v5007_v28 }
 0xb19   : > { %v12993_v35 = vsel %vm4809_vm2, %v12985_v22, %v4465_v37  ;;  %v5027_v37 = vsub.f32 %v5004_v14, %v12996_v8  ;;  %v4993_v15 = vsel %vm4809_vm2, 1, %v14834_v52  ;;  %v15139_v52 = vld [vmem:[#allocation21_spill] sm:$0xff] }
 0xb1a   : > { %15116 = vst [vmem:[#allocation10_spill] sm:$0xff] %v12993_v35  ;;  %v4906_v34 = vpop.f32.mrf.mxu0  ;;  %v4902_v26 = vadd.f32 %v4901_v9, %v4874_v10  ;;  %v4936_v35 = vpop.f32.mrf.mxu1 }
 0xb1c   : > { %v4931_v13 = vadd.f32 %v4930_v18, %v4902_v26  ;;  %v5035_v18 = vsub.f32 %v5007_v28, %v13004_v12  ;;  %v15120_v28 = vld [vmem:[#allocation12_spill] sm:$0xff] }
 0xb1f   : > { %v4847_v51 = vpop.f32.mrf.mxu2 }
 0xb20   : > { %v4986_v38 = vpop.f32.mrf.mxu3  ;;  %v4878_v23 = vadd.f32 %v4877_v32, %v4847_v51  ;;  %v5028_v51 = vand.u32 4294901760, %v5027_v37 }
 0xb22   : > { %v4907_v50 = vadd.f32 %v4906_v34, %v4878_v23  ;;  %v4994_v23 = vperm.slane %v4993_v15, 0  ;;  %v5029_v29 = vsub.f32 %v5027_v37, %v5028_v51 }
 0xb24   : > { %v4937_v2 = vadd.f32 %v4936_v35, %v4907_v50  ;;  %vm4995_vm3 = vcmp.eq.s32.totalorder %v4994_v23, 1  ;;  %v5030_v50 = vand.u32 4294901760, %v5029_v29  ;;  %v15128_v23 = vld [vmem:[#allocation22_spill] sm:$0xff] }
 0xb27   : > { %v4960_v33 = vpop.f32.mrf.mxu2 }
 0xb28   : > { %v4961_v32 = vadd.f32 %v4960_v33, %v4931_v13  ;;  %v4990_v10 = vpop.f32.mrf.mxu3  ;;  %v5036_v13 = vand.u32 4294901760, %v5035_v18  ;;  %v15121_v33 = vld [vmem:[#allocation13_spill] sm:$0xff] }
 0xb2a   : > { %v4987_v14 = vadd.f32 %v4986_v38, %v4961_v32  ;;  %v5037_v29 = vsub.f32 %v5035_v18, %v5036_v13 }
 0xb2c   : > { %v5038_v32 = vand.u32 4294901760, %v5037_v29  ;;  %v15135_v29 = vld [vmem:[#allocation43_spill] sm:$0xff] }
 0xb2f   : > { %v4964_v9 = vpop.f32.mrf.mxu2 }
 0xb30   : > { %v4965_v34 = vadd.f32 %v4964_v9, %v4937_v2  ;;  %v15123_v2 = vld [vmem:[#allocation14_spill] sm:$0xff] }
 0xb31   : > { %v15126_v9 = vld [vmem:[#allocation18_spill] sm:$0xff] }
 0xb32   : > { %v4991_v44 = vadd.f32 %v4990_v10, %v4965_v34  ;;  %v15127_v10 = vld [vmem:[#allocation19_spill] sm:$0xff]  ;;  %v15129_v34 = vld [vmem:[#allocation25_spill] sm:$0xff] }
 0xb34   : > { %v13007_v26 = vsel %vm4995_vm3, %v4991_v44, %v4987_v14  ;;  %v15130_v14 = vld [vmem:[#allocation28_spill] sm:$0xff] }
 0xb35   : > { %v13010_v36 = vand.u32 4294901760, %v13007_v26 }
 0xb37   : > { %15117 = vst [vmem:[#allocation8_spill] sm:$0xff] %v13010_v36  ;;  %5025 = vmatpush.msra.mxu0 %v13010_v36  ;;  %5118 = vmatpush.msrb.mxu3 %v13010_v36  ;;  %v13016_v35 = vsub.f32 %v13007_v26, %v13010_v36 }
 0xb38   : > { %5031 = vmatmul.f32.vlgmr.msra.gmra.mxu0 %v5030_v50  ;;  %5122 = vmatmul.f32.vlgmr.msrb.gmra.mxu3 %v5028_v51  ;;  %v15125_v51 = vld [vmem:[#allocation17_spill] sm:$0xff] }
 0xb39   : > { %15118 = vst [vmem:[#allocation7_spill] sm:$0xff] %v13016_v35  ;;  %5090 = vmatpush.msrb.mxu2 %v13016_v35  ;;  %v13020_v44 = vand.u32 4294901760, %v13016_v35  ;;  %5246 = vmatpush.msra.mxu3 %v15120_v28  ;;  %v15132_v50 = vld [vmem:[#allocation37_spill] sm:$0xff] }
 0xb3a   : > { %5093 = vmatmul.f32.vlgmr.msrb.gmra.mxu2 %v5027_v37  ;;  %v15124_v37 = vld [vmem:[#allocation16_spill] sm:$0xff] }
 0xb3b   : > { %15119 = vst [vmem:[#allocation9_spill] sm:$0xff] %v13020_v44  ;;  %5150 = vmatpush.msrb.mxu0 %v13020_v44  ;;  %v5061_v38 = vsub.f32 %v13016_v35, %v13020_v44  ;;  %5252 = vmatpush.msra.mxu3 %v15121_v33 }
 0xb3c   : > { %5201 = vmatpush.msra.mxu2 %v12520_v47 }
 0xb3d   : > { %5344 = vmatpush.msra.mxu0 %v12545_v58  ;;  %v13029_v15 = vand.u32 4294901760, %v5061_v38  ;;  %5258 = vmatpush.msra.mxu3 %v15123_v2  ;;  %v15136_v38 = vld [vmem:[#allocation44_spill] sm:$0xff] }
 0xb3e   : > { %5203 = vmatpush.msra.mxu2 %v12522_v48 }
 0xb3f   : > { %15122 = vst [vmem:[#allocation45_spill] sm:$0xff] %v13029_v15  ;;  %5347 = vmatpush.msra.mxu0 %v12548_v59  ;;  %5063 = vmatpush.msra.mxu1 %v13029_v15 }
 0xb40   : > { %5264 = vmatpush.msra.mxu3 %v15124_v37  ;;  %5039 = vmatmul.f32.gmra.mxu0 %v5038_v32  ;;  %v15138_v32 = vld [vmem:[#allocation20_spill] sm:$0xff] }
 0xb41   : > { %5065 = vmatmul.f32.vlgmr.msra.gmra.mxu1 %v12996_v8  ;;  %5128 = vmatmul.f32.gmra.mxu3 %v5036_v13  ;;  %v15133_v13 = vld [vmem:[#allocation38_spill] sm:$0xff] }
 0xb42   : > { %5176 = vmatpush.msrb.mxu1 %v13010_v36  ;;  %5098 = vmatmul.f32.gmra.mxu2 %v5035_v18  ;;  %v15131_v18 = vld [vmem:[#allocation31_spill] sm:$0xff] }
 0xb43   : > { %5350 = vmatpush.msra.mxu0 %v12551_v60  ;;  %5270 = vmatpush.msra.mxu3 %v15125_v51 }
 0xb44   : > { %5397 = vmatpush.msra.mxu1 %v12520_v47  ;;  %5205 = vmatpush.msra.mxu2 %v12524_v49 }
 0xb45   : > { %5353 = vmatpush.msra.mxu0 %v12556_v62  ;;  %5276 = vmatpush.msra.mxu3 %v15126_v9 }
 0xb46   : > { %5399 = vmatpush.msra.mxu1 %v12522_v48  ;;  %5207 = vmatpush.msra.mxu2 %v12535_v54 }
 0xb47   : > { %5356 = vmatpush.msra.mxu0 %v12559_v63  ;;  %5282 = vmatpush.msra.mxu3 %v15127_v10 }
 0xb48   : > { %5401 = vmatpush.msra.mxu1 %v12524_v49  ;;  %5152 = vmatmul.f32.vlgmr.msrb.gmra.mxu0 %v12996_v8 }
 0xb49   : > { %5069 = vmatmul.f32.gmra.mxu1 %v13004_v12  ;;  %5359 = vmatpush.msra.mxu0 %v12562_v0 }
 0xb4a   : > { %5403 = vmatpush.msra.mxu1 %v12535_v54  ;;  %5288 = vmatpush.msra.mxu3 %v15128_v23 }
 0xb4b   : > { %5209 = vmatpush.msra.mxu2 %v12537_v55  ;;  %5362 = vmatpush.msra.mxu0 %v12605_v24 }
 0xb4c   : > { %5405 = vmatpush.msra.mxu1 %v12537_v55  ;;  %5294 = vmatpush.msra.mxu3 %v15129_v34 }
 0xb4d   : > { %5211 = vmatpush.msra.mxu2 %v12539_v56  ;;  %5365 = vmatpush.msra.mxu0 %v12656_v42 }
 0xb4e   : > { %5407 = vmatpush.msra.mxu1 %v12539_v56  ;;  %5300 = vmatpush.msra.mxu3 %v15130_v14 }
 0xb4f   : > { %5213 = vmatpush.msra.mxu2 %v12564_v1  ;;  %5368 = vmatpush.msra.mxu0 %v12669_v45 }
 0xb50   : > { %5409 = vmatpush.msra.mxu1 %v12564_v1  ;;  %5156 = vmatmul.f32.gmra.mxu0 %v13004_v12 }
 0xb51   : > { %5178 = vmatmul.f32.vlgmr.msrb.gmra.mxu1 %v12996_v8  ;;  %5306 = vmatpush.msra.mxu3 %v15131_v18  ;;  %v15134_v8 = vld [vmem:[#allocation41_spill] sm:$0xff] }
 0xb52   : > { %5411 = vmatpush.msra.mxu1 %v12650_v40  ;;  %5371 = vmatpush.msra.mxu0 %v12685_v53 }
 0xb53   : > { %5215 = vmatpush.msra.mxu2 %v12650_v40  ;;  %5312 = vmatpush.msra.mxu3 %v15132_v50 }
 0xb54   : > { %5413 = vmatpush.msra.mxu1 %v12658_v43  ;;  %5374 = vmatpush.msra.mxu0 %v15099_v41 }
 0xb55   : > { %5217 = vmatpush.msra.mxu2 %v12658_v43  ;;  %5318 = vmatpush.msra.mxu3 %v15133_v13 }
 0xb56   : > { %5415 = vmatpush.msra.mxu1 %v12672_v46  ;;  %5377 = vmatpush.msra.mxu0 %v15100_v20 }
 0xb57   : > { %5219 = vmatpush.msra.mxu2 %v12672_v46  ;;  %5324 = vmatpush.msra.mxu3 %v15134_v8 }
 0xb58   : > { %5417 = vmatpush.msra.mxu1 %v12688_v57  ;;  %5380 = vmatpush.msra.mxu0 %v15103_v61 }
 0xb59   : > { %5182 = vmatmul.f32.gmra.mxu1 %v13004_v12  ;;  %5221 = vmatpush.msra.mxu2 %v12688_v57  ;;  %v15137_v12 = vld [vmem:[#allocation15_spill] sm:$0xff] }
 0xb5a   : > { %5419 = vmatpush.msra.mxu1 %v12707_v16  ;;  %5330 = vmatpush.msra.mxu3 %v15135_v29 }
 0xb5b   : > { %5383 = vmatpush.msra.mxu0 %v15106_v6  ;;  %5223 = vmatpush.msra.mxu2 %v12707_v16 }
 0xb5c   : > { %5421 = vmatpush.msra.mxu1 %v12722_v30  ;;  %5336 = vmatpush.msra.mxu3 %v15136_v38 }
 0xb5d   : > { %5386 = vmatpush.msra.mxu0 %v15108_v21  ;;  %5225 = vmatpush.msra.mxu2 %v12722_v30 }
 0xb5e   : > { %5423 = vmatpush.msra.mxu1 %v12740_v39  ;;  %5505 = vmatpush.msrb.mxu3 %v12520_v47 }
 0xb5f   : > { %5389 = vmatpush.msra.mxu0 %v15112_v31  ;;  %5227 = vmatpush.msra.mxu2 %v12740_v39 }
 0xb60   : > { %5425 = vmatpush.msra.mxu1 %v12759_v25  ;;  %5507 = vmatpush.msrb.mxu3 %v12522_v48 }
 0xb61   : > { %5542 = vmatpush.msrb.mxu0 %v12520_v47  ;;  %5229 = vmatpush.msra.mxu2 %v12759_v25 }
 0xb62   : > { %5427 = vmatpush.msra.mxu1 %v15101_v27  ;;  %5509 = vmatpush.msrb.mxu3 %v12524_v49 }
 0xb63   : > { %5544 = vmatpush.msrb.mxu0 %v12522_v48  ;;  %5231 = vmatpush.msra.mxu2 %v15101_v27 }
 0xb64   : > { %5587 = vmatpush.msrb.mxu1 %v15120_v28  ;;  %5511 = vmatpush.msrb.mxu3 %v12535_v54 }
 0xb65   : > { %5546 = vmatpush.msrb.mxu0 %v12524_v49  ;;  %5438 = vmatpush.msrb.mxu2 %v12568_v3 }
 0xb66   : > { %5593 = vmatpush.msrb.mxu1 %v15121_v33  ;;  %5513 = vmatpush.msrb.mxu3 %v12537_v55 }
 0xb67   : > { %5548 = vmatpush.msrb.mxu0 %v12535_v54  ;;  %5442 = vmatpush.msrb.mxu2 %v12571_v4 }
 0xb68   : > { %5599 = vmatpush.msrb.mxu1 %v15123_v2  ;;  %5515 = vmatpush.msrb.mxu3 %v12539_v56 }
 0xb69   : > { %5550 = vmatpush.msrb.mxu0 %v12537_v55  ;;  %5446 = vmatpush.msrb.mxu2 %v12575_v5 }
 0xb6a   : > { %5605 = vmatpush.msrb.mxu1 %v15124_v37  ;;  %5517 = vmatpush.msrb.mxu3 %v12564_v1 }
 0xb6b   : > { %5552 = vmatpush.msrb.mxu0 %v12539_v56  ;;  %5450 = vmatpush.msrb.mxu2 %v12579_v11 }
 0xb6c   : > { %5611 = vmatpush.msrb.mxu1 %v15125_v51  ;;  %5519 = vmatpush.msrb.mxu3 %v12650_v40 }
 0xb6d   : > { %5554 = vmatpush.msrb.mxu0 %v12564_v1  ;;  %5454 = vmatpush.msrb.mxu2 %v12590_v17 }
 0xb6e   : > { %5617 = vmatpush.msrb.mxu1 %v15126_v9  ;;  %5521 = vmatpush.msrb.mxu3 %v12658_v43 }
 0xb6f   : > { %5556 = vmatpush.msrb.mxu0 %v12650_v40  ;;  %5458 = vmatpush.msrb.mxu2 %v12594_v19 }
 0xb70   : > { %5623 = vmatpush.msrb.mxu1 %v15127_v10  ;;  %5523 = vmatpush.msrb.mxu3 %v12672_v46  ;;  %v15145_v10 = vld [vmem:[#allocation39_spill] sm:$0xff] }
 0xb71   : > { %5558 = vmatpush.msrb.mxu0 %v12658_v43  ;;  %5462 = vmatpush.msrb.mxu2 %v15137_v12 }
 0xb72   : > { %5629 = vmatpush.msrb.mxu1 %v15128_v23  ;;  %5525 = vmatpush.msrb.mxu3 %v12688_v57  ;;  %v15140_v23 = vld [vmem:[#allocation23_spill] sm:$0xff] }
 0xb73   : > { %5560 = vmatpush.msrb.mxu0 %v12672_v46  ;;  %5466 = vmatpush.msrb.mxu2 %v15138_v32 }
 0xb74   : > { %5635 = vmatpush.msrb.mxu1 %v15129_v34  ;;  %5527 = vmatpush.msrb.mxu3 %v12707_v16  ;;  %v15141_v34 = vld [vmem:[#allocation26_spill] sm:$0xff] }
 0xb75   : > { %5562 = vmatpush.msrb.mxu0 %v12688_v57  ;;  %5470 = vmatpush.msrb.mxu2 %v15139_v52 }
 0xb76   : > { %5641 = vmatpush.msrb.mxu1 %v15130_v14  ;;  %5529 = vmatpush.msrb.mxu3 %v12722_v30  ;;  %v15142_v14 = vld [vmem:[#allocation30_spill] sm:$0xff] }
 0xb77   : > { %5564 = vmatpush.msrb.mxu0 %v12707_v16  ;;  %5474 = vmatpush.msrb.mxu2 %v15140_v23 }
 0xb78   : > { %5647 = vmatpush.msrb.mxu1 %v15131_v18  ;;  %5531 = vmatpush.msrb.mxu3 %v12740_v39  ;;  %v15143_v18 = vld [vmem:[#allocation32_spill] sm:$0xff] }
 0xb79   : > { %5566 = vmatpush.msrb.mxu0 %v12722_v30  ;;  %5478 = vmatpush.msrb.mxu2 %v15141_v34 }
 0xb7a   : > { %5653 = vmatpush.msrb.mxu1 %v15132_v50  ;;  %5533 = vmatpush.msrb.mxu3 %v12759_v25  ;;  %v15144_v50 = vld [vmem:[#allocation34_spill] sm:$0xff] }
 0xb7b   : > { %5568 = vmatpush.msrb.mxu0 %v12740_v39  ;;  %5482 = vmatpush.msrb.mxu2 %v15142_v14 }
 0xb7c   : > { %5659 = vmatpush.msrb.mxu1 %v15133_v13  ;;  %5535 = vmatpush.msrb.mxu3 %v15101_v27  ;;  %v15146_v13 = vld [vmem:[#allocation42_spill] sm:$0xff] }
 0xb7d   : > { %5570 = vmatpush.msrb.mxu0 %v12759_v25  ;;  %5486 = vmatpush.msrb.mxu2 %v15143_v18 }
 0xb7e   : > { %5665 = vmatpush.msrb.mxu1 %v15134_v8 }
 0xb7f   : > { %5572 = vmatpush.msrb.mxu0 %v15101_v27  ;;  %5490 = vmatpush.msrb.mxu2 %v15144_v50 }
 0xb80   : > { %5671 = vmatpush.msrb.mxu1 %v15135_v29 }
 0xb81   : > { %5494 = vmatpush.msrb.mxu2 %v15145_v10 }
 0xb82   : > { %5677 = vmatpush.msrb.mxu1 %v15136_v38 }
 0xb83   : > { %5498 = vmatpush.msrb.mxu2 %v15146_v13 }
 0xbb5   : > { %v5032_v9 = vpop.f32.mrf.mxu0 }
 0xbbb   : > { %v5123_v22 = vpop.f32.mrf.mxu3 }
 0xbbd   : > { %v5040_v51 = vpop.f32.mrf.mxu0  ;;  %v5094_v33 = vpop.f32.mrf.mxu2 }
 0xbbe   : > { %v5066_v37 = vpop.f32.mrf.mxu1 }
 0xbbf   : > { %v5067_v2 = vadd.f32 %v5066_v37, %v5032_v9 }
 0xbc1   : > { %v5095_v28 = vadd.f32 %v5094_v33, %v5067_v2 }
 0xbc3   : > { %v5124_v31 = vadd.f32 %v5123_v22, %v5095_v28 }
 0xbc4   : > { %v5129_v15 = vpop.f32.mrf.mxu3 }
 0xbc5   : > { %v5153_v7 = vpop.f32.mrf.mxu0  ;;  %v5099_v21 = vpop.f32.mrf.mxu2 }
 0xbc6   : > { %v5070_v8 = vpop.f32.mrf.mxu1  ;;  %v5154_v29 = vadd.f32 %v5153_v7, %v5124_v31 }
 0xbc7   : > { %v5071_v44 = vadd.f32 %v5070_v8, %v5040_v51 }
 0xbc9   : > { %v5100_v6 = vadd.f32 %v5099_v21, %v5071_v44 }
 0xbcb   : > { %v5130_v61 = vadd.f32 %v5129_v15, %v5100_v6 }
 0xbcd   : > { %v5157_v13 = vpop.f32.mrf.mxu0 }
 0xbce   : > { %v5179_v35 = vpop.f32.mrf.mxu1  ;;  %v5158_v27 = vadd.f32 %v5157_v13, %v5130_v61 }
 0xbcf   : > { %v5180_v38 = vadd.f32 %v5179_v35, %v5154_v29 }
 0xbd1   : > { %v5186_v36 = vmul.f32 %v5180_v38, %v13007_v26  ;;  %v12132_v38 = vld [vmem:[%s14755_s0 + $0x30] sm:$0xff] }
 0xbd3   : > { %v5187_v10 = vrot.slane %v5186_v36, 4 }
 0xbd5   : > { %v5188_v37 = vadd.f32 %v5187_v10, %v5186_v36 }
 0xbd6   : > { %v5183_v9 = vpop.f32.mrf.mxu1 }
 0xbd7   : > { %v5189_v20 = vrot.slane %v5188_v37, 2  ;;  %v5184_v33 = vadd.f32 %v5183_v9, %v5158_v27 }
 0xbd9   : > { %v5190_v2 = vadd.f32 %v5189_v20, %v5188_v37  ;;  %v5193_v51 = vmul.f32 %v5184_v33, %v13007_v26  ;;  %v5886_v37 = vsel %vm171_vm0, %v12132_v38, 0  ;;  %v15147_v33 = vld [vmem:[#allocation27_spill] sm:$0xff] }
 0xbda   : > { %v5908_v9 = vand.u32 4294901760, %v5886_v37 }
 0xbdb   : > { %v5191_v22 = vrot.slane %v5190_v2, 1  ;;  %v5194_v7 = vrot.slane %v5193_v51, 4 }
 0xbdd   : > { %v5192_v31 = vadd.f32 %v5191_v22, %v5190_v2  ;;  %v5195_v28 = vadd.f32 %v5194_v7, %v5193_v51  ;;  %v15148_v2 = vld [vmem:[#allocation36_spill] sm:$0xff]  ;;  %v12133_v51 = vld [vmem:[%s14755_s0 + $0x38] sm:$0xff]  ;;  %v15150_v7 = vld [vmem:[#allocation29_spill] sm:$0xff] }
 0xbde   : > { %v15149_v22 = vld [vmem:[#allocation39_spill] sm:$0xff] }
 0xbdf   : > { %v5232_v21 = vand.u32 4294901760, %v5192_v31  ;;  %v5196_v35 = vrot.slane %v5195_v28, 2 }
 0xbe1   : > { %v5233_v44 = vsub.f32 %v5192_v31, %v5232_v21  ;;  %v5197_v8 = vadd.f32 %v5196_v35, %v5195_v28  ;;  %5338 = vmatmul.f32.vlgmr.msra.gmra.mxu3 %v5232_v21  ;;  %v5909_v31 = vsub.f32 %v5886_v37, %v5908_v9  ;;  %v15151_v28 = vld [vmem:[#allocation45_spill] sm:$0xff]  ;;  %v5889_v35 = vsel %vm171_vm0, %v12133_v51, 0 }
 0xbe2   : > { %5738 = vmatpush.msra.mxu3 %v12520_v47 }
 0xbe3   : > { %v5198_v6 = vrot.slane %v5197_v8, 1  ;;  %5392 = vmatmul.f32.vlgmr.msra.gmra.mxu0 %v5233_v44  ;;  %v5234_v61 = vand.u32 4294901760, %v5233_v44 }
 0xbe4   : > { %5740 = vmatpush.msra.mxu3 %v12522_v48  ;;  %5779 = vmatpush.msra.mxu0 %v12568_v3 }
 0xbe5   : > { %v5199_v20 = vadd.f32 %v5198_v6, %v5197_v8  ;;  %5431 = vmatmul.f32.vlgmr.msra.gmra.mxu1 %v5234_v61  ;;  %v5235_v27 = vsub.f32 %v5233_v44, %v5234_v61  ;;  %v15153_v44 = vld [vmem:[#allocation8_spill] sm:$0xff]  ;;  %v15154_v8 = vld [vmem:[#allocation33_spill] sm:$0xff]  ;;  %v15155_v6 = vld [vmem:[#allocation7_spill] sm:$0xff]  ;;  %v5910_v61 = vand.u32 4294901760, %v5909_v31 }
 0xbe6   : > { %5742 = vmatpush.msra.mxu3 %v12524_v49  ;;  %5783 = vmatpush.msra.mxu0 %v12571_v4 }
 0xbe7   : > { %v13170_v26 = vand.u32 4294901760, %v5199_v20  ;;  %5846 = vmatpush.msra.mxu1 %v12520_v47  ;;  %v5236_v36 = vand.u32 4294901760, %v5235_v27  ;;  %v15156_v27 = vld [vmem:[#allocation35_spill] sm:$0xff] }
 0xbe8   : > { %5744 = vmatpush.msra.mxu3 %v12535_v54  ;;  %5787 = vmatpush.msra.mxu0 %v12575_v5 }
 0xbe9   : > { %v13176_v15 = vsub.f32 %v5199_v20, %v13170_v26  ;;  %5848 = vmatpush.msra.mxu1 %v12522_v48  ;;  %5237 = vmatmul.f32.vlgmr.msra.gmra.mxu2 %v5236_v36  ;;  %v5916_v20 = vand.u32 4294901760, %v5889_v35  ;;  %v15157_v36 = vld [vmem:[#allocation40_spill] sm:$0xff] }
 0xbea   : > { %5537 = vmatmul.f32.vlgmr.msrb.gmra.mxu3 %v5232_v21  ;;  %5685 = vmatpush.msra.mxu2 %v12545_v58 }
 0xbeb   : > { %5746 = vmatpush.msra.mxu3 %v12537_v55  ;;  %5791 = vmatpush.msra.mxu0 %v12579_v11  ;;  %v5575_v10 = vand.u32 4294901760, %v13176_v15 }
 0xbec   : > { %5850 = vmatpush.msra.mxu1 %v12524_v49  ;;  %5688 = vmatpush.msra.mxu2 %v12548_v59 }
 0xbed   : > { %5748 = vmatpush.msra.mxu3 %v12539_v56  ;;  %5795 = vmatpush.msra.mxu0 %v12590_v17  ;;  %v5576_v13 = vsub.f32 %v13176_v15, %v5575_v10 }
 0xbee   : > { %5852 = vmatpush.msra.mxu1 %v12535_v54  ;;  %5691 = vmatpush.msra.mxu2 %v12551_v60 }
 0xbef   : > { %5679 = vmatmul.f32.vlgmr.msrb.gmra.mxu1 %v13170_v26  ;;  %5750 = vmatpush.msra.mxu3 %v12564_v1  ;;  %v5577_v29 = vand.u32 4294901760, %v5576_v13  ;;  %v5917_v13 = vsub.f32 %v5889_v35, %v5916_v20 }
 0xbf0   : > { %5799 = vmatpush.msra.mxu0 %v12594_v19  ;;  %5854 = vmatpush.msra.mxu1 %v12537_v55 }
 0xbf1   : > { %5694 = vmatpush.msra.mxu2 %v12556_v62  ;;  %5752 = vmatpush.msra.mxu3 %v12650_v40  ;;  %v5918_v37 = vand.u32 4294901760, %v5917_v13 }
 0xbf2   : > { %5803 = vmatpush.msra.mxu0 %v15137_v12  ;;  %5856 = vmatpush.msra.mxu1 %v12539_v56 }
 0xbf3   : > { %5500 = vmatmul.f32.vlgmr.msrb.gmra.mxu2 %v5232_v21  ;;  %5578 = vmatmul.f32.vlgmr.msrb.gmra.mxu0 %v5577_v29  ;;  %v15152_v21 = vld [vmem:[#allocation42_spill] sm:$0xff]  ;;  %v15158_v29 = vld [vmem:[#allocation9_spill] sm:$0xff] }
 0xbf4   : > { %5697 = vmatpush.msra.mxu2 %v12559_v63  ;;  %5754 = vmatpush.msra.mxu3 %v12658_v43 }
 0xbf5   : > { %5807 = vmatpush.msra.mxu0 %v15138_v32  ;;  %5858 = vmatpush.msra.mxu1 %v12564_v1 }
 0xbf6   : > { %5700 = vmatpush.msra.mxu2 %v12562_v0  ;;  %5756 = vmatpush.msra.mxu3 %v12672_v46 }
 0xbf7   : > { %5811 = vmatpush.msra.mxu0 %v15139_v52  ;;  %5860 = vmatpush.msra.mxu1 %v12650_v40  ;;  %v15159_v52 = vld [vmem:[#allocation10_spill] sm:$0xff] }
 0xbf8   : > { %5703 = vmatpush.msra.mxu2 %v12605_v24  ;;  %5758 = vmatpush.msra.mxu3 %v12688_v57 }
 0xbf9   : > { %5815 = vmatpush.msra.mxu0 %v15140_v23  ;;  %5862 = vmatpush.msra.mxu1 %v12658_v43 }
 0xbfa   : > { %5706 = vmatpush.msra.mxu2 %v12656_v42  ;;  %5760 = vmatpush.msra.mxu3 %v12707_v16 }
 0xbfb   : > { %5819 = vmatpush.msra.mxu0 %v15141_v34  ;;  %5864 = vmatpush.msra.mxu1 %v12672_v46 }
 0xbfc   : > { %5709 = vmatpush.msra.mxu2 %v12669_v45  ;;  %5762 = vmatpush.msra.mxu3 %v12722_v30 }
 0xbfd   : > { %5823 = vmatpush.msra.mxu0 %v15142_v14  ;;  %5866 = vmatpush.msra.mxu1 %v12688_v57 }
 0xbfe   : > { %5712 = vmatpush.msra.mxu2 %v12685_v53  ;;  %5764 = vmatpush.msra.mxu3 %v12740_v39 }
 0xbff   : > { %5827 = vmatpush.msra.mxu0 %v15143_v18  ;;  %5868 = vmatpush.msra.mxu1 %v12707_v16 }
 0xc00   : > { %5715 = vmatpush.msra.mxu2 %v15099_v41  ;;  %5766 = vmatpush.msra.mxu3 %v12759_v25 }
 0xc01   : > { %5831 = vmatpush.msra.mxu0 %v15144_v50  ;;  %5870 = vmatpush.msra.mxu1 %v12722_v30 }
 0xc02   : > { %5718 = vmatpush.msra.mxu2 %v15147_v33  ;;  %5768 = vmatpush.msra.mxu3 %v15148_v2 }
 0xc03   : > { %5835 = vmatpush.msra.mxu0 %v15149_v22  ;;  %5872 = vmatpush.msra.mxu1 %v12740_v39 }
 0xc04   : > { %5772 = vmatmul.f32.vlgmr.msra.gmra.mxu3 %v5575_v10  ;;  %5721 = vmatpush.msra.mxu2 %v15150_v7  ;;  %v5911_v10 = vsub.f32 %v5909_v31, %v5910_v61 }
 0xc05   : > { %5945 = vmatpush.msrb.mxu3 %v15151_v28  ;;  %5839 = vmatpush.msra.mxu0 %v15152_v21 }
 0xc06   : > { %5874 = vmatpush.msra.mxu1 %v12759_v25  ;;  %5841 = vmatmul.f32.vlgmr.msra.gmra.mxu0 %v13170_v26  ;;  %v5912_v38 = vand.u32 4294901760, %v5911_v10 }
 0xc07   : > { %6058 = vmatpush.msra.mxu3 %v15153_v44  ;;  %5724 = vmatpush.msra.mxu2 %v15154_v8 }
 0xc08   : > { %5972 = vmatpush.msrb.mxu0 %v15155_v6  ;;  %5876 = vmatpush.msra.mxu1 %v15148_v2 }
 0xc09   : > { %5878 = vmatmul.f32.vlgmr.msra.gmra.mxu1 %v13170_v26  ;;  %5727 = vmatpush.msra.mxu2 %v15156_v27  ;;  %v5919_v26 = vsub.f32 %v5917_v13, %v5918_v37 }
 0xc0a   : > { %6000 = vmatpush.msrb.mxu1 %v15153_v44 }
 0xc0b   : > { %5730 = vmatpush.msra.mxu2 %v15157_v36  ;;  %v5920_v51 = vand.u32 4294901760, %v5919_v26 }
 0xc0c   : > { %5733 = vmatmul.f32.vlgmr.msra.gmra.mxu2 %v13176_v15  ;;  %5947 = vmatmul.f32.vlgmr.msrb.gmra.mxu3 %v5908_v9 }
 0xc0d   : > { %5907 = vmatpush.msrb.mxu2 %v15153_v44 }
 0xc0e   : > { %5975 = vmatmul.f32.vlgmr.msrb.gmra.mxu0 %v5909_v31 }
 0xc0f   : > { %6032 = vmatpush.msra.mxu2 %v15158_v29 }
 0xc11   : > { %6004 = vmatmul.f32.vlgmr.msrb.gmra.mxu1 %v5910_v61 }
 0xc14   : > { %5913 = vmatmul.f32.vlgmr.msrb.gmra.mxu2 %v5912_v38  ;;  %5951 = vmatmul.f32.gmra.mxu3 %v5916_v20 }
 0xc16   : > { %5980 = vmatmul.f32.gmra.mxu0 %v5917_v13 }
 0xc19   : > { %6010 = vmatmul.f32.gmra.mxu1 %v5918_v37 }
 0xc1c   : > { %5921 = vmatmul.f32.gmra.mxu2 %v5920_v51  ;;  %6060 = vmatmul.f32.vlgmr.msra.gmra.mxu3 %v5908_v9 }
 0xc24   : > { %6034 = vmatmul.f32.vlgmr.msra.gmra.mxu2 %v5908_v9  ;;  %6064 = vmatmul.f32.gmra.mxu3 %v5916_v20 }
 0xc2c   : > { %6038 = vmatmul.f32.gmra.mxu2 %v5916_v20  ;;  %v5882_v20 = vld [vmem:[%s12980_s7 + $0x1] sm:$0x1] }
 0xc2d   : > { %v5883_v32 = vmul.f32 %v5882_v20, %v15159_v52  ;;  %v6075_v20 = vld [vmem:[#allocation2 + $0x28] sm:$0xff] }
 0xc60   : > { %v5393_v35 = vpop.f32.mrf.mxu0 }
 0xc62   : > { %v5432_v44 = vpop.f32.mrf.mxu1 }
 0xc64   : > { %v5339_v15 = vpop.f32.mrf.mxu3 }
 0xc6c   : > { %v5238_v28 = vpop.f32.mrf.mxu2  ;;  %v5680_v38 = vpop.f32.mrf.mxu1 }
 0xc6d   : > { %v5538_v31 = vpop.f32.mrf.mxu3  ;;  %v5340_v10 = vadd.f32 %v5339_v15, %v5238_v28 }
 0xc6f   : > { %v5394_v21 = vadd.f32 %v5393_v35, %v5340_v10  ;;  %v15161_v35 = vmov 1.0  }
 0xc70   : > { %v5579_v61 = vpop.f32.mrf.mxu0 }
 0xc71   : > { %v5681_v13 = vadd.f32 %v5680_v38, %v5579_v61  ;;  %v5433_v51 = vadd.f32 %v5432_v44, %v5394_v21 }
 0xc76   : > { %v5501_v6 = vpop.f32.mrf.mxu2 }
 0xc77   : > { %v5502_v9 = vadd.f32 %v5501_v6, %v5433_v51  ;;  %v6082_v6 = vsel %vm171_vm0, %v6075_v20, 0 }
 0xc79   : > { %v5539_v12 = vadd.f32 %v5538_v31, %v5502_v9  ;;  %v6074_v31 = vld [vmem:[#allocation2 + $0x20] sm:$0xff] }
 0xc83   : > { %v5842_v50 = vpop.f32.mrf.mxu0 }
 0xc86   : > { %v5879_v34 = vpop.f32.mrf.mxu1 }
 0xc87   : > { %v5773_v29 = vpop.f32.mrf.mxu3 }
 0xc8e   : > { %v6005_v61 = vpop.f32.mrf.mxu1 }
 0xc8f   : > { %v5734_v26 = vpop.f32.mrf.mxu2  ;;  %v5948_v18 = vpop.f32.mrf.mxu3 }
 0xc90   : > { %v5735_v37 = vadd.f32 %v5734_v26, %v5681_v13 }
 0xc92   : > { %v5774_v22 = vadd.f32 %v5773_v29, %v5735_v37 }
 0xc94   : > { %v5843_v14 = vadd.f32 %v5842_v50, %v5774_v22  ;;  %v4998_v50 = vsel %vm4809_vm2, 0.0, %v15161_v35  ;;  %vm12009_vm2 = vcmask 1044480  }
 0xc96   : > { %v5880_v23 = vadd.f32 %v5879_v34, %v5843_v14  ;;  %v5976_v34 = vpop.f32.mrf.mxu0  ;;  %v6011_v44 = vpop.f32.mrf.mxu1 }
 0xc97   : > { %v5914_v15 = vpop.f32.mrf.mxu2  ;;  %v5952_v52 = vpop.f32.mrf.mxu3 }
 0xc98   : > { %vm5884_vm4 = vcmp.lt.f32.partialorder %v5883_v32, %v5880_v23  ;;  %v5949_v29 = vadd.f32 %v5948_v18, %v5914_v15 }
 0xc99   : > { %v13257_v28 = vsel %vm5884_vm4, %v5880_v23, %v5539_v12  ;;  %v6073_v10 = vsel %vm5884_vm4, 0.0, %v15161_v35  ;;  %v6079_v12 = vsel %vm171_vm0, %v6074_v31, 0 }
 0xc9a   : > { %15160 = vst [vmem:[#allocation45_spill] sm:$0xff] %v13257_v28  ;;  %v11981_v21 = vrot.slane %v6073_v10, 7  ;;  %v13268_v26 = vand.u32 4294901760, %v6079_v12  ;;  %v5977_v9 = vadd.f32 %v5976_v34, %v5949_v29 }
 0xc9c   : > { %v13265_v22 = vsel %vm12001_vm5, %v4998_v50, %v11981_v21  ;;  %v6102_v21 = vsub.f32 %v6079_v12, %v13268_v26  ;;  %v6006_v50 = vadd.f32 %v6005_v61, %v5977_v9  ;;  %v15170_v9 = vld [vmem:[#allocation13_spill] sm:$0xff]  ;;  %vm12011_vm5 = vcmask 1045504  }
 0xc9d   : > { %15164 = vst [vmem:[#allocation8_spill] sm:$0xff] %v13265_v22  ;;  %v15165_v22 = vmov 0  }
 0xc9e   : > { %v5981_v37 = vpop.f32.mrf.mxu0  ;;  %v6068_v35 = vsel %vm5884_vm4, 1, %v15165_v22  ;;  %v6103_v15 = vand.u32 4294901760, %v6102_v21 }
 0xc9f   : > { %v5922_v14 = vpop.f32.mrf.mxu2  ;;  %v6061_v38 = vpop.f32.mrf.mxu3  ;;  %v6069_v19 = vperm.slane %v6068_v35, 0 }
 0xca0   : > { %v5953_v13 = vadd.f32 %v5952_v52, %v5922_v14  ;;  %v13274_v52 = vand.u32 4294901760, %v6082_v6 }
 0xca1   : > { %vm6070_vm6 = vcmp.eq.s32.totalorder %v6069_v19, 1 }
 0xca2   : > { %v5982_v10 = vadd.f32 %v5981_v37, %v5953_v13  ;;  %v6104_v37 = vsub.f32 %v6102_v21, %v6103_v15  ;;  %v6110_v12 = vsub.f32 %v6082_v6, %v13274_v52 }
 0xca4   : > { %v6012_v31 = vadd.f32 %v6011_v44, %v5982_v10  ;;  %v6105_v32 = vand.u32 4294901760, %v6104_v37  ;;  %v6111_v61 = vand.u32 4294901760, %v6110_v12  ;;  %v15172_v44 = vld [vmem:[#allocation14_spill] sm:$0xff] }
 0xca5   : > { %v15182_v37 = vld [vmem:[#allocation38_spill] sm:$0xff] }
 0xca7   : > { %v6035_v51 = vpop.f32.mrf.mxu2  ;;  %v6065_v28 = vpop.f32.mrf.mxu3 }
 0xca8   : > { %v6036_v18 = vadd.f32 %v6035_v51, %v6006_v50  ;;  %v15174_v50 = vld [vmem:[#allocation17_spill] sm:$0xff] }
 0xcaa   : > { %v6062_v29 = vadd.f32 %v6061_v38, %v6036_v18  ;;  %v6112_v38 = vsub.f32 %v6110_v12, %v6111_v61  ;;  %v15176_v18 = vld [vmem:[#allocation19_spill] sm:$0xff] }
 0xcac   : > { %v6113_v6 = vand.u32 4294901760, %v6112_v38  ;;  %v15188_v38 = vld [vmem:[#allocation20_spill] sm:$0xff] }
 0xcaf   : > { %v6039_v14 = vpop.f32.mrf.mxu2 }
 0xcb0   : > { %v6040_v34 = vadd.f32 %v6039_v14, %v6012_v31  ;;  %v15175_v31 = vld [vmem:[#allocation18_spill] sm:$0xff]  ;;  %v15178_v14 = vld [vmem:[#allocation25_spill] sm:$0xff] }
 0xcb2   : > { %v6066_v13 = vadd.f32 %v6065_v28, %v6040_v34  ;;  %v15169_v28 = vld [vmem:[#allocation12_spill] sm:$0xff] }
 0xcb3   : > { %v15179_v34 = vld [vmem:[#allocation28_spill] sm:$0xff] }
 0xcb4   : > { %v13277_v20 = vsel %vm6070_vm6, %v6066_v13, %v6062_v29  ;;  %v15180_v29 = vld [vmem:[#allocation31_spill] sm:$0xff]  ;;  %v15181_v13 = vld [vmem:[#allocation37_spill] sm:$0xff] }
 0xcb5   : > { %v13280_v23 = vand.u32 4294901760, %v13277_v20 }
 0xcb7   : > { %15166 = vst [vmem:[#allocation7_spill] sm:$0xff] %v13280_v23  ;;  %6100 = vmatpush.msra.mxu0 %v13280_v23  ;;  %6193 = vmatpush.msrb.mxu3 %v13280_v23  ;;  %v13286_v35 = vsub.f32 %v13277_v20, %v13280_v23 }
 0xcb8   : > { %6106 = vmatmul.f32.vlgmr.msra.gmra.mxu0 %v6105_v32  ;;  %6197 = vmatmul.f32.vlgmr.msrb.gmra.mxu3 %v6103_v15  ;;  %v15177_v15 = vld [vmem:[#allocation22_spill] sm:$0xff]  ;;  %v15185_v32 = vld [vmem:[#allocation44_spill] sm:$0xff] }
 0xcb9   : > { %15167 = vst [vmem:[#allocation9_spill] sm:$0xff] %v13286_v35  ;;  %6165 = vmatpush.msrb.mxu2 %v13286_v35  ;;  %v13290_v19 = vand.u32 4294901760, %v13286_v35  ;;  %6321 = vmatpush.msra.mxu3 %v15169_v28 }
 0xcba   : > { %6168 = vmatmul.f32.vlgmr.msrb.gmra.mxu2 %v6102_v21  ;;  %v15173_v21 = vld [vmem:[#allocation16_spill] sm:$0xff] }
 0xcbb   : > { %15168 = vst [vmem:[#allocation10_spill] sm:$0xff] %v13290_v19  ;;  %6225 = vmatpush.msrb.mxu0 %v13290_v19  ;;  %v6136_v51 = vsub.f32 %v13286_v35, %v13290_v19  ;;  %6327 = vmatpush.msra.mxu3 %v15170_v9 }
 0xcbc   : > { %6276 = vmatpush.msra.mxu2 %v12520_v47 }
 0xcbd   : > { %6419 = vmatpush.msra.mxu0 %v12545_v58  ;;  %v13299_v10 = vand.u32 4294901760, %v6136_v51  ;;  %6333 = vmatpush.msra.mxu3 %v15172_v44  ;;  %v15189_v51 = vld [vmem:[#allocation21_spill] sm:$0xff] }
 0xcbe   : > { %6278 = vmatpush.msra.mxu2 %v12522_v48 }
 0xcbf   : > { %15171 = vst [vmem:[#allocation24_spill] sm:$0xff] %v13299_v10  ;;  %6422 = vmatpush.msra.mxu0 %v12548_v59  ;;  %6138 = vmatpush.msra.mxu1 %v13299_v10 }
 0xcc0   : > { %6339 = vmatpush.msra.mxu3 %v15173_v21  ;;  %6114 = vmatmul.f32.gmra.mxu0 %v6113_v6  ;;  %v15190_v6 = vld [vmem:[#allocation23_spill] sm:$0xff] }
 0xcc1   : > { %6140 = vmatmul.f32.vlgmr.msra.gmra.mxu1 %v13268_v26  ;;  %6203 = vmatmul.f32.gmra.mxu3 %v6111_v61  ;;  %v15187_v61 = vld [vmem:[#allocation15_spill] sm:$0xff] }
 0xcc2   : > { %6251 = vmatpush.msrb.mxu1 %v13280_v23  ;;  %6173 = vmatmul.f32.gmra.mxu2 %v6110_v12  ;;  %v15184_v12 = vld [vmem:[#allocation43_spill] sm:$0xff] }
 0xcc3   : > { %6425 = vmatpush.msra.mxu0 %v12551_v60  ;;  %6345 = vmatpush.msra.mxu3 %v15174_v50 }
 0xcc4   : > { %6472 = vmatpush.msra.mxu1 %v12520_v47  ;;  %6280 = vmatpush.msra.mxu2 %v12524_v49 }
 0xcc5   : > { %6428 = vmatpush.msra.mxu0 %v12556_v62  ;;  %6351 = vmatpush.msra.mxu3 %v15175_v31 }
 0xcc6   : > { %6474 = vmatpush.msra.mxu1 %v12522_v48  ;;  %6282 = vmatpush.msra.mxu2 %v12535_v54 }
 0xcc7   : > { %6431 = vmatpush.msra.mxu0 %v12559_v63  ;;  %6357 = vmatpush.msra.mxu3 %v15176_v18 }
 0xcc8   : > { %6476 = vmatpush.msra.mxu1 %v12524_v49  ;;  %6227 = vmatmul.f32.vlgmr.msrb.gmra.mxu0 %v13268_v26 }
 0xcc9   : > { %6144 = vmatmul.f32.gmra.mxu1 %v13274_v52  ;;  %6434 = vmatpush.msra.mxu0 %v12562_v0 }
 0xcca   : > { %6478 = vmatpush.msra.mxu1 %v12535_v54  ;;  %6363 = vmatpush.msra.mxu3 %v15177_v15 }
 0xccb   : > { %6284 = vmatpush.msra.mxu2 %v12537_v55  ;;  %6437 = vmatpush.msra.mxu0 %v12605_v24 }
 0xccc   : > { %6480 = vmatpush.msra.mxu1 %v12537_v55  ;;  %6369 = vmatpush.msra.mxu3 %v15178_v14 }
 0xccd   : > { %6286 = vmatpush.msra.mxu2 %v12539_v56  ;;  %6440 = vmatpush.msra.mxu0 %v12656_v42 }
 0xcce   : > { %6482 = vmatpush.msra.mxu1 %v12539_v56  ;;  %6375 = vmatpush.msra.mxu3 %v15179_v34 }
 0xccf   : > { %6288 = vmatpush.msra.mxu2 %v12564_v1  ;;  %6443 = vmatpush.msra.mxu0 %v12669_v45 }
 0xcd0   : > { %6484 = vmatpush.msra.mxu1 %v12564_v1  ;;  %6231 = vmatmul.f32.gmra.mxu0 %v13274_v52 }
 0xcd1   : > { %6253 = vmatmul.f32.vlgmr.msrb.gmra.mxu1 %v13268_v26  ;;  %6381 = vmatpush.msra.mxu3 %v15180_v29  ;;  %v15183_v26 = vld [vmem:[#allocation41_spill] sm:$0xff] }
 0xcd2   : > { %6486 = vmatpush.msra.mxu1 %v12650_v40  ;;  %6446 = vmatpush.msra.mxu0 %v12685_v53 }
 0xcd3   : > { %6290 = vmatpush.msra.mxu2 %v12650_v40  ;;  %6387 = vmatpush.msra.mxu3 %v15181_v13 }
 0xcd4   : > { %6488 = vmatpush.msra.mxu1 %v12658_v43  ;;  %6449 = vmatpush.msra.mxu0 %v15099_v41 }
 0xcd5   : > { %6292 = vmatpush.msra.mxu2 %v12658_v43  ;;  %6393 = vmatpush.msra.mxu3 %v15182_v37 }
 0xcd6   : > { %6490 = vmatpush.msra.mxu1 %v12672_v46  ;;  %6452 = vmatpush.msra.mxu0 %v15147_v33 }
 0xcd7   : > { %6294 = vmatpush.msra.mxu2 %v12672_v46  ;;  %6399 = vmatpush.msra.mxu3 %v15183_v26 }
 0xcd8   : > { %6492 = vmatpush.msra.mxu1 %v12688_v57  ;;  %6455 = vmatpush.msra.mxu0 %v15150_v7 }
 0xcd9   : > { %6257 = vmatmul.f32.gmra.mxu1 %v13274_v52  ;;  %6296 = vmatpush.msra.mxu2 %v12688_v57  ;;  %v15186_v52 = vld [vmem:[#allocation11_spill] sm:$0xff] }
 0xcda   : > { %6494 = vmatpush.msra.mxu1 %v12707_v16  ;;  %6405 = vmatpush.msra.mxu3 %v15184_v12 }
 0xcdb   : > { %6458 = vmatpush.msra.mxu0 %v15154_v8  ;;  %6298 = vmatpush.msra.mxu2 %v12707_v16 }
 0xcdc   : > { %6496 = vmatpush.msra.mxu1 %v12722_v30  ;;  %6411 = vmatpush.msra.mxu3 %v15185_v32 }
 0xcdd   : > { %6461 = vmatpush.msra.mxu0 %v15156_v27  ;;  %6300 = vmatpush.msra.mxu2 %v12722_v30 }
 0xcde   : > { %6498 = vmatpush.msra.mxu1 %v12740_v39  ;;  %6580 = vmatpush.msrb.mxu3 %v12520_v47 }
 0xcdf   : > { %6464 = vmatpush.msra.mxu0 %v15157_v36  ;;  %6302 = vmatpush.msra.mxu2 %v12740_v39 }
 0xce0   : > { %6500 = vmatpush.msra.mxu1 %v12759_v25  ;;  %6582 = vmatpush.msrb.mxu3 %v12522_v48 }
 0xce1   : > { %6617 = vmatpush.msrb.mxu0 %v12520_v47  ;;  %6304 = vmatpush.msra.mxu2 %v12759_v25 }
 0xce2   : > { %6502 = vmatpush.msra.mxu1 %v15148_v2  ;;  %6584 = vmatpush.msrb.mxu3 %v12524_v49 }
 0xce3   : > { %6619 = vmatpush.msrb.mxu0 %v12522_v48  ;;  %6306 = vmatpush.msra.mxu2 %v15148_v2 }
 0xce4   : > { %6662 = vmatpush.msrb.mxu1 %v15169_v28  ;;  %6586 = vmatpush.msrb.mxu3 %v12535_v54 }
 0xce5   : > { %6621 = vmatpush.msrb.mxu0 %v12524_v49  ;;  %6513 = vmatpush.msrb.mxu2 %v12568_v3 }
 0xce6   : > { %6668 = vmatpush.msrb.mxu1 %v15170_v9  ;;  %6588 = vmatpush.msrb.mxu3 %v12537_v55 }
 0xce7   : > { %6623 = vmatpush.msrb.mxu0 %v12535_v54  ;;  %6517 = vmatpush.msrb.mxu2 %v12571_v4 }
 0xce8   : > { %6674 = vmatpush.msrb.mxu1 %v15172_v44  ;;  %6590 = vmatpush.msrb.mxu3 %v12539_v56 }
 0xce9   : > { %6625 = vmatpush.msrb.mxu0 %v12537_v55  ;;  %6521 = vmatpush.msrb.mxu2 %v12575_v5 }
 0xcea   : > { %6680 = vmatpush.msrb.mxu1 %v15173_v21  ;;  %6592 = vmatpush.msrb.mxu3 %v12564_v1 }
 0xceb   : > { %6627 = vmatpush.msrb.mxu0 %v12539_v56  ;;  %6525 = vmatpush.msrb.mxu2 %v12579_v11 }
 0xcec   : > { %6686 = vmatpush.msrb.mxu1 %v15174_v50  ;;  %6594 = vmatpush.msrb.mxu3 %v12650_v40 }
 0xced   : > { %6629 = vmatpush.msrb.mxu0 %v12564_v1  ;;  %6529 = vmatpush.msrb.mxu2 %v12590_v17 }
 0xcee   : > { %6692 = vmatpush.msrb.mxu1 %v15175_v31  ;;  %6596 = vmatpush.msrb.mxu3 %v12658_v43 }
 0xcef   : > { %6631 = vmatpush.msrb.mxu0 %v12650_v40  ;;  %6533 = vmatpush.msrb.mxu2 %v15186_v52 }
 0xcf0   : > { %6698 = vmatpush.msrb.mxu1 %v15176_v18  ;;  %6598 = vmatpush.msrb.mxu3 %v12672_v46 }
 0xcf1   : > { %6633 = vmatpush.msrb.mxu0 %v12658_v43  ;;  %6537 = vmatpush.msrb.mxu2 %v15187_v61 }
 0xcf2   : > { %6704 = vmatpush.msrb.mxu1 %v15177_v15  ;;  %6600 = vmatpush.msrb.mxu3 %v12688_v57  ;;  %v15195_v15 = vld [vmem:[#allocation39_spill] sm:$0xff] }
 0xcf3   : > { %6635 = vmatpush.msrb.mxu0 %v12672_v46  ;;  %6541 = vmatpush.msrb.mxu2 %v15188_v38 }
 0xcf4   : > { %6710 = vmatpush.msrb.mxu1 %v15178_v14  ;;  %6602 = vmatpush.msrb.mxu3 %v12707_v16  ;;  %v15191_v14 = vld [vmem:[#allocation26_spill] sm:$0xff] }
 0xcf5   : > { %6637 = vmatpush.msrb.mxu0 %v12688_v57  ;;  %6545 = vmatpush.msrb.mxu2 %v15189_v51 }
 0xcf6   : > { %6716 = vmatpush.msrb.mxu1 %v15179_v34  ;;  %6604 = vmatpush.msrb.mxu3 %v12722_v30  ;;  %v15192_v34 = vld [vmem:[#allocation30_spill] sm:$0xff] }
 0xcf7   : > { %6639 = vmatpush.msrb.mxu0 %v12707_v16  ;;  %6549 = vmatpush.msrb.mxu2 %v15190_v6 }
 0xcf8   : > { %6722 = vmatpush.msrb.mxu1 %v15180_v29  ;;  %6606 = vmatpush.msrb.mxu3 %v12740_v39  ;;  %v15193_v29 = vld [vmem:[#allocation32_spill] sm:$0xff] }
 0xcf9   : > { %6641 = vmatpush.msrb.mxu0 %v12722_v30  ;;  %6553 = vmatpush.msrb.mxu2 %v15191_v14 }
 0xcfa   : > { %6728 = vmatpush.msrb.mxu1 %v15181_v13  ;;  %6608 = vmatpush.msrb.mxu3 %v12759_v25  ;;  %v15194_v13 = vld [vmem:[#allocation34_spill] sm:$0xff] }
 0xcfb   : > { %6643 = vmatpush.msrb.mxu0 %v12740_v39  ;;  %6557 = vmatpush.msrb.mxu2 %v15192_v34 }
 0xcfc   : > { %6734 = vmatpush.msrb.mxu1 %v15182_v37  ;;  %6610 = vmatpush.msrb.mxu3 %v15148_v2  ;;  %v15196_v37 = vld [vmem:[#allocation42_spill] sm:$0xff] }
 0xcfd   : > { %6645 = vmatpush.msrb.mxu0 %v12759_v25  ;;  %6561 = vmatpush.msrb.mxu2 %v15193_v29 }
 0xcfe   : > { %6740 = vmatpush.msrb.mxu1 %v15183_v26 }
 0xcff   : > { %6647 = vmatpush.msrb.mxu0 %v15148_v2  ;;  %6565 = vmatpush.msrb.mxu2 %v15194_v13 }
 0xd00   : > { %6746 = vmatpush.msrb.mxu1 %v15184_v12 }
 0xd01   : > { %6569 = vmatpush.msrb.mxu2 %v15195_v15 }
 0xd02   : > { %6752 = vmatpush.msrb.mxu1 %v15185_v32 }
 0xd03   : > { %6573 = vmatpush.msrb.mxu2 %v15196_v37 }
 0xd35   : > { %v6107_v18 = vpop.f32.mrf.mxu0 }
 0xd3b   : > { %v6198_v28 = vpop.f32.mrf.mxu3 }
 0xd3d   : > { %v6115_v31 = vpop.f32.mrf.mxu0  ;;  %v6169_v44 = vpop.f32.mrf.mxu2 }
 0xd3e   : > { %v6141_v50 = vpop.f32.mrf.mxu1 }
 0xd3f   : > { %v6142_v21 = vadd.f32 %v6141_v50, %v6107_v18 }
 0xd41   : > { %v6170_v9 = vadd.f32 %v6169_v44, %v6142_v21 }
 0xd43   : > { %v6199_v36 = vadd.f32 %v6198_v28, %v6170_v9 }
 0xd44   : > { %v6204_v10 = vpop.f32.mrf.mxu3 }
 0xd45   : > { %v6228_v22 = vpop.f32.mrf.mxu0  ;;  %v6174_v27 = vpop.f32.mrf.mxu2 }
 0xd46   : > { %v6145_v26 = vpop.f32.mrf.mxu1  ;;  %v6229_v12 = vadd.f32 %v6228_v22, %v6199_v36 }
 0xd47   : > { %v6146_v19 = vadd.f32 %v6145_v26, %v6115_v31 }
 0xd49   : > { %v6175_v8 = vadd.f32 %v6174_v27, %v6146_v19 }
 0xd4b   : > { %v6205_v7 = vadd.f32 %v6204_v10, %v6175_v8 }
 0xd4d   : > { %v6232_v37 = vpop.f32.mrf.mxu0 }
 0xd4e   : > { %v6254_v35 = vpop.f32.mrf.mxu1  ;;  %v6233_v2 = vadd.f32 %v6232_v37, %v6205_v7 }
 0xd4f   : > { %v6255_v32 = vadd.f32 %v6254_v35, %v6229_v12 }
 0xd51   : > { %v6261_v23 = vmul.f32 %v6255_v32, %v13277_v20  ;;  %v12134_v32 = vld [vmem:[%s14755_s0 + $0x50] sm:$0xff] }
 0xd53   : > { %v6262_v15 = vrot.slane %v6261_v23, 4 }
 0xd55   : > { %v6263_v50 = vadd.f32 %v6262_v15, %v6261_v23 }
 0xd56   : > { %v6258_v18 = vpop.f32.mrf.mxu1 }
 0xd57   : > { %v6264_v33 = vrot.slane %v6263_v50, 2  ;;  %v6259_v44 = vadd.f32 %v6258_v18, %v6233_v2 }
 0xd59   : > { %v6265_v21 = vadd.f32 %v6264_v33, %v6263_v50  ;;  %v6268_v31 = vmul.f32 %v6259_v44, %v13277_v20  ;;  %v6961_v50 = vsel %vm171_vm0, %v12134_v32, 0  ;;  %v15197_v44 = vld [vmem:[#allocation27_spill] sm:$0xff] }
 0xd5a   : > { %v6983_v18 = vand.u32 4294901760, %v6961_v50 }
 0xd5b   : > { %v6266_v28 = vrot.slane %v6265_v21, 1  ;;  %v6269_v36 = vrot.slane %v6268_v31, 4 }
 0xd5d   : > { %v6267_v22 = vadd.f32 %v6266_v28, %v6265_v21  ;;  %v6270_v9 = vadd.f32 %v6269_v36, %v6268_v31  ;;  %v15198_v21 = vld [vmem:[#allocation36_spill] sm:$0xff]  ;;  %v12135_v31 = vld [vmem:[%s14755_s0 + $0x58] sm:$0xff]  ;;  %v15200_v36 = vld [vmem:[#allocation29_spill] sm:$0xff] }
 0xd5e   : > { %v15199_v28 = vld [vmem:[#allocation39_spill] sm:$0xff] }
 0xd5f   : > { %v6307_v27 = vand.u32 4294901760, %v6267_v22  ;;  %v6271_v35 = vrot.slane %v6270_v9, 2 }
 0xd61   : > { %v6308_v19 = vsub.f32 %v6267_v22, %v6307_v27  ;;  %v6272_v26 = vadd.f32 %v6271_v35, %v6270_v9  ;;  %6413 = vmatmul.f32.vlgmr.msra.gmra.mxu3 %v6307_v27  ;;  %v6984_v22 = vsub.f32 %v6961_v50, %v6983_v18  ;;  %v15201_v9 = vld [vmem:[#allocation24_spill] sm:$0xff]  ;;  %v6964_v35 = vsel %vm171_vm0, %v12135_v31, 0 }
 0xd62   : > { %6813 = vmatpush.msra.mxu3 %v12520_v47 }
 0xd63   : > { %v6273_v8 = vrot.slane %v6272_v26, 1  ;;  %6467 = vmatmul.f32.vlgmr.msra.gmra.mxu0 %v6308_v19  ;;  %v6309_v7 = vand.u32 4294901760, %v6308_v19 }
 0xd64   : > { %6815 = vmatpush.msra.mxu3 %v12522_v48  ;;  %6854 = vmatpush.msra.mxu0 %v12568_v3 }
 0xd65   : > { %v6274_v33 = vadd.f32 %v6273_v8, %v6272_v26  ;;  %6506 = vmatmul.f32.vlgmr.msra.gmra.mxu1 %v6309_v7  ;;  %v6310_v2 = vsub.f32 %v6308_v19, %v6309_v7  ;;  %v15203_v19 = vld [vmem:[#allocation7_spill] sm:$0xff]  ;;  %v15204_v26 = vld [vmem:[#allocation33_spill] sm:$0xff]  ;;  %v6985_v7 = vand.u32 4294901760, %v6984_v22 }
 0xd66   : > { %6817 = vmatpush.msra.mxu3 %v12524_v49  ;;  %6858 = vmatpush.msra.mxu0 %v12571_v4  ;;  %v15205_v8 = vld [vmem:[#allocation9_spill] sm:$0xff] }
 0xd67   : > { %v13440_v20 = vand.u32 4294901760, %v6274_v33  ;;  %6921 = vmatpush.msra.mxu1 %v12520_v47  ;;  %v6311_v23 = vand.u32 4294901760, %v6310_v2  ;;  %v15206_v2 = vld [vmem:[#allocation35_spill] sm:$0xff] }
 0xd68   : > { %6819 = vmatpush.msra.mxu3 %v12535_v54  ;;  %6862 = vmatpush.msra.mxu0 %v12575_v5 }
 0xd69   : > { %v13446_v10 = vsub.f32 %v6274_v33, %v13440_v20  ;;  %6923 = vmatpush.msra.mxu1 %v12522_v48  ;;  %6312 = vmatmul.f32.vlgmr.msra.gmra.mxu2 %v6311_v23  ;;  %v6991_v33 = vand.u32 4294901760, %v6964_v35  ;;  %v15207_v23 = vld [vmem:[#allocation40_spill] sm:$0xff] }
 0xd6a   : > { %6612 = vmatmul.f32.vlgmr.msrb.gmra.mxu3 %v6307_v27  ;;  %6760 = vmatpush.msra.mxu2 %v12545_v58 }
 0xd6b   : > { %6821 = vmatpush.msra.mxu3 %v12537_v55  ;;  %6866 = vmatpush.msra.mxu0 %v12579_v11  ;;  %v6650_v15 = vand.u32 4294901760, %v13446_v10 }
 0xd6c   : > { %6925 = vmatpush.msra.mxu1 %v12524_v49  ;;  %6763 = vmatpush.msra.mxu2 %v12548_v59 }
 0xd6d   : > { %6823 = vmatpush.msra.mxu3 %v12539_v56  ;;  %6870 = vmatpush.msra.mxu0 %v12590_v17  ;;  %v6651_v37 = vsub.f32 %v13446_v10, %v6650_v15 }
 0xd6e   : > { %6927 = vmatpush.msra.mxu1 %v12535_v54  ;;  %6766 = vmatpush.msra.mxu2 %v12551_v60 }
 0xd6f   : > { %6754 = vmatmul.f32.vlgmr.msrb.gmra.mxu1 %v13440_v20  ;;  %6825 = vmatpush.msra.mxu3 %v12564_v1  ;;  %v6652_v12 = vand.u32 4294901760, %v6651_v37  ;;  %v6992_v37 = vsub.f32 %v6964_v35, %v6991_v33 }
 0xd70   : > { %6874 = vmatpush.msra.mxu0 %v15186_v52  ;;  %6929 = vmatpush.msra.mxu1 %v12537_v55 }
 0xd71   : > { %6769 = vmatpush.msra.mxu2 %v12556_v62  ;;  %6827 = vmatpush.msra.mxu3 %v12650_v40  ;;  %v6993_v50 = vand.u32 4294901760, %v6992_v37 }
 0xd72   : > { %6878 = vmatpush.msra.mxu0 %v15187_v61  ;;  %6931 = vmatpush.msra.mxu1 %v12539_v56 }
 0xd73   : > { %6575 = vmatmul.f32.vlgmr.msrb.gmra.mxu2 %v6307_v27  ;;  %6653 = vmatmul.f32.vlgmr.msrb.gmra.mxu0 %v6652_v12  ;;  %v15202_v27 = vld [vmem:[#allocation42_spill] sm:$0xff] }
 0xd74   : > { %6772 = vmatpush.msra.mxu2 %v12559_v63  ;;  %6829 = vmatpush.msra.mxu3 %v12658_v43  ;;  %v15208_v12 = vld [vmem:[#allocation10_spill] sm:$0xff] }
 0xd75   : > { %6882 = vmatpush.msra.mxu0 %v15188_v38  ;;  %6933 = vmatpush.msra.mxu1 %v12564_v1 }
 0xd76   : > { %6775 = vmatpush.msra.mxu2 %v12562_v0  ;;  %6831 = vmatpush.msra.mxu3 %v12672_v46 }
 0xd77   : > { %6886 = vmatpush.msra.mxu0 %v15189_v51  ;;  %6935 = vmatpush.msra.mxu1 %v12650_v40  ;;  %v15209_v51 = vld [vmem:[#allocation45_spill] sm:$0xff] }
 0xd78   : > { %6778 = vmatpush.msra.mxu2 %v12605_v24  ;;  %6833 = vmatpush.msra.mxu3 %v12688_v57 }
 0xd79   : > { %6890 = vmatpush.msra.mxu0 %v15190_v6  ;;  %6937 = vmatpush.msra.mxu1 %v12658_v43 }
 0xd7a   : > { %6781 = vmatpush.msra.mxu2 %v12656_v42  ;;  %6835 = vmatpush.msra.mxu3 %v12707_v16 }
 0xd7b   : > { %6894 = vmatpush.msra.mxu0 %v15191_v14  ;;  %6939 = vmatpush.msra.mxu1 %v12672_v46 }
 0xd7c   : > { %6784 = vmatpush.msra.mxu2 %v12669_v45  ;;  %6837 = vmatpush.msra.mxu3 %v12722_v30 }
 0xd7d   : > { %6898 = vmatpush.msra.mxu0 %v15192_v34  ;;  %6941 = vmatpush.msra.mxu1 %v12688_v57 }
 0xd7e   : > { %6787 = vmatpush.msra.mxu2 %v12685_v53  ;;  %6839 = vmatpush.msra.mxu3 %v12740_v39 }
 0xd7f   : > { %6902 = vmatpush.msra.mxu0 %v15193_v29  ;;  %6943 = vmatpush.msra.mxu1 %v12707_v16 }
 0xd80   : > { %6790 = vmatpush.msra.mxu2 %v15099_v41  ;;  %6841 = vmatpush.msra.mxu3 %v12759_v25 }
 0xd81   : > { %6906 = vmatpush.msra.mxu0 %v15194_v13  ;;  %6945 = vmatpush.msra.mxu1 %v12722_v30 }
 0xd82   : > { %6793 = vmatpush.msra.mxu2 %v15197_v44  ;;  %6843 = vmatpush.msra.mxu3 %v15198_v21 }
 0xd83   : > { %6910 = vmatpush.msra.mxu0 %v15199_v28  ;;  %6947 = vmatpush.msra.mxu1 %v12740_v39 }
 0xd84   : > { %6847 = vmatmul.f32.vlgmr.msra.gmra.mxu3 %v6650_v15  ;;  %6796 = vmatpush.msra.mxu2 %v15200_v36  ;;  %v6986_v15 = vsub.f32 %v6984_v22, %v6985_v7 }
 0xd85   : > { %7020 = vmatpush.msrb.mxu3 %v15201_v9  ;;  %6914 = vmatpush.msra.mxu0 %v15202_v27 }
 0xd86   : > { %6949 = vmatpush.msra.mxu1 %v12759_v25  ;;  %6916 = vmatmul.f32.vlgmr.msra.gmra.mxu0 %v13440_v20  ;;  %v6987_v32 = vand.u32 4294901760, %v6986_v15 }
 0xd87   : > { %7133 = vmatpush.msra.mxu3 %v15203_v19  ;;  %6799 = vmatpush.msra.mxu2 %v15204_v26 }
 0xd88   : > { %7047 = vmatpush.msrb.mxu0 %v15205_v8  ;;  %6951 = vmatpush.msra.mxu1 %v15198_v21 }
 0xd89   : > { %6953 = vmatmul.f32.vlgmr.msra.gmra.mxu1 %v13440_v20  ;;  %6802 = vmatpush.msra.mxu2 %v15206_v2  ;;  %v6994_v20 = vsub.f32 %v6992_v37, %v6993_v50 }
 0xd8a   : > { %7075 = vmatpush.msrb.mxu1 %v15203_v19 }
 0xd8b   : > { %6805 = vmatpush.msra.mxu2 %v15207_v23  ;;  %v6995_v31 = vand.u32 4294901760, %v6994_v20 }
 0xd8c   : > { %6808 = vmatmul.f32.vlgmr.msra.gmra.mxu2 %v13446_v10  ;;  %7022 = vmatmul.f32.vlgmr.msrb.gmra.mxu3 %v6983_v18 }
 0xd8d   : > { %6982 = vmatpush.msrb.mxu2 %v15203_v19 }
 0xd8e   : > { %7050 = vmatmul.f32.vlgmr.msrb.gmra.mxu0 %v6984_v22 }
 0xd8f   : > { %7107 = vmatpush.msra.mxu2 %v15208_v12 }
 0xd91   : > { %7079 = vmatmul.f32.vlgmr.msrb.gmra.mxu1 %v6985_v7 }
 0xd94   : > { %6988 = vmatmul.f32.vlgmr.msrb.gmra.mxu2 %v6987_v32  ;;  %7026 = vmatmul.f32.gmra.mxu3 %v6991_v33 }
 0xd96   : > { %7055 = vmatmul.f32.gmra.mxu0 %v6992_v37 }
 0xd99   : > { %7085 = vmatmul.f32.gmra.mxu1 %v6993_v50 }
 0xd9c   : > { %6996 = vmatmul.f32.gmra.mxu2 %v6995_v31  ;;  %7135 = vmatmul.f32.vlgmr.msra.gmra.mxu3 %v6983_v18 }
 0xda4   : > { %7109 = vmatmul.f32.vlgmr.msra.gmra.mxu2 %v6983_v18  ;;  %7139 = vmatmul.f32.gmra.mxu3 %v6991_v33 }
 0xdac   : > { %7113 = vmatmul.f32.gmra.mxu2 %v6991_v33  ;;  %v6957_v33 = vld [vmem:[%s12980_s7 + $0x2] sm:$0x1] }
 0xdad   : > { %v6958_v38 = vmul.f32 %v6957_v33, %v15209_v51 }
 0xde0   : > { %v6468_v35 = vpop.f32.mrf.mxu0 }
 0xde2   : > { %v6507_v19 = vpop.f32.mrf.mxu1 }
 0xde4   : > { %v6414_v10 = vpop.f32.mrf.mxu3 }
 0xdec   : > { %v6313_v9 = vpop.f32.mrf.mxu2  ;;  %v6755_v32 = vpop.f32.mrf.mxu1 }
 0xded   : > { %v6613_v22 = vpop.f32.mrf.mxu3  ;;  %v6415_v15 = vadd.f32 %v6414_v10, %v6313_v9 }
 0xdef   : > { %v6469_v27 = vadd.f32 %v6468_v35, %v6415_v15  ;;  %v15211_v35 = vmov 1.0  }
 0xdf0   : > { %v6654_v7 = vpop.f32.mrf.mxu0 }
 0xdf1   : > { %v6756_v37 = vadd.f32 %v6755_v32, %v6654_v7  ;;  %v6508_v31 = vadd.f32 %v6507_v19, %v6469_v27  ;;  %v15212_v19 = vld [vmem:[#allocation8_spill] sm:$0xff] }
 0xdf6   : > { %v6576_v8 = vpop.f32.mrf.mxu2 }
 0xdf7   : > { %v6577_v18 = vadd.f32 %v6576_v8, %v6508_v31  ;;  %v7150_v31 = vld [vmem:[#allocation2 + $0x38] sm:$0xff] }
 0xdf9   : > { %v6614_v61 = vadd.f32 %v6613_v22, %v6577_v18 }
 0xe03   : > { %v6917_v13 = vpop.f32.mrf.mxu0 }
 0xe06   : > { %v6954_v14 = vpop.f32.mrf.mxu1 }
 0xe07   : > { %v6848_v12 = vpop.f32.mrf.mxu3 }
 0xe0b   : > { %v7051_v7 = vpop.f32.mrf.mxu0 }
 0xe0f   : > { %v6809_v20 = vpop.f32.mrf.mxu2  ;;  %v7023_v29 = vpop.f32.mrf.mxu3 }
 0xe10   : > { %v6810_v50 = vadd.f32 %v6809_v20, %v6756_v37 }
 0xe12   : > { %v6849_v28 = vadd.f32 %v6848_v12, %v6810_v50 }
 0xe13   : > { %v7056_v37 = vpop.f32.mrf.mxu0 }
 0xe14   : > { %v6918_v34 = vadd.f32 %v6917_v13, %v6849_v28 }
 0xe16   : > { %v6955_v6 = vadd.f32 %v6954_v14, %v6918_v34  ;;  %v7149_v14 = vld [vmem:[#allocation2 + $0x30] sm:$0xff]  ;;  %v7080_v34 = vpop.f32.mrf.mxu1 }
 0xe17   : > { %v6989_v10 = vpop.f32.mrf.mxu2  ;;  %v7027_v13 = vpop.f32.mrf.mxu3  ;;  %v7154_v51 = vsel %vm171_vm0, %v7149_v14, 0 }
 0xe18   : > { %vm6959_vm7 = vcmp.lt.f32.partialorder %v6958_v38, %v6955_v6  ;;  %v7024_v22 = vadd.f32 %v7023_v29, %v6989_v10 }
 0xe19   : > { %v13527_v9 = vsel %vm6959_vm7, %v6955_v6, %v6614_v61  ;;  %v7148_v15 = vsel %vm6959_vm7, 0.0, %v15211_v35  ;;  %v13535_v61 = vand.u32 4294901760, %v7154_v51 }
 0xe1a   : > { %15210 = vst [vmem:[#allocation6_spill] sm:$0xff] %v13527_v9  ;;  %v11984_v27 = vrot.slane %v7148_v15, 6  ;;  %v7052_v50 = vadd.f32 %v7051_v7, %v7024_v22 }
 0xe1b   : > { %v7177_v33 = vsub.f32 %v7154_v51, %v13535_v61 }
 0xe1c   : > { %v13532_v8 = vsel %vm12003_vm8, %v15212_v19, %v11984_v27  ;;  %v7157_v27 = vsel %vm171_vm0, %v7150_v31, 0  ;;  %v7081_v19 = vadd.f32 %v7080_v34, %v7052_v50  ;;  %v15219_v50 = vld [vmem:[#allocation13_spill] sm:$0xff] }
 0xe1d   : > { %15213 = vst [vmem:[#allocation24_spill] sm:$0xff] %v13532_v8  ;;  %v15214_v8 = vmov 0   ;;  %v7178_v10 = vand.u32 4294901760, %v7177_v33 }
 0xe1e   : > { %v7086_v15 = vpop.f32.mrf.mxu1  ;;  %v7143_v35 = vsel %vm6959_vm7, 1, %v15214_v8  ;;  %vm12013_vm7 = vcmask 1046528  }
 0xe1f   : > { %v6997_v28 = vpop.f32.mrf.mxu2  ;;  %v7136_v12 = vpop.f32.mrf.mxu3  ;;  %v7144_v52 = vperm.slane %v7143_v35, 0 }
 0xe20   : > { %v7028_v32 = vadd.f32 %v7027_v13, %v6997_v28  ;;  %v13541_v13 = vand.u32 4294901760, %v7157_v27 }
 0xe21   : > { %vm7145_vm9 = vcmp.eq.s32.totalorder %v7144_v52, 1 }
 0xe22   : > { %v7057_v18 = vadd.f32 %v7056_v37, %v7028_v32  ;;  %v7179_v37 = vsub.f32 %v7177_v33, %v7178_v10  ;;  %v7185_v51 = vsub.f32 %v7157_v27, %v13541_v13 }
 0xe24   : > { %v7087_v14 = vadd.f32 %v7086_v15, %v7057_v18  ;;  %v7180_v6 = vand.u32 4294901760, %v7179_v37  ;;  %v7186_v34 = vand.u32 4294901760, %v7185_v51  ;;  %v15221_v15 = vld [vmem:[#allocation14_spill] sm:$0xff] }
 0xe25   : > { %v15231_v37 = vld [vmem:[#allocation38_spill] sm:$0xff] }
 0xe27   : > { %v7110_v20 = vpop.f32.mrf.mxu2  ;;  %v7140_v9 = vpop.f32.mrf.mxu3 }
 0xe28   : > { %v7111_v29 = vadd.f32 %v7110_v20, %v7081_v19  ;;  %v15223_v19 = vld [vmem:[#allocation17_spill] sm:$0xff] }
 0xe2a   : > { %v7137_v22 = vadd.f32 %v7136_v12, %v7111_v29  ;;  %v7187_v12 = vsub.f32 %v7185_v51, %v7186_v34  ;;  %v15225_v29 = vld [vmem:[#allocation19_spill] sm:$0xff] }
 0xe2c   : > { %v7188_v27 = vand.u32 4294901760, %v7187_v12  ;;  %v15237_v12 = vld [vmem:[#allocation20_spill] sm:$0xff] }
 0xe2f   : > { %v7114_v28 = vpop.f32.mrf.mxu2 }
 0xe30   : > { %v7115_v7 = vadd.f32 %v7114_v28, %v7087_v14  ;;  %v15224_v14 = vld [vmem:[#allocation18_spill] sm:$0xff]  ;;  %v15227_v28 = vld [vmem:[#allocation25_spill] sm:$0xff] }
 0xe32   : > { %v7141_v32 = vadd.f32 %v7140_v9, %v7115_v7  ;;  %v15218_v9 = vld [vmem:[#allocation12_spill] sm:$0xff] }
 0xe33   : > { %v15228_v7 = vld [vmem:[#allocation28_spill] sm:$0xff] }
 0xe34   : > { %v13544_v31 = vsel %vm7145_vm9, %v7141_v32, %v7137_v22  ;;  %v15229_v22 = vld [vmem:[#allocation31_spill] sm:$0xff]  ;;  %v15230_v32 = vld [vmem:[#allocation37_spill] sm:$0xff] }
 0xe35   : > { %v13547_v38 = vand.u32 4294901760, %v13544_v31 }
 0xe37   : > { %15215 = vst [vmem:[#allocation7_spill] sm:$0xff] %v13547_v38  ;;  %7175 = vmatpush.msra.mxu0 %v13547_v38  ;;  %7268 = vmatpush.msrb.mxu3 %v13547_v38  ;;  %v13553_v35 = vsub.f32 %v13544_v31, %v13547_v38 }
 0xe38   : > { %7181 = vmatmul.f32.vlgmr.msra.gmra.mxu0 %v7180_v6  ;;  %7272 = vmatmul.f32.vlgmr.msrb.gmra.mxu3 %v7178_v10  ;;  %v15226_v10 = vld [vmem:[#allocation22_spill] sm:$0xff]  ;;  %v15234_v6 = vld [vmem:[#allocation44_spill] sm:$0xff] }
 0xe39   : > { %15216 = vst [vmem:[#allocation9_spill] sm:$0xff] %v13553_v35  ;;  %7240 = vmatpush.msrb.mxu2 %v13553_v35  ;;  %v13557_v52 = vand.u32 4294901760, %v13553_v35  ;;  %7396 = vmatpush.msra.mxu3 %v15218_v9 }
 0xe3a   : > { %7243 = vmatmul.f32.vlgmr.msrb.gmra.mxu2 %v7177_v33  ;;  %v15222_v33 = vld [vmem:[#allocation16_spill] sm:$0xff] }
 0xe3b   : > { %15217 = vst [vmem:[#allocation10_spill] sm:$0xff] %v13557_v52  ;;  %7300 = vmatpush.msrb.mxu0 %v13557_v52  ;;  %v7211_v20 = vsub.f32 %v13553_v35, %v13557_v52  ;;  %7402 = vmatpush.msra.mxu3 %v15219_v50 }
 0xe3c   : > { %7351 = vmatpush.msra.mxu2 %v12520_v47 }
 0xe3d   : > { %7494 = vmatpush.msra.mxu0 %v12545_v58  ;;  %v13566_v18 = vand.u32 4294901760, %v7211_v20  ;;  %7408 = vmatpush.msra.mxu3 %v15221_v15  ;;  %v15238_v20 = vld [vmem:[#allocation21_spill] sm:$0xff] }
 0xe3e   : > { %7353 = vmatpush.msra.mxu2 %v12522_v48 }
 0xe3f   : > { %15220 = vst [vmem:[#allocation45_spill] sm:$0xff] %v13566_v18  ;;  %7497 = vmatpush.msra.mxu0 %v12548_v59  ;;  %7213 = vmatpush.msra.mxu1 %v13566_v18 }
 0xe40   : > { %7414 = vmatpush.msra.mxu3 %v15222_v33  ;;  %7189 = vmatmul.f32.gmra.mxu0 %v7188_v27  ;;  %v15239_v27 = vld [vmem:[#allocation23_spill] sm:$0xff] }
 0xe41   : > { %7215 = vmatmul.f32.vlgmr.msra.gmra.mxu1 %v13535_v61  ;;  %7278 = vmatmul.f32.gmra.mxu3 %v7186_v34  ;;  %v15236_v34 = vld [vmem:[#allocation15_spill] sm:$0xff] }
 0xe42   : > { %7326 = vmatpush.msrb.mxu1 %v13547_v38  ;;  %7248 = vmatmul.f32.gmra.mxu2 %v7185_v51  ;;  %v15233_v51 = vld [vmem:[#allocation43_spill] sm:$0xff] }
 0xe43   : > { %7500 = vmatpush.msra.mxu0 %v12551_v60  ;;  %7420 = vmatpush.msra.mxu3 %v15223_v19 }
 0xe44   : > { %7547 = vmatpush.msra.mxu1 %v12520_v47  ;;  %7355 = vmatpush.msra.mxu2 %v12524_v49 }
 0xe45   : > { %7503 = vmatpush.msra.mxu0 %v12556_v62  ;;  %7426 = vmatpush.msra.mxu3 %v15224_v14 }
 0xe46   : > { %7549 = vmatpush.msra.mxu1 %v12522_v48  ;;  %7357 = vmatpush.msra.mxu2 %v12535_v54 }
 0xe47   : > { %7506 = vmatpush.msra.mxu0 %v12559_v63  ;;  %7432 = vmatpush.msra.mxu3 %v15225_v29 }
 0xe48   : > { %7551 = vmatpush.msra.mxu1 %v12524_v49  ;;  %7302 = vmatmul.f32.vlgmr.msrb.gmra.mxu0 %v13535_v61 }
 0xe49   : > { %7219 = vmatmul.f32.gmra.mxu1 %v13541_v13  ;;  %7509 = vmatpush.msra.mxu0 %v12562_v0 }
 0xe4a   : > { %7553 = vmatpush.msra.mxu1 %v12535_v54  ;;  %7438 = vmatpush.msra.mxu3 %v15226_v10 }
 0xe4b   : > { %7359 = vmatpush.msra.mxu2 %v12537_v55  ;;  %7512 = vmatpush.msra.mxu0 %v12605_v24 }
 0xe4c   : > { %7555 = vmatpush.msra.mxu1 %v12537_v55  ;;  %7444 = vmatpush.msra.mxu3 %v15227_v28 }
 0xe4d   : > { %7361 = vmatpush.msra.mxu2 %v12539_v56  ;;  %7515 = vmatpush.msra.mxu0 %v12656_v42 }
 0xe4e   : > { %7557 = vmatpush.msra.mxu1 %v12539_v56  ;;  %7450 = vmatpush.msra.mxu3 %v15228_v7 }
 0xe4f   : > { %7363 = vmatpush.msra.mxu2 %v12564_v1  ;;  %7518 = vmatpush.msra.mxu0 %v12669_v45 }
 0xe50   : > { %7559 = vmatpush.msra.mxu1 %v12564_v1  ;;  %7306 = vmatmul.f32.gmra.mxu0 %v13541_v13 }
 0xe51   : > { %7328 = vmatmul.f32.vlgmr.msrb.gmra.mxu1 %v13535_v61  ;;  %7456 = vmatpush.msra.mxu3 %v15229_v22  ;;  %v15232_v61 = vld [vmem:[#allocation41_spill] sm:$0xff] }
 0xe52   : > { %7561 = vmatpush.msra.mxu1 %v12650_v40  ;;  %7521 = vmatpush.msra.mxu0 %v12685_v53 }
 0xe53   : > { %7365 = vmatpush.msra.mxu2 %v12650_v40  ;;  %7462 = vmatpush.msra.mxu3 %v15230_v32 }
 0xe54   : > { %7563 = vmatpush.msra.mxu1 %v12658_v43  ;;  %7524 = vmatpush.msra.mxu0 %v15099_v41 }
 0xe55   : > { %7367 = vmatpush.msra.mxu2 %v12658_v43  ;;  %7468 = vmatpush.msra.mxu3 %v15231_v37 }
 0xe56   : > { %7565 = vmatpush.msra.mxu1 %v12672_v46  ;;  %7527 = vmatpush.msra.mxu0 %v15197_v44 }
 0xe57   : > { %7369 = vmatpush.msra.mxu2 %v12672_v46  ;;  %7474 = vmatpush.msra.mxu3 %v15232_v61 }
 0xe58   : > { %7567 = vmatpush.msra.mxu1 %v12688_v57  ;;  %7530 = vmatpush.msra.mxu0 %v15200_v36 }
 0xe59   : > { %7332 = vmatmul.f32.gmra.mxu1 %v13541_v13  ;;  %7371 = vmatpush.msra.mxu2 %v12688_v57  ;;  %v15235_v13 = vld [vmem:[#allocation11_spill] sm:$0xff] }
 0xe5a   : > { %7569 = vmatpush.msra.mxu1 %v12707_v16  ;;  %7480 = vmatpush.msra.mxu3 %v15233_v51 }
 0xe5b   : > { %7533 = vmatpush.msra.mxu0 %v15204_v26  ;;  %7373 = vmatpush.msra.mxu2 %v12707_v16 }
 0xe5c   : > { %7571 = vmatpush.msra.mxu1 %v12722_v30  ;;  %7486 = vmatpush.msra.mxu3 %v15234_v6 }
 0xe5d   : > { %7536 = vmatpush.msra.mxu0 %v15206_v2  ;;  %7375 = vmatpush.msra.mxu2 %v12722_v30 }
 0xe5e   : > { %7573 = vmatpush.msra.mxu1 %v12740_v39  ;;  %7655 = vmatpush.msrb.mxu3 %v12520_v47 }
 0xe5f   : > { %7539 = vmatpush.msra.mxu0 %v15207_v23  ;;  %7377 = vmatpush.msra.mxu2 %v12740_v39 }
 0xe60   : > { %7575 = vmatpush.msra.mxu1 %v12759_v25  ;;  %7657 = vmatpush.msrb.mxu3 %v12522_v48 }
 0xe61   : > { %7692 = vmatpush.msrb.mxu0 %v12520_v47  ;;  %7379 = vmatpush.msra.mxu2 %v12759_v25 }
 0xe62   : > { %7577 = vmatpush.msra.mxu1 %v15198_v21  ;;  %7659 = vmatpush.msrb.mxu3 %v12524_v49 }
 0xe63   : > { %7694 = vmatpush.msrb.mxu0 %v12522_v48  ;;  %7381 = vmatpush.msra.mxu2 %v15198_v21 }
 0xe64   : > { %7737 = vmatpush.msrb.mxu1 %v15218_v9  ;;  %7661 = vmatpush.msrb.mxu3 %v12535_v54 }
 0xe65   : > { %7696 = vmatpush.msrb.mxu0 %v12524_v49  ;;  %7588 = vmatpush.msrb.mxu2 %v12568_v3 }
 0xe66   : > { %7743 = vmatpush.msrb.mxu1 %v15219_v50  ;;  %7663 = vmatpush.msrb.mxu3 %v12537_v55 }
 0xe67   : > { %7698 = vmatpush.msrb.mxu0 %v12535_v54  ;;  %7592 = vmatpush.msrb.mxu2 %v12571_v4 }
 0xe68   : > { %7749 = vmatpush.msrb.mxu1 %v15221_v15  ;;  %7665 = vmatpush.msrb.mxu3 %v12539_v56 }
 0xe69   : > { %7700 = vmatpush.msrb.mxu0 %v12537_v55  ;;  %7596 = vmatpush.msrb.mxu2 %v12575_v5 }
 0xe6a   : > { %7755 = vmatpush.msrb.mxu1 %v15222_v33  ;;  %7667 = vmatpush.msrb.mxu3 %v12564_v1 }
 0xe6b   : > { %7702 = vmatpush.msrb.mxu0 %v12539_v56  ;;  %7600 = vmatpush.msrb.mxu2 %v12579_v11 }
 0xe6c   : > { %7761 = vmatpush.msrb.mxu1 %v15223_v19  ;;  %7669 = vmatpush.msrb.mxu3 %v12650_v40 }
 0xe6d   : > { %7704 = vmatpush.msrb.mxu0 %v12564_v1  ;;  %7604 = vmatpush.msrb.mxu2 %v12590_v17 }
 0xe6e   : > { %7767 = vmatpush.msrb.mxu1 %v15224_v14  ;;  %7671 = vmatpush.msrb.mxu3 %v12658_v43 }
 0xe6f   : > { %7706 = vmatpush.msrb.mxu0 %v12650_v40  ;;  %7608 = vmatpush.msrb.mxu2 %v15235_v13 }
 0xe70   : > { %7773 = vmatpush.msrb.mxu1 %v15225_v29  ;;  %7673 = vmatpush.msrb.mxu3 %v12672_v46 }
 0xe71   : > { %7708 = vmatpush.msrb.mxu0 %v12658_v43  ;;  %7612 = vmatpush.msrb.mxu2 %v15236_v34 }
 0xe72   : > { %7779 = vmatpush.msrb.mxu1 %v15226_v10  ;;  %7675 = vmatpush.msrb.mxu3 %v12688_v57  ;;  %v15244_v10 = vld [vmem:[#allocation39_spill] sm:$0xff] }
 0xe73   : > { %7710 = vmatpush.msrb.mxu0 %v12672_v46  ;;  %7616 = vmatpush.msrb.mxu2 %v15237_v12 }
 0xe74   : > { %7785 = vmatpush.msrb.mxu1 %v15227_v28  ;;  %7677 = vmatpush.msrb.mxu3 %v12707_v16  ;;  %v15240_v28 = vld [vmem:[#allocation26_spill] sm:$0xff] }
 0xe75   : > { %7712 = vmatpush.msrb.mxu0 %v12688_v57  ;;  %7620 = vmatpush.msrb.mxu2 %v15238_v20 }
 0xe76   : > { %7791 = vmatpush.msrb.mxu1 %v15228_v7  ;;  %7679 = vmatpush.msrb.mxu3 %v12722_v30  ;;  %v15241_v7 = vld [vmem:[#allocation30_spill] sm:$0xff] }
 0xe77   : > { %7714 = vmatpush.msrb.mxu0 %v12707_v16  ;;  %7624 = vmatpush.msrb.mxu2 %v15239_v27 }
 0xe78   : > { %7797 = vmatpush.msrb.mxu1 %v15229_v22  ;;  %7681 = vmatpush.msrb.mxu3 %v12740_v39  ;;  %v15242_v22 = vld [vmem:[#allocation32_spill] sm:$0xff] }
 0xe79   : > { %7716 = vmatpush.msrb.mxu0 %v12722_v30  ;;  %7628 = vmatpush.msrb.mxu2 %v15240_v28 }
 0xe7a   : > { %7803 = vmatpush.msrb.mxu1 %v15230_v32  ;;  %7683 = vmatpush.msrb.mxu3 %v12759_v25  ;;  %v15243_v32 = vld [vmem:[#allocation34_spill] sm:$0xff] }
 0xe7b   : > { %7718 = vmatpush.msrb.mxu0 %v12740_v39  ;;  %7632 = vmatpush.msrb.mxu2 %v15241_v7 }
 0xe7c   : > { %7809 = vmatpush.msrb.mxu1 %v15231_v37  ;;  %7685 = vmatpush.msrb.mxu3 %v15198_v21  ;;  %v15245_v37 = vld [vmem:[#allocation42_spill] sm:$0xff] }
 0xe7d   : > { %7720 = vmatpush.msrb.mxu0 %v12759_v25  ;;  %7636 = vmatpush.msrb.mxu2 %v15242_v22 }
 0xe7e   : > { %7815 = vmatpush.msrb.mxu1 %v15232_v61 }
 0xe7f   : > { %7722 = vmatpush.msrb.mxu0 %v15198_v21  ;;  %7640 = vmatpush.msrb.mxu2 %v15243_v32 }
 0xe80   : > { %7821 = vmatpush.msrb.mxu1 %v15233_v51 }
 0xe81   : > { %7644 = vmatpush.msrb.mxu2 %v15244_v10 }
 0xe82   : > { %7827 = vmatpush.msrb.mxu1 %v15234_v6 }
 0xe83   : > { %7648 = vmatpush.msrb.mxu2 %v15245_v37 }
 0xeb5   : > { %v7182_v29 = vpop.f32.mrf.mxu0 }
 0xebb   : > { %v7273_v9 = vpop.f32.mrf.mxu3 }
 0xebd   : > { %v7190_v14 = vpop.f32.mrf.mxu0  ;;  %v7244_v15 = vpop.f32.mrf.mxu2 }
 0xebe   : > { %v7216_v19 = vpop.f32.mrf.mxu1 }
 0xebf   : > { %v7217_v33 = vadd.f32 %v7216_v19, %v7182_v29 }
 0xec1   : > { %v7245_v50 = vadd.f32 %v7244_v15, %v7217_v33 }
 0xec3   : > { %v7274_v23 = vadd.f32 %v7273_v9, %v7245_v50 }
 0xec4   : > { %v7279_v18 = vpop.f32.mrf.mxu3 }
 0xec5   : > { %v7303_v8 = vpop.f32.mrf.mxu0  ;;  %v7249_v2 = vpop.f32.mrf.mxu2 }
 0xec6   : > { %v7220_v61 = vpop.f32.mrf.mxu1  ;;  %v7304_v51 = vadd.f32 %v7303_v8, %v7274_v23 }
 0xec7   : > { %v7221_v52 = vadd.f32 %v7220_v61, %v7190_v14 }
 0xec9   : > { %v7250_v26 = vadd.f32 %v7249_v2, %v7221_v52 }
 0xecb   : > { %v7280_v36 = vadd.f32 %v7279_v18, %v7250_v26 }
 0xecd   : > { %v7307_v37 = vpop.f32.mrf.mxu0 }
 0xece   : > { %v7329_v35 = vpop.f32.mrf.mxu1  ;;  %v7308_v21 = vadd.f32 %v7307_v37, %v7280_v36 }
 0xecf   : > { %v7330_v6 = vadd.f32 %v7329_v35, %v7304_v51 }
 0xed1   : > { %v7336_v38 = vmul.f32 %v7330_v6, %v13544_v31  ;;  %v12136_v6 = vld [vmem:[%s14755_s0 + $0x70] sm:$0xff] }
 0xed3   : > { %v7337_v10 = vrot.slane %v7336_v38, 4 }
 0xed5   : > { %v7338_v19 = vadd.f32 %v7337_v10, %v7336_v38 }
 0xed6   : > { %v7333_v29 = vpop.f32.mrf.mxu1 }
 0xed7   : > { %v7339_v44 = vrot.slane %v7338_v19, 2  ;;  %v7334_v15 = vadd.f32 %v7333_v29, %v7308_v21 }
 0xed9   : > { %v7340_v33 = vadd.f32 %v7339_v44, %v7338_v19  ;;  %v7343_v14 = vmul.f32 %v7334_v15, %v13544_v31  ;;  %v8036_v19 = vsel %vm171_vm0, %v12136_v6, 0  ;;  %v15246_v15 = vld [vmem:[#allocation27_spill] sm:$0xff] }
 0xeda   : > { %v8058_v29 = vand.u32 4294901760, %v8036_v19 }
 0xedb   : > { %v7341_v9 = vrot.slane %v7340_v33, 1  ;;  %v7344_v23 = vrot.slane %v7343_v14, 4 }
 0xedd   : > { %v7342_v8 = vadd.f32 %v7341_v9, %v7340_v33  ;;  %v7345_v50 = vadd.f32 %v7344_v23, %v7343_v14  ;;  %v15247_v33 = vld [vmem:[#allocation36_spill] sm:$0xff]  ;;  %v12137_v14 = vld [vmem:[%s14755_s0 + $0x78] sm:$0xff]  ;;  %v15249_v23 = vld [vmem:[#allocation29_spill] sm:$0xff] }
 0xede   : > { %v15248_v9 = vld [vmem:[#allocation39_spill] sm:$0xff] }
 0xedf   : > { %v7382_v2 = vand.u32 4294901760, %v7342_v8  ;;  %v7346_v35 = vrot.slane %v7345_v50, 2 }
 0xee1   : > { %v7383_v52 = vsub.f32 %v7342_v8, %v7382_v2  ;;  %v7347_v61 = vadd.f32 %v7346_v35, %v7345_v50  ;;  %7488 = vmatmul.f32.vlgmr.msra.gmra.mxu3 %v7382_v2  ;;  %v8059_v8 = vsub.f32 %v8036_v19, %v8058_v29  ;;  %v15250_v50 = vld [vmem:[#allocation45_spill] sm:$0xff]  ;;  %v8039_v35 = vsel %vm171_vm0, %v12137_v14, 0 }
 0xee2   : > { %7888 = vmatpush.msra.mxu3 %v12520_v47 }
 0xee3   : > { %v7348_v26 = vrot.slane %v7347_v61, 1  ;;  %7542 = vmatmul.f32.vlgmr.msra.gmra.mxu0 %v7383_v52  ;;  %v7384_v36 = vand.u32 4294901760, %v7383_v52 }
 0xee4   : > { %7890 = vmatpush.msra.mxu3 %v12522_v48  ;;  %7929 = vmatpush.msra.mxu0 %v12568_v3 }
 0xee5   : > { %v7349_v44 = vadd.f32 %v7348_v26, %v7347_v61  ;;  %7581 = vmatmul.f32.vlgmr.msra.gmra.mxu1 %v7384_v36  ;;  %v7385_v21 = vsub.f32 %v7383_v52, %v7384_v36  ;;  %v15252_v52 = vld [vmem:[#allocation7_spill] sm:$0xff]  ;;  %v15253_v61 = vld [vmem:[#allocation33_spill] sm:$0xff]  ;;  %v8060_v36 = vand.u32 4294901760, %v8059_v8 }
 0xee6   : > { %7892 = vmatpush.msra.mxu3 %v12524_v49  ;;  %7933 = vmatpush.msra.mxu0 %v12571_v4  ;;  %v15254_v26 = vld [vmem:[#allocation9_spill] sm:$0xff] }
 0xee7   : > { %v13707_v31 = vand.u32 4294901760, %v7349_v44  ;;  %7996 = vmatpush.msra.mxu1 %v12520_v47  ;;  %v7386_v38 = vand.u32 4294901760, %v7385_v21  ;;  %v15255_v21 = vld [vmem:[#allocation35_spill] sm:$0xff] }
 0xee8   : > { %7894 = vmatpush.msra.mxu3 %v12535_v54  ;;  %7937 = vmatpush.msra.mxu0 %v12575_v5 }
 0xee9   : > { %v13713_v18 = vsub.f32 %v7349_v44, %v13707_v31  ;;  %7998 = vmatpush.msra.mxu1 %v12522_v48  ;;  %7387 = vmatmul.f32.vlgmr.msra.gmra.mxu2 %v7386_v38  ;;  %v8066_v44 = vand.u32 4294901760, %v8039_v35  ;;  %v15256_v38 = vld [vmem:[#allocation40_spill] sm:$0xff] }
 0xeea   : > { %7687 = vmatmul.f32.vlgmr.msrb.gmra.mxu3 %v7382_v2  ;;  %7835 = vmatpush.msra.mxu2 %v12545_v58 }
 0xeeb   : > { %7896 = vmatpush.msra.mxu3 %v12537_v55  ;;  %7941 = vmatpush.msra.mxu0 %v12579_v11  ;;  %v7725_v10 = vand.u32 4294901760, %v13713_v18 }
 0xeec   : > { %8000 = vmatpush.msra.mxu1 %v12524_v49  ;;  %7838 = vmatpush.msra.mxu2 %v12548_v59 }
 0xeed   : > { %7898 = vmatpush.msra.mxu3 %v12539_v56  ;;  %7945 = vmatpush.msra.mxu0 %v12590_v17  ;;  %v7726_v37 = vsub.f32 %v13713_v18, %v7725_v10 }
 0xeee   : > { %8002 = vmatpush.msra.mxu1 %v12535_v54  ;;  %7841 = vmatpush.msra.mxu2 %v12551_v60 }
 0xeef   : > { %7829 = vmatmul.f32.vlgmr.msrb.gmra.mxu1 %v13707_v31  ;;  %7900 = vmatpush.msra.mxu3 %v12564_v1  ;;  %v7727_v51 = vand.u32 4294901760, %v7726_v37  ;;  %v8067_v37 = vsub.f32 %v8039_v35, %v8066_v44 }
 0xef0   : > { %7949 = vmatpush.msra.mxu0 %v15235_v13  ;;  %8004 = vmatpush.msra.mxu1 %v12537_v55 }
 0xef1   : > { %7844 = vmatpush.msra.mxu2 %v12556_v62  ;;  %7902 = vmatpush.msra.mxu3 %v12650_v40  ;;  %v8068_v19 = vand.u32 4294901760, %v8067_v37 }
 0xef2   : > { %7953 = vmatpush.msra.mxu0 %v15236_v34  ;;  %8006 = vmatpush.msra.mxu1 %v12539_v56 }
 0xef3   : > { %7650 = vmatmul.f32.vlgmr.msrb.gmra.mxu2 %v7382_v2  ;;  %7728 = vmatmul.f32.vlgmr.msrb.gmra.mxu0 %v7727_v51  ;;  %v15251_v2 = vld [vmem:[#allocation42_spill] sm:$0xff] }
 0xef4   : > { %7847 = vmatpush.msra.mxu2 %v12559_v63  ;;  %7904 = vmatpush.msra.mxu3 %v12658_v43  ;;  %v15257_v51 = vld [vmem:[#allocation10_spill] sm:$0xff] }
 0xef5   : > { %7957 = vmatpush.msra.mxu0 %v15237_v12  ;;  %8008 = vmatpush.msra.mxu1 %v12564_v1 }
 0xef6   : > { %7850 = vmatpush.msra.mxu2 %v12562_v0  ;;  %7906 = vmatpush.msra.mxu3 %v12672_v46 }
 0xef7   : > { %7961 = vmatpush.msra.mxu0 %v15238_v20  ;;  %8010 = vmatpush.msra.mxu1 %v12650_v40  ;;  %v15258_v20 = vld [vmem:[#allocation6_spill] sm:$0xff] }
 0xef8   : > { %7853 = vmatpush.msra.mxu2 %v12605_v24  ;;  %7908 = vmatpush.msra.mxu3 %v12688_v57 }
 0xef9   : > { %7965 = vmatpush.msra.mxu0 %v15239_v27  ;;  %8012 = vmatpush.msra.mxu1 %v12658_v43 }
 0xefa   : > { %7856 = vmatpush.msra.mxu2 %v12656_v42  ;;  %7910 = vmatpush.msra.mxu3 %v12707_v16 }
 0xefb   : > { %7969 = vmatpush.msra.mxu0 %v15240_v28  ;;  %8014 = vmatpush.msra.mxu1 %v12672_v46 }
 0xefc   : > { %7859 = vmatpush.msra.mxu2 %v12669_v45  ;;  %7912 = vmatpush.msra.mxu3 %v12722_v30 }
 0xefd   : > { %7973 = vmatpush.msra.mxu0 %v15241_v7  ;;  %8016 = vmatpush.msra.mxu1 %v12688_v57 }
 0xefe   : > { %7862 = vmatpush.msra.mxu2 %v12685_v53  ;;  %7914 = vmatpush.msra.mxu3 %v12740_v39 }
 0xeff   : > { %7977 = vmatpush.msra.mxu0 %v15242_v22  ;;  %8018 = vmatpush.msra.mxu1 %v12707_v16 }
 0xf00   : > { %7865 = vmatpush.msra.mxu2 %v15099_v41  ;;  %7916 = vmatpush.msra.mxu3 %v12759_v25 }
 0xf01   : > { %7981 = vmatpush.msra.mxu0 %v15243_v32  ;;  %8020 = vmatpush.msra.mxu1 %v12722_v30 }
 0xf02   : > { %7868 = vmatpush.msra.mxu2 %v15246_v15  ;;  %7918 = vmatpush.msra.mxu3 %v15247_v33 }
 0xf03   : > { %7985 = vmatpush.msra.mxu0 %v15248_v9  ;;  %8022 = vmatpush.msra.mxu1 %v12740_v39 }
 0xf04   : > { %7922 = vmatmul.f32.vlgmr.msra.gmra.mxu3 %v7725_v10  ;;  %7871 = vmatpush.msra.mxu2 %v15249_v23  ;;  %v8061_v10 = vsub.f32 %v8059_v8, %v8060_v36 }
 0xf05   : > { %8095 = vmatpush.msrb.mxu3 %v15250_v50  ;;  %7989 = vmatpush.msra.mxu0 %v15251_v2 }
 0xf06   : > { %8024 = vmatpush.msra.mxu1 %v12759_v25  ;;  %7991 = vmatmul.f32.vlgmr.msra.gmra.mxu0 %v13707_v31  ;;  %v8062_v6 = vand.u32 4294901760, %v8061_v10 }
 0xf07   : > { %8208 = vmatpush.msra.mxu3 %v15252_v52  ;;  %7874 = vmatpush.msra.mxu2 %v15253_v61 }
 0xf08   : > { %8122 = vmatpush.msrb.mxu0 %v15254_v26  ;;  %8026 = vmatpush.msra.mxu1 %v15247_v33 }
 0xf09   : > { %8028 = vmatmul.f32.vlgmr.msra.gmra.mxu1 %v13707_v31  ;;  %7877 = vmatpush.msra.mxu2 %v15255_v21  ;;  %v8069_v31 = vsub.f32 %v8067_v37, %v8068_v19 }
 0xf0a   : > { %8150 = vmatpush.msrb.mxu1 %v15252_v52 }
 0xf0b   : > { %7880 = vmatpush.msra.mxu2 %v15256_v38  ;;  %v8070_v14 = vand.u32 4294901760, %v8069_v31 }
 0xf0c   : > { %7883 = vmatmul.f32.vlgmr.msra.gmra.mxu2 %v13713_v18  ;;  %8097 = vmatmul.f32.vlgmr.msrb.gmra.mxu3 %v8058_v29 }
 0xf0d   : > { %8057 = vmatpush.msrb.mxu2 %v15252_v52 }
 0xf0e   : > { %8125 = vmatmul.f32.vlgmr.msrb.gmra.mxu0 %v8059_v8 }
 0xf0f   : > { %8182 = vmatpush.msra.mxu2 %v15257_v51 }
 0xf11   : > { %8154 = vmatmul.f32.vlgmr.msrb.gmra.mxu1 %v8060_v36 }
 0xf14   : > { %8063 = vmatmul.f32.vlgmr.msrb.gmra.mxu2 %v8062_v6  ;;  %8101 = vmatmul.f32.gmra.mxu3 %v8066_v44 }
 0xf16   : > { %8130 = vmatmul.f32.gmra.mxu0 %v8067_v37 }
 0xf19   : > { %8160 = vmatmul.f32.gmra.mxu1 %v8068_v19 }
 0xf1c   : > { %8071 = vmatmul.f32.gmra.mxu2 %v8070_v14  ;;  %8210 = vmatmul.f32.vlgmr.msra.gmra.mxu3 %v8058_v29 }
 0xf24   : > { %8184 = vmatmul.f32.vlgmr.msra.gmra.mxu2 %v8058_v29  ;;  %8214 = vmatmul.f32.gmra.mxu3 %v8066_v44 }
 0xf2c   : > { %8188 = vmatmul.f32.gmra.mxu2 %v8066_v44  ;;  %v8032_v44 = vld [vmem:[%s12980_s7 + $0x3] sm:$0x1] }
 0xf2d   : > { %v8033_v12 = vmul.f32 %v8032_v44, %v15258_v20 }
 0xf60   : > { %v7543_v35 = vpop.f32.mrf.mxu0 }
 0xf62   : > { %v7582_v52 = vpop.f32.mrf.mxu1 }
 0xf64   : > { %v7489_v18 = vpop.f32.mrf.mxu3 }
 0xf6c   : > { %v7388_v50 = vpop.f32.mrf.mxu2  ;;  %v7830_v6 = vpop.f32.mrf.mxu1 }
 0xf6d   : > { %v7688_v8 = vpop.f32.mrf.mxu3  ;;  %v7490_v10 = vadd.f32 %v7489_v18, %v7388_v50 }
 0xf6f   : > { %v7544_v2 = vadd.f32 %v7543_v35, %v7490_v10  ;;  %v15260_v35 = vmov 1.0  }
 0xf70   : > { %v7729_v36 = vpop.f32.mrf.mxu0 }
 0xf71   : > { %v7831_v37 = vadd.f32 %v7830_v6, %v7729_v36  ;;  %v7583_v14 = vadd.f32 %v7582_v52, %v7544_v2  ;;  %v15261_v52 = vld [vmem:[#allocation24_spill] sm:$0xff] }
 0xf76   : > { %v7651_v26 = vpop.f32.mrf.mxu2 }
 0xf77   : > { %v7652_v29 = vadd.f32 %v7651_v26, %v7583_v14  ;;  %v8225_v14 = vld [vmem:[#allocation2 + $0x48] sm:$0xff] }
 0xf79   : > { %v7689_v34 = vadd.f32 %v7688_v8, %v7652_v29 }
 0xf83   : > { %v7992_v32 = vpop.f32.mrf.mxu0 }
 0xf86   : > { %v8029_v28 = vpop.f32.mrf.mxu1 }
 0xf87   : > { %v7923_v51 = vpop.f32.mrf.mxu3 }
 0xf8b   : > { %v8126_v36 = vpop.f32.mrf.mxu0 }
 0xf8f   : > { %v7884_v31 = vpop.f32.mrf.mxu2  ;;  %v8098_v22 = vpop.f32.mrf.mxu3 }
 0xf90   : > { %v7885_v19 = vadd.f32 %v7884_v31, %v7831_v37 }
 0xf92   : > { %v7924_v9 = vadd.f32 %v7923_v51, %v7885_v19 }
 0xf93   : > { %v8131_v37 = vpop.f32.mrf.mxu0 }
 0xf94   : > { %v7993_v7 = vadd.f32 %v7992_v32, %v7924_v9 }
 0xf96   : > { %v8030_v27 = vadd.f32 %v8029_v28, %v7993_v7  ;;  %v8224_v28 = vld [vmem:[#allocation2 + $0x40] sm:$0xff]  ;;  %v8155_v7 = vpop.f32.mrf.mxu1 }
 0xf97   : > { %v8064_v18 = vpop.f32.mrf.mxu2  ;;  %v8102_v32 = vpop.f32.mrf.mxu3  ;;  %v8229_v20 = vsel %vm171_vm0, %v8224_v28, 0 }
 0xf98   : > { %vm8034_vm10 = vcmp.lt.f32.partialorder %v8033_v12, %v8030_v27  ;;  %v8099_v8 = vadd.f32 %v8098_v22, %v8064_v18 }
 0xf99   : > { %v13794_v50 = vsel %vm8034_vm10, %v8030_v27, %v7689_v34  ;;  %v8223_v10 = vsel %vm8034_vm10, 0.0, %v15260_v35  ;;  %v13802_v34 = vand.u32 4294901760, %v8229_v20 }
 0xf9a   : > { %15259 = vst [vmem:[#allocation8_spill] sm:$0xff] %v13794_v50  ;;  %v11987_v2 = vrot.slane %v8223_v10, 5  ;;  %v8127_v19 = vadd.f32 %v8126_v36, %v8099_v8 }
 0xf9b   : > { %v8252_v44 = vsub.f32 %v8229_v20, %v13802_v34 }
 0xf9c   : > { %v13799_v26 = vsel %vm12005_vm11, %v15261_v52, %v11987_v2  ;;  %v8232_v2 = vsel %vm171_vm0, %v8225_v14, 0  ;;  %v8156_v52 = vadd.f32 %v8155_v7, %v8127_v19  ;;  %v15268_v19 = vld [vmem:[#allocation13_spill] sm:$0xff] }
 0xf9d   : > { %15262 = vst [vmem:[#allocation45_spill] sm:$0xff] %v13799_v26  ;;  %v15263_v26 = vmov 0   ;;  %v8253_v18 = vand.u32 4294901760, %v8252_v44 }
 0xf9e   : > { %v8161_v10 = vpop.f32.mrf.mxu1  ;;  %v8218_v35 = vsel %vm8034_vm10, 1, %v15263_v26 }
 0xf9f   : > { %v8072_v9 = vpop.f32.mrf.mxu2  ;;  %v8211_v51 = vpop.f32.mrf.mxu3  ;;  %v8219_v13 = vperm.slane %v8218_v35, 0 }
 0xfa0   : > { %v8103_v6 = vadd.f32 %v8102_v32, %v8072_v9  ;;  %v13808_v32 = vand.u32 4294901760, %v8232_v2 }
 0xfa1   : > { %vm8220_vm12 = vcmp.eq.s32.totalorder %v8219_v13, 1 }
 0xfa2   : > { %v8132_v29 = vadd.f32 %v8131_v37, %v8103_v6  ;;  %v8254_v37 = vsub.f32 %v8252_v44, %v8253_v18  ;;  %v8260_v20 = vsub.f32 %v8232_v2, %v13808_v32 }
 0xfa4   : > { %v8162_v28 = vadd.f32 %v8161_v10, %v8132_v29  ;;  %v8255_v27 = vand.u32 4294901760, %v8254_v37  ;;  %v8261_v7 = vand.u32 4294901760, %v8260_v20  ;;  %v15270_v10 = vld [vmem:[#allocation14_spill] sm:$0xff] }
 0xfa5   : > { %v15280_v37 = vld [vmem:[#allocation38_spill] sm:$0xff] }
 0xfa7   : > { %v8185_v31 = vpop.f32.mrf.mxu2  ;;  %v8215_v50 = vpop.f32.mrf.mxu3 }
 0xfa8   : > { %v8186_v22 = vadd.f32 %v8185_v31, %v8156_v52  ;;  %v15272_v52 = vld [vmem:[#allocation17_spill] sm:$0xff] }
 0xfaa   : > { %v8212_v8 = vadd.f32 %v8211_v51, %v8186_v22  ;;  %v8262_v51 = vsub.f32 %v8260_v20, %v8261_v7  ;;  %v15274_v22 = vld [vmem:[#allocation19_spill] sm:$0xff] }
 0xfac   : > { %v8263_v2 = vand.u32 4294901760, %v8262_v51  ;;  %v15286_v51 = vld [vmem:[#allocation20_spill] sm:$0xff] }
 0xfaf   : > { %v8189_v9 = vpop.f32.mrf.mxu2 }
 0xfb0   : > { %v8190_v36 = vadd.f32 %v8189_v9, %v8162_v28  ;;  %v15273_v28 = vld [vmem:[#allocation18_spill] sm:$0xff]  ;;  %v15276_v9 = vld [vmem:[#allocation25_spill] sm:$0xff] }
 0xfb2   : > { %v8216_v6 = vadd.f32 %v8215_v50, %v8190_v36  ;;  %v15267_v50 = vld [vmem:[#allocation12_spill] sm:$0xff] }
 0xfb3   : > { %v15277_v36 = vld [vmem:[#allocation28_spill] sm:$0xff] }
 0xfb4   : > { %v13811_v14 = vsel %vm8220_vm12, %v8216_v6, %v8212_v8  ;;  %v15278_v8 = vld [vmem:[#allocation31_spill] sm:$0xff]  ;;  %v15279_v6 = vld [vmem:[#allocation37_spill] sm:$0xff] }
 0xfb5   : > { %v13814_v12 = vand.u32 4294901760, %v13811_v14 }
 0xfb7   : > { %15264 = vst [vmem:[#allocation7_spill] sm:$0xff] %v13814_v12  ;;  %8250 = vmatpush.msra.mxu0 %v13814_v12  ;;  %8343 = vmatpush.msrb.mxu3 %v13814_v12  ;;  %v13820_v35 = vsub.f32 %v13811_v14, %v13814_v12 }
 0xfb8   : > { %8256 = vmatmul.f32.vlgmr.msra.gmra.mxu0 %v8255_v27  ;;  %8347 = vmatmul.f32.vlgmr.msrb.gmra.mxu3 %v8253_v18  ;;  %v15275_v18 = vld [vmem:[#allocation22_spill] sm:$0xff]  ;;  %v15283_v27 = vld [vmem:[#allocation44_spill] sm:$0xff] }
 0xfb9   : > { %15265 = vst [vmem:[#allocation9_spill] sm:$0xff] %v13820_v35  ;;  %8315 = vmatpush.msrb.mxu2 %v13820_v35  ;;  %v13824_v13 = vand.u32 4294901760, %v13820_v35  ;;  %8471 = vmatpush.msra.mxu3 %v15267_v50 }
 0xfba   : > { %8318 = vmatmul.f32.vlgmr.msrb.gmra.mxu2 %v8252_v44  ;;  %v15271_v44 = vld [vmem:[#allocation16_spill] sm:$0xff] }
 0xfbb   : > { %15266 = vst [vmem:[#allocation10_spill] sm:$0xff] %v13824_v13  ;;  %8375 = vmatpush.msrb.mxu0 %v13824_v13  ;;  %v8286_v31 = vsub.f32 %v13820_v35, %v13824_v13  ;;  %8477 = vmatpush.msra.mxu3 %v15268_v19 }
 0xfbc   : > { %8426 = vmatpush.msra.mxu2 %v12520_v47 }
 0xfbd   : > { %8569 = vmatpush.msra.mxu0 %v12545_v58  ;;  %v13833_v29 = vand.u32 4294901760, %v8286_v31  ;;  %8483 = vmatpush.msra.mxu3 %v15270_v10  ;;  %v15287_v31 = vld [vmem:[#allocation21_spill] sm:$0xff] }
 0xfbe   : > { %8428 = vmatpush.msra.mxu2 %v12522_v48 }
 0xfbf   : > { %15269 = vst [vmem:[#allocation6_spill] sm:$0xff] %v13833_v29  ;;  %8572 = vmatpush.msra.mxu0 %v12548_v59  ;;  %8288 = vmatpush.msra.mxu1 %v13833_v29 }
 0xfc0   : > { %8489 = vmatpush.msra.mxu3 %v15271_v44  ;;  %8264 = vmatmul.f32.gmra.mxu0 %v8263_v2  ;;  %v15288_v2 = vld [vmem:[#allocation23_spill] sm:$0xff] }
 0xfc1   : > { %8290 = vmatmul.f32.vlgmr.msra.gmra.mxu1 %v13802_v34  ;;  %8353 = vmatmul.f32.gmra.mxu3 %v8261_v7  ;;  %v15285_v7 = vld [vmem:[#allocation15_spill] sm:$0xff] }
 0xfc2   : > { %8401 = vmatpush.msrb.mxu1 %v13814_v12  ;;  %8323 = vmatmul.f32.gmra.mxu2 %v8260_v20  ;;  %v15282_v20 = vld [vmem:[#allocation43_spill] sm:$0xff] }
 0xfc3   : > { %8575 = vmatpush.msra.mxu0 %v12551_v60  ;;  %8495 = vmatpush.msra.mxu3 %v15272_v52 }
 0xfc4   : > { %8622 = vmatpush.msra.mxu1 %v12520_v47  ;;  %8430 = vmatpush.msra.mxu2 %v12524_v49 }
 0xfc5   : > { %8578 = vmatpush.msra.mxu0 %v12556_v62  ;;  %8501 = vmatpush.msra.mxu3 %v15273_v28 }
 0xfc6   : > { %8624 = vmatpush.msra.mxu1 %v12522_v48  ;;  %8432 = vmatpush.msra.mxu2 %v12535_v54 }
 0xfc7   : > { %8581 = vmatpush.msra.mxu0 %v12559_v63  ;;  %8507 = vmatpush.msra.mxu3 %v15274_v22 }
 0xfc8   : > { %8626 = vmatpush.msra.mxu1 %v12524_v49  ;;  %8377 = vmatmul.f32.vlgmr.msrb.gmra.mxu0 %v13802_v34 }
 0xfc9   : > { %8294 = vmatmul.f32.gmra.mxu1 %v13808_v32  ;;  %8584 = vmatpush.msra.mxu0 %v12562_v0 }
 0xfca   : > { %8628 = vmatpush.msra.mxu1 %v12535_v54  ;;  %8513 = vmatpush.msra.mxu3 %v15275_v18 }
 0xfcb   : > { %8434 = vmatpush.msra.mxu2 %v12537_v55  ;;  %8587 = vmatpush.msra.mxu0 %v12605_v24 }
 0xfcc   : > { %8630 = vmatpush.msra.mxu1 %v12537_v55  ;;  %8519 = vmatpush.msra.mxu3 %v15276_v9 }
 0xfcd   : > { %8436 = vmatpush.msra.mxu2 %v12539_v56  ;;  %8590 = vmatpush.msra.mxu0 %v12656_v42 }
 0xfce   : > { %8632 = vmatpush.msra.mxu1 %v12539_v56  ;;  %8525 = vmatpush.msra.mxu3 %v15277_v36 }
 0xfcf   : > { %8438 = vmatpush.msra.mxu2 %v12564_v1  ;;  %8593 = vmatpush.msra.mxu0 %v12669_v45 }
 0xfd0   : > { %8634 = vmatpush.msra.mxu1 %v12564_v1  ;;  %8381 = vmatmul.f32.gmra.mxu0 %v13808_v32 }
 0xfd1   : > { %8403 = vmatmul.f32.vlgmr.msrb.gmra.mxu1 %v13802_v34  ;;  %8531 = vmatpush.msra.mxu3 %v15278_v8  ;;  %v15281_v34 = vld [vmem:[#allocation41_spill] sm:$0xff] }
 0xfd2   : > { %8636 = vmatpush.msra.mxu1 %v12650_v40  ;;  %8596 = vmatpush.msra.mxu0 %v12685_v53 }
 0xfd3   : > { %8440 = vmatpush.msra.mxu2 %v12650_v40  ;;  %8537 = vmatpush.msra.mxu3 %v15279_v6 }
 0xfd4   : > { %8638 = vmatpush.msra.mxu1 %v12658_v43  ;;  %8599 = vmatpush.msra.mxu0 %v15099_v41 }
 0xfd5   : > { %8442 = vmatpush.msra.mxu2 %v12658_v43  ;;  %8543 = vmatpush.msra.mxu3 %v15280_v37 }
 0xfd6   : > { %8640 = vmatpush.msra.mxu1 %v12672_v46  ;;  %8602 = vmatpush.msra.mxu0 %v15246_v15 }
 0xfd7   : > { %8444 = vmatpush.msra.mxu2 %v12672_v46  ;;  %8549 = vmatpush.msra.mxu3 %v15281_v34 }
 0xfd8   : > { %8642 = vmatpush.msra.mxu1 %v12688_v57  ;;  %8605 = vmatpush.msra.mxu0 %v15249_v23 }
 0xfd9   : > { %8407 = vmatmul.f32.gmra.mxu1 %v13808_v32  ;;  %8446 = vmatpush.msra.mxu2 %v12688_v57  ;;  %v15284_v32 = vld [vmem:[#allocation11_spill] sm:$0xff] }
 0xfda   : > { %8644 = vmatpush.msra.mxu1 %v12707_v16  ;;  %8555 = vmatpush.msra.mxu3 %v15282_v20 }
 0xfdb   : > { %8608 = vmatpush.msra.mxu0 %v15253_v61  ;;  %8448 = vmatpush.msra.mxu2 %v12707_v16 }
 0xfdc   : > { %8646 = vmatpush.msra.mxu1 %v12722_v30  ;;  %8561 = vmatpush.msra.mxu3 %v15283_v27 }
 0xfdd   : > { %8611 = vmatpush.msra.mxu0 %v15255_v21  ;;  %8450 = vmatpush.msra.mxu2 %v12722_v30 }
 0xfde   : > { %8648 = vmatpush.msra.mxu1 %v12740_v39  ;;  %8730 = vmatpush.msrb.mxu3 %v12520_v47 }
 0xfdf   : > { %8614 = vmatpush.msra.mxu0 %v15256_v38  ;;  %8452 = vmatpush.msra.mxu2 %v12740_v39 }
 0xfe0   : > { %8650 = vmatpush.msra.mxu1 %v12759_v25  ;;  %8732 = vmatpush.msrb.mxu3 %v12522_v48 }
 0xfe1   : > { %8767 = vmatpush.msrb.mxu0 %v12520_v47  ;;  %8454 = vmatpush.msra.mxu2 %v12759_v25 }
 0xfe2   : > { %8652 = vmatpush.msra.mxu1 %v15247_v33  ;;  %8734 = vmatpush.msrb.mxu3 %v12524_v49 }
 0xfe3   : > { %8769 = vmatpush.msrb.mxu0 %v12522_v48  ;;  %8456 = vmatpush.msra.mxu2 %v15247_v33 }
 0xfe4   : > { %8812 = vmatpush.msrb.mxu1 %v15267_v50  ;;  %8736 = vmatpush.msrb.mxu3 %v12535_v54 }
 0xfe5   : > { %8771 = vmatpush.msrb.mxu0 %v12524_v49  ;;  %8663 = vmatpush.msrb.mxu2 %v12568_v3 }
 0xfe6   : > { %8818 = vmatpush.msrb.mxu1 %v15268_v19  ;;  %8738 = vmatpush.msrb.mxu3 %v12537_v55 }
 0xfe7   : > { %8773 = vmatpush.msrb.mxu0 %v12535_v54  ;;  %8667 = vmatpush.msrb.mxu2 %v12571_v4 }
 0xfe8   : > { %8824 = vmatpush.msrb.mxu1 %v15270_v10  ;;  %8740 = vmatpush.msrb.mxu3 %v12539_v56 }
 0xfe9   : > { %8775 = vmatpush.msrb.mxu0 %v12537_v55  ;;  %8671 = vmatpush.msrb.mxu2 %v12575_v5 }
 0xfea   : > { %8830 = vmatpush.msrb.mxu1 %v15271_v44  ;;  %8742 = vmatpush.msrb.mxu3 %v12564_v1 }
 0xfeb   : > { %8777 = vmatpush.msrb.mxu0 %v12539_v56  ;;  %8675 = vmatpush.msrb.mxu2 %v12579_v11 }
 0xfec   : > { %8836 = vmatpush.msrb.mxu1 %v15272_v52  ;;  %8744 = vmatpush.msrb.mxu3 %v12650_v40 }
 0xfed   : > { %8779 = vmatpush.msrb.mxu0 %v12564_v1  ;;  %8679 = vmatpush.msrb.mxu2 %v12590_v17 }
 0xfee   : > { %8842 = vmatpush.msrb.mxu1 %v15273_v28  ;;  %8746 = vmatpush.msrb.mxu3 %v12658_v43 }
 0xfef   : > { %8781 = vmatpush.msrb.mxu0 %v12650_v40  ;;  %8683 = vmatpush.msrb.mxu2 %v15284_v32 }
 0xff0   : > { %8848 = vmatpush.msrb.mxu1 %v15274_v22  ;;  %8748 = vmatpush.msrb.mxu3 %v12672_v46 }
 0xff1   : > { %8783 = vmatpush.msrb.mxu0 %v12658_v43  ;;  %8687 = vmatpush.msrb.mxu2 %v15285_v7 }
 0xff2   : > { %8854 = vmatpush.msrb.mxu1 %v15275_v18  ;;  %8750 = vmatpush.msrb.mxu3 %v12688_v57  ;;  %v15293_v18 = vld [vmem:[#allocation39_spill] sm:$0xff] }
 0xff3   : > { %8785 = vmatpush.msrb.mxu0 %v12672_v46  ;;  %8691 = vmatpush.msrb.mxu2 %v15286_v51 }
 0xff4   : > { %8860 = vmatpush.msrb.mxu1 %v15276_v9  ;;  %8752 = vmatpush.msrb.mxu3 %v12707_v16  ;;  %v15289_v9 = vld [vmem:[#allocation26_spill] sm:$0xff] }
 0xff5   : > { %8787 = vmatpush.msrb.mxu0 %v12688_v57  ;;  %8695 = vmatpush.msrb.mxu2 %v15287_v31 }
 0xff6   : > { %8866 = vmatpush.msrb.mxu1 %v15277_v36  ;;  %8754 = vmatpush.msrb.mxu3 %v12722_v30  ;;  %v15290_v36 = vld [vmem:[#allocation30_spill] sm:$0xff] }
 0xff7   : > { %8789 = vmatpush.msrb.mxu0 %v12707_v16  ;;  %8699 = vmatpush.msrb.mxu2 %v15288_v2 }
 0xff8   : > { %8872 = vmatpush.msrb.mxu1 %v15278_v8  ;;  %8756 = vmatpush.msrb.mxu3 %v12740_v39  ;;  %v15291_v8 = vld [vmem:[#allocation32_spill] sm:$0xff] }
 0xff9   : > { %8791 = vmatpush.msrb.mxu0 %v12722_v30  ;;  %8703 = vmatpush.msrb.mxu2 %v15289_v9 }
 0xffa   : > { %8878 = vmatpush.msrb.mxu1 %v15279_v6  ;;  %8758 = vmatpush.msrb.mxu3 %v12759_v25  ;;  %v15292_v6 = vld [vmem:[#allocation34_spill] sm:$0xff] }
 0xffb   : > { %8793 = vmatpush.msrb.mxu0 %v12740_v39  ;;  %8707 = vmatpush.msrb.mxu2 %v15290_v36 }
 0xffc   : > { %8884 = vmatpush.msrb.mxu1 %v15280_v37  ;;  %8760 = vmatpush.msrb.mxu3 %v15247_v33  ;;  %v15294_v37 = vld [vmem:[#allocation42_spill] sm:$0xff] }
 0xffd   : > { %8795 = vmatpush.msrb.mxu0 %v12759_v25  ;;  %8711 = vmatpush.msrb.mxu2 %v15291_v8 }
 0xffe   : > { %8890 = vmatpush.msrb.mxu1 %v15281_v34 }
 0xfff   : > { %8797 = vmatpush.msrb.mxu0 %v15247_v33  ;;  %8715 = vmatpush.msrb.mxu2 %v15292_v6 }
0x1000   : > { %8896 = vmatpush.msrb.mxu1 %v15282_v20 }
0x1001   : > { %8719 = vmatpush.msrb.mxu2 %v15293_v18 }
0x1002   : > { %8902 = vmatpush.msrb.mxu1 %v15283_v27 }
0x1003   : > { %8723 = vmatpush.msrb.mxu2 %v15294_v37 }
0x1035   : > { %v8257_v22 = vpop.f32.mrf.mxu0 }
0x103b   : > { %v8348_v50 = vpop.f32.mrf.mxu3 }
0x103d   : > { %v8265_v28 = vpop.f32.mrf.mxu0  ;;  %v8319_v10 = vpop.f32.mrf.mxu2 }
0x103e   : > { %v8291_v52 = vpop.f32.mrf.mxu1 }
0x103f   : > { %v8292_v44 = vadd.f32 %v8291_v52, %v8257_v22 }
0x1041   : > { %v8320_v19 = vadd.f32 %v8319_v10, %v8292_v44 }
0x1043   : > { %v8349_v38 = vadd.f32 %v8348_v50, %v8320_v19 }
0x1044   : > { %v8354_v29 = vpop.f32.mrf.mxu3 }
0x1045   : > { %v8378_v26 = vpop.f32.mrf.mxu0  ;;  %v8324_v21 = vpop.f32.mrf.mxu2 }
0x1046   : > { %v8295_v34 = vpop.f32.mrf.mxu1  ;;  %v8379_v20 = vadd.f32 %v8378_v26, %v8349_v38 }
0x1047   : > { %v8296_v13 = vadd.f32 %v8295_v34, %v8265_v28 }
0x1049   : > { %v8325_v61 = vadd.f32 %v8324_v21, %v8296_v13 }
0x104b   : > { %v8355_v23 = vadd.f32 %v8354_v29, %v8325_v61 }
0x104d   : > { %v8382_v37 = vpop.f32.mrf.mxu0 }
0x104e   : > { %v8404_v35 = vpop.f32.mrf.mxu1  ;;  %v8383_v33 = vadd.f32 %v8382_v37, %v8355_v23 }
0x104f   : > { %v8405_v27 = vadd.f32 %v8404_v35, %v8379_v20 }
0x1051   : > { %v8411_v12 = vmul.f32 %v8405_v27, %v13811_v14  ;;  %v12138_v27 = vld [vmem:[%s14755_s0 + $0x90] sm:$0xff] }
0x1053   : > { %v8412_v18 = vrot.slane %v8411_v12, 4 }
0x1055   : > { %v8413_v52 = vadd.f32 %v8412_v18, %v8411_v12 }
0x1056   : > { %v8408_v22 = vpop.f32.mrf.mxu1 }
0x1057   : > { %v8414_v15 = vrot.slane %v8413_v52, 2  ;;  %v8409_v10 = vadd.f32 %v8408_v22, %v8383_v33 }
0x1059   : > { %v8415_v44 = vadd.f32 %v8414_v15, %v8413_v52  ;;  %v8418_v28 = vmul.f32 %v8409_v10, %v13811_v14  ;;  %v9111_v52 = vsel %vm171_vm0, %v12138_v27, 0  ;;  %v15295_v10 = vld [vmem:[#allocation27_spill] sm:$0xff] }
0x105a   : > { %v9133_v22 = vand.u32 4294901760, %v9111_v52 }
0x105b   : > { %v8416_v50 = vrot.slane %v8415_v44, 1  ;;  %v8419_v38 = vrot.slane %v8418_v28, 4 }
0x105d   : > { %v8417_v26 = vadd.f32 %v8416_v50, %v8415_v44  ;;  %v8420_v19 = vadd.f32 %v8419_v38, %v8418_v28  ;;  %v15296_v44 = vld [vmem:[#allocation36_spill] sm:$0xff]  ;;  %v12139_v28 = vld [vmem:[%s14755_s0 + $0x98] sm:$0xff]  ;;  %v15298_v38 = vld [vmem:[#allocation29_spill] sm:$0xff] }
0x105e   : > { %v15297_v50 = vld [vmem:[#allocation39_spill] sm:$0xff] }
0x105f   : > { %v8457_v21 = vand.u32 4294901760, %v8417_v26  ;;  %v8421_v35 = vrot.slane %v8420_v19, 2 }
0x1061   : > { %v8458_v13 = vsub.f32 %v8417_v26, %v8457_v21  ;;  %v8422_v34 = vadd.f32 %v8421_v35, %v8420_v19  ;;  %8563 = vmatmul.f32.vlgmr.msra.gmra.mxu3 %v8457_v21  ;;  %v9134_v26 = vsub.f32 %v9111_v52, %v9133_v22  ;;  %v15299_v19 = vld [vmem:[#allocation6_spill] sm:$0xff]  ;;  %v9114_v35 = vsel %vm171_vm0, %v12139_v28, 0 }
0x1062   : > { %8963 = vmatpush.msra.mxu3 %v12520_v47 }
0x1063   : > { %v8423_v61 = vrot.slane %v8422_v34, 1  ;;  %8617 = vmatmul.f32.vlgmr.msra.gmra.mxu0 %v8458_v13  ;;  %v8459_v23 = vand.u32 4294901760, %v8458_v13 }
0x1064   : > { %8965 = vmatpush.msra.mxu3 %v12522_v48  ;;  %9004 = vmatpush.msra.mxu0 %v12568_v3 }
0x1065   : > { %v8424_v15 = vadd.f32 %v8423_v61, %v8422_v34  ;;  %8656 = vmatmul.f32.vlgmr.msra.gmra.mxu1 %v8459_v23  ;;  %v8460_v33 = vsub.f32 %v8458_v13, %v8459_v23  ;;  %v15301_v13 = vld [vmem:[#allocation7_spill] sm:$0xff]  ;;  %v15302_v34 = vld [vmem:[#allocation33_spill] sm:$0xff]  ;;  %v9135_v23 = vand.u32 4294901760, %v9134_v26 }
0x1066   : > { %8967 = vmatpush.msra.mxu3 %v12524_v49  ;;  %9008 = vmatpush.msra.mxu0 %v12571_v4  ;;  %v15303_v61 = vld [vmem:[#allocation9_spill] sm:$0xff] }
0x1067   : > { %v13974_v14 = vand.u32 4294901760, %v8424_v15  ;;  %9071 = vmatpush.msra.mxu1 %v12520_v47  ;;  %v8461_v12 = vand.u32 4294901760, %v8460_v33  ;;  %v15304_v33 = vld [vmem:[#allocation35_spill] sm:$0xff] }
0x1068   : > { %8969 = vmatpush.msra.mxu3 %v12535_v54  ;;  %9012 = vmatpush.msra.mxu0 %v12575_v5 }
0x1069   : > { %v13980_v29 = vsub.f32 %v8424_v15, %v13974_v14  ;;  %9073 = vmatpush.msra.mxu1 %v12522_v48  ;;  %8462 = vmatmul.f32.vlgmr.msra.gmra.mxu2 %v8461_v12  ;;  %v9141_v15 = vand.u32 4294901760, %v9114_v35  ;;  %v15305_v12 = vld [vmem:[#allocation40_spill] sm:$0xff] }
0x106a   : > { %8762 = vmatmul.f32.vlgmr.msrb.gmra.mxu3 %v8457_v21  ;;  %8910 = vmatpush.msra.mxu2 %v12545_v58 }
0x106b   : > { %8971 = vmatpush.msra.mxu3 %v12537_v55  ;;  %9016 = vmatpush.msra.mxu0 %v12579_v11  ;;  %v8800_v18 = vand.u32 4294901760, %v13980_v29 }
0x106c   : > { %9075 = vmatpush.msra.mxu1 %v12524_v49  ;;  %8913 = vmatpush.msra.mxu2 %v12548_v59 }
0x106d   : > { %8973 = vmatpush.msra.mxu3 %v12539_v56  ;;  %9020 = vmatpush.msra.mxu0 %v12590_v17  ;;  %v8801_v37 = vsub.f32 %v13980_v29, %v8800_v18 }
0x106e   : > { %9077 = vmatpush.msra.mxu1 %v12535_v54  ;;  %8916 = vmatpush.msra.mxu2 %v12551_v60 }
0x106f   : > { %8904 = vmatmul.f32.vlgmr.msrb.gmra.mxu1 %v13974_v14  ;;  %8975 = vmatpush.msra.mxu3 %v12564_v1  ;;  %v8802_v20 = vand.u32 4294901760, %v8801_v37  ;;  %v9142_v37 = vsub.f32 %v9114_v35, %v9141_v15 }
0x1070   : > { %9024 = vmatpush.msra.mxu0 %v15284_v32  ;;  %9079 = vmatpush.msra.mxu1 %v12537_v55 }
0x1071   : > { %8919 = vmatpush.msra.mxu2 %v12556_v62  ;;  %8977 = vmatpush.msra.mxu3 %v12650_v40  ;;  %v9143_v52 = vand.u32 4294901760, %v9142_v37 }
0x1072   : > { %9028 = vmatpush.msra.mxu0 %v15285_v7  ;;  %9081 = vmatpush.msra.mxu1 %v12539_v56 }
0x1073   : > { %8725 = vmatmul.f32.vlgmr.msrb.gmra.mxu2 %v8457_v21  ;;  %8803 = vmatmul.f32.vlgmr.msrb.gmra.mxu0 %v8802_v20  ;;  %v15300_v21 = vld [vmem:[#allocation42_spill] sm:$0xff] }
0x1074   : > { %8922 = vmatpush.msra.mxu2 %v12559_v63  ;;  %8979 = vmatpush.msra.mxu3 %v12658_v43  ;;  %v15306_v20 = vld [vmem:[#allocation10_spill] sm:$0xff] }
0x1075   : > { %9032 = vmatpush.msra.mxu0 %v15286_v51  ;;  %9083 = vmatpush.msra.mxu1 %v12564_v1 }
0x1076   : > { %8925 = vmatpush.msra.mxu2 %v12562_v0  ;;  %8981 = vmatpush.msra.mxu3 %v12672_v46 }
0x1077   : > { %9036 = vmatpush.msra.mxu0 %v15287_v31  ;;  %9085 = vmatpush.msra.mxu1 %v12650_v40  ;;  %v15307_v31 = vld [vmem:[#allocation8_spill] sm:$0xff] }
0x1078   : > { %8928 = vmatpush.msra.mxu2 %v12605_v24  ;;  %8983 = vmatpush.msra.mxu3 %v12688_v57 }
0x1079   : > { %9040 = vmatpush.msra.mxu0 %v15288_v2  ;;  %9087 = vmatpush.msra.mxu1 %v12658_v43 }
0x107a   : > { %8931 = vmatpush.msra.mxu2 %v12656_v42  ;;  %8985 = vmatpush.msra.mxu3 %v12707_v16 }
0x107b   : > { %9044 = vmatpush.msra.mxu0 %v15289_v9  ;;  %9089 = vmatpush.msra.mxu1 %v12672_v46 }
0x107c   : > { %8934 = vmatpush.msra.mxu2 %v12669_v45  ;;  %8987 = vmatpush.msra.mxu3 %v12722_v30 }
0x107d   : > { %9048 = vmatpush.msra.mxu0 %v15290_v36  ;;  %9091 = vmatpush.msra.mxu1 %v12688_v57 }
0x107e   : > { %8937 = vmatpush.msra.mxu2 %v12685_v53  ;;  %8989 = vmatpush.msra.mxu3 %v12740_v39 }
0x107f   : > { %9052 = vmatpush.msra.mxu0 %v15291_v8  ;;  %9093 = vmatpush.msra.mxu1 %v12707_v16 }
0x1080   : > { %8940 = vmatpush.msra.mxu2 %v15099_v41  ;;  %8991 = vmatpush.msra.mxu3 %v12759_v25 }
0x1081   : > { %9056 = vmatpush.msra.mxu0 %v15292_v6  ;;  %9095 = vmatpush.msra.mxu1 %v12722_v30 }
0x1082   : > { %8943 = vmatpush.msra.mxu2 %v15295_v10  ;;  %8993 = vmatpush.msra.mxu3 %v15296_v44 }
0x1083   : > { %9060 = vmatpush.msra.mxu0 %v15297_v50  ;;  %9097 = vmatpush.msra.mxu1 %v12740_v39 }
0x1084   : > { %8997 = vmatmul.f32.vlgmr.msra.gmra.mxu3 %v8800_v18  ;;  %8946 = vmatpush.msra.mxu2 %v15298_v38  ;;  %v9136_v18 = vsub.f32 %v9134_v26, %v9135_v23 }
0x1085   : > { %9170 = vmatpush.msrb.mxu3 %v15299_v19  ;;  %9064 = vmatpush.msra.mxu0 %v15300_v21 }
0x1086   : > { %9099 = vmatpush.msra.mxu1 %v12759_v25  ;;  %9066 = vmatmul.f32.vlgmr.msra.gmra.mxu0 %v13974_v14  ;;  %v9137_v27 = vand.u32 4294901760, %v9136_v18 }
0x1087   : > { %9283 = vmatpush.msra.mxu3 %v15301_v13  ;;  %8949 = vmatpush.msra.mxu2 %v15302_v34 }
0x1088   : > { %9197 = vmatpush.msrb.mxu0 %v15303_v61  ;;  %9101 = vmatpush.msra.mxu1 %v15296_v44 }
0x1089   : > { %9103 = vmatmul.f32.vlgmr.msra.gmra.mxu1 %v13974_v14  ;;  %8952 = vmatpush.msra.mxu2 %v15304_v33  ;;  %v9144_v14 = vsub.f32 %v9142_v37, %v9143_v52 }
0x108a   : > { %9225 = vmatpush.msrb.mxu1 %v15301_v13 }
0x108b   : > { %8955 = vmatpush.msra.mxu2 %v15305_v12  ;;  %v9145_v28 = vand.u32 4294901760, %v9144_v14 }
0x108c   : > { %8958 = vmatmul.f32.vlgmr.msra.gmra.mxu2 %v13980_v29  ;;  %9172 = vmatmul.f32.vlgmr.msrb.gmra.mxu3 %v9133_v22 }
0x108d   : > { %9132 = vmatpush.msrb.mxu2 %v15301_v13 }
0x108e   : > { %9200 = vmatmul.f32.vlgmr.msrb.gmra.mxu0 %v9134_v26 }
0x108f   : > { %9257 = vmatpush.msra.mxu2 %v15306_v20 }
0x1091   : > { %9229 = vmatmul.f32.vlgmr.msrb.gmra.mxu1 %v9135_v23 }
0x1094   : > { %9138 = vmatmul.f32.vlgmr.msrb.gmra.mxu2 %v9137_v27  ;;  %9176 = vmatmul.f32.gmra.mxu3 %v9141_v15 }
0x1096   : > { %9205 = vmatmul.f32.gmra.mxu0 %v9142_v37 }
0x1099   : > { %9235 = vmatmul.f32.gmra.mxu1 %v9143_v52 }
0x109c   : > { %9146 = vmatmul.f32.gmra.mxu2 %v9145_v28  ;;  %9285 = vmatmul.f32.vlgmr.msra.gmra.mxu3 %v9133_v22 }
0x10a4   : > { %9259 = vmatmul.f32.vlgmr.msra.gmra.mxu2 %v9133_v22  ;;  %9289 = vmatmul.f32.gmra.mxu3 %v9141_v15 }
0x10ac   : > { %9263 = vmatmul.f32.gmra.mxu2 %v9141_v15  ;;  %v9107_v15 = vld [vmem:[%s12980_s7 + $0x4] sm:$0x1] }
0x10ad   : > { %v9108_v51 = vmul.f32 %v9107_v15, %v15307_v31 }
0x10e0   : > { %v8618_v35 = vpop.f32.mrf.mxu0 }
0x10e2   : > { %v8657_v13 = vpop.f32.mrf.mxu1 }
0x10e4   : > { %v8564_v29 = vpop.f32.mrf.mxu3 }
0x10ec   : > { %v8463_v19 = vpop.f32.mrf.mxu2  ;;  %v8905_v27 = vpop.f32.mrf.mxu1 }
0x10ed   : > { %v8763_v26 = vpop.f32.mrf.mxu3  ;;  %v8565_v18 = vadd.f32 %v8564_v29, %v8463_v19  ;;  %v15308_v19 = vmov 1.0  }
0x10ef   : > { %v8619_v21 = vadd.f32 %v8618_v35, %v8565_v18 }
0x10f0   : > { %v8804_v23 = vpop.f32.mrf.mxu0 }
0x10f1   : > { %v8906_v37 = vadd.f32 %v8905_v27, %v8804_v23  ;;  %v8658_v28 = vadd.f32 %v8657_v13, %v8619_v21  ;;  %v15310_v13 = vld [vmem:[#allocation45_spill] sm:$0xff] }
0x10f6   : > { %v8726_v61 = vpop.f32.mrf.mxu2 }
0x10f7   : > { %v8727_v22 = vadd.f32 %v8726_v61, %v8658_v28  ;;  %v9300_v28 = vld [vmem:[#allocation2 + $0x58] sm:$0xff] }
0x10f9   : > { %v8764_v7 = vadd.f32 %v8763_v26, %v8727_v22 }
0x1103   : > { %v9067_v6 = vpop.f32.mrf.mxu0 }
0x1106   : > { %v9104_v9 = vpop.f32.mrf.mxu1 }
0x1107   : > { %v8998_v20 = vpop.f32.mrf.mxu3 }
0x110b   : > { %v9201_v23 = vpop.f32.mrf.mxu0 }
0x110f   : > { %v8959_v14 = vpop.f32.mrf.mxu2  ;;  %v9173_v8 = vpop.f32.mrf.mxu3 }
0x1110   : > { %v8960_v52 = vadd.f32 %v8959_v14, %v8906_v37 }
0x1112   : > { %v8999_v50 = vadd.f32 %v8998_v20, %v8960_v52 }
0x1113   : > { %v9206_v14 = vpop.f32.mrf.mxu0 }
0x1114   : > { %v9068_v36 = vadd.f32 %v9067_v6, %v8999_v50 }
0x1116   : > { %v9105_v2 = vadd.f32 %v9104_v9, %v9068_v36  ;;  %v9299_v9 = vld [vmem:[#allocation2 + $0x50] sm:$0xff]  ;;  %v9230_v36 = vpop.f32.mrf.mxu1 }
0x1117   : > { %v9139_v29 = vpop.f32.mrf.mxu2  ;;  %v9177_v6 = vpop.f32.mrf.mxu3  ;;  %v9304_v31 = vsel %vm171_vm0, %v9299_v9, 0 }
0x1118   : > { %vm9109_vm13 = vcmp.lt.f32.partialorder %v9108_v51, %v9105_v2  ;;  %v9174_v26 = vadd.f32 %v9173_v8, %v9139_v29  ;;  %v14069_v37 = vand.u32 4294901760, %v9304_v31 }
0x1119   : > { %v9298_v35 = vsel %vm9109_vm13, 0.0, %v15308_v19  ;;  %v14063_v18 = vsel %vm9109_vm13, %v9105_v2, %v8764_v7 }
0x111a   : > { %15309 = vst [vmem:[#allocation24_spill] sm:$0xff] %v14063_v18  ;;  %v11990_v21 = vrot.slane %v9298_v35, 4  ;;  %v9202_v52 = vadd.f32 %v9201_v23, %v9174_v26  ;;  %v9327_v15 = vsub.f32 %v9304_v31, %v14069_v37 }
0x111c   : > { %v14066_v61 = vsel %vm12007_vm14, %v15310_v13, %v11990_v21  ;;  %v9307_v21 = vsel %vm171_vm0, %v9300_v28, 0  ;;  %v9231_v13 = vadd.f32 %v9230_v36, %v9202_v52  ;;  %v9328_v29 = vand.u32 4294901760, %v9327_v15  ;;  %v15317_v52 = vld [vmem:[#allocation13_spill] sm:$0xff] }
0x111d   : > { %15311 = vst [vmem:[#allocation6_spill] sm:$0xff] %v14066_v61  ;;  %v15312_v61 = vmov 0  }
0x111e   : > { %v9236_v35 = vpop.f32.mrf.mxu1  ;;  %v9293_v19 = vsel %vm9109_vm13, 1, %v15312_v61 }
0x111f   : > { %v9147_v50 = vpop.f32.mrf.mxu2  ;;  %v9286_v20 = vpop.f32.mrf.mxu3  ;;  %v9294_v32 = vperm.slane %v9293_v19, 0 }
0x1120   : > { %v9178_v27 = vadd.f32 %v9177_v6, %v9147_v50  ;;  %v14075_v6 = vand.u32 4294901760, %v9307_v21 }
0x1121   : > { %vm9295_vm15 = vcmp.eq.s32.totalorder %v9294_v32, 1 }
0x1122   : > { %v9207_v22 = vadd.f32 %v9206_v14, %v9178_v27  ;;  %v9329_v14 = vsub.f32 %v9327_v15, %v9328_v29  ;;  %v9335_v31 = vsub.f32 %v9307_v21, %v14075_v6 }
0x1124   : > { %v9237_v9 = vadd.f32 %v9236_v35, %v9207_v22  ;;  %v9330_v2 = vand.u32 4294901760, %v9329_v14  ;;  %v9336_v36 = vand.u32 4294901760, %v9335_v31  ;;  %v15319_v35 = vld [vmem:[#allocation14_spill] sm:$0xff] }
0x1125   : > { %v15329_v14 = vld [vmem:[#allocation38_spill] sm:$0xff] }
0x1127   : > { %v9260_v7 = vpop.f32.mrf.mxu2  ;;  %v9290_v18 = vpop.f32.mrf.mxu3 }
0x1128   : > { %v9261_v8 = vadd.f32 %v9260_v7, %v9231_v13  ;;  %v15321_v13 = vld [vmem:[#allocation17_spill] sm:$0xff] }
0x112a   : > { %v9287_v26 = vadd.f32 %v9286_v20, %v9261_v8  ;;  %v9337_v20 = vsub.f32 %v9335_v31, %v9336_v36  ;;  %v15323_v8 = vld [vmem:[#allocation19_spill] sm:$0xff] }
0x112c   : > { %v9338_v21 = vand.u32 4294901760, %v9337_v20  ;;  %v15335_v20 = vld [vmem:[#allocation20_spill] sm:$0xff] }
0x112f   : > { %v9264_v50 = vpop.f32.mrf.mxu2 }
0x1130   : > { %v9265_v23 = vadd.f32 %v9264_v50, %v9237_v9  ;;  %v15322_v9 = vld [vmem:[#allocation18_spill] sm:$0xff]  ;;  %v15325_v50 = vld [vmem:[#allocation25_spill] sm:$0xff] }
0x1132   : > { %v9291_v27 = vadd.f32 %v9290_v18, %v9265_v23  ;;  %v15316_v18 = vld [vmem:[#allocation12_spill] sm:$0xff] }
0x1133   : > { %v15326_v23 = vld [vmem:[#allocation28_spill] sm:$0xff] }
0x1134   : > { %v14078_v28 = vsel %vm9295_vm15, %v9291_v27, %v9287_v26  ;;  %v15327_v26 = vld [vmem:[#allocation31_spill] sm:$0xff]  ;;  %v15328_v27 = vld [vmem:[#allocation37_spill] sm:$0xff] }
0x1135   : > { %v14081_v51 = vand.u32 4294901760, %v14078_v28 }
0x1137   : > { %15313 = vst [vmem:[#allocation7_spill] sm:$0xff] %v14081_v51  ;;  %9325 = vmatpush.msra.mxu0 %v14081_v51  ;;  %9418 = vmatpush.msrb.mxu3 %v14081_v51  ;;  %v14087_v19 = vsub.f32 %v14078_v28, %v14081_v51 }
0x1138   : > { %9331 = vmatmul.f32.vlgmr.msra.gmra.mxu0 %v9330_v2  ;;  %9422 = vmatmul.f32.vlgmr.msrb.gmra.mxu3 %v9328_v29  ;;  %v15324_v29 = vld [vmem:[#allocation22_spill] sm:$0xff]  ;;  %v15332_v2 = vld [vmem:[#allocation44_spill] sm:$0xff] }
0x1139   : > { %15314 = vst [vmem:[#allocation9_spill] sm:$0xff] %v14087_v19  ;;  %9390 = vmatpush.msrb.mxu2 %v14087_v19  ;;  %v14091_v32 = vand.u32 4294901760, %v14087_v19  ;;  %9546 = vmatpush.msra.mxu3 %v15316_v18 }
0x113a   : > { %9393 = vmatmul.f32.vlgmr.msrb.gmra.mxu2 %v9327_v15  ;;  %v15320_v15 = vld [vmem:[#allocation16_spill] sm:$0xff] }
0x113b   : > { %15315 = vst [vmem:[#allocation10_spill] sm:$0xff] %v14091_v32  ;;  %9450 = vmatpush.msrb.mxu0 %v14091_v32  ;;  %v9361_v7 = vsub.f32 %v14087_v19, %v14091_v32  ;;  %9552 = vmatpush.msra.mxu3 %v15317_v52 }
0x113c   : > { %9501 = vmatpush.msra.mxu2 %v12520_v47 }
0x113d   : > { %9644 = vmatpush.msra.mxu0 %v12545_v58  ;;  %v14100_v22 = vand.u32 4294901760, %v9361_v7  ;;  %9558 = vmatpush.msra.mxu3 %v15319_v35  ;;  %v15336_v7 = vld [vmem:[#allocation21_spill] sm:$0xff] }
0x113e   : > { %9503 = vmatpush.msra.mxu2 %v12522_v48 }
0x113f   : > { %15318 = vst [vmem:[#allocation8_spill] sm:$0xff] %v14100_v22  ;;  %9647 = vmatpush.msra.mxu0 %v12548_v59  ;;  %9363 = vmatpush.msra.mxu1 %v14100_v22 }
0x1140   : > { %9564 = vmatpush.msra.mxu3 %v15320_v15  ;;  %9339 = vmatmul.f32.gmra.mxu0 %v9338_v21  ;;  %v15337_v21 = vld [vmem:[#allocation23_spill] sm:$0xff] }
0x1141   : > { %9365 = vmatmul.f32.vlgmr.msra.gmra.mxu1 %v14069_v37  ;;  %9428 = vmatmul.f32.gmra.mxu3 %v9336_v36  ;;  %v15334_v36 = vld [vmem:[#allocation15_spill] sm:$0xff] }
0x1142   : > { %9476 = vmatpush.msrb.mxu1 %v14081_v51  ;;  %9398 = vmatmul.f32.gmra.mxu2 %v9335_v31  ;;  %v15331_v31 = vld [vmem:[#allocation43_spill] sm:$0xff] }
0x1143   : > { %9650 = vmatpush.msra.mxu0 %v12551_v60  ;;  %9570 = vmatpush.msra.mxu3 %v15321_v13 }
0x1144   : > { %9697 = vmatpush.msra.mxu1 %v12520_v47  ;;  %9505 = vmatpush.msra.mxu2 %v12524_v49 }
0x1145   : > { %9653 = vmatpush.msra.mxu0 %v12556_v62  ;;  %9576 = vmatpush.msra.mxu3 %v15322_v9 }
0x1146   : > { %9699 = vmatpush.msra.mxu1 %v12522_v48  ;;  %9507 = vmatpush.msra.mxu2 %v12535_v54 }
0x1147   : > { %9656 = vmatpush.msra.mxu0 %v12559_v63  ;;  %9582 = vmatpush.msra.mxu3 %v15323_v8 }
0x1148   : > { %9701 = vmatpush.msra.mxu1 %v12524_v49  ;;  %9452 = vmatmul.f32.vlgmr.msrb.gmra.mxu0 %v14069_v37 }
0x1149   : > { %9369 = vmatmul.f32.gmra.mxu1 %v14075_v6  ;;  %9659 = vmatpush.msra.mxu0 %v12562_v0 }
0x114a   : > { %9703 = vmatpush.msra.mxu1 %v12535_v54  ;;  %9588 = vmatpush.msra.mxu3 %v15324_v29 }
0x114b   : > { %9509 = vmatpush.msra.mxu2 %v12537_v55  ;;  %9662 = vmatpush.msra.mxu0 %v12605_v24 }
0x114c   : > { %9705 = vmatpush.msra.mxu1 %v12537_v55  ;;  %9594 = vmatpush.msra.mxu3 %v15325_v50 }
0x114d   : > { %9511 = vmatpush.msra.mxu2 %v12539_v56  ;;  %9665 = vmatpush.msra.mxu0 %v12656_v42 }
0x114e   : > { %9707 = vmatpush.msra.mxu1 %v12539_v56  ;;  %9600 = vmatpush.msra.mxu3 %v15326_v23 }
0x114f   : > { %9513 = vmatpush.msra.mxu2 %v12564_v1  ;;  %9668 = vmatpush.msra.mxu0 %v12669_v45 }
0x1150   : > { %9709 = vmatpush.msra.mxu1 %v12564_v1  ;;  %9456 = vmatmul.f32.gmra.mxu0 %v14075_v6 }
0x1151   : > { %9478 = vmatmul.f32.vlgmr.msrb.gmra.mxu1 %v14069_v37  ;;  %9606 = vmatpush.msra.mxu3 %v15327_v26  ;;  %v15330_v37 = vld [vmem:[#allocation41_spill] sm:$0xff] }
0x1152   : > { %9711 = vmatpush.msra.mxu1 %v12650_v40  ;;  %9671 = vmatpush.msra.mxu0 %v12685_v53 }
0x1153   : > { %9515 = vmatpush.msra.mxu2 %v12650_v40  ;;  %9612 = vmatpush.msra.mxu3 %v15328_v27 }
0x1154   : > { %9713 = vmatpush.msra.mxu1 %v12658_v43  ;;  %9674 = vmatpush.msra.mxu0 %v15099_v41 }
0x1155   : > { %9517 = vmatpush.msra.mxu2 %v12658_v43  ;;  %9618 = vmatpush.msra.mxu3 %v15329_v14 }
0x1156   : > { %9715 = vmatpush.msra.mxu1 %v12672_v46  ;;  %9677 = vmatpush.msra.mxu0 %v15295_v10 }
0x1157   : > { %9519 = vmatpush.msra.mxu2 %v12672_v46  ;;  %9624 = vmatpush.msra.mxu3 %v15330_v37 }
0x1158   : > { %9717 = vmatpush.msra.mxu1 %v12688_v57  ;;  %9680 = vmatpush.msra.mxu0 %v15298_v38 }
0x1159   : > { %9482 = vmatmul.f32.gmra.mxu1 %v14075_v6  ;;  %9521 = vmatpush.msra.mxu2 %v12688_v57  ;;  %v15333_v6 = vld [vmem:[#allocation11_spill] sm:$0xff] }
0x115a   : > { %9719 = vmatpush.msra.mxu1 %v12707_v16  ;;  %9630 = vmatpush.msra.mxu3 %v15331_v31 }
0x115b   : > { %9683 = vmatpush.msra.mxu0 %v15302_v34  ;;  %9523 = vmatpush.msra.mxu2 %v12707_v16 }
0x115c   : > { %9721 = vmatpush.msra.mxu1 %v12722_v30  ;;  %9636 = vmatpush.msra.mxu3 %v15332_v2 }
0x115d   : > { %9686 = vmatpush.msra.mxu0 %v15304_v33  ;;  %9525 = vmatpush.msra.mxu2 %v12722_v30 }
0x115e   : > { %9723 = vmatpush.msra.mxu1 %v12740_v39  ;;  %9805 = vmatpush.msrb.mxu3 %v12520_v47 }
0x115f   : > { %9689 = vmatpush.msra.mxu0 %v15305_v12  ;;  %9527 = vmatpush.msra.mxu2 %v12740_v39 }
0x1160   : > { %9725 = vmatpush.msra.mxu1 %v12759_v25  ;;  %9807 = vmatpush.msrb.mxu3 %v12522_v48 }
0x1161   : > { %9842 = vmatpush.msrb.mxu0 %v12520_v47  ;;  %9529 = vmatpush.msra.mxu2 %v12759_v25 }
0x1162   : > { %9727 = vmatpush.msra.mxu1 %v15296_v44  ;;  %9809 = vmatpush.msrb.mxu3 %v12524_v49 }
0x1163   : > { %9844 = vmatpush.msrb.mxu0 %v12522_v48  ;;  %9531 = vmatpush.msra.mxu2 %v15296_v44 }
0x1164   : > { %9887 = vmatpush.msrb.mxu1 %v15316_v18  ;;  %9811 = vmatpush.msrb.mxu3 %v12535_v54 }
0x1165   : > { %9846 = vmatpush.msrb.mxu0 %v12524_v49  ;;  %9738 = vmatpush.msrb.mxu2 %v12568_v3 }
0x1166   : > { %9893 = vmatpush.msrb.mxu1 %v15317_v52  ;;  %9813 = vmatpush.msrb.mxu3 %v12537_v55 }
0x1167   : > { %9848 = vmatpush.msrb.mxu0 %v12535_v54  ;;  %9742 = vmatpush.msrb.mxu2 %v12571_v4 }
0x1168   : > { %9899 = vmatpush.msrb.mxu1 %v15319_v35  ;;  %9815 = vmatpush.msrb.mxu3 %v12539_v56 }
0x1169   : > { %9850 = vmatpush.msrb.mxu0 %v12537_v55  ;;  %9746 = vmatpush.msrb.mxu2 %v12575_v5 }
0x116a   : > { %9905 = vmatpush.msrb.mxu1 %v15320_v15  ;;  %9817 = vmatpush.msrb.mxu3 %v12564_v1 }
0x116b   : > { %9852 = vmatpush.msrb.mxu0 %v12539_v56  ;;  %9750 = vmatpush.msrb.mxu2 %v12579_v11 }
0x116c   : > { %9911 = vmatpush.msrb.mxu1 %v15321_v13  ;;  %9819 = vmatpush.msrb.mxu3 %v12650_v40 }
0x116d   : > { %9854 = vmatpush.msrb.mxu0 %v12564_v1  ;;  %9754 = vmatpush.msrb.mxu2 %v12590_v17 }
0x116e   : > { %9917 = vmatpush.msrb.mxu1 %v15322_v9  ;;  %9821 = vmatpush.msrb.mxu3 %v12658_v43 }
0x116f   : > { %9856 = vmatpush.msrb.mxu0 %v12650_v40  ;;  %9758 = vmatpush.msrb.mxu2 %v15333_v6 }
0x1170   : > { %9923 = vmatpush.msrb.mxu1 %v15323_v8  ;;  %9823 = vmatpush.msrb.mxu3 %v12672_v46 }
0x1171   : > { %9858 = vmatpush.msrb.mxu0 %v12658_v43  ;;  %9762 = vmatpush.msrb.mxu2 %v15334_v36 }
0x1172   : > { %9929 = vmatpush.msrb.mxu1 %v15324_v29  ;;  %9825 = vmatpush.msrb.mxu3 %v12688_v57  ;;  %v15342_v29 = vld [vmem:[#allocation39_spill] sm:$0xff] }
0x1173   : > { %9860 = vmatpush.msrb.mxu0 %v12672_v46  ;;  %9766 = vmatpush.msrb.mxu2 %v15335_v20 }
0x1174   : > { %9935 = vmatpush.msrb.mxu1 %v15325_v50  ;;  %9827 = vmatpush.msrb.mxu3 %v12707_v16  ;;  %v15338_v50 = vld [vmem:[#allocation26_spill] sm:$0xff] }
0x1175   : > { %9862 = vmatpush.msrb.mxu0 %v12688_v57  ;;  %9770 = vmatpush.msrb.mxu2 %v15336_v7 }
0x1176   : > { %9941 = vmatpush.msrb.mxu1 %v15326_v23  ;;  %9829 = vmatpush.msrb.mxu3 %v12722_v30  ;;  %v15339_v23 = vld [vmem:[#allocation30_spill] sm:$0xff] }
0x1177   : > { %9864 = vmatpush.msrb.mxu0 %v12707_v16  ;;  %9774 = vmatpush.msrb.mxu2 %v15337_v21 }
0x1178   : > { %9947 = vmatpush.msrb.mxu1 %v15327_v26  ;;  %9831 = vmatpush.msrb.mxu3 %v12740_v39  ;;  %v15340_v26 = vld [vmem:[#allocation32_spill] sm:$0xff] }
0x1179   : > { %9866 = vmatpush.msrb.mxu0 %v12722_v30  ;;  %9778 = vmatpush.msrb.mxu2 %v15338_v50 }
0x117a   : > { %9953 = vmatpush.msrb.mxu1 %v15328_v27  ;;  %9833 = vmatpush.msrb.mxu3 %v12759_v25  ;;  %v15341_v27 = vld [vmem:[#allocation34_spill] sm:$0xff] }
0x117b   : > { %9868 = vmatpush.msrb.mxu0 %v12740_v39  ;;  %9782 = vmatpush.msrb.mxu2 %v15339_v23 }
0x117c   : > { %9959 = vmatpush.msrb.mxu1 %v15329_v14  ;;  %9835 = vmatpush.msrb.mxu3 %v15296_v44  ;;  %v15343_v14 = vld [vmem:[#allocation42_spill] sm:$0xff] }
0x117d   : > { %9870 = vmatpush.msrb.mxu0 %v12759_v25  ;;  %9786 = vmatpush.msrb.mxu2 %v15340_v26 }
0x117e   : > { %9965 = vmatpush.msrb.mxu1 %v15330_v37 }
0x117f   : > { %9872 = vmatpush.msrb.mxu0 %v15296_v44  ;;  %9790 = vmatpush.msrb.mxu2 %v15341_v27 }
0x1180   : > { %9971 = vmatpush.msrb.mxu1 %v15331_v31 }
0x1181   : > { %9794 = vmatpush.msrb.mxu2 %v15342_v29 }
0x1182   : > { %9977 = vmatpush.msrb.mxu1 %v15332_v2 }
0x1183   : > { %9798 = vmatpush.msrb.mxu2 %v15343_v14 }
0x11b5   : > { %v9332_v8 = vpop.f32.mrf.mxu0 }
0x11bb   : > { %v9423_v18 = vpop.f32.mrf.mxu3 }
0x11bd   : > { %v9340_v9 = vpop.f32.mrf.mxu0  ;;  %v9394_v35 = vpop.f32.mrf.mxu2 }
0x11be   : > { %v9366_v13 = vpop.f32.mrf.mxu1 }
0x11bf   : > { %v9367_v15 = vadd.f32 %v9366_v13, %v9332_v8 }
0x11c1   : > { %v9395_v52 = vadd.f32 %v9394_v35, %v9367_v15 }
0x11c3   : > { %v9424_v12 = vadd.f32 %v9423_v18, %v9395_v52 }
0x11c4   : > { %v9429_v22 = vpop.f32.mrf.mxu3 }
0x11c5   : > { %v9453_v61 = vpop.f32.mrf.mxu0  ;;  %v9399_v33 = vpop.f32.mrf.mxu2 }
0x11c6   : > { %v9370_v37 = vpop.f32.mrf.mxu1  ;;  %v9454_v31 = vadd.f32 %v9453_v61, %v9424_v12 }
0x11c7   : > { %v9371_v32 = vadd.f32 %v9370_v37, %v9340_v9 }
0x11c9   : > { %v9400_v34 = vadd.f32 %v9399_v33, %v9371_v32 }
0x11cb   : > { %v9430_v38 = vadd.f32 %v9429_v22, %v9400_v34 }
0x11cd   : > { %v9457_v14 = vpop.f32.mrf.mxu0 }
0x11ce   : > { %v9479_v19 = vpop.f32.mrf.mxu1  ;;  %v9458_v44 = vadd.f32 %v9457_v14, %v9430_v38 }
0x11cf   : > { %v9480_v2 = vadd.f32 %v9479_v19, %v9454_v31 }
0x11d1   : > { %v9486_v51 = vmul.f32 %v9480_v2, %v14078_v28  ;;  %v12140_v2 = vld [vmem:[%s14755_s0 + $0xb0] sm:$0xff] }
0x11d3   : > { %v9487_v29 = vrot.slane %v9486_v51, 4 }
0x11d5   : > { %v9488_v13 = vadd.f32 %v9487_v29, %v9486_v51 }
0x11d6   : > { %v9483_v8 = vpop.f32.mrf.mxu1 }
0x11d7   : > { %v9489_v10 = vrot.slane %v9488_v13, 2  ;;  %v9484_v35 = vadd.f32 %v9483_v8, %v9458_v44 }
0x11d9   : > { %v9490_v15 = vadd.f32 %v9489_v10, %v9488_v13  ;;  %v9493_v9 = vmul.f32 %v9484_v35, %v14078_v28  ;;  %v10186_v13 = vsel %vm171_vm0, %v12140_v2, 0  ;;  %v15344_v35 = vld [vmem:[#allocation27_spill] sm:$0xff] }
0x11da   : > { %v10208_v8 = vand.u32 4294901760, %v10186_v13 }
0x11db   : > { %v9491_v18 = vrot.slane %v9490_v15, 1  ;;  %v9494_v12 = vrot.slane %v9493_v9, 4 }
0x11dd   : > { %v9492_v61 = vadd.f32 %v9491_v18, %v9490_v15  ;;  %v9495_v52 = vadd.f32 %v9494_v12, %v9493_v9  ;;  %v15345_v15 = vld [vmem:[#allocation36_spill] sm:$0xff]  ;;  %v12141_v9 = vld [vmem:[%s14755_s0 + $0xb8] sm:$0xff]  ;;  %v15347_v12 = vld [vmem:[#allocation29_spill] sm:$0xff] }
0x11de   : > { %v15346_v18 = vld [vmem:[#allocation39_spill] sm:$0xff] }
0x11df   : > { %v9532_v33 = vand.u32 4294901760, %v9492_v61  ;;  %v9496_v19 = vrot.slane %v9495_v52, 2 }
0x11e1   : > { %v9533_v32 = vsub.f32 %v9492_v61, %v9532_v33  ;;  %v9497_v37 = vadd.f32 %v9496_v19, %v9495_v52  ;;  %9638 = vmatmul.f32.vlgmr.msra.gmra.mxu3 %v9532_v33  ;;  %v10209_v61 = vsub.f32 %v10186_v13, %v10208_v8  ;;  %v15348_v52 = vld [vmem:[#allocation8_spill] sm:$0xff]  ;;  %v10189_v19 = vsel %vm171_vm0, %v12141_v9, 0 }
0x11e2   : > { %10038 = vmatpush.msra.mxu3 %v12520_v47 }
0x11e3   : > { %v9498_v34 = vrot.slane %v9497_v37, 1  ;;  %9692 = vmatmul.f32.vlgmr.msra.gmra.mxu0 %v9533_v32  ;;  %v9534_v38 = vand.u32 4294901760, %v9533_v32 }
0x11e4   : > { %10040 = vmatpush.msra.mxu3 %v12522_v48  ;;  %10079 = vmatpush.msra.mxu0 %v12568_v3 }
0x11e5   : > { %v9499_v10 = vadd.f32 %v9498_v34, %v9497_v37  ;;  %9731 = vmatmul.f32.vlgmr.msra.gmra.mxu1 %v9534_v38  ;;  %v9535_v44 = vsub.f32 %v9533_v32, %v9534_v38  ;;  %v15350_v32 = vld [vmem:[#allocation7_spill] sm:$0xff]  ;;  %v15351_v37 = vld [vmem:[#allocation33_spill] sm:$0xff]  ;;  %v10210_v38 = vand.u32 4294901760, %v10209_v61 }
0x11e6   : > { %10042 = vmatpush.msra.mxu3 %v12524_v49  ;;  %10083 = vmatpush.msra.mxu0 %v12571_v4  ;;  %v15352_v34 = vld [vmem:[#allocation9_spill] sm:$0xff] }
0x11e7   : > { %v14241_v28 = vand.u32 4294901760, %v9499_v10  ;;  %10146 = vmatpush.msra.mxu1 %v12520_v47  ;;  %v9536_v51 = vand.u32 4294901760, %v9535_v44  ;;  %v15353_v44 = vld [vmem:[#allocation35_spill] sm:$0xff] }
0x11e8   : > { %10044 = vmatpush.msra.mxu3 %v12535_v54  ;;  %10087 = vmatpush.msra.mxu0 %v12575_v5 }
0x11e9   : > { %v14247_v22 = vsub.f32 %v9499_v10, %v14241_v28  ;;  %10148 = vmatpush.msra.mxu1 %v12522_v48  ;;  %9537 = vmatmul.f32.vlgmr.msra.gmra.mxu2 %v9536_v51  ;;  %v10216_v10 = vand.u32 4294901760, %v10189_v19  ;;  %v15354_v51 = vld [vmem:[#allocation40_spill] sm:$0xff] }
0x11ea   : > { %9837 = vmatmul.f32.vlgmr.msrb.gmra.mxu3 %v9532_v33  ;;  %9985 = vmatpush.msra.mxu2 %v12545_v58 }
0x11eb   : > { %10046 = vmatpush.msra.mxu3 %v12537_v55  ;;  %10091 = vmatpush.msra.mxu0 %v12579_v11  ;;  %v9875_v29 = vand.u32 4294901760, %v14247_v22 }
0x11ec   : > { %10150 = vmatpush.msra.mxu1 %v12524_v49  ;;  %9988 = vmatpush.msra.mxu2 %v12548_v59 }
0x11ed   : > { %10048 = vmatpush.msra.mxu3 %v12539_v56  ;;  %10095 = vmatpush.msra.mxu0 %v12590_v17  ;;  %v9876_v14 = vsub.f32 %v14247_v22, %v9875_v29 }
0x11ee   : > { %10152 = vmatpush.msra.mxu1 %v12535_v54  ;;  %9991 = vmatpush.msra.mxu2 %v12551_v60 }
0x11ef   : > { %9979 = vmatmul.f32.vlgmr.msrb.gmra.mxu1 %v14241_v28  ;;  %10050 = vmatpush.msra.mxu3 %v12564_v1  ;;  %v9877_v31 = vand.u32 4294901760, %v9876_v14  ;;  %v10217_v14 = vsub.f32 %v10189_v19, %v10216_v10 }
0x11f0   : > { %10099 = vmatpush.msra.mxu0 %v15333_v6  ;;  %10154 = vmatpush.msra.mxu1 %v12537_v55 }
0x11f1   : > { %9994 = vmatpush.msra.mxu2 %v12556_v62  ;;  %10052 = vmatpush.msra.mxu3 %v12650_v40  ;;  %v10218_v13 = vand.u32 4294901760, %v10217_v14 }
0x11f2   : > { %10103 = vmatpush.msra.mxu0 %v15334_v36  ;;  %10156 = vmatpush.msra.mxu1 %v12539_v56 }
0x11f3   : > { %9800 = vmatmul.f32.vlgmr.msrb.gmra.mxu2 %v9532_v33  ;;  %9878 = vmatmul.f32.vlgmr.msrb.gmra.mxu0 %v9877_v31  ;;  %v15349_v33 = vld [vmem:[#allocation42_spill] sm:$0xff] }
0x11f4   : > { %9997 = vmatpush.msra.mxu2 %v12559_v63  ;;  %10054 = vmatpush.msra.mxu3 %v12658_v43  ;;  %v15355_v31 = vld [vmem:[#allocation10_spill] sm:$0xff] }
0x11f5   : > { %10107 = vmatpush.msra.mxu0 %v15335_v20  ;;  %10158 = vmatpush.msra.mxu1 %v12564_v1 }
0x11f6   : > { %10000 = vmatpush.msra.mxu2 %v12562_v0  ;;  %10056 = vmatpush.msra.mxu3 %v12672_v46 }
0x11f7   : > { %10111 = vmatpush.msra.mxu0 %v15336_v7  ;;  %10160 = vmatpush.msra.mxu1 %v12650_v40  ;;  %v15361_v7 = vmov 0  }
0x11f8   : > { %10003 = vmatpush.msra.mxu2 %v12605_v24  ;;  %10058 = vmatpush.msra.mxu3 %v12688_v57 }
0x11f9   : > { %10115 = vmatpush.msra.mxu0 %v15337_v21  ;;  %10162 = vmatpush.msra.mxu1 %v12658_v43 }
0x11fa   : > { %10006 = vmatpush.msra.mxu2 %v12656_v42  ;;  %10060 = vmatpush.msra.mxu3 %v12707_v16 }
0x11fb   : > { %10119 = vmatpush.msra.mxu0 %v15338_v50  ;;  %10164 = vmatpush.msra.mxu1 %v12672_v46 }
0x11fc   : > { %10009 = vmatpush.msra.mxu2 %v12669_v45  ;;  %10062 = vmatpush.msra.mxu3 %v12722_v30 }
0x11fd   : > { %10123 = vmatpush.msra.mxu0 %v15339_v23  ;;  %10166 = vmatpush.msra.mxu1 %v12688_v57 }
0x11fe   : > { %10012 = vmatpush.msra.mxu2 %v12685_v53  ;;  %10064 = vmatpush.msra.mxu3 %v12740_v39 }
0x11ff   : > { %10127 = vmatpush.msra.mxu0 %v15340_v26  ;;  %10168 = vmatpush.msra.mxu1 %v12707_v16  ;;  %v10182_v26 = vld [vmem:[%s12980_s7 + $0x5] sm:$0x1] }
0x1200   : > { %10015 = vmatpush.msra.mxu2 %v15099_v41  ;;  %10066 = vmatpush.msra.mxu3 %v12759_v25 }
0x1201   : > { %10131 = vmatpush.msra.mxu0 %v15341_v27  ;;  %10170 = vmatpush.msra.mxu1 %v12722_v30 }
0x1202   : > { %10018 = vmatpush.msra.mxu2 %v15344_v35  ;;  %10068 = vmatpush.msra.mxu3 %v15345_v15 }
0x1203   : > { %10135 = vmatpush.msra.mxu0 %v15346_v18  ;;  %10172 = vmatpush.msra.mxu1 %v12740_v39 }
0x1204   : > { %10072 = vmatmul.f32.vlgmr.msra.gmra.mxu3 %v9875_v29  ;;  %10021 = vmatpush.msra.mxu2 %v15347_v12  ;;  %v10211_v29 = vsub.f32 %v10209_v61, %v10210_v38 }
0x1205   : > { %10245 = vmatpush.msrb.mxu3 %v15348_v52  ;;  %10139 = vmatpush.msra.mxu0 %v15349_v33 }
0x1206   : > { %10174 = vmatpush.msra.mxu1 %v12759_v25  ;;  %10141 = vmatmul.f32.vlgmr.msra.gmra.mxu0 %v14241_v28  ;;  %v10212_v2 = vand.u32 4294901760, %v10211_v29 }
0x1207   : > { %10358 = vmatpush.msra.mxu3 %v15350_v32  ;;  %10024 = vmatpush.msra.mxu2 %v15351_v37 }
0x1208   : > { %10272 = vmatpush.msrb.mxu0 %v15352_v34  ;;  %10176 = vmatpush.msra.mxu1 %v15345_v15 }
0x1209   : > { %10178 = vmatmul.f32.vlgmr.msra.gmra.mxu1 %v14241_v28  ;;  %10027 = vmatpush.msra.mxu2 %v15353_v44  ;;  %v10219_v28 = vsub.f32 %v10217_v14, %v10218_v13 }
0x120a   : > { %10300 = vmatpush.msrb.mxu1 %v15350_v32 }
0x120b   : > { %10030 = vmatpush.msra.mxu2 %v15354_v51  ;;  %v10220_v9 = vand.u32 4294901760, %v10219_v28 }
0x120c   : > { %10033 = vmatmul.f32.vlgmr.msra.gmra.mxu2 %v14247_v22  ;;  %10247 = vmatmul.f32.vlgmr.msrb.gmra.mxu3 %v10208_v8 }
0x120d   : > { %10207 = vmatpush.msrb.mxu2 %v15350_v32 }
0x120e   : > { %10275 = vmatmul.f32.vlgmr.msrb.gmra.mxu0 %v10209_v61 }
0x120f   : > { %10332 = vmatpush.msra.mxu2 %v15355_v31 }
0x1211   : > { %10304 = vmatmul.f32.vlgmr.msrb.gmra.mxu1 %v10210_v38 }
0x1214   : > { %10213 = vmatmul.f32.vlgmr.msrb.gmra.mxu2 %v10212_v2  ;;  %10251 = vmatmul.f32.gmra.mxu3 %v10216_v10 }
0x1216   : > { %10280 = vmatmul.f32.gmra.mxu0 %v10217_v14 }
0x1219   : > { %10310 = vmatmul.f32.gmra.mxu1 %v10218_v13 }
0x121c   : > { %10221 = vmatmul.f32.gmra.mxu2 %v10220_v9  ;;  %10360 = vmatmul.f32.vlgmr.msra.gmra.mxu3 %v10208_v8 }
0x1224   : > { %10334 = vmatmul.f32.vlgmr.msra.gmra.mxu2 %v10208_v8  ;;  %10364 = vmatmul.f32.gmra.mxu3 %v10216_v10 }
0x122c   : > { %10338 = vmatmul.f32.gmra.mxu2 %v10216_v10 }
0x1260   : > { %v9693_v32 = vpop.f32.mrf.mxu0 }
0x1262   : > { %v9732_v34 = vpop.f32.mrf.mxu1 }
0x1264   : > { %v9639_v22 = vpop.f32.mrf.mxu3 }
0x126c   : > { %v9538_v52 = vpop.f32.mrf.mxu2  ;;  %v9980_v13 = vpop.f32.mrf.mxu1 }
0x126d   : > { %v9640_v19 = vadd.f32 %v9639_v22, %v9538_v52  ;;  %v9838_v2 = vpop.f32.mrf.mxu3 }
0x126f   : > { %v9694_v61 = vadd.f32 %v9693_v32, %v9640_v19  ;;  %v15356_v19 = vld [vmem:[#allocation24_spill] sm:$0xff] }
0x1270   : > { %v9879_v14 = vpop.f32.mrf.mxu0  ;;  %v10183_v32 = vmul.f32 %v10182_v26, %v15356_v19 }
0x1271   : > { %v9733_v29 = vadd.f32 %v9732_v34, %v9694_v61  ;;  %v9981_v9 = vadd.f32 %v9980_v13, %v9879_v14  ;;  %v10374_v13 = vld [vmem:[#allocation2 + $0x60] sm:$0xff] }
0x1272   : > { %v10379_v26 = vsel %vm171_vm0, %v10374_v13, 0 }
0x1276   : > { %v9801_v38 = vpop.f32.mrf.mxu2 }
0x1277   : > { %v9802_v31 = vadd.f32 %v9801_v38, %v9733_v29  ;;  %v15358_v29 = vmov 1.0  }
0x1279   : > { %v9839_v33 = vadd.f32 %v9838_v2, %v9802_v31 }
0x1283   : > { %v10142_v10 = vpop.f32.mrf.mxu0 }
0x1286   : > { %v10179_v52 = vpop.f32.mrf.mxu1 }
0x1287   : > { %v10073_v28 = vpop.f32.mrf.mxu3 }
0x128b   : > { %v10276_v14 = vpop.f32.mrf.mxu0 }
0x128f   : > { %v10034_v18 = vpop.f32.mrf.mxu2  ;;  %v10248_v23 = vpop.f32.mrf.mxu3 }
0x1290   : > { %v10035_v8 = vadd.f32 %v10034_v18, %v9981_v9  ;;  %v15359_v18 = vld [vmem:[#allocation6_spill] sm:$0xff]  ;;  %v10305_v9 = vpop.f32.mrf.mxu1 }
0x1292   : > { %v10074_v27 = vadd.f32 %v10073_v28, %v10035_v8 }
0x1294   : > { %v10143_v22 = vadd.f32 %v10142_v10, %v10074_v27 }
0x1296   : > { %v10180_v50 = vadd.f32 %v10179_v52, %v10143_v22  ;;  %v10281_v52 = vpop.f32.mrf.mxu0 }
0x1297   : > { %v10214_v61 = vpop.f32.mrf.mxu2  ;;  %v10252_v28 = vpop.f32.mrf.mxu3 }
0x1298   : > { %vm10184_vm1 = vcmp.lt.f32.partialorder %v10183_v32, %v10180_v50  ;;  %v10249_v8 = vadd.f32 %v10248_v23, %v10214_v61 }
0x1299   : > { %v14328_v34 = vsel %vm10184_vm1, %v10180_v50, %v9839_v33  ;;  %v10373_v38 = vsel %vm10184_vm1, 0.0, %v15358_v29  ;;  %v14336_v33 = vand.u32 4294901760, %v10379_v26  ;;  %v10368_v20 = vsel %vm10184_vm1, 1, %v15361_v7 }
0x129a   : > { %15357 = vst [vmem:[#allocation45_spill] sm:$0xff] %v14328_v34  ;;  %v11993_v31 = vrot.slane %v10373_v38, 3  ;;  %v10277_v29 = vadd.f32 %v10276_v14, %v10249_v8  ;;  %v10375_v34 = vld [vmem:[#allocation2 + $0x68] sm:$0xff]  ;;  %v10369_v6 = vperm.slane %v10368_v20, 0 }
0x129c   : > { %v14333_v2 = vsel %vm12009_vm2, %v15359_v18, %v11993_v31  ;;  %v10402_v31 = vsub.f32 %v10379_v26, %v14336_v33  ;;  %v10311_v18 = vpop.f32.mrf.mxu1  ;;  %v10306_v21 = vadd.f32 %v10305_v9, %v10277_v29  ;;  %vm10370_vm3 = vcmp.eq.s32.totalorder %v10369_v6, 1  ;;  %v15366_v9 = vld [vmem:[#allocation13_spill] sm:$0xff] }
0x129d   : > { %15360 = vst [vmem:[#allocation8_spill] sm:$0xff] %v14333_v2  ;;  %v10382_v2 = vsel %vm171_vm0, %v10375_v34, 0 }
0x129e   : > { %v10403_v61 = vand.u32 4294901760, %v10402_v31 }
0x129f   : > { %v10222_v27 = vpop.f32.mrf.mxu2  ;;  %v10361_v10 = vpop.f32.mrf.mxu3 }
0x12a0   : > { %v10253_v22 = vadd.f32 %v10252_v28, %v10222_v27  ;;  %v14342_v28 = vand.u32 4294901760, %v10382_v2 }
0x12a2   : > { %v10282_v38 = vadd.f32 %v10281_v52, %v10253_v22  ;;  %v10404_v52 = vsub.f32 %v10402_v31, %v10403_v61  ;;  %v10410_v26 = vsub.f32 %v10382_v2, %v14342_v28 }
0x12a4   : > { %v10312_v13 = vadd.f32 %v10311_v18, %v10282_v38  ;;  %v10405_v32 = vand.u32 4294901760, %v10404_v52  ;;  %v15370_v18 = vld [vmem:[#allocation17_spill] sm:$0xff]  ;;  %v15378_v52 = vld [vmem:[#allocation38_spill] sm:$0xff] }
0x12a7   : > { %v10335_v19 = vpop.f32.mrf.mxu2  ;;  %v10365_v36 = vpop.f32.mrf.mxu3 }
0x12a8   : > { %v10336_v23 = vadd.f32 %v10335_v19, %v10306_v21  ;;  %v10411_v21 = vand.u32 4294901760, %v10410_v26  ;;  %v15368_v19 = vld [vmem:[#allocation14_spill] sm:$0xff] }
0x12aa   : > { %v10362_v8 = vadd.f32 %v10361_v10, %v10336_v23  ;;  %v10412_v29 = vsub.f32 %v10410_v26, %v10411_v21  ;;  %v15372_v23 = vld [vmem:[#allocation19_spill] sm:$0xff] }
0x12ac   : > { %v10413_v38 = vand.u32 4294901760, %v10412_v29  ;;  %v15384_v29 = vld [vmem:[#allocation20_spill] sm:$0xff] }
0x12af   : > { %v10339_v27 = vpop.f32.mrf.mxu2 }
0x12b0   : > { %v10340_v14 = vadd.f32 %v10339_v27, %v10312_v13  ;;  %v15371_v13 = vld [vmem:[#allocation18_spill] sm:$0xff]  ;;  %v15374_v27 = vld [vmem:[#allocation25_spill] sm:$0xff] }
0x12b2   : > { %v10366_v22 = vadd.f32 %v10365_v36, %v10340_v14  ;;  %v15365_v36 = vld [vmem:[#allocation12_spill] sm:$0xff] }
0x12b3   : > { %v15375_v14 = vld [vmem:[#allocation28_spill] sm:$0xff] }
0x12b4   : > { %v14345_v34 = vsel %vm10370_vm3, %v10366_v22, %v10362_v8  ;;  %v15376_v8 = vld [vmem:[#allocation31_spill] sm:$0xff]  ;;  %v15377_v22 = vld [vmem:[#allocation37_spill] sm:$0xff] }
0x12b5   : > { %v14348_v50 = vand.u32 4294901760, %v14345_v34 }
0x12b7   : > { %15362 = vst [vmem:[#allocation7_spill] sm:$0xff] %v14348_v50  ;;  %10400 = vmatpush.msra.mxu0 %v14348_v50  ;;  %10493 = vmatpush.msrb.mxu3 %v14348_v50  ;;  %v14354_v20 = vsub.f32 %v14345_v34, %v14348_v50 }
0x12b8   : > { %10406 = vmatmul.f32.vlgmr.msra.gmra.mxu0 %v10405_v32  ;;  %10497 = vmatmul.f32.vlgmr.msrb.gmra.mxu3 %v10403_v61  ;;  %v15373_v61 = vld [vmem:[#allocation22_spill] sm:$0xff]  ;;  %v15381_v32 = vld [vmem:[#allocation44_spill] sm:$0xff] }
0x12b9   : > { %15363 = vst [vmem:[#allocation9_spill] sm:$0xff] %v14354_v20  ;;  %10465 = vmatpush.msrb.mxu2 %v14354_v20  ;;  %v14358_v6 = vand.u32 4294901760, %v14354_v20  ;;  %10621 = vmatpush.msra.mxu3 %v15365_v36 }
0x12ba   : > { %10468 = vmatmul.f32.vlgmr.msrb.gmra.mxu2 %v10402_v31  ;;  %v15369_v31 = vld [vmem:[#allocation16_spill] sm:$0xff] }
0x12bb   : > { %15364 = vst [vmem:[#allocation10_spill] sm:$0xff] %v14358_v6  ;;  %10525 = vmatpush.msrb.mxu0 %v14358_v6  ;;  %v10436_v2 = vsub.f32 %v14354_v20, %v14358_v6  ;;  %10627 = vmatpush.msra.mxu3 %v15366_v9 }
0x12bc   : > { %10576 = vmatpush.msra.mxu2 %v12520_v47 }
0x12bd   : > { %10719 = vmatpush.msra.mxu0 %v12545_v58  ;;  %v14367_v10 = vand.u32 4294901760, %v10436_v2  ;;  %10633 = vmatpush.msra.mxu3 %v15368_v19  ;;  %v15385_v2 = vld [vmem:[#allocation21_spill] sm:$0xff] }
0x12be   : > { %10578 = vmatpush.msra.mxu2 %v12522_v48 }
0x12bf   : > { %15367 = vst [vmem:[#allocation24_spill] sm:$0xff] %v14367_v10  ;;  %10722 = vmatpush.msra.mxu0 %v12548_v59  ;;  %10438 = vmatpush.msra.mxu1 %v14367_v10 }
0x12c0   : > { %10639 = vmatpush.msra.mxu3 %v15369_v31  ;;  %10414 = vmatmul.f32.gmra.mxu0 %v10413_v38  ;;  %v15386_v38 = vld [vmem:[#allocation23_spill] sm:$0xff] }
0x12c1   : > { %10440 = vmatmul.f32.vlgmr.msra.gmra.mxu1 %v14336_v33  ;;  %10503 = vmatmul.f32.gmra.mxu3 %v10411_v21  ;;  %v15383_v21 = vld [vmem:[#allocation15_spill] sm:$0xff] }
0x12c2   : > { %10551 = vmatpush.msrb.mxu1 %v14348_v50  ;;  %10473 = vmatmul.f32.gmra.mxu2 %v10410_v26  ;;  %v15380_v26 = vld [vmem:[#allocation43_spill] sm:$0xff] }
0x12c3   : > { %10725 = vmatpush.msra.mxu0 %v12551_v60  ;;  %10645 = vmatpush.msra.mxu3 %v15370_v18 }
0x12c4   : > { %10772 = vmatpush.msra.mxu1 %v12520_v47  ;;  %10580 = vmatpush.msra.mxu2 %v12524_v49 }
0x12c5   : > { %10728 = vmatpush.msra.mxu0 %v12556_v62  ;;  %10651 = vmatpush.msra.mxu3 %v15371_v13 }
0x12c6   : > { %10774 = vmatpush.msra.mxu1 %v12522_v48  ;;  %10582 = vmatpush.msra.mxu2 %v12535_v54 }
0x12c7   : > { %10731 = vmatpush.msra.mxu0 %v12559_v63  ;;  %10657 = vmatpush.msra.mxu3 %v15372_v23 }
0x12c8   : > { %10776 = vmatpush.msra.mxu1 %v12524_v49  ;;  %10527 = vmatmul.f32.vlgmr.msrb.gmra.mxu0 %v14336_v33 }
0x12c9   : > { %10444 = vmatmul.f32.gmra.mxu1 %v14342_v28  ;;  %10734 = vmatpush.msra.mxu0 %v12562_v0 }
0x12ca   : > { %10778 = vmatpush.msra.mxu1 %v12535_v54  ;;  %10663 = vmatpush.msra.mxu3 %v15373_v61 }
0x12cb   : > { %10584 = vmatpush.msra.mxu2 %v12537_v55  ;;  %10737 = vmatpush.msra.mxu0 %v12605_v24 }
0x12cc   : > { %10780 = vmatpush.msra.mxu1 %v12537_v55  ;;  %10669 = vmatpush.msra.mxu3 %v15374_v27 }
0x12cd   : > { %10586 = vmatpush.msra.mxu2 %v12539_v56  ;;  %10740 = vmatpush.msra.mxu0 %v12656_v42 }
0x12ce   : > { %10782 = vmatpush.msra.mxu1 %v12539_v56  ;;  %10675 = vmatpush.msra.mxu3 %v15375_v14 }
0x12cf   : > { %10588 = vmatpush.msra.mxu2 %v12564_v1  ;;  %10743 = vmatpush.msra.mxu0 %v12669_v45 }
0x12d0   : > { %10784 = vmatpush.msra.mxu1 %v12564_v1  ;;  %10531 = vmatmul.f32.gmra.mxu0 %v14342_v28 }
0x12d1   : > { %10553 = vmatmul.f32.vlgmr.msrb.gmra.mxu1 %v14336_v33  ;;  %10681 = vmatpush.msra.mxu3 %v15376_v8  ;;  %v15379_v33 = vld [vmem:[#allocation41_spill] sm:$0xff] }
0x12d2   : > { %10786 = vmatpush.msra.mxu1 %v12650_v40  ;;  %10746 = vmatpush.msra.mxu0 %v12685_v53 }
0x12d3   : > { %10590 = vmatpush.msra.mxu2 %v12650_v40  ;;  %10687 = vmatpush.msra.mxu3 %v15377_v22 }
0x12d4   : > { %10788 = vmatpush.msra.mxu1 %v12658_v43  ;;  %10749 = vmatpush.msra.mxu0 %v15099_v41 }
0x12d5   : > { %10592 = vmatpush.msra.mxu2 %v12658_v43  ;;  %10693 = vmatpush.msra.mxu3 %v15378_v52 }
0x12d6   : > { %10790 = vmatpush.msra.mxu1 %v12672_v46  ;;  %10752 = vmatpush.msra.mxu0 %v15344_v35 }
0x12d7   : > { %10594 = vmatpush.msra.mxu2 %v12672_v46  ;;  %10699 = vmatpush.msra.mxu3 %v15379_v33 }
0x12d8   : > { %10792 = vmatpush.msra.mxu1 %v12688_v57  ;;  %10755 = vmatpush.msra.mxu0 %v15347_v12 }
0x12d9   : > { %10557 = vmatmul.f32.gmra.mxu1 %v14342_v28  ;;  %10596 = vmatpush.msra.mxu2 %v12688_v57  ;;  %v15382_v28 = vld [vmem:[#allocation11_spill] sm:$0xff] }
0x12da   : > { %10794 = vmatpush.msra.mxu1 %v12707_v16  ;;  %10705 = vmatpush.msra.mxu3 %v15380_v26 }
0x12db   : > { %10758 = vmatpush.msra.mxu0 %v15351_v37  ;;  %10598 = vmatpush.msra.mxu2 %v12707_v16 }
0x12dc   : > { %10796 = vmatpush.msra.mxu1 %v12722_v30  ;;  %10711 = vmatpush.msra.mxu3 %v15381_v32 }
0x12dd   : > { %10761 = vmatpush.msra.mxu0 %v15353_v44  ;;  %10600 = vmatpush.msra.mxu2 %v12722_v30 }
0x12de   : > { %10798 = vmatpush.msra.mxu1 %v12740_v39  ;;  %10880 = vmatpush.msrb.mxu3 %v12520_v47 }
0x12df   : > { %10764 = vmatpush.msra.mxu0 %v15354_v51  ;;  %10602 = vmatpush.msra.mxu2 %v12740_v39 }
0x12e0   : > { %10800 = vmatpush.msra.mxu1 %v12759_v25  ;;  %10882 = vmatpush.msrb.mxu3 %v12522_v48 }
0x12e1   : > { %10917 = vmatpush.msrb.mxu0 %v12520_v47  ;;  %10604 = vmatpush.msra.mxu2 %v12759_v25 }
0x12e2   : > { %10802 = vmatpush.msra.mxu1 %v15345_v15  ;;  %10884 = vmatpush.msrb.mxu3 %v12524_v49 }
0x12e3   : > { %10919 = vmatpush.msrb.mxu0 %v12522_v48  ;;  %10606 = vmatpush.msra.mxu2 %v15345_v15 }
0x12e4   : > { %10962 = vmatpush.msrb.mxu1 %v15365_v36  ;;  %10886 = vmatpush.msrb.mxu3 %v12535_v54 }
0x12e5   : > { %10921 = vmatpush.msrb.mxu0 %v12524_v49  ;;  %10813 = vmatpush.msrb.mxu2 %v12568_v3 }
0x12e6   : > { %10968 = vmatpush.msrb.mxu1 %v15366_v9  ;;  %10888 = vmatpush.msrb.mxu3 %v12537_v55 }
0x12e7   : > { %10923 = vmatpush.msrb.mxu0 %v12535_v54  ;;  %10817 = vmatpush.msrb.mxu2 %v12571_v4 }
0x12e8   : > { %10974 = vmatpush.msrb.mxu1 %v15368_v19  ;;  %10890 = vmatpush.msrb.mxu3 %v12539_v56 }
0x12e9   : > { %10925 = vmatpush.msrb.mxu0 %v12537_v55  ;;  %10821 = vmatpush.msrb.mxu2 %v12575_v5 }
0x12ea   : > { %10980 = vmatpush.msrb.mxu1 %v15369_v31  ;;  %10892 = vmatpush.msrb.mxu3 %v12564_v1 }
0x12eb   : > { %10927 = vmatpush.msrb.mxu0 %v12539_v56  ;;  %10825 = vmatpush.msrb.mxu2 %v12579_v11 }
0x12ec   : > { %10986 = vmatpush.msrb.mxu1 %v15370_v18  ;;  %10894 = vmatpush.msrb.mxu3 %v12650_v40 }
0x12ed   : > { %10929 = vmatpush.msrb.mxu0 %v12564_v1  ;;  %10829 = vmatpush.msrb.mxu2 %v12590_v17 }
0x12ee   : > { %10992 = vmatpush.msrb.mxu1 %v15371_v13  ;;  %10896 = vmatpush.msrb.mxu3 %v12658_v43 }
0x12ef   : > { %10931 = vmatpush.msrb.mxu0 %v12650_v40  ;;  %10833 = vmatpush.msrb.mxu2 %v15382_v28 }
0x12f0   : > { %10998 = vmatpush.msrb.mxu1 %v15372_v23  ;;  %10898 = vmatpush.msrb.mxu3 %v12672_v46 }
0x12f1   : > { %10933 = vmatpush.msrb.mxu0 %v12658_v43  ;;  %10837 = vmatpush.msrb.mxu2 %v15383_v21 }
0x12f2   : > { %11004 = vmatpush.msrb.mxu1 %v15373_v61  ;;  %10900 = vmatpush.msrb.mxu3 %v12688_v57  ;;  %v15391_v61 = vld [vmem:[#allocation39_spill] sm:$0xff] }
0x12f3   : > { %10935 = vmatpush.msrb.mxu0 %v12672_v46  ;;  %10841 = vmatpush.msrb.mxu2 %v15384_v29 }
0x12f4   : > { %11010 = vmatpush.msrb.mxu1 %v15374_v27  ;;  %10902 = vmatpush.msrb.mxu3 %v12707_v16  ;;  %v15387_v27 = vld [vmem:[#allocation26_spill] sm:$0xff] }
0x12f5   : > { %10937 = vmatpush.msrb.mxu0 %v12688_v57  ;;  %10845 = vmatpush.msrb.mxu2 %v15385_v2 }
0x12f6   : > { %11016 = vmatpush.msrb.mxu1 %v15375_v14  ;;  %10904 = vmatpush.msrb.mxu3 %v12722_v30  ;;  %v15388_v14 = vld [vmem:[#allocation30_spill] sm:$0xff] }
0x12f7   : > { %10939 = vmatpush.msrb.mxu0 %v12707_v16  ;;  %10849 = vmatpush.msrb.mxu2 %v15386_v38 }
0x12f8   : > { %11022 = vmatpush.msrb.mxu1 %v15376_v8  ;;  %10906 = vmatpush.msrb.mxu3 %v12740_v39  ;;  %v15389_v8 = vld [vmem:[#allocation32_spill] sm:$0xff] }
0x12f9   : > { %10941 = vmatpush.msrb.mxu0 %v12722_v30  ;;  %10853 = vmatpush.msrb.mxu2 %v15387_v27 }
0x12fa   : > { %11028 = vmatpush.msrb.mxu1 %v15377_v22  ;;  %10908 = vmatpush.msrb.mxu3 %v12759_v25  ;;  %v15390_v22 = vld [vmem:[#allocation34_spill] sm:$0xff] }
0x12fb   : > { %10943 = vmatpush.msrb.mxu0 %v12740_v39  ;;  %10857 = vmatpush.msrb.mxu2 %v15388_v14 }
0x12fc   : > { %11034 = vmatpush.msrb.mxu1 %v15378_v52  ;;  %10910 = vmatpush.msrb.mxu3 %v15345_v15  ;;  %v15392_v52 = vld [vmem:[#allocation42_spill] sm:$0xff] }
0x12fd   : > { %10945 = vmatpush.msrb.mxu0 %v12759_v25  ;;  %10861 = vmatpush.msrb.mxu2 %v15389_v8 }
0x12fe   : > { %11040 = vmatpush.msrb.mxu1 %v15379_v33 }
0x12ff   : > { %10947 = vmatpush.msrb.mxu0 %v15345_v15  ;;  %10865 = vmatpush.msrb.mxu2 %v15390_v22 }
0x1300   : > { %11046 = vmatpush.msrb.mxu1 %v15380_v26 }
0x1301   : > { %10869 = vmatpush.msrb.mxu2 %v15391_v61 }
0x1302   : > { %11052 = vmatpush.msrb.mxu1 %v15381_v32 }
0x1303   : > { %10873 = vmatpush.msrb.mxu2 %v15392_v52 }
0x1335   : > { %v10407_v23 = vpop.f32.mrf.mxu0 }
0x133b   : > { %v10498_v36 = vpop.f32.mrf.mxu3 }
0x133d   : > { %v10415_v13 = vpop.f32.mrf.mxu0  ;;  %v10469_v19 = vpop.f32.mrf.mxu2 }
0x133e   : > { %v10441_v18 = vpop.f32.mrf.mxu1 }
0x133f   : > { %v10442_v31 = vadd.f32 %v10441_v18, %v10407_v23 }
0x1341   : > { %v10470_v9 = vadd.f32 %v10469_v19, %v10442_v31 }
0x1343   : > { %v10499_v51 = vadd.f32 %v10498_v36, %v10470_v9 }
0x1344   : > { %v10504_v10 = vpop.f32.mrf.mxu3 }
0x1345   : > { %v10528_v7 = vpop.f32.mrf.mxu0  ;;  %v10474_v44 = vpop.f32.mrf.mxu2 }
0x1346   : > { %v10445_v33 = vpop.f32.mrf.mxu1  ;;  %v10529_v26 = vadd.f32 %v10528_v7, %v10499_v51 }
0x1347   : > { %v10446_v6 = vadd.f32 %v10445_v33, %v10415_v13 }
0x1349   : > { %v10475_v37 = vadd.f32 %v10474_v44, %v10446_v6 }
0x134b   : > { %v10505_v12 = vadd.f32 %v10504_v10, %v10475_v37 }
0x134d   : > { %v10532_v52 = vpop.f32.mrf.mxu0 }
0x134e   : > { %v10554_v20 = vpop.f32.mrf.mxu1  ;;  %v10533_v15 = vadd.f32 %v10532_v52, %v10505_v12 }
0x134f   : > { %v10555_v32 = vadd.f32 %v10554_v20, %v10529_v26 }
0x1351   : > { %v10561_v50 = vmul.f32 %v10555_v32, %v14345_v34  ;;  %v12142_v32 = vld [vmem:[%s14755_s0 + $0xd0] sm:$0xff] }
0x1353   : > { %v10562_v61 = vrot.slane %v10561_v50, 4 }
0x1355   : > { %v10563_v18 = vadd.f32 %v10562_v61, %v10561_v50 }
0x1356   : > { %v10558_v23 = vpop.f32.mrf.mxu1 }
0x1357   : > { %v10564_v35 = vrot.slane %v10563_v18, 2  ;;  %v10559_v19 = vadd.f32 %v10558_v23, %v10533_v15 }
0x1359   : > { %v10565_v31 = vadd.f32 %v10564_v35, %v10563_v18  ;;  %v10568_v13 = vmul.f32 %v10559_v19, %v14345_v34  ;;  %v11261_v18 = vsel %vm171_vm0, %v12142_v32, 0  ;;  %v15393_v19 = vld [vmem:[#allocation27_spill] sm:$0xff] }
0x135a   : > { %v11283_v23 = vand.u32 4294901760, %v11261_v18 }
0x135b   : > { %v10566_v36 = vrot.slane %v10565_v31, 1  ;;  %v10569_v7 = vrot.slane %v10568_v13, 4 }
0x135d   : > { %v10567_v51 = vadd.f32 %v10566_v36, %v10565_v31  ;;  %v10570_v9 = vadd.f32 %v10569_v7, %v10568_v13  ;;  %v15394_v31 = vld [vmem:[#allocation36_spill] sm:$0xff]  ;;  %v12143_v13 = vld [vmem:[%s14755_s0 + $0xd8] sm:$0xff]  ;;  %v15396_v7 = vld [vmem:[#allocation29_spill] sm:$0xff] }
0x135e   : > { %v15395_v36 = vld [vmem:[#allocation39_spill] sm:$0xff] }
0x135f   : > { %v10607_v44 = vand.u32 4294901760, %v10567_v51  ;;  %v10571_v20 = vrot.slane %v10570_v9, 2 }
0x1361   : > { %v10608_v6 = vsub.f32 %v10567_v51, %v10607_v44  ;;  %v10572_v33 = vadd.f32 %v10571_v20, %v10570_v9  ;;  %10713 = vmatmul.f32.vlgmr.msra.gmra.mxu3 %v10607_v44  ;;  %v11284_v51 = vsub.f32 %v11261_v18, %v11283_v23  ;;  %v15397_v9 = vld [vmem:[#allocation24_spill] sm:$0xff]  ;;  %v11264_v20 = vsel %vm171_vm0, %v12143_v13, 0 }
0x1362   : > { %11113 = vmatpush.msra.mxu3 %v12520_v47 }
0x1363   : > { %v10573_v37 = vrot.slane %v10572_v33, 1  ;;  %10767 = vmatmul.f32.vlgmr.msra.gmra.mxu0 %v10608_v6  ;;  %v10609_v12 = vand.u32 4294901760, %v10608_v6 }
0x1364   : > { %11115 = vmatpush.msra.mxu3 %v12522_v48  ;;  %11154 = vmatpush.msra.mxu0 %v12568_v3 }
0x1365   : > { %v10574_v35 = vadd.f32 %v10573_v37, %v10572_v33  ;;  %10806 = vmatmul.f32.vlgmr.msra.gmra.mxu1 %v10609_v12  ;;  %v10610_v15 = vsub.f32 %v10608_v6, %v10609_v12  ;;  %v15399_v6 = vld [vmem:[#allocation7_spill] sm:$0xff]  ;;  %v15400_v33 = vld [vmem:[#allocation33_spill] sm:$0xff]  ;;  %v11285_v12 = vand.u32 4294901760, %v11284_v51 }
0x1366   : > { %11117 = vmatpush.msra.mxu3 %v12524_v49  ;;  %11158 = vmatpush.msra.mxu0 %v12571_v4  ;;  %v15401_v37 = vld [vmem:[#allocation9_spill] sm:$0xff] }
0x1367   : > { %v14508_v34 = vand.u32 4294901760, %v10574_v35  ;;  %11221 = vmatpush.msra.mxu1 %v12520_v47  ;;  %v10611_v50 = vand.u32 4294901760, %v10610_v15  ;;  %v15402_v15 = vld [vmem:[#allocation35_spill] sm:$0xff] }
0x1368   : > { %11119 = vmatpush.msra.mxu3 %v12535_v54  ;;  %11162 = vmatpush.msra.mxu0 %v12575_v5 }
0x1369   : > { %v14514_v10 = vsub.f32 %v10574_v35, %v14508_v34  ;;  %11223 = vmatpush.msra.mxu1 %v12522_v48  ;;  %10612 = vmatmul.f32.vlgmr.msra.gmra.mxu2 %v10611_v50  ;;  %v11291_v35 = vand.u32 4294901760, %v11264_v20  ;;  %v15403_v50 = vld [vmem:[#allocation40_spill] sm:$0xff] }
0x136a   : > { %10912 = vmatmul.f32.vlgmr.msrb.gmra.mxu3 %v10607_v44  ;;  %11060 = vmatpush.msra.mxu2 %v12545_v58 }
0x136b   : > { %11121 = vmatpush.msra.mxu3 %v12537_v55  ;;  %11166 = vmatpush.msra.mxu0 %v12579_v11  ;;  %v10950_v61 = vand.u32 4294901760, %v14514_v10 }
0x136c   : > { %11225 = vmatpush.msra.mxu1 %v12524_v49  ;;  %11063 = vmatpush.msra.mxu2 %v12548_v59 }
0x136d   : > { %11123 = vmatpush.msra.mxu3 %v12539_v56  ;;  %11170 = vmatpush.msra.mxu0 %v12590_v17  ;;  %v10951_v52 = vsub.f32 %v14514_v10, %v10950_v61 }
0x136e   : > { %11227 = vmatpush.msra.mxu1 %v12535_v54  ;;  %11066 = vmatpush.msra.mxu2 %v12551_v60 }
0x136f   : > { %11054 = vmatmul.f32.vlgmr.msrb.gmra.mxu1 %v14508_v34  ;;  %11125 = vmatpush.msra.mxu3 %v12564_v1  ;;  %v10952_v26 = vand.u32 4294901760, %v10951_v52  ;;  %v11292_v52 = vsub.f32 %v11264_v20, %v11291_v35 }
0x1370   : > { %11174 = vmatpush.msra.mxu0 %v15382_v28  ;;  %11229 = vmatpush.msra.mxu1 %v12537_v55 }
0x1371   : > { %11069 = vmatpush.msra.mxu2 %v12556_v62  ;;  %11127 = vmatpush.msra.mxu3 %v12650_v40  ;;  %v11293_v18 = vand.u32 4294901760, %v11292_v52 }
0x1372   : > { %11178 = vmatpush.msra.mxu0 %v15383_v21  ;;  %11231 = vmatpush.msra.mxu1 %v12539_v56 }
0x1373   : > { %10875 = vmatmul.f32.vlgmr.msrb.gmra.mxu2 %v10607_v44  ;;  %10953 = vmatmul.f32.vlgmr.msrb.gmra.mxu0 %v10952_v26  ;;  %v15398_v44 = vld [vmem:[#allocation42_spill] sm:$0xff] }
0x1374   : > { %11072 = vmatpush.msra.mxu2 %v12559_v63  ;;  %11129 = vmatpush.msra.mxu3 %v12658_v43  ;;  %v15404_v26 = vld [vmem:[#allocation10_spill] sm:$0xff] }
0x1375   : > { %11182 = vmatpush.msra.mxu0 %v15384_v29  ;;  %11233 = vmatpush.msra.mxu1 %v12564_v1 }
0x1376   : > { %11075 = vmatpush.msra.mxu2 %v12562_v0  ;;  %11131 = vmatpush.msra.mxu3 %v12672_v46 }
0x1377   : > { %11186 = vmatpush.msra.mxu0 %v15385_v2  ;;  %11235 = vmatpush.msra.mxu1 %v12650_v40  ;;  %v15410_v2 = vmov 0  }
0x1378   : > { %11078 = vmatpush.msra.mxu2 %v12605_v24  ;;  %11133 = vmatpush.msra.mxu3 %v12688_v57 }
0x1379   : > { %11190 = vmatpush.msra.mxu0 %v15386_v38  ;;  %11237 = vmatpush.msra.mxu1 %v12658_v43 }
0x137a   : > { %11081 = vmatpush.msra.mxu2 %v12656_v42  ;;  %11135 = vmatpush.msra.mxu3 %v12707_v16 }
0x137b   : > { %11194 = vmatpush.msra.mxu0 %v15387_v27  ;;  %11239 = vmatpush.msra.mxu1 %v12672_v46 }
0x137c   : > { %11084 = vmatpush.msra.mxu2 %v12669_v45  ;;  %11137 = vmatpush.msra.mxu3 %v12722_v30 }
0x137d   : > { %11198 = vmatpush.msra.mxu0 %v15388_v14  ;;  %11241 = vmatpush.msra.mxu1 %v12688_v57 }
0x137e   : > { %11087 = vmatpush.msra.mxu2 %v12685_v53  ;;  %11139 = vmatpush.msra.mxu3 %v12740_v39 }
0x137f   : > { %11202 = vmatpush.msra.mxu0 %v15389_v8  ;;  %11243 = vmatpush.msra.mxu1 %v12707_v16  ;;  %v11257_v8 = vld [vmem:[%s12980_s7 + $0x6] sm:$0x1] }
0x1380   : > { %11090 = vmatpush.msra.mxu2 %v15099_v41  ;;  %11141 = vmatpush.msra.mxu3 %v12759_v25 }
0x1381   : > { %11206 = vmatpush.msra.mxu0 %v15390_v22  ;;  %11245 = vmatpush.msra.mxu1 %v12722_v30 }
0x1382   : > { %11093 = vmatpush.msra.mxu2 %v15393_v19  ;;  %11143 = vmatpush.msra.mxu3 %v15394_v31 }
0x1383   : > { %11210 = vmatpush.msra.mxu0 %v15395_v36  ;;  %11247 = vmatpush.msra.mxu1 %v12740_v39 }
0x1384   : > { %11147 = vmatmul.f32.vlgmr.msra.gmra.mxu3 %v10950_v61  ;;  %11096 = vmatpush.msra.mxu2 %v15396_v7  ;;  %v11286_v61 = vsub.f32 %v11284_v51, %v11285_v12 }
0x1385   : > { %11320 = vmatpush.msrb.mxu3 %v15397_v9  ;;  %11214 = vmatpush.msra.mxu0 %v15398_v44 }
0x1386   : > { %11249 = vmatpush.msra.mxu1 %v12759_v25  ;;  %11216 = vmatmul.f32.vlgmr.msra.gmra.mxu0 %v14508_v34  ;;  %v11287_v32 = vand.u32 4294901760, %v11286_v61 }
0x1387   : > { %11433 = vmatpush.msra.mxu3 %v15399_v6  ;;  %11099 = vmatpush.msra.mxu2 %v15400_v33 }
0x1388   : > { %11347 = vmatpush.msrb.mxu0 %v15401_v37  ;;  %11251 = vmatpush.msra.mxu1 %v15394_v31 }
0x1389   : > { %11253 = vmatmul.f32.vlgmr.msra.gmra.mxu1 %v14508_v34  ;;  %11102 = vmatpush.msra.mxu2 %v15402_v15  ;;  %v11294_v34 = vsub.f32 %v11292_v52, %v11293_v18 }
0x138a   : > { %11375 = vmatpush.msrb.mxu1 %v15399_v6 }
0x138b   : > { %11105 = vmatpush.msra.mxu2 %v15403_v50  ;;  %v11295_v13 = vand.u32 4294901760, %v11294_v34 }
0x138c   : > { %11108 = vmatmul.f32.vlgmr.msra.gmra.mxu2 %v14514_v10  ;;  %11322 = vmatmul.f32.vlgmr.msrb.gmra.mxu3 %v11283_v23 }
0x138d   : > { %11282 = vmatpush.msrb.mxu2 %v15399_v6 }
0x138e   : > { %11350 = vmatmul.f32.vlgmr.msrb.gmra.mxu0 %v11284_v51 }
0x138f   : > { %11407 = vmatpush.msra.mxu2 %v15404_v26 }
0x1391   : > { %11379 = vmatmul.f32.vlgmr.msrb.gmra.mxu1 %v11285_v12 }
0x1394   : > { %11288 = vmatmul.f32.vlgmr.msrb.gmra.mxu2 %v11287_v32  ;;  %11326 = vmatmul.f32.gmra.mxu3 %v11291_v35 }
0x1396   : > { %11355 = vmatmul.f32.gmra.mxu0 %v11292_v52 }
0x1399   : > { %11385 = vmatmul.f32.gmra.mxu1 %v11293_v18 }
0x139c   : > { %11296 = vmatmul.f32.gmra.mxu2 %v11295_v13  ;;  %11435 = vmatmul.f32.vlgmr.msra.gmra.mxu3 %v11283_v23 }
0x13a4   : > { %11409 = vmatmul.f32.vlgmr.msra.gmra.mxu2 %v11283_v23  ;;  %11439 = vmatmul.f32.gmra.mxu3 %v11291_v35 }
0x13ac   : > { %11413 = vmatmul.f32.gmra.mxu2 %v11291_v35 }
0x13e0   : > { %v10768_v6 = vpop.f32.mrf.mxu0 }
0x13e2   : > { %v10807_v37 = vpop.f32.mrf.mxu1 }
0x13e4   : > { %v10714_v10 = vpop.f32.mrf.mxu3 }
0x13ec   : > { %v10613_v9 = vpop.f32.mrf.mxu2  ;;  %v11055_v18 = vpop.f32.mrf.mxu1 }
0x13ed   : > { %v10715_v20 = vadd.f32 %v10714_v10, %v10613_v9  ;;  %v10913_v32 = vpop.f32.mrf.mxu3 }
0x13ef   : > { %v10769_v51 = vadd.f32 %v10768_v6, %v10715_v20  ;;  %v15405_v20 = vld [vmem:[#allocation45_spill] sm:$0xff] }
0x13f0   : > { %v10954_v52 = vpop.f32.mrf.mxu0  ;;  %v11258_v6 = vmul.f32 %v11257_v8, %v15405_v20 }
0x13f1   : > { %v10808_v61 = vadd.f32 %v10807_v37, %v10769_v51  ;;  %v11056_v13 = vadd.f32 %v11055_v18, %v10954_v52  ;;  %v15406_v37 = vmov 1.0   ;;  %v11449_v18 = vld [vmem:[#allocation2 + $0x70] sm:$0xff] }
0x13f2   : > { %v11452_v8 = vsel %vm171_vm0, %v11449_v18, 0 }
0x13f6   : > { %v10876_v12 = vpop.f32.mrf.mxu2 }
0x13f7   : > { %v10877_v26 = vadd.f32 %v10876_v12, %v10808_v61 }
0x13f9   : > { %v10914_v44 = vadd.f32 %v10913_v32, %v10877_v26 }
0x1403   : > { %v11217_v35 = vpop.f32.mrf.mxu0 }
0x1406   : > { %v11254_v9 = vpop.f32.mrf.mxu1 }
0x1407   : > { %v11148_v34 = vpop.f32.mrf.mxu3 }
0x140b   : > { %v11351_v52 = vpop.f32.mrf.mxu0 }
0x140f   : > { %v11109_v36 = vpop.f32.mrf.mxu2  ;;  %v11323_v14 = vpop.f32.mrf.mxu3 }
0x1410   : > { %v11110_v23 = vadd.f32 %v11109_v36, %v11056_v13  ;;  %v15408_v36 = vld [vmem:[#allocation8_spill] sm:$0xff]  ;;  %v11380_v13 = vpop.f32.mrf.mxu1 }
0x1412   : > { %v11149_v22 = vadd.f32 %v11148_v34, %v11110_v23 }
0x1413   : > { %v11356_v20 = vpop.f32.mrf.mxu0 }
0x1414   : > { %v11218_v10 = vadd.f32 %v11217_v35, %v11149_v22 }
0x1416   : > { %v11255_v27 = vadd.f32 %v11254_v9, %v11218_v10  ;;  %v14603_v9 = vand.u32 4294901760, %v11452_v8 }
0x1417   : > { %v11289_v51 = vpop.f32.mrf.mxu2  ;;  %v11327_v34 = vpop.f32.mrf.mxu3 }
0x1418   : > { %vm11259_vm4 = vcmp.lt.f32.partialorder %v11258_v6, %v11255_v27  ;;  %v11324_v23 = vadd.f32 %v11323_v14, %v11289_v51 }
0x1419   : > { %v11448_v61 = vsel %vm11259_vm4, 0.0, %v15406_v37  ;;  %v14597_v12 = vsel %vm11259_vm4, %v11255_v27, %v10914_v44  ;;  %v11443_v29 = vsel %vm11259_vm4, 1, %v15410_v2 }
0x141a   : > { %15407 = vst [vmem:[#allocation6_spill] sm:$0xff] %v14597_v12  ;;  %v11996_v26 = vrot.slane %v11448_v61, 2  ;;  %v11352_v37 = vadd.f32 %v11351_v52, %v11324_v23  ;;  %v11450_v12 = vld [vmem:[#allocation2 + $0x78] sm:$0xff]  ;;  %v11444_v28 = vperm.slane %v11443_v29, 0 }
0x141c   : > { %v14600_v32 = vsel %vm12011_vm5, %v15408_v36, %v11996_v26  ;;  %v11475_v26 = vsub.f32 %v11452_v8, %v14603_v9  ;;  %v11386_v36 = vpop.f32.mrf.mxu1  ;;  %v11381_v38 = vadd.f32 %v11380_v13, %v11352_v37  ;;  %vm11445_vm6 = vcmp.eq.s32.totalorder %v11444_v28, 1  ;;  %v15411_v37 = vld [vmem:[#allocation12_spill] sm:$0xff] }
0x141d   : > { %15409 = vst [vmem:[#allocation27_spill] sm:$0xff] %v14600_v32  ;;  %v11455_v32 = vsel %vm171_vm0, %v11450_v12, 0 }
0x141e   : > { %v11476_v51 = vand.u32 4294901760, %v11475_v26 }
0x141f   : > { %v11297_v22 = vpop.f32.mrf.mxu2  ;;  %v11436_v35 = vpop.f32.mrf.mxu3 }
0x1420   : > { %v11328_v10 = vadd.f32 %v11327_v34, %v11297_v22  ;;  %v14609_v34 = vand.u32 4294901760, %v11455_v32 }
0x1422   : > { %v11357_v61 = vadd.f32 %v11356_v20, %v11328_v10  ;;  %v11477_v20 = vsub.f32 %v11475_v26, %v11476_v51  ;;  %v11482_v8 = vsub.f32 %v11455_v32, %v14609_v34  ;;  %v15412_v32 = vld [vmem:[#allocation13_spill] sm:$0xff] }
0x1424   : > { %v11387_v18 = vadd.f32 %v11386_v36, %v11357_v61  ;;  %v11478_v2 = vand.u32 4294901760, %v11477_v20  ;;  %v11483_v6 = vand.u32 4294901760, %v11482_v8  ;;  %v15414_v61 = vld [vmem:[#allocation16_spill] sm:$0xff]  ;;  %v15418_v36 = vld [vmem:[#allocation22_spill] sm:$0xff] }
0x1427   : > { %v11410_v44 = vpop.f32.mrf.mxu2  ;;  %v11440_v21 = vpop.f32.mrf.mxu3 }
0x1428   : > { %v11411_v14 = vadd.f32 %v11410_v44, %v11381_v38 }
0x142a   : > { %v11437_v23 = vadd.f32 %v11436_v35, %v11411_v14  ;;  %v15413_v35 = vld [vmem:[#allocation14_spill] sm:$0xff] }
0x142f   : > { %v11414_v22 = vpop.f32.mrf.mxu2 }
0x1430   : > { %v11415_v52 = vadd.f32 %v11414_v22, %v11387_v18  ;;  %v15421_v18 = vld [vmem:[#allocation31_spill] sm:$0xff] }
0x1432   : > { %v11441_v10 = vadd.f32 %v11440_v21, %v11415_v52  ;;  %v11484_v21 = vsub.f32 %v11482_v8, %v11483_v6 }
0x1434   : > { %v14612_v12 = vsel %vm11445_vm6, %v11441_v10, %v11437_v23  ;;  %v11485_v44 = vand.u32 4294901760, %v11484_v21 }
0x1435   : > { %v11472_v27 = vand.u32 4294901760, %v14612_v12 }
0x1437   : > { %v11506_v38 = vsub.f32 %v14612_v12, %v11472_v27  ;;  %11473 = vmatpush.msra.mxu0 %v11472_v27  ;;  %11563 = vmatpush.msrb.mxu3 %v11472_v27 }
0x1438   : > { %11479 = vmatmul.f32.vlgmr.msra.gmra.mxu0 %v11478_v2  ;;  %11567 = vmatmul.f32.vlgmr.msrb.gmra.mxu3 %v11476_v51 }
0x1439   : > { %11536 = vmatpush.msrb.mxu2 %v11506_v38  ;;  %v11507_v29 = vand.u32 4294901760, %v11506_v38  ;;  %11681 = vmatpush.msra.mxu3 %v15411_v37 }
0x143a   : > { %11539 = vmatmul.f32.vlgmr.msrb.gmra.mxu2 %v11475_v26  ;;  %v15415_v26 = vld [vmem:[#allocation17_spill] sm:$0xff] }
0x143b   : > { %11594 = vmatpush.msrb.mxu0 %v11507_v29  ;;  %v11508_v28 = vsub.f32 %v11506_v38, %v11507_v29  ;;  %11687 = vmatpush.msra.mxu3 %v15412_v32 }
0x143c   : > { %11636 = vmatpush.msra.mxu2 %v12520_v47 }
0x143d   : > { %11779 = vmatpush.msra.mxu0 %v12545_v58  ;;  %v11509_v13 = vand.u32 4294901760, %v11508_v28  ;;  %11693 = vmatpush.msra.mxu3 %v15413_v35  ;;  %v15416_v58 = vld [vmem:[#allocation18_spill] sm:$0xff] }
0x143e   : > { %11638 = vmatpush.msra.mxu2 %v12522_v48 }
0x143f   : > { %11782 = vmatpush.msra.mxu0 %v12548_v59  ;;  %11510 = vmatpush.msra.mxu1 %v11509_v13  ;;  %v15417_v59 = vld [vmem:[#allocation19_spill] sm:$0xff]  ;;  %v11976_v13 = vld [vmem:[%s12980_s7 + $0x7] sm:$0x1]  ;;  %s12204_s7 = sshra.s32 %s12032_s5, 4  ;;  %s12205_s7 = int_to_ptr.hbm [resolvable:$true] %s12204_s7 }
0x1440   : > { %11699 = vmatpush.msra.mxu3 %v15414_v61  ;;  %11486 = vmatmul.f32.gmra.mxu0 %v11485_v44  ;;  %s12206_s6 = scalar_lea.hbm %s12205_s7, 8  ;;  %p12211_p0 = scmp.lt.s32.totalorder %s12205_s7, %s14758_s3 }
0x1441   : > { %11512 = vmatmul.f32.vlgmr.msra.gmra.mxu1 %v14603_v9  ;;  %11572 = vmatmul.f32.gmra.mxu3 %v11483_v6  ;;  %p12207_p11 = scmp.ne.s32.totalorder %s12205_s7, %s12206_s6  ;;  %p12212_p1 = scmp.lt.s32.totalorder %s12210_s10, %s12206_s6 }
0x1442   : > { %11619 = vmatpush.msrb.mxu1 %v11472_v27  ;;  %11543 = vmatmul.f32.gmra.mxu2 %v11482_v8 }
0x1443   : > { %11705 = vmatpush.msra.mxu3 %v15415_v26  ;;  %11640 = vmatpush.msra.mxu2 %v12524_v49  ;;  %v15438_v26 = vld [vmem:[#allocation6_spill] sm:$0xff]  ;;  %p12208_p12 = pnand %p12207_p11, %p12315_p5  ;;  %p12213_p2 = por %p12212_p1, %p12211_p0 }
0x1444   : > { %11832 = vmatpush.msra.mxu1 %v12520_v47  ;;  %11785 = vmatpush.msra.mxu0 %v12551_v60  ;;  %v15419_v60 = vld [vmem:[#allocation25_spill] sm:$0xff] }
0x1445   : > { %11711 = vmatpush.msra.mxu3 %v15416_v58  ;;  %11642 = vmatpush.msra.mxu2 %v12535_v54  ;;  %v11977_v58 = vmul.f32 %v11976_v13, %v15438_v26  ;;  %p12209_p13 = pneg %p12208_p12 }
0x1446   : > { %11834 = vmatpush.msra.mxu1 %v12522_v48  ;;  %11788 = vmatpush.msra.mxu0 %v12556_v62  ;;  %v15420_v62 = vld [vmem:[#allocation28_spill] sm:$0xff] }
0x1447   : > { %11717 = vmatpush.msra.mxu3 %v15417_v59  ;;  %11644 = vmatpush.msra.mxu2 %v12537_v55  ;;  %v15439_v59 = vmov 1.0   ;;  %p12214_p3 = pnand %p12213_p2, %p12209_p13 }
0x1448   : > { %11836 = vmatpush.msra.mxu1 %v12524_v49  ;;  %11596 = vmatmul.f32.vlgmr.msrb.gmra.mxu0 %v14603_v9 }
0x1449   : > { %11515 = vmatmul.f32.gmra.mxu1 %v14609_v34  ;;  %11723 = vmatpush.msra.mxu3 %v15418_v36 }
0x144a   : > { %11646 = vmatpush.msra.mxu2 %v12539_v56  ;;  %11791 = vmatpush.msra.mxu0 %v12559_v63  ;;  %v15422_v63 = vld [vmem:[#allocation37_spill] sm:$0xff] }
0x144b   : > { %11838 = vmatpush.msra.mxu1 %v12535_v54  ;;  %11729 = vmatpush.msra.mxu3 %v15419_v60 }
0x144c   : > { %11648 = vmatpush.msra.mxu2 %v12564_v1  ;;  %11794 = vmatpush.msra.mxu0 %v12562_v0  ;;  %v15423_v0 = vld [vmem:[#allocation38_spill] sm:$0xff] }
0x144d   : > { %11840 = vmatpush.msra.mxu1 %v12537_v55  ;;  %11735 = vmatpush.msra.mxu3 %v15420_v62  ;;  %v15440_v62 = vld [vmem:[#allocation27_spill] sm:$0xff] }
0x144e   : > { %11650 = vmatpush.msra.mxu2 %v12650_v40  ;;  %11797 = vmatpush.msra.mxu0 %v12605_v24  ;;  %v15424_v24 = vld [vmem:[#allocation41_spill] sm:$0xff] }
0x144f   : > { %11842 = vmatpush.msra.mxu1 %v12539_v56  ;;  %11741 = vmatpush.msra.mxu3 %v15421_v18 }
0x1450   : > { %11652 = vmatpush.msra.mxu2 %v12658_v43  ;;  %11599 = vmatmul.f32.gmra.mxu0 %v14609_v34 }
0x1451   : > { %11621 = vmatmul.f32.vlgmr.msrb.gmra.mxu1 %v14603_v9  ;;  %11747 = vmatpush.msra.mxu3 %v15422_v63  ;;  %v15425_v9 = vld [vmem:[#allocation43_spill] sm:$0xff] }
0x1452   : > { %11654 = vmatpush.msra.mxu2 %v12672_v46  ;;  %11800 = vmatpush.msra.mxu0 %v12656_v42  ;;  %v15426_v42 = vld [vmem:[#allocation44_spill] sm:$0xff] }
0x1453   : > { %11844 = vmatpush.msra.mxu1 %v12564_v1  ;;  %11753 = vmatpush.msra.mxu3 %v15423_v0 }
0x1454   : > { %11656 = vmatpush.msra.mxu2 %v12688_v57  ;;  %11803 = vmatpush.msra.mxu0 %v12669_v45 }
0x1455   : > { %11846 = vmatpush.msra.mxu1 %v12650_v40  ;;  %11759 = vmatpush.msra.mxu3 %v15424_v24 }
0x1456   : > { %11658 = vmatpush.msra.mxu2 %v12707_v16  ;;  %11806 = vmatpush.msra.mxu0 %v12685_v53 }
0x1457   : > { %11848 = vmatpush.msra.mxu1 %v12658_v43  ;;  %11765 = vmatpush.msra.mxu3 %v15425_v9 }
0x1458   : > { %11660 = vmatpush.msra.mxu2 %v12722_v30  ;;  %11809 = vmatpush.msra.mxu0 %v15099_v41 }
0x1459   : > { %11624 = vmatmul.f32.gmra.mxu1 %v14609_v34  ;;  %11771 = vmatpush.msra.mxu3 %v15426_v42 }
0x145a   : > { %11662 = vmatpush.msra.mxu2 %v12740_v39  ;;  %11850 = vmatpush.msra.mxu1 %v12672_v46 }
0x145b   : > { %11940 = vmatpush.msrb.mxu3 %v12520_v47  ;;  %11812 = vmatpush.msra.mxu0 %v15393_v19  ;;  %v15427_v47 = vld [vmem:[#allocation11_spill] sm:$0xff] }
0x145c   : > { %11664 = vmatpush.msra.mxu2 %v12759_v25  ;;  %11852 = vmatpush.msra.mxu1 %v12688_v57 }
0x145d   : > { %11942 = vmatpush.msrb.mxu3 %v12522_v48  ;;  %11815 = vmatpush.msra.mxu0 %v15396_v7  ;;  %v15428_v48 = vld [vmem:[#allocation15_spill] sm:$0xff] }
0x145e   : > { %11666 = vmatpush.msra.mxu2 %v15394_v31  ;;  %11854 = vmatpush.msra.mxu1 %v12707_v16 }
0x145f   : > { %11944 = vmatpush.msrb.mxu3 %v12524_v49  ;;  %11818 = vmatpush.msra.mxu0 %v15400_v33  ;;  %v15429_v49 = vld [vmem:[#allocation20_spill] sm:$0xff] }
0x1460   : > { %11873 = vmatpush.msrb.mxu2 %v12568_v3  ;;  %11856 = vmatpush.msra.mxu1 %v12722_v30  ;;  %v15434_v3 = vld [vmem:[#allocation32_spill] sm:$0xff] }
0x1461   : > { %11946 = vmatpush.msrb.mxu3 %v12535_v54  ;;  %11821 = vmatpush.msra.mxu0 %v15402_v15  ;;  %v15430_v54 = vld [vmem:[#allocation21_spill] sm:$0xff] }
0x1462   : > { %11877 = vmatpush.msrb.mxu2 %v12571_v4  ;;  %11858 = vmatpush.msra.mxu1 %v12740_v39  ;;  %v15435_v4 = vld [vmem:[#allocation34_spill] sm:$0xff] }
0x1463   : > { %11948 = vmatpush.msrb.mxu3 %v12537_v55  ;;  %11824 = vmatpush.msra.mxu0 %v15403_v50  ;;  %v15431_v55 = vld [vmem:[#allocation23_spill] sm:$0xff] }
0x1464   : > { %11881 = vmatpush.msrb.mxu2 %v12575_v5  ;;  %11860 = vmatpush.msra.mxu1 %v12759_v25  ;;  %v15436_v5 = vld [vmem:[#allocation39_spill] sm:$0xff] }
0x1465   : > { %11950 = vmatpush.msrb.mxu3 %v12539_v56  ;;  %v15432_v56 = vld [vmem:[#allocation26_spill] sm:$0xff] }
0x1466   : > { %11885 = vmatpush.msrb.mxu2 %v12579_v11  ;;  %11862 = vmatpush.msra.mxu1 %v15394_v31  ;;  %v15437_v11 = vld [vmem:[#allocation42_spill] sm:$0xff] }
0x1467   : > { %11952 = vmatpush.msrb.mxu3 %v12564_v1  ;;  %v15433_v1 = vld [vmem:[#allocation30_spill] sm:$0xff] }
0x1468   : > { %11889 = vmatpush.msrb.mxu2 %v12590_v17 }
0x1469   : > { %11954 = vmatpush.msrb.mxu3 %v12650_v40 }
0x146a   : > { %11893 = vmatpush.msrb.mxu2 %v15427_v47 }
0x146b   : > { %11956 = vmatpush.msrb.mxu3 %v12658_v43 }
0x146c   : > { %11897 = vmatpush.msrb.mxu2 %v15428_v48 }
0x146d   : > { %11958 = vmatpush.msrb.mxu3 %v12672_v46 }
0x146e   : > { %11901 = vmatpush.msrb.mxu2 %v15429_v49 }
0x146f   : > { %11960 = vmatpush.msrb.mxu3 %v12688_v57 }
0x1470   : > { %11905 = vmatpush.msrb.mxu2 %v15430_v54 }
0x1471   : > { %11962 = vmatpush.msrb.mxu3 %v12707_v16 }
0x1472   : > { %11909 = vmatpush.msrb.mxu2 %v15431_v55 }
0x1473   : > { %11964 = vmatpush.msrb.mxu3 %v12722_v30 }
0x1474   : > { %11913 = vmatpush.msrb.mxu2 %v15432_v56 }
0x1475   : > { %11966 = vmatpush.msrb.mxu3 %v12740_v39 }
0x1476   : > { %11917 = vmatpush.msrb.mxu2 %v15433_v1 }
0x1477   : > { %11968 = vmatpush.msrb.mxu3 %v12759_v25 }
0x1478   : > { %11921 = vmatpush.msrb.mxu2 %v15434_v3 }
0x1479   : > { %11970 = vmatpush.msrb.mxu3 %v15394_v31 }
0x147a   : > { %11925 = vmatpush.msrb.mxu2 %v15435_v4 }
0x147c   : > { %11929 = vmatpush.msrb.mxu2 %v15436_v5 }
0x147e   : > { %11933 = vmatpush.msrb.mxu2 %v15437_v11 }
0x14b5   : > { %v11480_v17 = vpop.f32.mrf.mxu0 }
0x14bb   : > { %v11568_v40 = vpop.f32.mrf.mxu3 }
0x14bd   : > { %v11487_v43 = vpop.f32.mrf.mxu0  ;;  %v11540_v46 = vpop.f32.mrf.mxu2 }
0x14be   : > { %v11513_v45 = vpop.f32.mrf.mxu1 }
0x14c4   : > { %v11573_v41 = vpop.f32.mrf.mxu3 }
0x14c5   : > { %v11597_v57 = vpop.f32.mrf.mxu0  ;;  %v11544_v30 = vpop.f32.mrf.mxu2 }
0x14c6   : > { %v11516_v53 = vpop.f32.mrf.mxu1 }
0x14c7   : > { %v11517_v16 = vadd.f32 %v11516_v53, %v11487_v43 }
0x14c9   : > { %v11545_v25 = vadd.f32 %v11544_v30, %v11517_v16 }
0x14cb   : > { %v11574_v31 = vadd.f32 %v11573_v41, %v11545_v25 }
0x14cd   : > { %v11600_v19 = vpop.f32.mrf.mxu0 }
0x14ce   : > { %v11622_v39 = vpop.f32.mrf.mxu1  ;;  %v11601_v7 = vadd.f32 %v11600_v19, %v11574_v31 }
0x14d6   : > { %v11625_v33 = vpop.f32.mrf.mxu1 }
0x14d7   : > { %v11626_v15 = vadd.f32 %v11625_v33, %v11601_v7 }
0x14d9   : > { %v11628_v50 = vmul.f32 %v11626_v15, %v14612_v12 }
0x14db   : > { %v11629_v14 = vrot.slane %v11628_v50, 4 }
0x14dd   : > { %v11630_v51 = vadd.f32 %v11629_v14, %v11628_v50 }
0x14df   : > { %v11631_v34 = vrot.slane %v11630_v51, 2 }
0x14e1   : > { %v11632_v22 = vadd.f32 %v11631_v34, %v11630_v51 }
0x14e3   : > { %v11633_v52 = vrot.slane %v11632_v22, 1 }
0x14e5   : > { %v11634_v23 = vadd.f32 %v11633_v52, %v11632_v22 }
0x14e7   : > { %v11667_v10 = vand.u32 4294901760, %v11634_v23 }
0x14e9   : > { %v11668_v20 = vsub.f32 %v11634_v23, %v11667_v10  ;;  %11773 = vmatmul.f32.vlgmr.msra.gmra.mxu3 %v11667_v10 }
0x14eb   : > { %11827 = vmatmul.f32.vlgmr.msra.gmra.mxu0 %v11668_v20  ;;  %v11669_v8 = vand.u32 4294901760, %v11668_v20 }
0x14ed   : > { %11866 = vmatmul.f32.vlgmr.msra.gmra.mxu1 %v11669_v8  ;;  %v11670_v27 = vsub.f32 %v11668_v20, %v11669_v8 }
0x14ef   : > { %v11671_v2 = vand.u32 4294901760, %v11670_v27 }
0x14f1   : > { %11672 = vmatmul.f32.vlgmr.msra.gmra.mxu2 %v11671_v2  ;;  %11972 = vmatmul.f32.vlgmr.msrb.gmra.mxu3 %v11667_v10 }
0x14f9   : > { %11935 = vmatmul.f32.vlgmr.msrb.gmra.mxu2 %v11667_v10 }
0x1568   : > { %v11828_v29 = vpop.f32.mrf.mxu0 }
0x156a   : > { %v11867_v21 = vpop.f32.mrf.mxu1 }
0x156c   : > { %v11774_v12 = vpop.f32.mrf.mxu3 }
0x1574   : > { %v11673_v6 = vpop.f32.mrf.mxu2  ;;  %v11973_v44 = vpop.f32.mrf.mxu3 }
0x1575   : > { %v11775_v38 = vadd.f32 %v11774_v12, %v11673_v6 }
0x1577   : > { %v11829_v37 = vadd.f32 %v11828_v29, %v11775_v38 }
0x1579   : > { %v11868_v28 = vadd.f32 %v11867_v21, %v11829_v37 }
0x157c   : > { %v11936_v32 = vpop.f32.mrf.mxu2 }
0x157d   : > { %v11937_v35 = vadd.f32 %v11936_v32, %v11868_v28 }
0x157f   : > { %v11974_v61 = vadd.f32 %v11973_v44, %v11937_v35 }
0x1581   : > { %vm11978_vm0 = vcmp.lt.f32.partialorder %v11977_v58, %v11974_v61 }
0x1582   : > { %v11979_v36 = vsel %vm11978_vm0, 0.0, %v15439_v59 }
0x1583   : > { %v11999_v60 = vrot.slane %v11979_v36, 1 }
0x1585   : > { %v12014_v18 = vsel %vm12013_vm7, %v15440_v62, %v11999_v60 }
0x1586   : > { %12015 = vst [vmem:[%s161_s30] sm:$0xff] %v12014_v18 }
0x1587   : > { %12217 = shalt.err (!%p12214_p3)
}
0x1588   : > { %12148 = dma.vmem_to_hbm [thread:$0]  (%p12315_p5), %s12030_s4, 128, %s12032_s5, %s12017_s16  }
0x1589 PF: > { %p12154_p4 = scmp.ge.s32.totalorder %s12252_s15, 2  ;;  %s12043_s19 = sand.u32 1, %s12240_s12  }
0x158a   : > { %s12044_s20 = scalar_lea.sflag [#allocation4], %s12043_s19 }
0x158b   : > { %p12151_p7 = pnand %p12154_p4, %p12319_p6 }
0x158d   : > { %p12152_p8 = pneg %p12151_p7 }
0x158f   : > { %12235 = dma.done.wait (%p12152_p8), %s12044_s20, 128  }
0x1590   : > { %12237 = vsyncadd (%p12152_p8), %s12044_s20, 4294967168  ;;  %p13_p9 = scmp.ge.s32.totalorder %s12302_s18, 4   ;;  %s15441_s12 = smov %s12244_s13 }
0x1591   : > { %s15442_s13 = smov %s12248_s14  ;;  %s15443_s14 = smov %s12313_s21 }
0x1592   : > { %s15444_s15 = smov %s12302_s18  ;;  %15 = sbr.rel (!%p13_p9) target bundleno = 3 (0x3), region = 81 }
0x1597   :  { %12050 = vsyncpa [#allocation4], 1 }
0x1598   :  { %12052 = vsyncpa [#allocation4 + $0x1], 1 }

</bundles_post_ra>
